<compile_context>
chip_gen: v6e
topology: v6e:2x2x1
jax: 0.10.0
libtpu: 0.0.40
codegen_flags: <defaults>
</compile_context>

<pallas_src>
import itertools

import jax
import jax.numpy as jnp
from jax.experimental import pallas as pl
from jax.experimental.pallas import tpu as pltpu

MLP_DIM = 4096     # fixed by build_mlp in the module
OUT_DIM = 256      # fixed by build_mlp in the module
BN_EPS = 1e-5      # nn.BatchNorm1d default


def _fused_head_kernel(x_ref, w1p_ref, w1q_ref, w2_ref, g_ref, b_ref,
                       o_ref, act_ref, h_ref):
    """Fused projector (head=0) + predictor (head=1).

    Each head: Linear(bias=False) -> BatchNorm1d (training batch stats, affine)
    -> ReLU -> Linear(bias=False).  The 4096-wide hidden dim is tiled along the
    second grid axis; partial (N, 256) results accumulate directly into the
    resident f32 output block.  The projector output is cast once into the small
    bf16 `act_ref` scratch and used as the predictor input without leaving VMEM.
    """
    head = pl.program_id(0)
    j = pl.program_id(1)

    # Hand the finished projector output (resident in o_ref after all head-0 tiles)
    # to the predictor BEFORE the accumulator is reset.  Single bf16 cast here.
    @pl.when((head == 1) & (j == 0))
    def _():
        act_ref[...] = o_ref[...].astype(jnp.bfloat16)

    @pl.when(j == 0)
    def _():
        o_ref[...] = jnp.zeros_like(o_ref)

    # First matmul: per-head input and per-head W1 (no zero-padded K rows streamed).
    @pl.when(head == 0)
    def _():
        h_ref[...] = jnp.dot(x_ref[...], w1p_ref[...],
                             preferred_element_type=jnp.float32)

    @pl.when(head == 1)
    def _():
        h_ref[...] = jnp.dot(act_ref[...], w1q_ref[...],
                             preferred_element_type=jnp.float32)

    h = h_ref[...]

    # BatchNorm1d, training-mode batch statistics (biased variance) + learnable affine,
    # folded into a single scale/shift pass: scale = g*rsqrt(var+eps), shift = b - mean*scale.
    # BN is per hidden column, so tiling the hidden dim is numerically exact.
    # TODO(synk): eval-mode running statistics are not implemented (the DINO-style head
    # in this module always runs with train-mode BN during the forward).
    mean = jnp.mean(h, axis=0, keepdims=True)
    var = jnp.maximum(jnp.mean(h * h, axis=0, keepdims=True) - mean * mean, 0.0)
    scale = g_ref[...] * jax.lax.rsqrt(var + BN_EPS)
    shift = b_ref[...] - mean * scale

    # affine + ReLU, then back to bf16 for the second MXU matmul.
    h = jnp.maximum(h * scale + shift, 0.0).astype(jnp.bfloat16)

    # Accumulate (N, hid_tile) @ (hid_tile, 256) into the resident f32 output block.
    o_ref[...] += jnp.dot(h, w2_ref[...], preferred_element_type=jnp.float32)


def pack_head_params(embed_dim, proj_w1, proj_w2, pred_w1, pred_w2,
                     proj_gamma, proj_beta, pred_gamma, pred_beta):
    """One-time host-side packing.  W1 stays per-head (different K, no padded rows);
    W2 / BN params are stacked so the fused kernel selects the head via the leading
    grid axis.  Weights are bf16 (kernel is HBM-weight-byte bound); BN params f32."""
    del embed_dim  # kept for API symmetry; W1 keeps its natural K
    w2 = jnp.stack([proj_w2, pred_w2], axis=0).astype(jnp.bfloat16)
    gamma = jnp.stack([proj_gamma, pred_gamma], axis=0).reshape(2, 1, MLP_DIM)
    beta = jnp.stack([proj_beta, pred_beta], axis=0).reshape(2, 1, MLP_DIM)
    return {"w1_proj": proj_w1.astype(jnp.bfloat16),   # (embed_dim, 4096)
            "w1_pred": pred_w1.astype(jnp.bfloat16),    # (256, 4096)
            "w2": w2,                                   # (2, 4096, 256)
            "gamma": gamma.astype(jnp.float32),
            "beta": beta.astype(jnp.float32)}


def _vmem_budget_and_limit():
    """Generation-aware scoped-VMEM budget (v5e/v6e: 128 MiB physical, v7x: 64 MiB)."""
    try:
        vmem_cap = int(pltpu.get_tpu_info().vmem_capacity_bytes)
    except Exception:
        vmem_cap = 64 * 1024 * 1024          # conservative fallback (v7x-sized)
    limit = min(vmem_cap // 2, 48 * 1024 * 1024)
    return int(limit * 3 // 4), int(limit)   # (tile-selection budget, scoped limit)


def fused_projector_predictor(x, head_params):
    """predictor(projector(x)) as a single pallas_call."""
    n, embed_dim = x.shape

    budget, vmem_limit = _vmem_budget_and_limit()

    def vmem_estimate(ht):
        # Count everything actually resident: double-buffered bf16 weights, BN params,
        # x block, f32 output block, scratches, and the f32 hidden temporaries.
        w = 2 * 2 * (embed_dim + OUT_DIM + OUT_DIM) * ht          # W1(proj)+W1(pred)+W2
        bn = 2 * 2 * 2 * ht * 4                                   # gamma + beta
        xb = 2 * n * embed_dim * 2
        ob = 2 * n * OUT_DIM * 4
        scr = n * ht * 4 + n * OUT_DIM * 2                        # h scratch + act scratch
        tmp = 2 * n * ht * 4                                      # in-flight f32 hidden values
        return w + bn + xb + ob + scr + tmp

    hid_tile = MLP_DIM
    while vmem_estimate(hid_tile) > budget and hid_tile > 512:
        hid_tile //= 2
    assert MLP_DIM % hid_tile == 0
    n_tiles = MLP_DIM // hid_tile

    # Activations enter the kernel already in bf16 (single cast, done by XLA here).
    x_bf16 = x.astype(jnp.bfloat16)

    # W1 index maps: step through tiles only while that head is active, otherwise pin
    # the block index so the unused head's weights are never (re-)fetched.
    proj_w1_map = lambda h, j: (0, j * (1 - h) + (n_tiles - 1) * h)   # head 0: j, head 1: pinned
    pred_w1_map = lambda h, j: (0, j * h)                             # head 0: pinned, head 1: j

    return pl.pallas_call(
        _fused_head_kernel,
        out_shape=jax.ShapeDtypeStruct((n, OUT_DIM), jnp.float32),
        grid_spec=pltpu.PrefetchScalarGridSpec(
            num_scalar_prefetch=0,
            grid=(2, n_tiles),                                        # (head, hidden tile)
            in_specs=[
                pl.BlockSpec((n, embed_dim), lambda h, j: (0, 0)),            # activations (bf16)
                pl.BlockSpec((embed_dim, hid_tile), proj_w1_map),             # projector W1 tile
                pl.BlockSpec((OUT_DIM, hid_tile), pred_w1_map),               # predictor W1 tile
                pl.BlockSpec((None, hid_tile, OUT_DIM), lambda h, j: (h, j, 0)),  # W2 tile
                pl.BlockSpec((None, 1, hid_tile), lambda h, j: (h, 0, j)),        # BN gamma
                pl.BlockSpec((None, 1, hid_tile), lambda h, j: (h, 0, j)),        # BN beta
            ],
            out_specs=pl.BlockSpec((n, OUT_DIM), lambda h, j: (0, 0)),
            scratch_shapes=[
                pltpu.VMEM((n, OUT_DIM), jnp.bfloat16),   # predictor input (projector output)
                pltpu.VMEM((n, hid_tile), jnp.float32),   # pre-BN hidden activations
            ],
        ),
        # Both axes MUST stay "arbitrary": head 1 reads head 0's accumulated output and
        # the j axis accumulates into the resident output block.
        compiler_params=pltpu.CompilerParams(
            dimension_semantics=("arbitrary", "arbitrary"),
            vmem_limit_bytes=vmem_limit),
    )(x_bf16, head_params["w1_proj"], head_params["w1_pred"],
      head_params["w2"], head_params["gamma"], head_params["beta"])


# TODO(synk): the encoder is injected from outside MultiCropWrapper (ATST frame encoder);
# it has no definition in this module, so a deterministic linear masked-mean-pool
# stand-in is used here in plain JAX (glue, not the hot path).
def synthetic_encoder(x_cat, length, mask_index, mask_input, w_enc):
    # x_cat: (B, F, T), length: (B,), mask_index: (B, T) bool -> (B, embed_dim)
    _, _, t = x_cat.shape
    t_idx = jnp.arange(t)[None, :]
    valid = (t_idx < length[:, None]).astype(jnp.float32)
    if mask_input:
        valid = valid * (1.0 - mask_index.astype(jnp.float32))
    denom = jnp.maximum(jnp.sum(valid, axis=-1, keepdims=True), 1.0)
    pooled = jnp.einsum("bft,bt->bf", x_cat, valid) / denom
    return pooled @ w_enc


def multicrop_forward(x, length, mask, mask_input, params):
    """Mirrors MultiCropWrapper.forward."""
    if not isinstance(x, (list, tuple)):
        x, length, mask = [x], [length], [mask]

    # idx_crops = cumsum(unique_consecutive(last dims).counts)  (static glue)
    last_dims = [int(inp.shape[-1]) for inp in x]
    counts = []
    prev = None
    for d in last_dims:
        if counts and d == prev:
            counts[-1] += 1
        else:
            counts.append(1)
        prev = d
    idx_crops = list(itertools.accumulate(counts))

    start_idx = 0
    out_frames = []
    for end_idx in idx_crops:
        x_cat = jnp.concatenate(x[start_idx:end_idx], axis=0)
        len_cat = jnp.concatenate(length[start_idx:end_idx], axis=0)
        mask_cat = jnp.concatenate(mask[start_idx:end_idx], axis=0)
        out_frames.append(
            synthetic_encoder(x_cat, len_cat, mask_cat, mask_input, params["w_enc"]))
        start_idx = end_idx
    output_frame = jnp.concatenate(out_frames, axis=0)  # (N, embed_dim)

    # predictor(projector(.)) in one fused Pallas call.
    return fused_projector_predictor(output_frame, params["head"])


if __name__ == "__main__":
    key = jax.random.PRNGKey(0)
    embed_dim = 32
    B, F = 2, 8                       # per-crop batch, freq bins
    crop_T = [16, 16, 8, 8]           # two resolutions -> two encoder passes

    keys = jax.random.split(key, 5 + 2 * len(crop_T))
    proj_w1 = 0.02 * jax.random.normal(keys[1], (embed_dim, MLP_DIM), jnp.float32)
    proj_w2 = 0.02 * jax.random.normal(keys[2], (MLP_DIM, OUT_DIM), jnp.float32)
    pred_w1 = 0.02 * jax.random.normal(keys[3], (OUT_DIM, MLP_DIM), jnp.float32)
    pred_w2 = 0.02 * jax.random.normal(keys[4], (MLP_DIM, OUT_DIM), jnp.float32)
    bn_ones = jnp.ones((MLP_DIM,), jnp.float32)    # PyTorch BatchNorm1d init: weight=1
    bn_zeros = jnp.zeros((MLP_DIM,), jnp.float32)  #                           bias=0

    params = {
        "w_enc": 0.05 * jax.random.normal(keys[0], (F, embed_dim), jnp.float32),
        "head": pack_head_params(embed_dim, proj_w1, proj_w2, pred_w1, pred_w2,
                                 bn_ones, bn_zeros, bn_ones, bn_zeros),
    }

    x, length, mask = [], [], []
    for i, T in enumerate(crop_T):
        kx, km = keys[5 + 2 * i], keys[6 + 2 * i]
        x.append(jax.random.normal(kx, (B, F, T), jnp.float32))
        length.append(jnp.full((B,), T, jnp.int32))
        mask.append(jax.random.bernoulli(km, 0.25, (B, T)))

    out = multicrop_forward(x, length, mask, mask_input=True, params=params)
    out = jax.block_until_ready(out)
    assert out.shape == (B * len(crop_T), OUT_DIM) and out.dtype == jnp.float32
    assert bool(jnp.all(jnp.isfinite(out)))
    print("KERNEL_OK")
</pallas_src>

<mosaic_0001>
module attributes {stable_mosaic.version = 11 : i64} {
  func.func @_fused_head_kernel(%arg0: i32, %arg1: i32, %arg2: memref<8x32xbf16, #tpu.memory_space<vmem>>, %arg3: memref<32x4096xbf16, #tpu.memory_space<vmem>>, %arg4: memref<256x4096xbf16, #tpu.memory_space<vmem>>, %arg5: memref<1x4096x256xbf16, #tpu.memory_space<vmem>>, %arg6: memref<1x1x4096xf32, #tpu.memory_space<vmem>>, %arg7: memref<1x1x4096xf32, #tpu.memory_space<vmem>>, %arg8: memref<8x256xf32, #tpu.memory_space<vmem>>, %arg9: memref<8x256xbf16, #tpu.memory_space<vmem>>, %arg10: memref<8x4096xf32, #tpu.memory_space<vmem>>) attributes {dimension_semantics = [#tpu.dimension_semantics<arbitrary>, #tpu.dimension_semantics<arbitrary>], iteration_bounds = array<i64: 2, 1>, scalar_prefetch = 0 : i64, scratch_operands = 2 : i64, tpu.core_type = #tpu.core_type<tc>, window_params = [{pipeline_mode = #tpu.pipeline_mode<synchronous>, transform_indices = @transform_0, window_bounds = array<i64: 8, 32>}, {transform_indices = @transform_1, window_bounds = array<i64: 32, 4096>}, {transform_indices = @transform_2, window_bounds = array<i64: 256, 4096>}, {transform_indices = @transform_3, window_bounds = array<i64: 1, 4096, 256>}, {transform_indices = @transform_4, window_bounds = array<i64: 1, 1, 4096>}, {transform_indices = @transform_5, window_bounds = array<i64: 1, 1, 4096>}, {pipeline_mode = #tpu.pipeline_mode<synchronous>, transform_indices = @transform_6, window_bounds = array<i64: 8, 256>}]} {
    %c1_i32 = arith.constant 1 : i32
    %0 = arith.cmpi eq, %arg0, %c1_i32 : i32
    %c0_i32 = arith.constant 0 : i32
    %1 = arith.cmpi eq, %arg1, %c0_i32 : i32
    %2 = arith.andi %0, %1 : i1
    %3 = arith.extui %2 : i1 to i32
    %c0_i32_0 = arith.constant 0 : i32
    %4 = arith.cmpi ne, %3, %c0_i32_0 : i32
    scf.if %4 {
      %c0_28 = arith.constant 0 : index
      %c0_29 = arith.constant 0 : index
      %51 = vector.load %arg8[%c0_28, %c0_29] : memref<8x256xf32, #tpu.memory_space<vmem>>, vector<8x256xf32>
      %52 = arith.truncf %51 : vector<8x256xf32> to vector<8x256xbf16>
      %c0_30 = arith.constant 0 : index
      %c0_31 = arith.constant 0 : index
      %53 = vector.load %arg9[%c0_30, %c0_31] : memref<8x256xbf16, #tpu.memory_space<vmem>>, vector<8x256xbf16>
      tpu.vector_store %arg9[%c0_30, %c0_31], %52 {strides = array<i32>} : memref<8x256xbf16, #tpu.memory_space<vmem>>, vector<8x256xbf16>,
    } else {
    }
    %c0_i32_1 = arith.constant 0 : i32
    %5 = arith.cmpi eq, %arg1, %c0_i32_1 : i32
    %6 = arith.extui %5 : i1 to i32
    %c0_i32_2 = arith.constant 0 : i32
    %7 = arith.cmpi ne, %6, %c0_i32_2 : i32
    scf.if %7 {
      %cst_28 = arith.constant 0.000000e+00 : f32
      %51 = vector.broadcast %cst_28 : f32 to vector<8x256xf32>
      %c0_29 = arith.constant 0 : index
      %c0_30 = arith.constant 0 : index
      %52 = vector.load %arg8[%c0_29, %c0_30] : memref<8x256xf32, #tpu.memory_space<vmem>>, vector<8x256xf32>
      tpu.vector_store %arg8[%c0_29, %c0_30], %51 {strides = array<i32>} : memref<8x256xf32, #tpu.memory_space<vmem>>, vector<8x256xf32>,
    } else {
    }
    %c0_i32_3 = arith.constant 0 : i32
    %8 = arith.cmpi eq, %arg0, %c0_i32_3 : i32
    %9 = arith.extui %8 : i1 to i32
    %c0_i32_4 = arith.constant 0 : i32
    %10 = arith.cmpi ne, %9, %c0_i32_4 : i32
    scf.if %10 {
      %c0_28 = arith.constant 0 : index
      %c0_29 = arith.constant 0 : index
      %51 = vector.load %arg2[%c0_28, %c0_29] : memref<8x32xbf16, #tpu.memory_space<vmem>>, vector<8x32xbf16>
      %c0_30 = arith.constant 0 : index
      %c0_31 = arith.constant 0 : index
      %52 = vector.load %arg3[%c0_30, %c0_31] : memref<32x4096xbf16, #tpu.memory_space<vmem>>, vector<32x4096xbf16>
      %cst_32 = arith.constant dense<0.000000e+00> : vector<8x4096xf32>
      %53 = tpu.matmul %51, %52, %cst_32 {dimension_numbers = #tpu.dot_dimension_numbers<[1], [0], [0], [1], [0, 0, 1, 1], [], []>} : vector<8x32xbf16>, vector<32x4096xbf16>, vector<8x4096xf32> -> vector<8x4096xf32>
      %c0_33 = arith.constant 0 : index
      %c0_34 = arith.constant 0 : index
      %54 = vector.load %arg10[%c0_33, %c0_34] : memref<8x4096xf32, #tpu.memory_space<vmem>>, vector<8x4096xf32>
      tpu.vector_store %arg10[%c0_33, %c0_34], %53 {strides = array<i32>} : memref<8x4096xf32, #tpu.memory_space<vmem>>, vector<8x4096xf32>,
    } else {
    }
    %c1_i32_5 = arith.constant 1 : i32
    %11 = arith.cmpi eq, %arg0, %c1_i32_5 : i32
    %12 = arith.extui %11 : i1 to i32
    %c0_i32_6 = arith.constant 0 : i32
    %13 = arith.cmpi ne, %12, %c0_i32_6 : i32
    scf.if %13 {
      %c0_28 = arith.constant 0 : index
      %c0_29 = arith.constant 0 : index
      %51 = vector.load %arg9[%c0_28, %c0_29] : memref<8x256xbf16, #tpu.memory_space<vmem>>, vector<8x256xbf16>
      %c0_30 = arith.constant 0 : index
      %c0_31 = arith.constant 0 : index
      %52 = vector.load %arg4[%c0_30, %c0_31] : memref<256x4096xbf16, #tpu.memory_space<vmem>>, vector<256x4096xbf16>
      %cst_32 = arith.constant dense<0.000000e+00> : vector<8x4096xf32>
      %53 = tpu.matmul %51, %52, %cst_32 {dimension_numbers = #tpu.dot_dimension_numbers<[1], [0], [0], [1], [0, 0, 1, 1], [], []>} : vector<8x256xbf16>, vector<256x4096xbf16>, vector<8x4096xf32> -> vector<8x4096xf32>
      %c0_33 = arith.constant 0 : index
      %c0_34 = arith.constant 0 : index
      %54 = vector.load %arg10[%c0_33, %c0_34] : memref<8x4096xf32, #tpu.memory_space<vmem>>, vector<8x4096xf32>
      tpu.vector_store %arg10[%c0_33, %c0_34], %53 {strides = array<i32>} : memref<8x4096xf32, #tpu.memory_space<vmem>>, vector<8x4096xf32>,
    } else {
    }
    %c0 = arith.constant 0 : index
    %c0_7 = arith.constant 0 : index
    %14 = vector.load %arg10[%c0, %c0_7] : memref<8x4096xf32, #tpu.memory_space<vmem>>, vector<8x4096xf32>
    %cst = arith.constant dense<0.000000e+00> : vector<4096xf32>
    %15 = vector.multi_reduction <add>, %14, %cst [0] : vector<8x4096xf32> to vector<4096xf32>
    %16 = vector.shape_cast %15 : vector<4096xf32> to vector<1x4096xf32>
    %cst_8 = arith.constant 8.000000e+00 : f32
    %17 = vector.broadcast %cst_8 : f32 to vector<1x4096xf32>
    %18 = arith.divf %16, %17 : vector<1x4096xf32>
    %19 = arith.mulf %14, %14 : vector<8x4096xf32>
    %cst_9 = arith.constant dense<0.000000e+00> : vector<4096xf32>
    %20 = vector.multi_reduction <add>, %19, %cst_9 [0] : vector<8x4096xf32> to vector<4096xf32>
    %21 = vector.shape_cast %20 : vector<4096xf32> to vector<1x4096xf32>
    %cst_10 = arith.constant 8.000000e+00 : f32
    %22 = vector.broadcast %cst_10 : f32 to vector<1x4096xf32>
    %23 = arith.divf %21, %22 : vector<1x4096xf32>
    %24 = arith.mulf %18, %18 : vector<1x4096xf32>
    %25 = arith.subf %23, %24 : vector<1x4096xf32>
    %cst_11 = arith.constant 0.000000e+00 : f32
    %26 = vector.broadcast %cst_11 : f32 to vector<1x4096xf32>
    %27 = arith.maximumf %25, %26 : vector<1x4096xf32>
    %c0_12 = arith.constant 0 : index
    %c0_13 = arith.constant 0 : index
    %c0_14 = arith.constant 0 : index
    %28 = vector.load %arg6[%c0_12, %c0_13, %c0_14] : memref<1x1x4096xf32, #tpu.memory_space<vmem>>, vector<1x1x4096xf32>
    %29 = vector.shape_cast %28 : vector<1x1x4096xf32> to vector<1x4096xf32>
    %cst_15 = arith.constant 9.99999974E-6 : f32
    %30 = vector.broadcast %cst_15 : f32 to vector<1x4096xf32>
    %31 = arith.addf %27, %30 : vector<1x4096xf32>
    %32 = math.rsqrt %31 : vector<1x4096xf32>
    %33 = arith.mulf %29, %32 : vector<1x4096xf32>
    %c0_16 = arith.constant 0 : index
    %c0_17 = arith.constant 0 : index
    %c0_18 = arith.constant 0 : index
    %34 = vector.load %arg7[%c0_16, %c0_17, %c0_18] : memref<1x1x4096xf32, #tpu.memory_space<vmem>>, vector<1x1x4096xf32>
    %35 = vector.shape_cast %34 : vector<1x1x4096xf32> to vector<1x4096xf32>
    %36 = arith.mulf %18, %33 : vector<1x4096xf32>
    %37 = arith.subf %35, %36 : vector<1x4096xf32>
    %38 = vector.broadcast %33 : vector<1x4096xf32> to vector<8x4096xf32>
    %39 = arith.mulf %14, %38 : vector<8x4096xf32>
    %40 = vector.broadcast %37 : vector<1x4096xf32> to vector<8x4096xf32>
    %41 = arith.addf %39, %40 : vector<8x4096xf32>
    %cst_19 = arith.constant 0.000000e+00 : f32
    %42 = vector.broadcast %cst_19 : f32 to vector<8x4096xf32>
    %43 = arith.maximumf %41, %42 : vector<8x4096xf32>
    %44 = arith.truncf %43 : vector<8x4096xf32> to vector<8x4096xbf16>
    %c0_20 = arith.constant 0 : index
    %c0_21 = arith.constant 0 : index
    %45 = vector.load %arg8[%c0_20, %c0_21] : memref<8x256xf32, #tpu.memory_space<vmem>>, vector<8x256xf32>
    %c0_22 = arith.constant 0 : index
    %c0_23 = arith.constant 0 : index
    %c0_24 = arith.constant 0 : index
    %46 = vector.load %arg5[%c0_22, %c0_23, %c0_24] : memref<1x4096x256xbf16, #tpu.memory_space<vmem>>, vector<1x4096x256xbf16>
    %47 = vector.shape_cast %46 : vector<1x4096x256xbf16> to vector<4096x256xbf16>
    %cst_25 = arith.constant dense<0.000000e+00> : vector<8x256xf32>
    %48 = tpu.matmul %44, %47, %cst_25 {dimension_numbers = #tpu.dot_dimension_numbers<[1], [0], [0], [1], [0, 0, 1, 1], [], []>} : vector<8x4096xbf16>, vector<4096x256xbf16>, vector<8x256xf32> -> vector<8x256xf32>
    %49 = arith.addf %45, %48 : vector<8x256xf32>
    %c0_26 = arith.constant 0 : index
    %c0_27 = arith.constant 0 : index
    %50 = vector.load %arg8[%c0_26, %c0_27] : memref<8x256xf32, #tpu.memory_space<vmem>>, vector<8x256xf32>
    tpu.vector_store %arg8[%c0_26, %c0_27], %49 {strides = array<i32>} : memref<8x256xf32, #tpu.memory_space<vmem>>, vector<8x256xf32>,
    return
  }
  func.func @transform_0(%arg0: i32, %arg1: i32) -> (i32, i32) {
    %c0_i32 = arith.constant 0 : i32
    %c0_i32_0 = arith.constant 0 : i32
    %c0_i32_1 = arith.constant 0 : i32
    return %c0_i32, %c0_i32_0 : i32, i32
  }
  func.func @transform_1(%arg0: i32, %arg1: i32) -> (i32, i32) {
    %c1_i32 = arith.constant 1 : i32
    %0 = arith.subi %c1_i32, %arg0 : i32
    %1 = arith.muli %arg1, %0 : i32
    %c0_i32 = arith.constant 0 : i32
    %2 = arith.muli %c0_i32, %arg0 : i32
    %3 = arith.addi %1, %2 : i32
    %c0_i32_0 = arith.constant 0 : i32
    %c0_i32_1 = arith.constant 0 : i32
    return %c0_i32_0, %3 : i32, i32
  }
  func.func @transform_2(%arg0: i32, %arg1: i32) -> (i32, i32) {
    %0 = arith.muli %arg1, %arg0 : i32
    %c0_i32 = arith.constant 0 : i32
    %c0_i32_0 = arith.constant 0 : i32
    return %c0_i32, %0 : i32, i32
  }
  func.func @transform_3(%arg0: i32, %arg1: i32) -> (i32, i32, i32) {
    %c0_i32 = arith.constant 0 : i32
    %c0_i32_0 = arith.constant 0 : i32
    return %arg0, %arg1, %c0_i32 : i32, i32, i32
  }
  func.func @transform_4(%arg0: i32, %arg1: i32) -> (i32, i32, i32) {
    %c0_i32 = arith.constant 0 : i32
    %c0_i32_0 = arith.constant 0 : i32
    return %arg0, %c0_i32, %arg1 : i32, i32, i32
  }
  func.func @transform_5(%arg0: i32, %arg1: i32) -> (i32, i32, i32) {
    %c0_i32 = arith.constant 0 : i32
    %c0_i32_0 = arith.constant 0 : i32
    return %arg0, %c0_i32, %arg1 : i32, i32, i32
  }
  func.func @transform_6(%arg0: i32, %arg1: i32) -> (i32, i32) {
    %c0_i32 = arith.constant 0 : i32
    %c0_i32_0 = arith.constant 0 : i32
    %c0_i32_1 = arith.constant 0 : i32
    return %c0_i32, %c0_i32_0 : i32, i32
  }
}

</mosaic_0001>

<bundles_post_ra>
// kernel: tpu_custom_call.1
= control target key start
LH: loop header
LB: loop body
LE: loop exit
PB: predicated region body
PF: predicated region fallthrough
CT: control target
= control target key end

     0   :  { %s14817_s0 = inlined_call_operand.hbm [shape: bf16[8,32], index: 0, kind: input, shape index: {}]   ;;  %s14818_s1 = inlined_call_operand.hbm [shape: bf16[32,4096], index: 1, kind: input, shape index: {}]   ;;  %s14819_s2 = inlined_call_operand.hbm [shape: bf16[256,4096], index: 2, kind: input, shape index: {}]   ;;  %s14820_s3 = inlined_call_operand.hbm [shape: bf16[2,4096,256], index: 3, kind: input, shape index: {}]   ;;  %s14821_s4 = inlined_call_operand.hbm [shape: f32[2,1,4096], index: 4, kind: input, shape index: {}]   ;;  %s14822_s5 = inlined_call_operand.hbm [shape: f32[2,1,4096], index: 5, kind: input, shape index: {}]   ;;  %s14823_s6 = inlined_call_operand.hbm [shape: f32[8,256], index: 6, kind: output, shape index: {}]  }
   0x1   :  { %14827 = sst [smem:[#allocation21_spill]] %s14817_s0 }
   0x2   :  { %14828 = sst [smem:[#allocation22_spill]] %s14818_s1 }
   0x3   :  { %14829 = sst [smem:[#allocation23_spill]] %s14819_s2 }
   0x4   :  { %11 = vsyncpa [#allocation5], 0 }
   0x5   :  { %12 = vsyncpa [#allocation8], 0 }
   0x6   :  { %14 = vsyncpa [#allocation8 + $0x1], 0 }
   0x7   :  { %15 = vsyncpa [#allocation11], 0 }
   0x8   :  { %17 = vsyncpa [#allocation11 + $0x1], 0 }
   0x9   :  { %18 = vsyncpa [#allocation14], 0 }
   0xa   :  { %20 = vsyncpa [#allocation14 + $0x1], 0 }
   0xb   :  { %21 = vsyncpa [#allocation6], 0  ;;  %s13293_s21 = smov 0   ;;  %s13295_s22 = smov 0  }
   0xc   :  { %s13297_s23 = smov 0   ;;  %s13299_s24 = smov 0  }
   0xd   :  { %s13301_s25 = smov 0   ;;  %s13303_s26 = smov 0  }
   0xe LB: > { %s13245_s27 = smov [#allocation7]   ;;  %p135_p0 = scmp.eq.s32.totalorder %s13243_s26, 0  ;;  %s13243_s26 = sphi %s13303_s26, %s27_s26   ;;  %s13239_s25 = sphi %s13301_s25, %s14848_s25   ;;  %s13235_s24 = sphi %s13299_s24, %s14847_s24   ;;  %s13231_s23 = sphi %s13297_s23, %s14846_s23   ;;  %s13227_s22 = sphi %s13295_s22, %s14845_s22   ;;  %s13223_s21 = sphi %s13293_s21, %s14844_s21  }
   0xf   : > { %s265_s28 = sshll.u32 %s13245_s27, 4  ;;  %p12070_p1 = scmp.lt.s32.totalorder %s13243_s26, 2  ;;  %s266_s28 = int_to_ptr.vmem [resolvable:$true] %s265_s28 }
  0x10   : > { %s252_s29 = sand.u32 1, %s13243_s26   ;;  %s13002_s8 = scalar_lea.vmem %s266_s28, 8192 }
  0x11   : > { %p13330_p2 = pnand %p12070_p1, %p135_p0  ;;  %s13336_s7 = scalar_lea.sflag [#allocation8], %s252_s29 }
  0x12   : > { %p13003_p4 = scmp.ne.s32.totalorder %s266_s28, %s13002_s8  ;;  %s13009_s9 = scalar_lea.vmem %s266_s28, 16384 }
  0x13   : > { %p12993_p3 = pneg %p13330_p2  ;;  %p13010_p7 = scmp.lt.s32.totalorder %s266_s28, %s266_s28 }
  0x14   : > { %p13011_p8 = scmp.lt.s32.totalorder %s13009_s9, %s13002_s8 }
  0x15   : > { %p13005_p5 = pnand %p13003_p4, %p12993_p3 }
  0x16   : > { %p13012_p9 = por %p13011_p8, %p13010_p7 }
  0x17   : > { %p13006_p6 = pneg %p13005_p5 }
  0x19   : > { %p13013_p10 = pnand %p13012_p9, %p13006_p6 }
  0x1b   : > { %13016 = shalt.err (!%p13013_p10)
}
  0x1c   : > { %s14824_s10 = smov 2048   ;;  %s13247_s11 = smov 128  }
  0x1d   : > { %s14831_s1 = sld [smem:[#allocation22_spill]]  ;;  %s39_s14 = sadd.s32 1, %s13239_s25 }
  0x1e   : > { %s127_s15 = sadd.s32 1, %s13231_s23  ;;  %p41_p11 = scmp.ge.s32.totalorder %s39_s14, 2 }
  0x1f   : > { %p134_p12 = scmp.ne.s32.totalorder %s13231_s23, %s13227_s22  ;;  %s13357_s16 = sand.u32 1, %s13231_s23  }
  0x20   : > { %s12022_s17 = sshll.u32 %s13239_s25, 16  ;;  %s14850_s14 = smov (%p41_p11, %s39_s14), 0 }
  0x21   : > { %p136_p13 = por %p135_p0, %p134_p12  ;;  %s10892_s18 = sshll.u32 %s13357_s16, 12 }
  0x22   : > { %s122_s19 = ssub.s32 %s13239_s25, %s14850_s14  ;;  %s301_s8 = scalar_lea.vmem [#allocation10], %s10892_s18 }
  0x23   : > { %12056 = dma.hbm_to_vmem [thread:$0]  (!%p13330_p2), %s14831_s1, 8192, %s266_s28, %s13336_s7, %s14824_s10, %s14824_s10, %s13247_s11  }
  0x24   : > { %p125_p4 = scmp.eq.s32.totalorder %s122_s19, 0  ;;  %s310_s28 = scalar_lea.hbm %s14820_s3, %s12022_s17 }
  0x25   : > { %s311_s9 = sshll.u32 %s301_s8, 4  ;;  %p13372_p5 = pnand %p12070_p1, %p136_p13  ;;  %s312_s9 = int_to_ptr.vmem [resolvable:$true] %s311_s9 }
  0x26   : > { %s13377_s13 = scalar_select %p125_p4, %s13231_s23, %s127_s15  }
  0x27   : > { %s13381_s10 = scalar_lea.sflag [#allocation11], %s252_s29  ;;  %p14825_p0 = pneg %p13372_p5 }
  0x28   : > { %s13030_s19 = scalar_lea.vmem %s312_s9, 65536  ;;  %s13248_s17 = smov [#allocation10]  }
  0x29   : > { %p13031_p6 = scmp.ne.s32.totalorder %s312_s9, %s13030_s19  ;;  %s13035_s18 = sshll.u32 %s13248_s17, 4  ;;  %s13036_s18 = int_to_ptr.vmem [resolvable:$false] %s13035_s18 }
  0x2a   : > { %s13037_s20 = scalar_lea.vmem %s13036_s18, 131072  ;;  %p13038_p1 = scmp.lt.s32.totalorder %s312_s9, %s13036_s18 }
  0x2b   : > { %p13033_p7 = pnand %p13031_p6, %p14825_p0  ;;  %p13039_p9 = scmp.lt.s32.totalorder %s13037_s20, %s13030_s19 }
  0x2d   : > { %p13034_p8 = pneg %p13033_p7  ;;  %p13040_p10 = por %p13039_p9, %p13038_p1 }
  0x2f   : > { %p13041_p11 = pnand %p13040_p10, %p13034_p8 }
  0x31   : > { %13044 = shalt.err (!%p13041_p11)
}
  0x32   : > { %s13249_s15 = smov 8   ;;  %s13394_s29 = sadd.s32 4294967295, %s13243_s26  }
  0x33   : > { %12062 = dma.hbm_to_vmem [thread:$0]  (!%p13372_p5), %s310_s28, 65536, %s312_s9, %s13381_s10, %s13247_s11, %s13247_s11, %s13249_s15  }
  0x34   : > { %p140_p12 = scmp.ne.s32.totalorder %s13227_s22, %s13223_s21  ;;  %p141_p13 = scmp.eq.s32.totalorder %s13394_s29, 0 }
  0x35   : > { %p10887_p4 = scmp.ge.s32.totalorder %s13243_s26, 1  ;;  %p228_p6 = scmp.lt.s32.totalorder %s13243_s26, 3 }
  0x36   : > { %p13403_p7 = por %p141_p13, %p140_p12  ;;  %s13250_s28 = smov [#allocation4]  }
  0x37   : > { %p13407_p8 = pnand %p10887_p4, %p228_p6  ;;  %s241_s9 = sshll.u32 %s13250_s28, 4  ;;  %s242_s9 = int_to_ptr.vmem [resolvable:$true] %s241_s9 }
  0x38   : > { %s14833_s27 = scalar_select %p13403_p7, 1, 0 }
  0x39   : > { %p12049_p1 = pneg %p13407_p8  ;;  %s13251_s21 = smov [#allocation9]  }
  0x3a   : > { %s287_s19 = sshll.u32 %s13251_s21, 4  ;;  %s288_s19 = int_to_ptr.vmem [resolvable:$true] %s287_s19 }
  0x3b   : > { %p13416_p9 = pnand %p12049_p1, %p141_p13  ;;  %s13056_s20 = scalar_lea.vmem %s288_s19, 65536 }
  0x3c   : > { %p13057_p10 = scmp.ne.s32.totalorder %s288_s19, %s13056_s20  ;;  %s13063_s15 = scalar_lea.vmem %s288_s19, 131072 }
  0x3d   : > { %p13064_p4 = scmp.lt.s32.totalorder %s288_s19, %s288_s19  ;;  %p13065_p6 = scmp.lt.s32.totalorder %s13063_s15, %s13056_s20 }
  0x3e   : > { %p13059_p11 = pnand %p13057_p10, %p12993_p3 }
  0x3f   : > { %p13066_p0 = por %p13065_p6, %p13064_p4 }
  0x40   : > { %p13060_p12 = pneg %p13059_p11 }
  0x42   : > { %p13067_p7 = pnand %p13066_p0, %p13060_p12 }
  0x44   : > { %13070 = shalt.err (!%p13067_p7)
}
  0x45   : > { %s14836_s28 = smov 2048   ;;  %s14837_s2 = sld [smem:[#allocation23_spill]] }
  0x46   : > { %p13073_p3 = pneg %p13416_p9  ;;  %s13082_s1 = scalar_lea.vmem %s242_s9, 64 }
  0x47   : > { %p13083_p1 = scmp.ne.s32.totalorder %s242_s9, %s13082_s1  ;;  %p13090_p4 = scmp.lt.s32.totalorder %s242_s9, %s242_s9 }
  0x48   : > { %p13091_p0 = scmp.lt.s32.totalorder %s13082_s1, %s13082_s1 }
  0x49   : > { %p13085_p10 = pnand %p13083_p1, %p13073_p3 }
  0x4a   : > { %p13092_p7 = por %p13091_p0, %p13090_p4 }
  0x4b   : > { %12059 = dma.hbm_to_vmem [thread:$0]  (!%p13330_p2), %s14837_s2, 65536, %s288_s19, %s13336_s7, %s14836_s28, %s14836_s28, %s13247_s11  }
  0x4c   : > { %p13086_p11 = pneg %p13085_p10 }
  0x4e   : > { %p13093_p12 = pnand %p13092_p7, %p13086_p11 }
  0x50   : > { %13096 = shalt.err (!%p13093_p12)
}
  0x51   : > { %s14838_s0 = sld [smem:[#allocation21_spill]]  ;;  %s12023_s7 = sshll.u32 %s13239_s25, 9 }
  0x52   : > { %s14839_s11 = sshll.u32 %s13357_s16, 5  ;;  %s333_s1 = scalar_lea.hbm %s14821_s4, %s12023_s7 }
  0x53   : > { %s325_s19 = scalar_lea.vmem [#allocation12], %s14839_s11  ;;  %p14840_p6 = pneg %p13372_p5 }
  0x54   : > { %s335_s17 = sshll.u32 %s325_s19, 4  ;;  %s13252_s18 = smov [#allocation12]   ;;  %s336_s17 = int_to_ptr.vmem [resolvable:$true] %s335_s17 }
  0x55   : > { %s13110_s21 = scalar_lea.vmem %s336_s17, 512  ;;  %s13115_s30 = sshll.u32 %s13252_s18, 4  ;;  %s13116_s30 = int_to_ptr.vmem [resolvable:$false] %s13115_s30 }
  0x56   : > { %p13111_p2 = scmp.ne.s32.totalorder %s336_s17, %s13110_s21  ;;  %s13117_s20 = scalar_lea.vmem %s13116_s30, 1024 }
  0x57   : > { %12052 = dma.hbm_to_vmem [thread:$0]  (!%p13416_p9), %s14838_s0, 64, %s242_s9, [#allocation5]  }
  0x58   : > { %p13113_p3 = pnand %p13111_p2, %p14840_p6  ;;  %p13118_p9 = scmp.lt.s32.totalorder %s336_s17, %s13116_s30 }
  0x59   : > { %p13119_p10 = scmp.lt.s32.totalorder %s13117_s20, %s13110_s21 }
  0x5a   : > { %p13114_p1 = pneg %p13113_p3 }
  0x5b   : > { %p13120_p11 = por %p13119_p10, %p13118_p9 }
  0x5d   : > { %p13121_p4 = pnand %p13120_p11, %p13114_p1 }
  0x5f   : > { %13124 = shalt.err (!%p13121_p4)
}
  0x60   : > { %12065 = dma.hbm_to_vmem [thread:$0]  (!%p13372_p5), %s333_s1, 512, %s336_s17, %s13381_s10  }
  0x61   : > { %s354_s19 = scalar_lea.hbm %s14822_s5, %s12023_s7  ;;  %s14841_s15 = sshll.u32 %s13357_s16, 5 }
  0x62   : > { %s346_s28 = scalar_lea.vmem [#allocation13], %s14841_s15  ;;  %s343_s30 = scalar_lea.sflag [#allocation14], %s13357_s16 }
  0x63   : > { %s356_s18 = sshll.u32 %s346_s28, 4  ;;  %p14842_p7 = pmov %p14840_p6  ;;  %s357_s18 = int_to_ptr.vmem [resolvable:$true] %s356_s18 }
  0x64   : > { %s13138_s21 = scalar_lea.vmem %s357_s18, 512  ;;  %s13253_s20 = smov [#allocation13]  }
  0x65   : > { %p13139_p0 = scmp.ne.s32.totalorder %s357_s18, %s13138_s21  ;;  %s13143_s0 = sshll.u32 %s13253_s20, 4  ;;  %s13144_s0 = int_to_ptr.vmem [resolvable:$false] %s13143_s0 }
  0x66   : > { %s13145_s2 = scalar_lea.vmem %s13144_s0, 1024  ;;  %p13146_p6 = scmp.lt.s32.totalorder %s357_s18, %s13144_s0 }
  0x67   : > { %p13141_p12 = pnand %p13139_p0, %p14842_p7  ;;  %p13147_p3 = scmp.lt.s32.totalorder %s13145_s2, %s13138_s21 }
  0x69   : > { %p13142_p2 = pneg %p13141_p12  ;;  %p13148_p1 = por %p13147_p3, %p13146_p6 }
  0x6b   : > { %p13149_p9 = pnand %p13148_p1, %p13142_p2 }
  0x6d   : > { %13152 = shalt.err (!%p13149_p9)
}
  0x6e   : > { %12068 = dma.hbm_to_vmem [thread:$0]  (!%p13372_p5), %s354_s19, 512, %s357_s18, %s343_s30  }
  0x6f   : > { %365 = sbr.rel (%p13407_p8) target bundleno = 1915 (0x77b), region = 44 }
  0x74   : > { %13202 = dma.done.wait (%p141_p13), [#allocation5], 64  }
  0x75   : > { %13204 = vsyncadd (%p141_p13), [#allocation5], 4294967232  ;;  %s371_s10 = sand.u32 1, %s13394_s29  }
  0x76   : > { %s372_s0 = scalar_lea.sflag [#allocation8], %s371_s10 }
  0x77   : > { %13206 = dma.done.wait (%p141_p13), %s372_s0, 73728  }
  0x78   : > { %13208 = vsyncadd (%p141_p13), %s372_s0, 4294893568  ;;  %s391_s2 = sand.u32 1, %s13227_s22   ;;  %s390_s12 = scalar_lea.sflag [#allocation11], %s371_s10 }
  0x79   : > { %s10905_s16 = sshll.u32 %s391_s2, 12  ;;  %p14843_p5 = scmp.ne.s32.totalorder %s14833_s27, 0 }
  0x7a   : > { %s13474_s8 = scalar_lea.vmem [#allocation10], %s10905_s16 }
  0x7b   : > { %13210 = dma.done.wait (%p14843_p5), %s390_s12, 66048  }
  0x7c   : > { %13212 = vsyncadd (%p14843_p5), %s390_s12, 4294901248  ;;  %s10906_s7 = sshll.u32 %s391_s2, 5  ;;  %s408_s1 = scalar_lea.sflag [#allocation14], %s391_s2 }
  0x7d   : > { %s13480_s17 = scalar_lea.vmem [#allocation12], %s10906_s7  ;;  %s13482_s9 = scalar_lea.vmem [#allocation13], %s10906_s7 }
  0x7e   : > { %13214 = dma.done.wait (%p14843_p5), %s408_s1, 512  }
  0x7f   : > { %13216 = vsyncadd (%p14843_p5), %s408_s1, 4294966784  ;;  %p464_p13 = scmp.eq.s32.totalorder %s13235_s24, 1 }
  0x80   : > { %v470_v0 = vld [vmem:[#allocation15] sm:$0xff] (%p464_p13)  ;;  %v471_v1 = vld [vmem:[#allocation15 + $0x8] sm:$0xff] (%p464_p13) }
  0x81   : > { %469 = sbr.rel (!%p464_p13) target bundleno = 134 (0x86), region = 72  ;;  %v12026_v2 = vpack.c.bf16 (%p464_p13), %v471_v1, %v470_v0 }
  0x83   : > { %480 = vst [vmem:[#allocation2] sm:$0xff] (%p464_p13), %v12026_v2 }
  0x86 PF: > { %v13254_v3 = vmov 0.0   ;;  %p10910_p8 = scmp.ne.s32.totalorder %s13235_s24, 0 }
  0x87   : > { %484 = vst [vmem:[#allocation15] sm:$0xff] %v13254_v3  ;;  %485 = vst [vmem:[#allocation15 + $0x8] sm:$0xff] %v13254_v3 }
  0x88   : > { %489 = sbr.rel (%p10910_p8) target bundleno = 408 (0x198), region = 80 }
  0x8d   : > { %v523_v4 = vld [vmem:[#allocation7 + $0x100] sm:$0xff]  ;;  %v524_v6 = vld [vmem:[#allocation7 + $0x108] sm:$0xff]  ;;  %v13255_v12 = vmov 0   ;;  %v525_v19 = vld [vmem:[#allocation7 + $0x110] sm:$0xff]  ;;  %vm875_vm0 = vcmask 261120  }
  0x8e   : > { %v539_v5 = vld [vmem:[#allocation7 + $0x180] sm:$0xff]  ;;  %v540_v8 = vld [vmem:[#allocation7 + $0x188] sm:$0xff]  ;;  %911 = vmatprep.mubr.bf16.mxu0 %v13255_v12  ;;  %952 = vmatprep.mubr.bf16.mxu1 %v13255_v12  ;;  %v541_v20 = vld [vmem:[#allocation7 + $0x190] sm:$0xff] }
  0x8f   : > { %v10944_v7 = vcombine.high %v523_v4, %v539_v5  ;;  %v10943_v9 = vcombine.low %v523_v4, %v539_v5  ;;  %v491_v10 = vld [vmem:[#allocation7] sm:$0xff]  ;;  %v10946_v13 = vcombine.high %v524_v6, %v540_v8  ;;  %v10945_v14 = vcombine.low %v524_v6, %v540_v8  ;;  %v492_v16 = vld [vmem:[#allocation7 + $0x8] sm:$0xff]  ;;  %v526_v21 = vld [vmem:[#allocation7 + $0x118] sm:$0xff] }
  0x90   : > { %v507_v11 = vld [vmem:[#allocation7 + $0x80] sm:$0xff]  ;;  %v508_v17 = vld [vmem:[#allocation7 + $0x88] sm:$0xff]  ;;  %v542_v23 = vld [vmem:[#allocation7 + $0x198] sm:$0xff]  ;;  %v10948_v25 = vcombine.high %v525_v19, %v541_v20  ;;  %v10947_v32 = vcombine.low %v525_v19, %v541_v20 }
  0x91   : > { %v10912_v15 = vcombine.high %v491_v10, %v507_v11  ;;  %891 = vmatprep.subr.bf16.mxu0 %v10944_v7  ;;  %v10914_v18 = vcombine.high %v492_v16, %v508_v17  ;;  %932 = vmatprep.subr.bf16.mxu1 %v10946_v13  ;;  %v10911_v22 = vcombine.low %v491_v10, %v507_v11  ;;  %v493_v27 = vld [vmem:[#allocation7 + $0x10] sm:$0xff]  ;;  %v494_v29 = vld [vmem:[#allocation7 + $0x18] sm:$0xff]  ;;  %v527_v36 = vld [vmem:[#allocation7 + $0x120] sm:$0xff] }
  0x92   : > { %892 = vmatpush1.bf16.msra.mxu0 %v10943_v9  ;;  %933 = vmatpush1.bf16.msra.mxu1 %v10945_v14  ;;  %v10913_v24 = vcombine.low %v492_v16, %v508_v17  ;;  %v10950_v26 = vcombine.high %v526_v21, %v542_v23  ;;  %v509_v28 = vld [vmem:[#allocation7 + $0x90] sm:$0xff]  ;;  %v510_v30 = vld [vmem:[#allocation7 + $0x98] sm:$0xff]  ;;  %v10949_v33 = vcombine.low %v526_v21, %v542_v23  ;;  %v543_v37 = vld [vmem:[#allocation7 + $0x1a0] sm:$0xff] }
  0x93   : > { %893 = vmatprep.subr.bf16.mxu0 %v10912_v15  ;;  %934 = vmatprep.subr.bf16.mxu1 %v10914_v18  ;;  %v13492_v31 = vld [vmem:[#allocation4] sm:$0xf]  ;;  %v10916_v34 = vcombine.high %v493_v27, %v509_v28  ;;  %v10918_v35 = vcombine.high %v494_v29, %v510_v30  ;;  %v528_v38 = vld [vmem:[#allocation7 + $0x128] sm:$0xff]  ;;  %v10915_v40 = vcombine.low %v493_v27, %v509_v28  ;;  %v495_v44 = vld [vmem:[#allocation7 + $0x20] sm:$0xff] }
  0x94   : > { %v544_v39 = vld [vmem:[#allocation7 + $0x1a8] sm:$0xff]  ;;  %v10917_v41 = vcombine.low %v494_v29, %v510_v30  ;;  %v10952_v42 = vcombine.high %v527_v36, %v543_v37  ;;  %v511_v45 = vld [vmem:[#allocation7 + $0xa0] sm:$0xff]  ;;  %v10951_v48 = vcombine.low %v527_v36, %v543_v37  ;;  %v529_v52 = vld [vmem:[#allocation7 + $0x130] sm:$0xff] }
  0x95   : > { %v10954_v43 = vcombine.high %v528_v38, %v544_v39  ;;  %v496_v46 = vld [vmem:[#allocation7 + $0x28] sm:$0xff]  ;;  %v10953_v49 = vcombine.low %v528_v38, %v544_v39  ;;  %v10920_v50 = vcombine.high %v495_v44, %v511_v45  ;;  %v545_v53 = vld [vmem:[#allocation7 + $0x1b0] sm:$0xff]  ;;  %v530_v54 = vld [vmem:[#allocation7 + $0x138] sm:$0xff]  ;;  %v10919_v56 = vcombine.low %v495_v44, %v511_v45 }
  0x96   : > { %894 = vmatpush1.bf16.msra.mxu0 %v10911_v22  ;;  %935 = vmatpush1.bf16.msra.mxu1 %v10913_v24  ;;  %v512_v47 = vld [vmem:[#allocation7 + $0xa8] sm:$0xff]  ;;  %v546_v55 = vld [vmem:[#allocation7 + $0x1b8] sm:$0xff]  ;;  %v10956_v58 = vcombine.high %v529_v52, %v545_v53  ;;  %v497_v60 = vld [vmem:[#allocation7 + $0x30] sm:$0xff]  ;;  %v10955_v0 = vcombine.low %v529_v52, %v545_v53 }
  0x97   : > { %973 = vmatprep.subr.bf16.mxu0 %v10948_v25  ;;  %1014 = vmatprep.subr.bf16.mxu1 %v10950_v26  ;;  %v10922_v51 = vcombine.high %v496_v46, %v512_v47  ;;  %v10921_v57 = vcombine.low %v496_v46, %v512_v47  ;;  %v10958_v59 = vcombine.high %v530_v54, %v546_v55  ;;  %v513_v61 = vld [vmem:[#allocation7 + $0xb0] sm:$0xff]  ;;  %v498_v62 = vld [vmem:[#allocation7 + $0x38] sm:$0xff]  ;;  %v531_v4 = vld [vmem:[#allocation7 + $0x140] sm:$0xff] }
  0x98   : > { %v514_v63 = vld [vmem:[#allocation7 + $0xb8] sm:$0xff]  ;;  %v10957_v1 = vcombine.low %v530_v54, %v546_v55  ;;  %v10924_v2 = vcombine.high %v497_v60, %v513_v61  ;;  %v547_v5 = vld [vmem:[#allocation7 + $0x1c0] sm:$0xff]  ;;  %v532_v6 = vld [vmem:[#allocation7 + $0x148] sm:$0xff]  ;;  %v10923_v8 = vcombine.low %v497_v60, %v513_v61 }
  0x99   : > { %10975 = vmatmul.mubr.msk.bf16.vlgmr.msra.gmra.mxu0 %vm875_vm0, %v13492_v31  ;;  %10976 = vmatmul.mubr.msk.bf16.vlgmr.msra.gmra.mxu1 %vm875_vm0, %v13492_v31  ;;  %v10926_v3 = vcombine.high %v498_v62, %v514_v63  ;;  %v548_v7 = vld [vmem:[#allocation7 + $0x1c8] sm:$0xff]  ;;  %v10925_v9 = vcombine.low %v498_v62, %v514_v63  ;;  %v10960_v10 = vcombine.high %v531_v4, %v547_v5  ;;  %v499_v13 = vld [vmem:[#allocation7 + $0x40] sm:$0xff]  ;;  %v533_v21 = vld [vmem:[#allocation7 + $0x150] sm:$0xff] }
  0x9a   : > { %974 = vmatpush1.bf16.msra.mxu0 %v10947_v32  ;;  %1015 = vmatpush1.bf16.msra.mxu1 %v10949_v33  ;;  %v10962_v11 = vcombine.high %v532_v6, %v548_v7  ;;  %v515_v14 = vld [vmem:[#allocation7 + $0xc0] sm:$0xff]  ;;  %v500_v15 = vld [vmem:[#allocation7 + $0x48] sm:$0xff]  ;;  %v10959_v17 = vcombine.low %v531_v4, %v547_v5  ;;  %v10961_v18 = vcombine.low %v532_v6, %v548_v7  ;;  %v549_v22 = vld [vmem:[#allocation7 + $0x1d0] sm:$0xff] }
  0x9b   : > { %975 = vmatprep.subr.bf16.mxu0 %v10916_v34  ;;  %1016 = vmatprep.subr.bf16.mxu1 %v10918_v35  ;;  %v516_v16 = vld [vmem:[#allocation7 + $0xc8] sm:$0xff]  ;;  %v10928_v19 = vcombine.high %v499_v13, %v515_v14  ;;  %v534_v23 = vld [vmem:[#allocation7 + $0x158] sm:$0xff]  ;;  %v10927_v25 = vcombine.low %v499_v13, %v515_v14  ;;  %v10964_v27 = vcombine.high %v533_v21, %v549_v22  ;;  %v501_v29 = vld [vmem:[#allocation7 + $0x50] sm:$0xff] }
  0x9c   : > { %993 = vmatprep.mubr.bf16.mxu0 %v13255_v12  ;;  %1034 = vmatprep.mubr.bf16.mxu1 %v13255_v12  ;;  %v10930_v20 = vcombine.high %v500_v15, %v516_v16  ;;  %v550_v24 = vld [vmem:[#allocation7 + $0x1d8] sm:$0xff]  ;;  %v10929_v26 = vcombine.low %v500_v15, %v516_v16  ;;  %v517_v30 = vld [vmem:[#allocation7 + $0xd0] sm:$0xff]  ;;  %v10963_v34 = vcombine.low %v533_v21, %v549_v22  ;;  %v535_v38 = vld [vmem:[#allocation7 + $0x160] sm:$0xff] }
  0x9d   : > { %v10966_v28 = vcombine.high %v534_v23, %v550_v24  ;;  %v502_v32 = vld [vmem:[#allocation7 + $0x58] sm:$0xff]  ;;  %v10965_v35 = vcombine.low %v534_v23, %v550_v24  ;;  %v10932_v36 = vcombine.high %v501_v29, %v517_v30  ;;  %v551_v39 = vld [vmem:[#allocation7 + $0x1e0] sm:$0xff]  ;;  %v537_v54 = vld [vmem:[#allocation7 + $0x170] sm:$0xff] }
  0x9e   : > { %976 = vmatpush1.bf16.msra.mxu0 %v10915_v40  ;;  %1017 = vmatpush1.bf16.msra.mxu1 %v10917_v41  ;;  %v518_v33 = vld [vmem:[#allocation7 + $0xd8] sm:$0xff]  ;;  %v536_v40 = vld [vmem:[#allocation7 + $0x168] sm:$0xff]  ;;  %v10968_v44 = vcombine.high %v535_v38, %v551_v39  ;;  %v503_v46 = vld [vmem:[#allocation7 + $0x60] sm:$0xff] }
  0x9f   : > { %1055 = vmatprep.subr.bf16.mxu0 %v10952_v42  ;;  %1096 = vmatprep.subr.bf16.mxu1 %v10954_v43  ;;  %v10934_v37 = vcombine.high %v502_v32, %v518_v33  ;;  %v552_v41 = vld [vmem:[#allocation7 + $0x1e8] sm:$0xff]  ;;  %v10931_v42 = vcombine.low %v501_v29, %v517_v30  ;;  %v10933_v43 = vcombine.low %v502_v32, %v518_v33  ;;  %v519_v47 = vld [vmem:[#allocation7 + $0xe0] sm:$0xff]  ;;  %v553_v55 = vld [vmem:[#allocation7 + $0x1f0] sm:$0xff] }
  0xa0   : > { %v10970_v45 = vcombine.high %v536_v40, %v552_v41  ;;  %v10936_v52 = vcombine.high %v503_v46, %v519_v47  ;;  %v10972_v60 = vcombine.high %v537_v54, %v553_v55  ;;  %v505_v62 = vld [vmem:[#allocation7 + $0x70] sm:$0xff] }
  0xa1   : > { %10977 = vmatmul.mubr.msk.bf16.vlgmr.msra.gmra.mxu0 %vm875_vm0, %v13492_v31  ;;  %10978 = vmatmul.mubr.msk.bf16.vlgmr.msra.gmra.mxu1 %vm875_vm0, %v13492_v31  ;;  %v521_v63 = vld [vmem:[#allocation7 + $0xf0] sm:$0xff] }
  0xa2   : > { %1056 = vmatpush1.bf16.msra.mxu0 %v10951_v48  ;;  %1097 = vmatpush1.bf16.msra.mxu1 %v10953_v49  ;;  %v504_v48 = vld [vmem:[#allocation7 + $0x68] sm:$0xff]  ;;  %v10940_v4 = vcombine.high %v505_v62, %v521_v63  ;;  %v10939_v6 = vcombine.low %v505_v62, %v521_v63 }
  0xa3   : > { %1057 = vmatprep.subr.bf16.mxu0 %v10920_v50  ;;  %1098 = vmatprep.subr.bf16.mxu1 %v10922_v51  ;;  %v520_v49 = vld [vmem:[#allocation7 + $0xe8] sm:$0xff]  ;;  %v10967_v50 = vcombine.low %v535_v38, %v551_v39  ;;  %v10969_v51 = vcombine.low %v536_v40, %v552_v41 }
  0xa4   : > { %1075 = vmatprep.mubr.bf16.mxu0 %v13255_v12  ;;  %1116 = vmatprep.mubr.bf16.mxu1 %v13255_v12  ;;  %v10938_v53 = vcombine.high %v504_v48, %v520_v49 }
  0xa6   : > { %1058 = vmatpush1.bf16.msra.mxu0 %v10919_v56  ;;  %1099 = vmatpush1.bf16.msra.mxu1 %v10921_v57  ;;  %v538_v56 = vld [vmem:[#allocation7 + $0x178] sm:$0xff] }
  0xa7   : > { %1137 = vmatprep.subr.bf16.mxu0 %v10956_v58  ;;  %1178 = vmatprep.subr.bf16.mxu1 %v10958_v59  ;;  %v554_v57 = vld [vmem:[#allocation7 + $0x1f8] sm:$0xff]  ;;  %v10935_v58 = vcombine.low %v503_v46, %v519_v47  ;;  %v10937_v59 = vcombine.low %v504_v48, %v520_v49 }
  0xa8   : > { %v10974_v61 = vcombine.high %v538_v56, %v554_v57 }
  0xa9   : > { %10979 = vmatmul.mubr.msk.bf16.vlgmr.msra.gmra.mxu0 %vm875_vm0, %v13492_v31  ;;  %10980 = vmatmul.mubr.msk.bf16.vlgmr.msra.gmra.mxu1 %vm875_vm0, %v13492_v31 }
  0xaa   : > { %1138 = vmatpush1.bf16.msra.mxu0 %v10955_v0  ;;  %1179 = vmatpush1.bf16.msra.mxu1 %v10957_v1  ;;  %v506_v0 = vld [vmem:[#allocation7 + $0x78] sm:$0xff] }
  0xab   : > { %1139 = vmatprep.subr.bf16.mxu0 %v10924_v2  ;;  %1180 = vmatprep.subr.bf16.mxu1 %v10926_v3  ;;  %v522_v1 = vld [vmem:[#allocation7 + $0xf8] sm:$0xff]  ;;  %v10971_v2 = vcombine.low %v537_v54, %v553_v55  ;;  %v10973_v3 = vcombine.low %v538_v56, %v554_v57 }
  0xac   : > { %1157 = vmatprep.mubr.bf16.mxu0 %v13255_v12  ;;  %1198 = vmatprep.mubr.bf16.mxu1 %v13255_v12  ;;  %v10942_v5 = vcombine.high %v506_v0, %v522_v1  ;;  %v10941_v7 = vcombine.low %v506_v0, %v522_v1 }
  0xae   : > { %1140 = vmatpush1.bf16.msra.mxu0 %v10923_v8  ;;  %1181 = vmatpush1.bf16.msra.mxu1 %v10925_v9 }
  0xaf   : > { %1219 = vmatprep.subr.bf16.mxu0 %v10960_v10  ;;  %1260 = vmatprep.subr.bf16.mxu1 %v10962_v11 }
  0xb1   : > { %10981 = vmatmul.mubr.msk.bf16.vlgmr.msra.gmra.mxu0 %vm875_vm0, %v13492_v31  ;;  %10982 = vmatmul.mubr.msk.bf16.vlgmr.msra.gmra.mxu1 %vm875_vm0, %v13492_v31 }
  0xb2   : > { %1220 = vmatpush1.bf16.msra.mxu0 %v10959_v17  ;;  %1261 = vmatpush1.bf16.msra.mxu1 %v10961_v18 }
  0xb3   : > { %1221 = vmatprep.subr.bf16.mxu0 %v10928_v19  ;;  %1262 = vmatprep.subr.bf16.mxu1 %v10930_v20 }
  0xb4   : > { %1239 = vmatprep.mubr.bf16.mxu0 %v13255_v12  ;;  %1280 = vmatprep.mubr.bf16.mxu1 %v13255_v12 }
  0xb6   : > { %1222 = vmatpush1.bf16.msra.mxu0 %v10927_v25  ;;  %1263 = vmatpush1.bf16.msra.mxu1 %v10929_v26 }
  0xb7   : > { %1301 = vmatprep.subr.bf16.mxu0 %v10964_v27  ;;  %1342 = vmatprep.subr.bf16.mxu1 %v10966_v28 }
  0xb9   : > { %10983 = vmatmul.mubr.msk.bf16.vlgmr.msra.gmra.mxu0 %vm875_vm0, %v13492_v31  ;;  %10984 = vmatmul.mubr.msk.bf16.vlgmr.msra.gmra.mxu1 %vm875_vm0, %v13492_v31 }
  0xba   : > { %1302 = vmatpush1.bf16.msra.mxu0 %v10963_v34  ;;  %1343 = vmatpush1.bf16.msra.mxu1 %v10965_v35 }
  0xbb   : > { %1303 = vmatprep.subr.bf16.mxu0 %v10932_v36  ;;  %1344 = vmatprep.subr.bf16.mxu1 %v10934_v37 }
  0xbc   : > { %1321 = vmatprep.mubr.bf16.mxu0 %v13255_v12  ;;  %1362 = vmatprep.mubr.bf16.mxu1 %v13255_v12 }
  0xbe   : > { %1304 = vmatpush1.bf16.msra.mxu0 %v10931_v42  ;;  %1345 = vmatpush1.bf16.msra.mxu1 %v10933_v43 }
  0xbf   : > { %1383 = vmatprep.subr.bf16.mxu0 %v10968_v44  ;;  %1424 = vmatprep.subr.bf16.mxu1 %v10970_v45 }
  0xc1   : > { %10985 = vmatmul.mubr.msk.bf16.vlgmr.msra.gmra.mxu0 %vm875_vm0, %v13492_v31  ;;  %10986 = vmatmul.mubr.msk.bf16.vlgmr.msra.gmra.mxu1 %vm875_vm0, %v13492_v31 }
  0xc2   : > { %1384 = vmatpush1.bf16.msra.mxu0 %v10967_v50  ;;  %1425 = vmatpush1.bf16.msra.mxu1 %v10969_v51 }
  0xc3   : > { %1385 = vmatprep.subr.bf16.mxu0 %v10936_v52  ;;  %1426 = vmatprep.subr.bf16.mxu1 %v10938_v53 }
  0xc4   : > { %1403 = vmatprep.mubr.bf16.mxu0 %v13255_v12  ;;  %1444 = vmatprep.mubr.bf16.mxu1 %v13255_v12 }
  0xc6   : > { %1386 = vmatpush1.bf16.msra.mxu0 %v10935_v58  ;;  %1427 = vmatpush1.bf16.msra.mxu1 %v10937_v59 }
  0xc7   : > { %1465 = vmatprep.subr.bf16.mxu0 %v10972_v60  ;;  %1506 = vmatprep.subr.bf16.mxu1 %v10974_v61 }
  0xc9   : > { %10987 = vmatmul.mubr.msk.bf16.vlgmr.msra.gmra.mxu0 %vm875_vm0, %v13492_v31  ;;  %10988 = vmatmul.mubr.msk.bf16.vlgmr.msra.gmra.mxu1 %vm875_vm0, %v13492_v31 }
  0xca   : > { %1466 = vmatpush1.bf16.msra.mxu0 %v10971_v2  ;;  %1507 = vmatpush1.bf16.msra.mxu1 %v10973_v3 }
  0xcb   : > { %1467 = vmatprep.subr.bf16.mxu0 %v10940_v4  ;;  %1508 = vmatprep.subr.bf16.mxu1 %v10942_v5 }
  0xcc   : > { %1485 = vmatprep.mubr.bf16.mxu0 %v13255_v12  ;;  %1526 = vmatprep.mubr.bf16.mxu1 %v13255_v12 }
  0xce   : > { %1468 = vmatpush1.bf16.msra.mxu0 %v10939_v6  ;;  %1509 = vmatpush1.bf16.msra.mxu1 %v10941_v7 }
  0xd1   : > { %10989 = vmatmul.mubr.msk.bf16.vlgmr.msra.gmra.mxu0 %vm875_vm0, %v13492_v31  ;;  %10990 = vmatmul.mubr.msk.bf16.vlgmr.msra.gmra.mxu1 %vm875_vm0, %v13492_v31 }
 0x159   : > { %v913_v8 = vpop.f32.mrf.mxu0  ;;  %v954_v9 = vpop.f32.mrf.mxu1 }
 0x15a   : > { %1535 = vst [vmem:[#allocation3 + $0xb0] sm:$0xff] %v913_v8  ;;  %1537 = vst [vmem:[#allocation3 + $0xd8] sm:$0xff] %v954_v9 }
 0x15b   : > { %v915_v10 = vpop.f32.mrf.mxu0  ;;  %v956_v11 = vpop.f32.mrf.mxu1 }
 0x15c   : > { %1536 = vst [vmem:[#allocation3] sm:$0xff] %v915_v10  ;;  %1538 = vst [vmem:[#allocation3 + $0x18] sm:$0xff] %v956_v11 }
 0x15d   : > { %v917_v13 = vpop.f32.mrf.mxu0  ;;  %v958_v14 = vpop.f32.mrf.mxu1 }
 0x15f   : > { %v918_v15 = vpop.f32.mrf.mxu0  ;;  %v959_v12 = vpop.f32.mrf.mxu1 }
 0x161   : > { %v995_v16 = vpop.f32.mrf.mxu0  ;;  %v1036_v17 = vpop.f32.mrf.mxu1 }
 0x162   : > { %1539 = vst [vmem:[#allocation3 + $0x50] sm:$0xff] %v995_v16  ;;  %1541 = vst [vmem:[#allocation3 + $0x30] sm:$0xff] %v1036_v17 }
 0x163   : > { %v997_v18 = vpop.f32.mrf.mxu0  ;;  %v1038_v19 = vpop.f32.mrf.mxu1 }
 0x164   : > { %1540 = vst [vmem:[#allocation3 + $0x68] sm:$0xff] %v997_v18  ;;  %1542 = vst [vmem:[#allocation3 + $0x48] sm:$0xff] %v1038_v19 }
 0x165   : > { %v999_v31 = vpop.f32.mrf.mxu0  ;;  %v1040_v20 = vpop.f32.mrf.mxu1 }
 0x167   : > { %v1000_v21 = vpop.f32.mrf.mxu0  ;;  %v1041_v22 = vpop.f32.mrf.mxu1 }
 0x169   : > { %v1077_v23 = vpop.f32.mrf.mxu0  ;;  %v1118_v24 = vpop.f32.mrf.mxu1 }
 0x16a   : > { %1543 = vst [vmem:[#allocation3 + $0x80] sm:$0xff] %v1077_v23  ;;  %1545 = vst [vmem:[#allocation3 + $0xe8] sm:$0xff] %v1118_v24 }
 0x16b   : > { %v1079_v25 = vpop.f32.mrf.mxu0  ;;  %v1120_v26 = vpop.f32.mrf.mxu1 }
 0x16c   : > { %1544 = vst [vmem:[#allocation3 + $0x88] sm:$0xff] %v1079_v25  ;;  %1546 = vst [vmem:[#allocation3 + $0xb8] sm:$0xff] %v1120_v26 }
 0x16d   : > { %v1081_v27 = vpop.f32.mrf.mxu0  ;;  %v1122_v28 = vpop.f32.mrf.mxu1 }
 0x16f   : > { %v1082_v29 = vpop.f32.mrf.mxu0  ;;  %v1123_v30 = vpop.f32.mrf.mxu1 }
 0x171   : > { %v1159_v32 = vpop.f32.mrf.mxu0  ;;  %v1200_v33 = vpop.f32.mrf.mxu1 }
 0x172   : > { %1547 = vst [vmem:[#allocation3 + $0x60] sm:$0xff] %v1159_v32  ;;  %1549 = vst [vmem:[#allocation3 + $0x8] sm:$0xff] %v1200_v33 }
 0x173   : > { %v1161_v34 = vpop.f32.mrf.mxu0  ;;  %v1202_v35 = vpop.f32.mrf.mxu1 }
 0x174   : > { %1548 = vst [vmem:[#allocation3 + $0xf0] sm:$0xff] %v1161_v34  ;;  %1550 = vst [vmem:[#allocation3 + $0x78] sm:$0xff] %v1202_v35 }
 0x175   : > { %v1163_v36 = vpop.f32.mrf.mxu0  ;;  %v1204_v37 = vpop.f32.mrf.mxu1 }
 0x177   : > { %v1164_v38 = vpop.f32.mrf.mxu0  ;;  %v1205_v39 = vpop.f32.mrf.mxu1 }
 0x179   : > { %v1241_v40 = vpop.f32.mrf.mxu0  ;;  %v1282_v41 = vpop.f32.mrf.mxu1 }
 0x17a   : > { %1551 = vst [vmem:[#allocation3 + $0x38] sm:$0xff] %v1241_v40  ;;  %1553 = vst [vmem:[#allocation3 + $0x40] sm:$0xff] %v1282_v41 }
 0x17b   : > { %v1243_v42 = vpop.f32.mrf.mxu0  ;;  %v1284_v43 = vpop.f32.mrf.mxu1 }
 0x17c   : > { %1552 = vst [vmem:[#allocation3 + $0x58] sm:$0xff] %v1243_v42  ;;  %1554 = vst [vmem:[#allocation3 + $0xc8] sm:$0xff] %v1284_v43 }
 0x17d   : > { %v1245_v44 = vpop.f32.mrf.mxu0  ;;  %v1286_v45 = vpop.f32.mrf.mxu1 }
 0x17f   : > { %v1246_v46 = vpop.f32.mrf.mxu0  ;;  %v1287_v47 = vpop.f32.mrf.mxu1 }
 0x181   : > { %v1323_v48 = vpop.f32.mrf.mxu0  ;;  %v1364_v49 = vpop.f32.mrf.mxu1 }
 0x182   : > { %1555 = vst [vmem:[#allocation3 + $0xe0] sm:$0xff] %v1323_v48  ;;  %1557 = vst [vmem:[#allocation3 + $0x70] sm:$0xff] %v1364_v49 }
 0x183   : > { %v1325_v50 = vpop.f32.mrf.mxu0  ;;  %v1366_v51 = vpop.f32.mrf.mxu1 }
 0x184   : > { %1556 = vst [vmem:[#allocation3 + $0x90] sm:$0xff] %v1325_v50  ;;  %1558 = vst [vmem:[#allocation3 + $0xc0] sm:$0xff] %v1366_v51 }
 0x185   : > { %v1327_v52 = vpop.f32.mrf.mxu0  ;;  %v1368_v53 = vpop.f32.mrf.mxu1 }
 0x187   : > { %v1328_v54 = vpop.f32.mrf.mxu0  ;;  %v1369_v55 = vpop.f32.mrf.mxu1 }
 0x189   : > { %v1405_v56 = vpop.f32.mrf.mxu0  ;;  %v1446_v57 = vpop.f32.mrf.mxu1 }
 0x18a   : > { %1559 = vst [vmem:[#allocation3 + $0xa8] sm:$0xff] %v1405_v56  ;;  %1561 = vst [vmem:[#allocation3 + $0x10] sm:$0xff] %v1446_v57 }
 0x18b   : > { %v1407_v58 = vpop.f32.mrf.mxu0  ;;  %v1448_v59 = vpop.f32.mrf.mxu1 }
 0x18c   : > { %1560 = vst [vmem:[#allocation3 + $0xd0] sm:$0xff] %v1407_v58  ;;  %1562 = vst [vmem:[#allocation3 + $0x28] sm:$0xff] %v1448_v59 }
 0x18d   : > { %v1409_v60 = vpop.f32.mrf.mxu0  ;;  %v1450_v61 = vpop.f32.mrf.mxu1 }
 0x18f   : > { %v1410_v62 = vpop.f32.mrf.mxu0  ;;  %v1451_v63 = vpop.f32.mrf.mxu1 }
 0x191   : > { %v1487_v0 = vpop.f32.mrf.mxu0  ;;  %v1528_v1 = vpop.f32.mrf.mxu1 }
 0x192   : > { %1563 = vst [vmem:[#allocation3 + $0xa0] sm:$0xff] %v1487_v0  ;;  %1565 = vst [vmem:[#allocation3 + $0x20] sm:$0xff] %v1528_v1 }
 0x193   : > { %v1489_v2 = vpop.f32.mrf.mxu0  ;;  %v1530_v3 = vpop.f32.mrf.mxu1 }
 0x194   : > { %1564 = vst [vmem:[#allocation3 + $0xf8] sm:$0xff] %v1489_v2  ;;  %1566 = vst [vmem:[#allocation3 + $0x98] sm:$0xff] %v1530_v3 }
 0x195   : > { %v1491_v4 = vpop.f32.mrf.mxu0  ;;  %v1532_v5 = vpop.f32.mrf.mxu1 }
 0x197   : > { %v1492_v6 = vpop.f32.mrf.mxu0  ;;  %v1533_v7 = vpop.f32.mrf.mxu1 }
 0x198 PF: > { %p10991_p10 = scmp.ne.s32.totalorder %s13235_s24, 1 }
 0x19a   : > { %1569 = sbr.rel (%p10991_p10) target bundleno = 1130 (0x46a), region = 84 }
 0x19f   : > { %v1795_v8 = vld [vmem:[#allocation9 + $0x700] sm:$0xff]  ;;  %v1796_v10 = vld [vmem:[#allocation9 + $0x708] sm:$0xff]  ;;  %v13541_v61 = vld [vmem:[#allocation2] sm:$0xff] }
 0x1a0   : > { %v1811_v9 = vld [vmem:[#allocation9 + $0x780] sm:$0xff]  ;;  %v1812_v13 = vld [vmem:[#allocation9 + $0x788] sm:$0xff]  ;;  %v13545_v1 = vcombine.high %v13541_v61, %v13541_v61 }
 0x1a1   : > { %v11219_v11 = vcombine.high %v1795_v8, %v1811_v9  ;;  %v11218_v14 = vcombine.low %v1795_v8, %v1811_v9  ;;  %v1763_v15 = vld [vmem:[#allocation9 + $0x600] sm:$0xff]  ;;  %v11221_v16 = vcombine.high %v1796_v10, %v1812_v13  ;;  %v11220_v17 = vcombine.low %v1796_v10, %v1812_v13  ;;  %v1764_v19 = vld [vmem:[#allocation9 + $0x608] sm:$0xff] }
 0x1a2   : > { %v1779_v12 = vld [vmem:[#allocation9 + $0x680] sm:$0xff]  ;;  %v1780_v31 = vld [vmem:[#allocation9 + $0x688] sm:$0xff]  ;;  %4682 = vmatprep.mubr.bf16.mxu0 %v13545_v1  ;;  %4723 = vmatprep.mubr.bf16.mxu1 %v13545_v1 }
 0x1a3   : > { %v11187_v18 = vcombine.high %v1763_v15, %v1779_v12  ;;  %v1731_v20 = vld [vmem:[#allocation9 + $0x500] sm:$0xff]  ;;  %4650 = vmatprep.subr.bf16.mxu0 %v11219_v11  ;;  %v11189_v21 = vcombine.high %v1764_v19, %v1780_v31  ;;  %v1732_v23 = vld [vmem:[#allocation9 + $0x508] sm:$0xff]  ;;  %4691 = vmatprep.subr.bf16.mxu1 %v11221_v16  ;;  %v11186_v25 = vcombine.low %v1763_v15, %v1779_v12 }
 0x1a4   : > { %v1747_v22 = vld [vmem:[#allocation9 + $0x580] sm:$0xff]  ;;  %v1748_v24 = vld [vmem:[#allocation9 + $0x588] sm:$0xff]  ;;  %4651 = vmatpush1.bf16.msra.mxu0 %v11218_v14  ;;  %4692 = vmatpush1.bf16.msra.mxu1 %v11220_v17  ;;  %v11188_v26 = vcombine.low %v1764_v19, %v1780_v31 }
 0x1a5   : > { %4652 = vmatprep.subr.bf16.mxu0 %v11187_v18  ;;  %v11155_v27 = vcombine.high %v1731_v20, %v1747_v22  ;;  %4693 = vmatprep.subr.bf16.mxu1 %v11189_v21  ;;  %v11157_v28 = vcombine.high %v1732_v23, %v1748_v24  ;;  %v1699_v29 = vld [vmem:[#allocation9 + $0x400] sm:$0xff]  ;;  %v1700_v32 = vld [vmem:[#allocation9 + $0x408] sm:$0xff]  ;;  %v11154_v34 = vcombine.low %v1731_v20, %v1747_v22 }
 0x1a6   : > { %v1715_v30 = vld [vmem:[#allocation9 + $0x480] sm:$0xff]  ;;  %v1716_v33 = vld [vmem:[#allocation9 + $0x488] sm:$0xff]  ;;  %v11156_v35 = vcombine.low %v1732_v23, %v1748_v24 }
 0x1a7   : > { %v11123_v36 = vcombine.high %v1699_v29, %v1715_v30  ;;  %v11125_v37 = vcombine.high %v1700_v32, %v1716_v33  ;;  %v1667_v38 = vld [vmem:[#allocation9 + $0x300] sm:$0xff]  ;;  %v1668_v40 = vld [vmem:[#allocation9 + $0x308] sm:$0xff]  ;;  %v11122_v42 = vcombine.low %v1699_v29, %v1715_v30  ;;  %v11124_v43 = vcombine.low %v1700_v32, %v1716_v33 }
 0x1a8   : > { %4653 = vmatpush1.bf16.msra.mxu0 %v11186_v25  ;;  %4694 = vmatpush1.bf16.msra.mxu1 %v11188_v26  ;;  %v1683_v39 = vld [vmem:[#allocation9 + $0x380] sm:$0xff]  ;;  %v1684_v41 = vld [vmem:[#allocation9 + $0x388] sm:$0xff] }
 0x1a9   : > { %4654 = vmatprep.subr.bf16.mxu0 %v11155_v27  ;;  %4695 = vmatprep.subr.bf16.mxu1 %v11157_v28  ;;  %v11091_v44 = vcombine.high %v1667_v38, %v1683_v39  ;;  %v11093_v45 = vcombine.high %v1668_v40, %v1684_v41  ;;  %v1635_v46 = vld [vmem:[#allocation9 + $0x200] sm:$0xff]  ;;  %v1636_v48 = vld [vmem:[#allocation9 + $0x208] sm:$0xff]  ;;  %v11090_v50 = vcombine.low %v1667_v38, %v1683_v39 }
 0x1aa   : > { %v1651_v47 = vld [vmem:[#allocation9 + $0x280] sm:$0xff]  ;;  %v1652_v49 = vld [vmem:[#allocation9 + $0x288] sm:$0xff]  ;;  %v11092_v51 = vcombine.low %v1668_v40, %v1684_v41 }
 0x1ab   : > { %v11059_v52 = vcombine.high %v1635_v46, %v1651_v47  ;;  %v11061_v53 = vcombine.high %v1636_v48, %v1652_v49  ;;  %v1603_v54 = vld [vmem:[#allocation9 + $0x100] sm:$0xff]  ;;  %v1604_v56 = vld [vmem:[#allocation9 + $0x108] sm:$0xff]  ;;  %v11058_v58 = vcombine.low %v1635_v46, %v1651_v47  ;;  %v11060_v59 = vcombine.low %v1636_v48, %v1652_v49 }
 0x1ac   : > { %4655 = vmatpush1.bf16.msra.mxu0 %v11154_v34  ;;  %4696 = vmatpush1.bf16.msra.mxu1 %v11156_v35  ;;  %v1619_v55 = vld [vmem:[#allocation9 + $0x180] sm:$0xff]  ;;  %v1620_v57 = vld [vmem:[#allocation9 + $0x188] sm:$0xff] }
 0x1ad   : > { %4656 = vmatprep.subr.bf16.mxu0 %v11123_v36  ;;  %4697 = vmatprep.subr.bf16.mxu1 %v11125_v37  ;;  %v11027_v60 = vcombine.high %v1603_v54, %v1619_v55  ;;  %v11029_v62 = vcombine.high %v1604_v56, %v1620_v57  ;;  %v1571_v63 = vld [vmem:[#allocation9] sm:$0xff]  ;;  %v1572_v2 = vld [vmem:[#allocation9 + $0x8] sm:$0xff]  ;;  %v11026_v4 = vcombine.low %v1603_v54, %v1619_v55 }
 0x1ae   : > { %v1587_v0 = vld [vmem:[#allocation9 + $0x80] sm:$0xff]  ;;  %v1588_v3 = vld [vmem:[#allocation9 + $0x88] sm:$0xff]  ;;  %v11028_v5 = vcombine.low %v1604_v56, %v1620_v57 }
 0x1af   : > { %v10995_v6 = vcombine.high %v1571_v63, %v1587_v0  ;;  %v10997_v7 = vcombine.high %v1572_v2, %v1588_v3  ;;  %v2051_v8 = vld [vmem:[#allocation9 + $0xf00] sm:$0xff]  ;;  %v2052_v10 = vld [vmem:[#allocation9 + $0xf08] sm:$0xff]  ;;  %v10994_v13 = vcombine.low %v1571_v63, %v1587_v0  ;;  %v10996_v14 = vcombine.low %v1572_v2, %v1588_v3 }
 0x1b0   : > { %4657 = vmatpush1.bf16.msra.mxu0 %v11122_v42  ;;  %4698 = vmatpush1.bf16.msra.mxu1 %v11124_v43  ;;  %v2067_v9 = vld [vmem:[#allocation9 + $0xf80] sm:$0xff]  ;;  %v2068_v11 = vld [vmem:[#allocation9 + $0xf88] sm:$0xff] }
 0x1b1   : > { %4658 = vmatprep.subr.bf16.mxu0 %v11091_v44  ;;  %4699 = vmatprep.subr.bf16.mxu1 %v11093_v45  ;;  %v11475_v15 = vcombine.high %v2051_v8, %v2067_v9  ;;  %v11477_v12 = vcombine.high %v2052_v10, %v2068_v11  ;;  %v2019_v16 = vld [vmem:[#allocation9 + $0xe00] sm:$0xff]  ;;  %v2020_v18 = vld [vmem:[#allocation9 + $0xe08] sm:$0xff]  ;;  %v11474_v31 = vcombine.low %v2051_v8, %v2067_v9 }
 0x1b2   : > { %v2035_v17 = vld [vmem:[#allocation9 + $0xe80] sm:$0xff]  ;;  %v2036_v19 = vld [vmem:[#allocation9 + $0xe88] sm:$0xff]  ;;  %v11476_v20 = vcombine.low %v2052_v10, %v2068_v11  ;;  %v1797_v10 = vld [vmem:[#allocation9 + $0x710] sm:$0xff] }
 0x1b3   : > { %v11443_v21 = vcombine.high %v2019_v16, %v2035_v17  ;;  %v11445_v22 = vcombine.high %v2020_v18, %v2036_v19  ;;  %v1987_v23 = vld [vmem:[#allocation9 + $0xd00] sm:$0xff]  ;;  %v1988_v25 = vld [vmem:[#allocation9 + $0xd08] sm:$0xff]  ;;  %v11442_v27 = vcombine.low %v2019_v16, %v2035_v17  ;;  %v11444_v28 = vcombine.low %v2020_v18, %v2036_v19  ;;  %v1813_v11 = vld [vmem:[#allocation9 + $0x790] sm:$0xff] }
 0x1b4   : > { %4659 = vmatpush1.bf16.msra.mxu0 %v11090_v50  ;;  %4700 = vmatpush1.bf16.msra.mxu1 %v11092_v51  ;;  %v2003_v24 = vld [vmem:[#allocation9 + $0xd80] sm:$0xff]  ;;  %v2004_v26 = vld [vmem:[#allocation9 + $0xd88] sm:$0xff]  ;;  %v11223_v16 = vcombine.high %v1797_v10, %v1813_v11  ;;  %v1765_v18 = vld [vmem:[#allocation9 + $0x610] sm:$0xff] }
 0x1b5   : > { %4660 = vmatprep.subr.bf16.mxu0 %v11059_v52  ;;  %4701 = vmatprep.subr.bf16.mxu1 %v11061_v53  ;;  %v11411_v29 = vcombine.high %v1987_v23, %v2003_v24  ;;  %v11413_v30 = vcombine.high %v1988_v25, %v2004_v26  ;;  %v1955_v32 = vld [vmem:[#allocation9 + $0xc00] sm:$0xff]  ;;  %v1956_v34 = vld [vmem:[#allocation9 + $0xc08] sm:$0xff]  ;;  %v11410_v36 = vcombine.low %v1987_v23, %v2003_v24  ;;  %v1781_v19 = vld [vmem:[#allocation9 + $0x690] sm:$0xff] }
 0x1b6   : > { %v1971_v33 = vld [vmem:[#allocation9 + $0xc80] sm:$0xff]  ;;  %v1972_v35 = vld [vmem:[#allocation9 + $0xc88] sm:$0xff]  ;;  %v11412_v37 = vcombine.low %v1988_v25, %v2004_v26  ;;  %v11191_v24 = vcombine.high %v1765_v18, %v1781_v19  ;;  %v1733_v26 = vld [vmem:[#allocation9 + $0x510] sm:$0xff] }
 0x1b7   : > { %v11379_v38 = vcombine.high %v1955_v32, %v1971_v33  ;;  %v11381_v39 = vcombine.high %v1956_v34, %v1972_v35  ;;  %v1923_v40 = vld [vmem:[#allocation9 + $0xb00] sm:$0xff]  ;;  %v1924_v42 = vld [vmem:[#allocation9 + $0xb08] sm:$0xff]  ;;  %v11378_v44 = vcombine.low %v1955_v32, %v1971_v33  ;;  %v11380_v45 = vcombine.low %v1956_v34, %v1972_v35  ;;  %v1701_v34 = vld [vmem:[#allocation9 + $0x410] sm:$0xff] }
 0x1b8   : > { %4661 = vmatpush1.bf16.msra.mxu0 %v11058_v58  ;;  %4702 = vmatpush1.bf16.msra.mxu1 %v11060_v59  ;;  %v1939_v41 = vld [vmem:[#allocation9 + $0xb80] sm:$0xff]  ;;  %v1940_v43 = vld [vmem:[#allocation9 + $0xb88] sm:$0xff]  ;;  %v1717_v35 = vld [vmem:[#allocation9 + $0x490] sm:$0xff] }
 0x1b9   : > { %4662 = vmatprep.subr.bf16.mxu0 %v11027_v60  ;;  %4703 = vmatprep.subr.bf16.mxu1 %v11029_v62  ;;  %v11347_v46 = vcombine.high %v1923_v40, %v1939_v41  ;;  %v11349_v47 = vcombine.high %v1924_v42, %v1940_v43  ;;  %v1891_v48 = vld [vmem:[#allocation9 + $0xa00] sm:$0xff]  ;;  %v1892_v50 = vld [vmem:[#allocation9 + $0xa08] sm:$0xff]  ;;  %v11346_v52 = vcombine.low %v1923_v40, %v1939_v41 }
 0x1ba   : > { %v1907_v49 = vld [vmem:[#allocation9 + $0xa80] sm:$0xff]  ;;  %v1908_v51 = vld [vmem:[#allocation9 + $0xa88] sm:$0xff]  ;;  %v11348_v53 = vcombine.low %v1924_v42, %v1940_v43  ;;  %v11127_v40 = vcombine.high %v1701_v34, %v1717_v35  ;;  %v1669_v42 = vld [vmem:[#allocation9 + $0x310] sm:$0xff] }
 0x1bb   : > { %v11315_v54 = vcombine.high %v1891_v48, %v1907_v49  ;;  %v11317_v55 = vcombine.high %v1892_v50, %v1908_v51  ;;  %v1859_v56 = vld [vmem:[#allocation9 + $0x900] sm:$0xff]  ;;  %v1860_v58 = vld [vmem:[#allocation9 + $0x908] sm:$0xff]  ;;  %v11314_v60 = vcombine.low %v1891_v48, %v1907_v49  ;;  %v11316_v62 = vcombine.low %v1892_v50, %v1908_v51  ;;  %v1685_v43 = vld [vmem:[#allocation9 + $0x390] sm:$0xff] }
 0x1bc   : > { %4663 = vmatpush1.bf16.msra.mxu0 %v11026_v4  ;;  %4704 = vmatpush1.bf16.msra.mxu1 %v11028_v5  ;;  %v1875_v57 = vld [vmem:[#allocation9 + $0x980] sm:$0xff]  ;;  %v1876_v59 = vld [vmem:[#allocation9 + $0x988] sm:$0xff]  ;;  %v11095_v48 = vcombine.high %v1669_v42, %v1685_v43  ;;  %v1637_v50 = vld [vmem:[#allocation9 + $0x210] sm:$0xff] }
 0x1bd   : > { %4664 = vmatprep.subr.bf16.mxu0 %v10995_v6  ;;  %4705 = vmatprep.subr.bf16.mxu1 %v10997_v7  ;;  %v11283_v63 = vcombine.high %v1859_v56, %v1875_v57  ;;  %v11285_v0 = vcombine.high %v1860_v58, %v1876_v59  ;;  %v1827_v2 = vld [vmem:[#allocation9 + $0x800] sm:$0xff]  ;;  %v1828_v4 = vld [vmem:[#allocation9 + $0x808] sm:$0xff]  ;;  %v11282_v6 = vcombine.low %v1859_v56, %v1875_v57  ;;  %v1653_v51 = vld [vmem:[#allocation9 + $0x290] sm:$0xff] }
 0x1be   : > { %v1843_v3 = vld [vmem:[#allocation9 + $0x880] sm:$0xff]  ;;  %v1844_v5 = vld [vmem:[#allocation9 + $0x888] sm:$0xff]  ;;  %v11284_v7 = vcombine.low %v1860_v58, %v1876_v59  ;;  %v11063_v56 = vcombine.high %v1637_v50, %v1653_v51  ;;  %v1605_v58 = vld [vmem:[#allocation9 + $0x110] sm:$0xff] }
 0x1bf   : > { %v11251_v8 = vcombine.high %v1827_v2, %v1843_v3  ;;  %v11253_v9 = vcombine.high %v1828_v4, %v1844_v5  ;;  %v1621_v59 = vld [vmem:[#allocation9 + $0x190] sm:$0xff] }
 0x1c0   : > { %4665 = vmatpush1.bf16.msra.mxu0 %v10994_v13  ;;  %4706 = vmatpush1.bf16.msra.mxu1 %v10996_v14  ;;  %v1798_v13 = vld [vmem:[#allocation9 + $0x718] sm:$0xff] }
 0x1c1   : > { %4666 = vmatprep.subr.bf16.mxu0 %v11475_v15  ;;  %4707 = vmatprep.subr.bf16.mxu1 %v11477_v12  ;;  %v1814_v14 = vld [vmem:[#allocation9 + $0x798] sm:$0xff]  ;;  %v11250_v15 = vcombine.low %v1827_v2, %v1843_v3  ;;  %v11252_v12 = vcombine.low %v1828_v4, %v1844_v5  ;;  %v11031_v2 = vcombine.high %v1605_v58, %v1621_v59  ;;  %v1573_v4 = vld [vmem:[#allocation9 + $0x10] sm:$0xff] }
 0x1c2   : > { %v11225_v17 = vcombine.high %v1798_v13, %v1814_v14  ;;  %v11224_v23 = vcombine.low %v1798_v13, %v1814_v14  ;;  %v1589_v5 = vld [vmem:[#allocation9 + $0x90] sm:$0xff] }
 0x1c3   : > { %v2053_v13 = vld [vmem:[#allocation9 + $0xf10] sm:$0xff] }
 0x1c4   : > { %4667 = vmatpush2.bf16.msra.mxu0 %v11474_v31  ;;  %4708 = vmatpush2.bf16.msra.mxu1 %v11476_v20  ;;  %v13551_v31 = vcombine.low %v13541_v61, %v13541_v61  ;;  %v1766_v20 = vld [vmem:[#allocation9 + $0x618] sm:$0xff]  ;;  %v11190_v61 = vcombine.low %v1765_v18, %v1781_v19  ;;  %v2069_v14 = vld [vmem:[#allocation9 + $0xf90] sm:$0xff] }
 0x1c5   : > { %4668 = vmatprep.subr.bf16.mxu0 %v11443_v21  ;;  %4709 = vmatprep.subr.bf16.mxu1 %v11445_v22  ;;  %v1782_v21 = vld [vmem:[#allocation9 + $0x698] sm:$0xff]  ;;  %v11222_v22 = vcombine.low %v1797_v10, %v1813_v11  ;;  %v10999_v10 = vcombine.high %v1573_v4, %v1589_v5  ;;  %v11479_v18 = vcombine.high %v2053_v13, %v2069_v14 }
 0x1c6   : > { %v11193_v25 = vcombine.high %v1766_v20, %v1782_v21 }
 0x1c8   : > { %4669 = vmatpush2.bf16.msra.mxu0 %v11442_v27  ;;  %4710 = vmatpush2.bf16.msra.mxu1 %v11444_v28  ;;  %v1749_v27 = vld [vmem:[#allocation9 + $0x590] sm:$0xff]  ;;  %v1734_v28 = vld [vmem:[#allocation9 + $0x518] sm:$0xff] }
 0x1c9   : > { %4670 = vmatprep.subr.bf16.mxu0 %v11411_v29  ;;  %4711 = vmatprep.subr.bf16.mxu1 %v11413_v30  ;;  %v1750_v29 = vld [vmem:[#allocation9 + $0x598] sm:$0xff]  ;;  %v11192_v30 = vcombine.low %v1766_v20, %v1782_v21  ;;  %v11159_v32 = vcombine.high %v1733_v26, %v1749_v27  ;;  %v2021_v20 = vld [vmem:[#allocation9 + $0xe10] sm:$0xff] }
 0x1ca   : > { %v11161_v33 = vcombine.high %v1734_v28, %v1750_v29  ;;  %v2037_v21 = vld [vmem:[#allocation9 + $0xe90] sm:$0xff] }
 0x1cc   : > { %4671 = vmatpush2.bf16.msra.mxu0 %v11410_v36  ;;  %4712 = vmatpush2.bf16.msra.mxu1 %v11412_v37  ;;  %v1702_v36 = vld [vmem:[#allocation9 + $0x418] sm:$0xff] }
 0x1cd   : > { %4672 = vmatprep.subr.bf16.mxu0 %v11379_v38  ;;  %4713 = vmatprep.subr.bf16.mxu1 %v11381_v39  ;;  %v1718_v37 = vld [vmem:[#allocation9 + $0x498] sm:$0xff]  ;;  %v11158_v38 = vcombine.low %v1733_v26, %v1749_v27  ;;  %v11160_v39 = vcombine.low %v1734_v28, %v1750_v29  ;;  %v11447_v26 = vcombine.high %v2021_v20, %v2037_v21  ;;  %v1989_v28 = vld [vmem:[#allocation9 + $0xd10] sm:$0xff] }
 0x1ce   : > { %v11129_v41 = vcombine.high %v1702_v36, %v1718_v37  ;;  %v2005_v29 = vld [vmem:[#allocation9 + $0xd90] sm:$0xff] }
 0x1d0   : > { %4673 = vmatpush2.bf16.msra.mxu0 %v11378_v44  ;;  %4714 = vmatpush2.bf16.msra.mxu1 %v11380_v45  ;;  %v1670_v44 = vld [vmem:[#allocation9 + $0x318] sm:$0xff] }
 0x1d1   : > { %4674 = vmatprep.subr.bf16.mxu0 %v11347_v46  ;;  %4715 = vmatprep.subr.bf16.mxu1 %v11349_v47  ;;  %v1686_v45 = vld [vmem:[#allocation9 + $0x398] sm:$0xff]  ;;  %v11126_v46 = vcombine.low %v1701_v34, %v1717_v35  ;;  %v11128_v47 = vcombine.low %v1702_v36, %v1718_v37  ;;  %v11415_v34 = vcombine.high %v1989_v28, %v2005_v29  ;;  %v1957_v36 = vld [vmem:[#allocation9 + $0xc10] sm:$0xff] }
 0x1d2   : > { %v11097_v49 = vcombine.high %v1670_v44, %v1686_v45  ;;  %v1973_v37 = vld [vmem:[#allocation9 + $0xc90] sm:$0xff] }
 0x1d4   : > { %4675 = vmatpush2.bf16.msra.mxu0 %v11346_v52  ;;  %4716 = vmatpush2.bf16.msra.mxu1 %v11348_v53  ;;  %v1638_v52 = vld [vmem:[#allocation9 + $0x218] sm:$0xff] }
 0x1d5   : > { %4676 = vmatprep.subr.bf16.mxu0 %v11315_v54  ;;  %4717 = vmatprep.subr.bf16.mxu1 %v11317_v55  ;;  %v1654_v53 = vld [vmem:[#allocation9 + $0x298] sm:$0xff]  ;;  %v11094_v54 = vcombine.low %v1669_v42, %v1685_v43  ;;  %v11096_v55 = vcombine.low %v1670_v44, %v1686_v45  ;;  %v11383_v42 = vcombine.high %v1957_v36, %v1973_v37  ;;  %v1925_v44 = vld [vmem:[#allocation9 + $0xb10] sm:$0xff] }
 0x1d6   : > { %v11065_v57 = vcombine.high %v1638_v52, %v1654_v53  ;;  %v1941_v45 = vld [vmem:[#allocation9 + $0xb90] sm:$0xff] }
 0x1d8   : > { %4677 = vmatpush2.bf16.msra.mxu0 %v11314_v60  ;;  %4718 = vmatpush2.bf16.msra.mxu1 %v11316_v62  ;;  %v1606_v60 = vld [vmem:[#allocation9 + $0x118] sm:$0xff] }
 0x1d9   : > { %4678 = vmatprep.subr.bf16.mxu0 %v11283_v63  ;;  %4719 = vmatprep.subr.bf16.mxu1 %v11285_v0  ;;  %v1622_v62 = vld [vmem:[#allocation9 + $0x198] sm:$0xff]  ;;  %v11062_v63 = vcombine.low %v1637_v50, %v1653_v51  ;;  %v11064_v0 = vcombine.low %v1638_v52, %v1654_v53  ;;  %v11351_v50 = vcombine.high %v1925_v44, %v1941_v45  ;;  %v1893_v52 = vld [vmem:[#allocation9 + $0xa10] sm:$0xff] }
 0x1da   : > { %v11033_v3 = vcombine.high %v1606_v60, %v1622_v62  ;;  %v1909_v53 = vld [vmem:[#allocation9 + $0xa90] sm:$0xff] }
 0x1dc   : > { %4679 = vmatpush2.bf16.msra.mxu0 %v11282_v6  ;;  %4720 = vmatpush2.bf16.msra.mxu1 %v11284_v7  ;;  %v1574_v6 = vld [vmem:[#allocation9 + $0x18] sm:$0xff] }
 0x1dd   : > { %4680 = vmatprep.subr.bf16.mxu0 %v11251_v8  ;;  %4721 = vmatprep.subr.bf16.mxu1 %v11253_v9  ;;  %v1590_v7 = vld [vmem:[#allocation9 + $0x98] sm:$0xff]  ;;  %v11030_v8 = vcombine.low %v1605_v58, %v1621_v59  ;;  %v11032_v9 = vcombine.low %v1606_v60, %v1622_v62  ;;  %v11319_v58 = vcombine.high %v1893_v52, %v1909_v53  ;;  %v1861_v60 = vld [vmem:[#allocation9 + $0x910] sm:$0xff] }
 0x1de   : > { %v11001_v11 = vcombine.high %v1574_v6, %v1590_v7  ;;  %v1877_v62 = vld [vmem:[#allocation9 + $0x990] sm:$0xff] }
 0x1e0   : > { %4681 = vmatpush2.bf16.msra.mxu0 %v11250_v15  ;;  %4722 = vmatpush2.bf16.msra.mxu1 %v11252_v12  ;;  %v2054_v15 = vld [vmem:[#allocation9 + $0xf18] sm:$0xff] }
 0x1e1   : > { %4732 = vmatprep.subr.bf16.mxu0 %v11223_v16  ;;  %4773 = vmatprep.subr.bf16.mxu1 %v11225_v17  ;;  %v2070_v12 = vld [vmem:[#allocation9 + $0xf98] sm:$0xff]  ;;  %v10998_v16 = vcombine.low %v1573_v4, %v1589_v5  ;;  %v11000_v17 = vcombine.low %v1574_v6, %v1590_v7  ;;  %v11287_v4 = vcombine.high %v1861_v60, %v1877_v62  ;;  %v1829_v6 = vld [vmem:[#allocation9 + $0x810] sm:$0xff] }
 0x1e2   : > { %v11481_v19 = vcombine.high %v2054_v15, %v2070_v12  ;;  %v1845_v7 = vld [vmem:[#allocation9 + $0x890] sm:$0xff] }
 0x1e3   : > { %4683 = vmatmul.mubr.bf16.vlgmr.msra.gmra.mxu0 %v13551_v31  ;;  %4724 = vmatmul.mubr.bf16.vlgmr.msra.gmra.mxu1 %v13551_v31 }
 0x1e4   : > { %4733 = vmatpush1.bf16.msra.mxu0 %v11222_v22  ;;  %4774 = vmatpush1.bf16.msra.mxu1 %v11224_v23  ;;  %v2022_v22 = vld [vmem:[#allocation9 + $0xe18] sm:$0xff] }
 0x1e5   : > { %4734 = vmatprep.subr.bf16.mxu0 %v11191_v24  ;;  %4775 = vmatprep.subr.bf16.mxu1 %v11193_v25  ;;  %v2038_v23 = vld [vmem:[#allocation9 + $0xe98] sm:$0xff]  ;;  %v11478_v24 = vcombine.low %v2053_v13, %v2069_v14  ;;  %v11480_v25 = vcombine.low %v2054_v15, %v2070_v12  ;;  %v11255_v13 = vcombine.high %v1829_v6, %v1845_v7  ;;  %v1799_v15 = vld [vmem:[#allocation9 + $0x720] sm:$0xff] }
 0x1e6   : > { %4764 = vmatprep.mubr.bf16.mxu0 %v13545_v1  ;;  %4805 = vmatprep.mubr.bf16.mxu1 %v13545_v1  ;;  %v11449_v27 = vcombine.high %v2022_v22, %v2038_v23  ;;  %v1815_v12 = vld [vmem:[#allocation9 + $0x7a0] sm:$0xff] }
 0x1e8   : > { %4735 = vmatpush1.bf16.msra.mxu0 %v11190_v61  ;;  %4776 = vmatpush1.bf16.msra.mxu1 %v11192_v30  ;;  %v1990_v61 = vld [vmem:[#allocation9 + $0xd18] sm:$0xff] }
 0x1e9   : > { %4736 = vmatprep.subr.bf16.mxu0 %v11159_v32  ;;  %4777 = vmatprep.subr.bf16.mxu1 %v11161_v33  ;;  %v2006_v30 = vld [vmem:[#allocation9 + $0xd98] sm:$0xff]  ;;  %v11446_v32 = vcombine.low %v2021_v20, %v2037_v21  ;;  %v11448_v33 = vcombine.low %v2022_v22, %v2038_v23  ;;  %v11227_v20 = vcombine.high %v1799_v15, %v1815_v12  ;;  %v1767_v22 = vld [vmem:[#allocation9 + $0x620] sm:$0xff] }
 0x1ea   : > { %v11417_v35 = vcombine.high %v1990_v61, %v2006_v30  ;;  %v1783_v23 = vld [vmem:[#allocation9 + $0x6a0] sm:$0xff] }
 0x1ec   : > { %4737 = vmatpush1.bf16.msra.mxu0 %v11158_v38  ;;  %4778 = vmatpush1.bf16.msra.mxu1 %v11160_v39  ;;  %v1958_v38 = vld [vmem:[#allocation9 + $0xc18] sm:$0xff] }
 0x1ed   : > { %4738 = vmatprep.subr.bf16.mxu0 %v11127_v40  ;;  %4779 = vmatprep.subr.bf16.mxu1 %v11129_v41  ;;  %v1974_v39 = vld [vmem:[#allocation9 + $0xc98] sm:$0xff]  ;;  %v11414_v40 = vcombine.low %v1989_v28, %v2005_v29  ;;  %v11416_v41 = vcombine.low %v1990_v61, %v2006_v30  ;;  %v11195_v28 = vcombine.high %v1767_v22, %v1783_v23  ;;  %v1735_v61 = vld [vmem:[#allocation9 + $0x520] sm:$0xff] }
 0x1ee   : > { %v11385_v43 = vcombine.high %v1958_v38, %v1974_v39  ;;  %v1751_v30 = vld [vmem:[#allocation9 + $0x5a0] sm:$0xff] }
 0x1f0   : > { %4739 = vmatpush1.bf16.msra.mxu0 %v11126_v46  ;;  %4780 = vmatpush1.bf16.msra.mxu1 %v11128_v47  ;;  %v1926_v46 = vld [vmem:[#allocation9 + $0xb18] sm:$0xff] }
 0x1f1   : > { %4740 = vmatprep.subr.bf16.mxu0 %v11095_v48  ;;  %4781 = vmatprep.subr.bf16.mxu1 %v11097_v49  ;;  %v1942_v47 = vld [vmem:[#allocation9 + $0xb98] sm:$0xff]  ;;  %v11382_v48 = vcombine.low %v1957_v36, %v1973_v37  ;;  %v11384_v49 = vcombine.low %v1958_v38, %v1974_v39  ;;  %v11163_v36 = vcombine.high %v1735_v61, %v1751_v30  ;;  %v1703_v38 = vld [vmem:[#allocation9 + $0x420] sm:$0xff] }
 0x1f2   : > { %v11353_v51 = vcombine.high %v1926_v46, %v1942_v47  ;;  %v1719_v39 = vld [vmem:[#allocation9 + $0x4a0] sm:$0xff] }
 0x1f4   : > { %4741 = vmatpush1.bf16.msra.mxu0 %v11094_v54  ;;  %4782 = vmatpush1.bf16.msra.mxu1 %v11096_v55  ;;  %v1894_v54 = vld [vmem:[#allocation9 + $0xa18] sm:$0xff] }
 0x1f5   : > { %4742 = vmatprep.subr.bf16.mxu0 %v11063_v56  ;;  %4783 = vmatprep.subr.bf16.mxu1 %v11065_v57  ;;  %v1910_v55 = vld [vmem:[#allocation9 + $0xa98] sm:$0xff]  ;;  %v11350_v56 = vcombine.low %v1925_v44, %v1941_v45  ;;  %v11352_v57 = vcombine.low %v1926_v46, %v1942_v47  ;;  %v11131_v44 = vcombine.high %v1703_v38, %v1719_v39  ;;  %v1671_v46 = vld [vmem:[#allocation9 + $0x320] sm:$0xff] }
 0x1f6   : > { %v11321_v59 = vcombine.high %v1894_v54, %v1910_v55  ;;  %v1687_v47 = vld [vmem:[#allocation9 + $0x3a0] sm:$0xff] }
 0x1f8   : > { %4743 = vmatpush1.bf16.msra.mxu0 %v11062_v63  ;;  %4784 = vmatpush1.bf16.msra.mxu1 %v11064_v0  ;;  %v1862_v63 = vld [vmem:[#allocation9 + $0x918] sm:$0xff] }
 0x1f9   : > { %4744 = vmatprep.subr.bf16.mxu0 %v11031_v2  ;;  %4785 = vmatprep.subr.bf16.mxu1 %v11033_v3  ;;  %v1878_v0 = vld [vmem:[#allocation9 + $0x998] sm:$0xff]  ;;  %v11318_v2 = vcombine.low %v1893_v52, %v1909_v53  ;;  %v11320_v3 = vcombine.low %v1894_v54, %v1910_v55  ;;  %v11099_v52 = vcombine.high %v1671_v46, %v1687_v47  ;;  %v1639_v54 = vld [vmem:[#allocation9 + $0x220] sm:$0xff] }
 0x1fa   : > { %v11289_v5 = vcombine.high %v1862_v63, %v1878_v0  ;;  %v1655_v55 = vld [vmem:[#allocation9 + $0x2a0] sm:$0xff] }
 0x1fc   : > { %4745 = vmatpush1.bf16.msra.mxu0 %v11030_v8  ;;  %4786 = vmatpush1.bf16.msra.mxu1 %v11032_v9  ;;  %v1830_v8 = vld [vmem:[#allocation9 + $0x818] sm:$0xff] }
 0x1fd   : > { %4746 = vmatprep.subr.bf16.mxu0 %v10999_v10  ;;  %4787 = vmatprep.subr.bf16.mxu1 %v11001_v11  ;;  %v1846_v9 = vld [vmem:[#allocation9 + $0x898] sm:$0xff]  ;;  %v11286_v10 = vcombine.low %v1861_v60, %v1877_v62  ;;  %v11288_v11 = vcombine.low %v1862_v63, %v1878_v0  ;;  %v11067_v60 = vcombine.high %v1639_v54, %v1655_v55  ;;  %v1607_v63 = vld [vmem:[#allocation9 + $0x120] sm:$0xff] }
 0x1fe   : > { %v11257_v14 = vcombine.high %v1830_v8, %v1846_v9  ;;  %v1623_v0 = vld [vmem:[#allocation9 + $0x1a0] sm:$0xff] }
 0x200   : > { %4747 = vmatpush1.bf16.msra.mxu0 %v10998_v16  ;;  %4788 = vmatpush1.bf16.msra.mxu1 %v11000_v17  ;;  %v1800_v16 = vld [vmem:[#allocation9 + $0x728] sm:$0xff] }
 0x201   : > { %4748 = vmatprep.subr.bf16.mxu0 %v11479_v18  ;;  %4789 = vmatprep.subr.bf16.mxu1 %v11481_v19  ;;  %v1816_v17 = vld [vmem:[#allocation9 + $0x7a8] sm:$0xff]  ;;  %v11254_v18 = vcombine.low %v1829_v6, %v1845_v7  ;;  %v11256_v19 = vcombine.low %v1830_v8, %v1846_v9  ;;  %v11035_v6 = vcombine.high %v1607_v63, %v1623_v0  ;;  %v1575_v8 = vld [vmem:[#allocation9 + $0x20] sm:$0xff] }
 0x202   : > { %v11229_v21 = vcombine.high %v1800_v16, %v1816_v17  ;;  %v1591_v9 = vld [vmem:[#allocation9 + $0xa0] sm:$0xff] }
 0x204   : > { %4749 = vmatpush2.bf16.msra.mxu0 %v11478_v24  ;;  %4790 = vmatpush2.bf16.msra.mxu1 %v11480_v25  ;;  %v1768_v24 = vld [vmem:[#allocation9 + $0x628] sm:$0xff] }
 0x205   : > { %4750 = vmatprep.subr.bf16.mxu0 %v11447_v26  ;;  %4791 = vmatprep.subr.bf16.mxu1 %v11449_v27  ;;  %v1784_v25 = vld [vmem:[#allocation9 + $0x6a8] sm:$0xff]  ;;  %v11226_v26 = vcombine.low %v1799_v15, %v1815_v12  ;;  %v11228_v27 = vcombine.low %v1800_v16, %v1816_v17  ;;  %v11003_v15 = vcombine.high %v1575_v8, %v1591_v9  ;;  %v2055_v16 = vld [vmem:[#allocation9 + $0xf20] sm:$0xff] }
 0x206   : > { %v11197_v29 = vcombine.high %v1768_v24, %v1784_v25  ;;  %v2071_v17 = vld [vmem:[#allocation9 + $0xfa0] sm:$0xff] }
 0x208   : > { %4751 = vmatpush2.bf16.msra.mxu0 %v11446_v32  ;;  %4792 = vmatpush2.bf16.msra.mxu1 %v11448_v33  ;;  %v1736_v32 = vld [vmem:[#allocation9 + $0x528] sm:$0xff] }
 0x209   : > { %4752 = vmatprep.subr.bf16.mxu0 %v11415_v34  ;;  %4793 = vmatprep.subr.bf16.mxu1 %v11417_v35  ;;  %v1752_v33 = vld [vmem:[#allocation9 + $0x5a8] sm:$0xff]  ;;  %v11194_v34 = vcombine.low %v1767_v22, %v1783_v23  ;;  %v11196_v35 = vcombine.low %v1768_v24, %v1784_v25  ;;  %v11483_v22 = vcombine.high %v2055_v16, %v2071_v17  ;;  %v2023_v24 = vld [vmem:[#allocation9 + $0xe20] sm:$0xff] }
 0x20a   : > { %v11165_v37 = vcombine.high %v1736_v32, %v1752_v33  ;;  %v2039_v25 = vld [vmem:[#allocation9 + $0xea0] sm:$0xff] }
 0x20c   : > { %4753 = vmatpush2.bf16.msra.mxu0 %v11414_v40  ;;  %4794 = vmatpush2.bf16.msra.mxu1 %v11416_v41  ;;  %v1704_v40 = vld [vmem:[#allocation9 + $0x428] sm:$0xff] }
 0x20d   : > { %4754 = vmatprep.subr.bf16.mxu0 %v11383_v42  ;;  %4795 = vmatprep.subr.bf16.mxu1 %v11385_v43  ;;  %v1720_v41 = vld [vmem:[#allocation9 + $0x4a8] sm:$0xff]  ;;  %v11162_v42 = vcombine.low %v1735_v61, %v1751_v30  ;;  %v11164_v43 = vcombine.low %v1736_v32, %v1752_v33  ;;  %v11451_v61 = vcombine.high %v2023_v24, %v2039_v25  ;;  %v1991_v32 = vld [vmem:[#allocation9 + $0xd20] sm:$0xff] }
 0x20e   : > { %v11133_v45 = vcombine.high %v1704_v40, %v1720_v41  ;;  %v2007_v33 = vld [vmem:[#allocation9 + $0xda0] sm:$0xff] }
 0x210   : > { %4755 = vmatpush2.bf16.msra.mxu0 %v11382_v48  ;;  %4796 = vmatpush2.bf16.msra.mxu1 %v11384_v49  ;;  %v1672_v48 = vld [vmem:[#allocation9 + $0x328] sm:$0xff] }
 0x211   : > { %4756 = vmatprep.subr.bf16.mxu0 %v11351_v50  ;;  %4797 = vmatprep.subr.bf16.mxu1 %v11353_v51  ;;  %v1688_v49 = vld [vmem:[#allocation9 + $0x3a8] sm:$0xff]  ;;  %v11130_v50 = vcombine.low %v1703_v38, %v1719_v39  ;;  %v11132_v51 = vcombine.low %v1704_v40, %v1720_v41  ;;  %v11419_v38 = vcombine.high %v1991_v32, %v2007_v33  ;;  %v1959_v40 = vld [vmem:[#allocation9 + $0xc20] sm:$0xff] }
 0x212   : > { %v11101_v53 = vcombine.high %v1672_v48, %v1688_v49  ;;  %v1975_v41 = vld [vmem:[#allocation9 + $0xca0] sm:$0xff] }
 0x214   : > { %4757 = vmatpush2.bf16.msra.mxu0 %v11350_v56  ;;  %4798 = vmatpush2.bf16.msra.mxu1 %v11352_v57  ;;  %v1640_v56 = vld [vmem:[#allocation9 + $0x228] sm:$0xff] }
 0x215   : > { %4758 = vmatprep.subr.bf16.mxu0 %v11319_v58  ;;  %4799 = vmatprep.subr.bf16.mxu1 %v11321_v59  ;;  %v1656_v57 = vld [vmem:[#allocation9 + $0x2a8] sm:$0xff]  ;;  %v11098_v58 = vcombine.low %v1671_v46, %v1687_v47  ;;  %v11100_v59 = vcombine.low %v1672_v48, %v1688_v49  ;;  %v11387_v46 = vcombine.high %v1959_v40, %v1975_v41  ;;  %v1927_v48 = vld [vmem:[#allocation9 + $0xb20] sm:$0xff] }
 0x216   : > { %v11069_v62 = vcombine.high %v1640_v56, %v1656_v57  ;;  %v1943_v49 = vld [vmem:[#allocation9 + $0xba0] sm:$0xff] }
 0x218   : > { %4759 = vmatpush2.bf16.msra.mxu0 %v11318_v2  ;;  %4800 = vmatpush2.bf16.msra.mxu1 %v11320_v3  ;;  %v1608_v2 = vld [vmem:[#allocation9 + $0x128] sm:$0xff] }
 0x219   : > { %4760 = vmatprep.subr.bf16.mxu0 %v11287_v4  ;;  %4801 = vmatprep.subr.bf16.mxu1 %v11289_v5  ;;  %v1624_v3 = vld [vmem:[#allocation9 + $0x1a8] sm:$0xff]  ;;  %v11066_v4 = vcombine.low %v1639_v54, %v1655_v55  ;;  %v11068_v5 = vcombine.low %v1640_v56, %v1656_v57  ;;  %v11355_v54 = vcombine.high %v1927_v48, %v1943_v49  ;;  %v1895_v56 = vld [vmem:[#allocation9 + $0xa20] sm:$0xff] }
 0x21a   : > { %v11037_v7 = vcombine.high %v1608_v2, %v1624_v3  ;;  %v1911_v57 = vld [vmem:[#allocation9 + $0xaa0] sm:$0xff] }
 0x21c   : > { %4761 = vmatpush2.bf16.msra.mxu0 %v11286_v10  ;;  %4802 = vmatpush2.bf16.msra.mxu1 %v11288_v11  ;;  %v1576_v10 = vld [vmem:[#allocation9 + $0x28] sm:$0xff] }
 0x21d   : > { %4762 = vmatprep.subr.bf16.mxu0 %v11255_v13  ;;  %4803 = vmatprep.subr.bf16.mxu1 %v11257_v14  ;;  %v1592_v11 = vld [vmem:[#allocation9 + $0xa8] sm:$0xff]  ;;  %v11034_v13 = vcombine.low %v1607_v63, %v1623_v0  ;;  %v11036_v14 = vcombine.low %v1608_v2, %v1624_v3  ;;  %v11323_v63 = vcombine.high %v1895_v56, %v1911_v57  ;;  %v1863_v2 = vld [vmem:[#allocation9 + $0x920] sm:$0xff] }
 0x21e   : > { %v11005_v12 = vcombine.high %v1576_v10, %v1592_v11  ;;  %v1879_v3 = vld [vmem:[#allocation9 + $0x9a0] sm:$0xff] }
 0x220   : > { %4763 = vmatpush2.bf16.msra.mxu0 %v11254_v18  ;;  %4804 = vmatpush2.bf16.msra.mxu1 %v11256_v19  ;;  %v2056_v18 = vld [vmem:[#allocation9 + $0xf28] sm:$0xff] }
 0x221   : > { %4814 = vmatprep.subr.bf16.mxu0 %v11227_v20  ;;  %4855 = vmatprep.subr.bf16.mxu1 %v11229_v21  ;;  %v2072_v19 = vld [vmem:[#allocation9 + $0xfa8] sm:$0xff]  ;;  %v11002_v20 = vcombine.low %v1575_v8, %v1591_v9  ;;  %v11004_v21 = vcombine.low %v1576_v10, %v1592_v11  ;;  %v11291_v8 = vcombine.high %v1863_v2, %v1879_v3  ;;  %v1831_v10 = vld [vmem:[#allocation9 + $0x820] sm:$0xff] }
 0x222   : > { %v11485_v23 = vcombine.high %v2056_v18, %v2072_v19  ;;  %v1847_v11 = vld [vmem:[#allocation9 + $0x8a0] sm:$0xff] }
 0x223   : > { %4765 = vmatmul.mubr.bf16.vlgmr.msra.gmra.mxu0 %v13551_v31  ;;  %4806 = vmatmul.mubr.bf16.vlgmr.msra.gmra.mxu1 %v13551_v31 }
 0x224   : > { %4815 = vmatpush1.bf16.msra.mxu0 %v11226_v26  ;;  %4856 = vmatpush1.bf16.msra.mxu1 %v11228_v27  ;;  %v2024_v26 = vld [vmem:[#allocation9 + $0xe28] sm:$0xff] }
 0x225   : > { %4816 = vmatprep.subr.bf16.mxu0 %v11195_v28  ;;  %4857 = vmatprep.subr.bf16.mxu1 %v11197_v29  ;;  %v2040_v27 = vld [vmem:[#allocation9 + $0xea8] sm:$0xff]  ;;  %v11482_v28 = vcombine.low %v2055_v16, %v2071_v17  ;;  %v11484_v29 = vcombine.low %v2056_v18, %v2072_v19  ;;  %v11259_v16 = vcombine.high %v1831_v10, %v1847_v11  ;;  %v1801_v18 = vld [vmem:[#allocation9 + $0x730] sm:$0xff] }
 0x226   : > { %4846 = vmatprep.mubr.bf16.mxu0 %v13545_v1  ;;  %4887 = vmatprep.mubr.bf16.mxu1 %v13545_v1  ;;  %v11453_v30 = vcombine.high %v2024_v26, %v2040_v27  ;;  %v1817_v19 = vld [vmem:[#allocation9 + $0x7b0] sm:$0xff] }
 0x228   : > { %4817 = vmatpush1.bf16.msra.mxu0 %v11194_v34  ;;  %4858 = vmatpush1.bf16.msra.mxu1 %v11196_v35  ;;  %v1992_v34 = vld [vmem:[#allocation9 + $0xd28] sm:$0xff] }
 0x229   : > { %4818 = vmatprep.subr.bf16.mxu0 %v11163_v36  ;;  %4859 = vmatprep.subr.bf16.mxu1 %v11165_v37  ;;  %v2008_v35 = vld [vmem:[#allocation9 + $0xda8] sm:$0xff]  ;;  %v11450_v36 = vcombine.low %v2023_v24, %v2039_v25  ;;  %v11452_v37 = vcombine.low %v2024_v26, %v2040_v27  ;;  %v11231_v24 = vcombine.high %v1801_v18, %v1817_v19  ;;  %v1769_v26 = vld [vmem:[#allocation9 + $0x630] sm:$0xff] }
 0x22a   : > { %v11421_v39 = vcombine.high %v1992_v34, %v2008_v35  ;;  %v1785_v27 = vld [vmem:[#allocation9 + $0x6b0] sm:$0xff] }
 0x22c   : > { %4819 = vmatpush1.bf16.msra.mxu0 %v11162_v42  ;;  %4860 = vmatpush1.bf16.msra.mxu1 %v11164_v43  ;;  %v1960_v42 = vld [vmem:[#allocation9 + $0xc28] sm:$0xff] }
 0x22d   : > { %4820 = vmatprep.subr.bf16.mxu0 %v11131_v44  ;;  %4861 = vmatprep.subr.bf16.mxu1 %v11133_v45  ;;  %v1976_v43 = vld [vmem:[#allocation9 + $0xca8] sm:$0xff]  ;;  %v11418_v44 = vcombine.low %v1991_v32, %v2007_v33  ;;  %v11420_v45 = vcombine.low %v1992_v34, %v2008_v35  ;;  %v11199_v32 = vcombine.high %v1769_v26, %v1785_v27  ;;  %v1737_v34 = vld [vmem:[#allocation9 + $0x530] sm:$0xff] }
 0x22e   : > { %v11389_v47 = vcombine.high %v1960_v42, %v1976_v43  ;;  %v1753_v35 = vld [vmem:[#allocation9 + $0x5b0] sm:$0xff] }
 0x230   : > { %4821 = vmatpush1.bf16.msra.mxu0 %v11130_v50  ;;  %4862 = vmatpush1.bf16.msra.mxu1 %v11132_v51  ;;  %v1928_v50 = vld [vmem:[#allocation9 + $0xb28] sm:$0xff] }
 0x231   : > { %4822 = vmatprep.subr.bf16.mxu0 %v11099_v52  ;;  %4863 = vmatprep.subr.bf16.mxu1 %v11101_v53  ;;  %v1944_v51 = vld [vmem:[#allocation9 + $0xba8] sm:$0xff]  ;;  %v11386_v52 = vcombine.low %v1959_v40, %v1975_v41  ;;  %v11388_v53 = vcombine.low %v1960_v42, %v1976_v43  ;;  %v11167_v40 = vcombine.high %v1737_v34, %v1753_v35  ;;  %v1705_v42 = vld [vmem:[#allocation9 + $0x430] sm:$0xff] }
 0x232   : > { %v11357_v55 = vcombine.high %v1928_v50, %v1944_v51  ;;  %v1721_v43 = vld [vmem:[#allocation9 + $0x4b0] sm:$0xff] }
 0x234   : > { %4823 = vmatpush1.bf16.msra.mxu0 %v11098_v58  ;;  %4864 = vmatpush1.bf16.msra.mxu1 %v11100_v59  ;;  %v1896_v58 = vld [vmem:[#allocation9 + $0xa28] sm:$0xff] }
 0x235   : > { %4824 = vmatprep.subr.bf16.mxu0 %v11067_v60  ;;  %4865 = vmatprep.subr.bf16.mxu1 %v11069_v62  ;;  %v1912_v59 = vld [vmem:[#allocation9 + $0xaa8] sm:$0xff]  ;;  %v11354_v60 = vcombine.low %v1927_v48, %v1943_v49  ;;  %v11356_v62 = vcombine.low %v1928_v50, %v1944_v51  ;;  %v11135_v48 = vcombine.high %v1705_v42, %v1721_v43  ;;  %v1673_v50 = vld [vmem:[#allocation9 + $0x330] sm:$0xff] }
 0x236   : > { %v11325_v0 = vcombine.high %v1896_v58, %v1912_v59  ;;  %v1689_v51 = vld [vmem:[#allocation9 + $0x3b0] sm:$0xff] }
 0x238   : > { %4825 = vmatpush1.bf16.msra.mxu0 %v11066_v4  ;;  %4866 = vmatpush1.bf16.msra.mxu1 %v11068_v5  ;;  %v1864_v4 = vld [vmem:[#allocation9 + $0x928] sm:$0xff] }
 0x239   : > { %4826 = vmatprep.subr.bf16.mxu0 %v11035_v6  ;;  %4867 = vmatprep.subr.bf16.mxu1 %v11037_v7  ;;  %v1880_v5 = vld [vmem:[#allocation9 + $0x9a8] sm:$0xff]  ;;  %v11322_v6 = vcombine.low %v1895_v56, %v1911_v57  ;;  %v11324_v7 = vcombine.low %v1896_v58, %v1912_v59  ;;  %v11103_v56 = vcombine.high %v1673_v50, %v1689_v51  ;;  %v1641_v58 = vld [vmem:[#allocation9 + $0x230] sm:$0xff] }
 0x23a   : > { %v11293_v9 = vcombine.high %v1864_v4, %v1880_v5  ;;  %v1657_v59 = vld [vmem:[#allocation9 + $0x2b0] sm:$0xff] }
 0x23c   : > { %4827 = vmatpush1.bf16.msra.mxu0 %v11034_v13  ;;  %4868 = vmatpush1.bf16.msra.mxu1 %v11036_v14  ;;  %v1832_v13 = vld [vmem:[#allocation9 + $0x828] sm:$0xff] }
 0x23d   : > { %4828 = vmatprep.subr.bf16.mxu0 %v11003_v15  ;;  %4869 = vmatprep.subr.bf16.mxu1 %v11005_v12  ;;  %v1848_v14 = vld [vmem:[#allocation9 + $0x8a8] sm:$0xff]  ;;  %v11290_v15 = vcombine.low %v1863_v2, %v1879_v3  ;;  %v11292_v12 = vcombine.low %v1864_v4, %v1880_v5  ;;  %v11071_v2 = vcombine.high %v1641_v58, %v1657_v59  ;;  %v1609_v4 = vld [vmem:[#allocation9 + $0x130] sm:$0xff] }
 0x23e   : > { %v11261_v17 = vcombine.high %v1832_v13, %v1848_v14  ;;  %v1625_v5 = vld [vmem:[#allocation9 + $0x1b0] sm:$0xff] }
 0x240   : > { %4829 = vmatpush1.bf16.msra.mxu0 %v11002_v20  ;;  %4870 = vmatpush1.bf16.msra.mxu1 %v11004_v21  ;;  %v1802_v20 = vld [vmem:[#allocation9 + $0x738] sm:$0xff] }
 0x241   : > { %4830 = vmatprep.subr.bf16.mxu0 %v11483_v22  ;;  %4871 = vmatprep.subr.bf16.mxu1 %v11485_v23  ;;  %v1818_v21 = vld [vmem:[#allocation9 + $0x7b8] sm:$0xff]  ;;  %v11258_v22 = vcombine.low %v1831_v10, %v1847_v11  ;;  %v11260_v23 = vcombine.low %v1832_v13, %v1848_v14  ;;  %v11039_v10 = vcombine.high %v1609_v4, %v1625_v5  ;;  %v1577_v13 = vld [vmem:[#allocation9 + $0x30] sm:$0xff] }
 0x242   : > { %v11233_v25 = vcombine.high %v1802_v20, %v1818_v21  ;;  %v1593_v14 = vld [vmem:[#allocation9 + $0xb0] sm:$0xff] }
 0x244   : > { %4831 = vmatpush2.bf16.msra.mxu0 %v11482_v28  ;;  %4872 = vmatpush2.bf16.msra.mxu1 %v11484_v29  ;;  %v1770_v28 = vld [vmem:[#allocation9 + $0x638] sm:$0xff] }
 0x245   : > { %4832 = vmatprep.subr.bf16.mxu0 %v11451_v61  ;;  %4873 = vmatprep.subr.bf16.mxu1 %v11453_v30  ;;  %v1786_v29 = vld [vmem:[#allocation9 + $0x6b8] sm:$0xff]  ;;  %v11230_v61 = vcombine.low %v1801_v18, %v1817_v19  ;;  %v11232_v30 = vcombine.low %v1802_v20, %v1818_v21  ;;  %v11007_v18 = vcombine.high %v1577_v13, %v1593_v14  ;;  %v2057_v20 = vld [vmem:[#allocation9 + $0xf30] sm:$0xff] }
 0x246   : > { %v11201_v33 = vcombine.high %v1770_v28, %v1786_v29  ;;  %v2073_v21 = vld [vmem:[#allocation9 + $0xfb0] sm:$0xff] }
 0x248   : > { %4833 = vmatpush2.bf16.msra.mxu0 %v11450_v36  ;;  %4874 = vmatpush2.bf16.msra.mxu1 %v11452_v37  ;;  %v1738_v36 = vld [vmem:[#allocation9 + $0x538] sm:$0xff] }
 0x249   : > { %4834 = vmatprep.subr.bf16.mxu0 %v11419_v38  ;;  %4875 = vmatprep.subr.bf16.mxu1 %v11421_v39  ;;  %v1754_v37 = vld [vmem:[#allocation9 + $0x5b8] sm:$0xff]  ;;  %v11198_v38 = vcombine.low %v1769_v26, %v1785_v27  ;;  %v11200_v39 = vcombine.low %v1770_v28, %v1786_v29  ;;  %v11487_v26 = vcombine.high %v2057_v20, %v2073_v21  ;;  %v2025_v28 = vld [vmem:[#allocation9 + $0xe30] sm:$0xff] }
 0x24a   : > { %v11169_v41 = vcombine.high %v1738_v36, %v1754_v37  ;;  %v2041_v29 = vld [vmem:[#allocation9 + $0xeb0] sm:$0xff] }
 0x24c   : > { %4835 = vmatpush2.bf16.msra.mxu0 %v11418_v44  ;;  %4876 = vmatpush2.bf16.msra.mxu1 %v11420_v45  ;;  %v1706_v44 = vld [vmem:[#allocation9 + $0x438] sm:$0xff] }
 0x24d   : > { %4836 = vmatprep.subr.bf16.mxu0 %v11387_v46  ;;  %4877 = vmatprep.subr.bf16.mxu1 %v11389_v47  ;;  %v1722_v45 = vld [vmem:[#allocation9 + $0x4b8] sm:$0xff]  ;;  %v11166_v46 = vcombine.low %v1737_v34, %v1753_v35  ;;  %v11168_v47 = vcombine.low %v1738_v36, %v1754_v37  ;;  %v11455_v34 = vcombine.high %v2025_v28, %v2041_v29  ;;  %v1993_v36 = vld [vmem:[#allocation9 + $0xd30] sm:$0xff] }
 0x24e   : > { %v11137_v49 = vcombine.high %v1706_v44, %v1722_v45  ;;  %v2009_v37 = vld [vmem:[#allocation9 + $0xdb0] sm:$0xff] }
 0x250   : > { %4837 = vmatpush2.bf16.msra.mxu0 %v11386_v52  ;;  %4878 = vmatpush2.bf16.msra.mxu1 %v11388_v53  ;;  %v1674_v52 = vld [vmem:[#allocation9 + $0x338] sm:$0xff] }
 0x251   : > { %4838 = vmatprep.subr.bf16.mxu0 %v11355_v54  ;;  %4879 = vmatprep.subr.bf16.mxu1 %v11357_v55  ;;  %v1690_v53 = vld [vmem:[#allocation9 + $0x3b8] sm:$0xff]  ;;  %v11134_v54 = vcombine.low %v1705_v42, %v1721_v43  ;;  %v11136_v55 = vcombine.low %v1706_v44, %v1722_v45  ;;  %v11423_v42 = vcombine.high %v1993_v36, %v2009_v37  ;;  %v1961_v44 = vld [vmem:[#allocation9 + $0xc30] sm:$0xff] }
 0x252   : > { %v11105_v57 = vcombine.high %v1674_v52, %v1690_v53  ;;  %v1977_v45 = vld [vmem:[#allocation9 + $0xcb0] sm:$0xff] }
 0x254   : > { %4839 = vmatpush2.bf16.msra.mxu0 %v11354_v60  ;;  %4880 = vmatpush2.bf16.msra.mxu1 %v11356_v62  ;;  %v1642_v60 = vld [vmem:[#allocation9 + $0x238] sm:$0xff] }
 0x255   : > { %4840 = vmatprep.subr.bf16.mxu0 %v11323_v63  ;;  %4881 = vmatprep.subr.bf16.mxu1 %v11325_v0  ;;  %v1658_v62 = vld [vmem:[#allocation9 + $0x2b8] sm:$0xff]  ;;  %v11102_v63 = vcombine.low %v1673_v50, %v1689_v51  ;;  %v11104_v0 = vcombine.low %v1674_v52, %v1690_v53  ;;  %v11391_v50 = vcombine.high %v1961_v44, %v1977_v45  ;;  %v1929_v52 = vld [vmem:[#allocation9 + $0xb30] sm:$0xff] }
 0x256   : > { %v11073_v3 = vcombine.high %v1642_v60, %v1658_v62  ;;  %v1945_v53 = vld [vmem:[#allocation9 + $0xbb0] sm:$0xff] }
 0x258   : > { %4841 = vmatpush2.bf16.msra.mxu0 %v11322_v6  ;;  %4882 = vmatpush2.bf16.msra.mxu1 %v11324_v7  ;;  %v1610_v6 = vld [vmem:[#allocation9 + $0x138] sm:$0xff] }
 0x259   : > { %4842 = vmatprep.subr.bf16.mxu0 %v11291_v8  ;;  %4883 = vmatprep.subr.bf16.mxu1 %v11293_v9  ;;  %v1626_v7 = vld [vmem:[#allocation9 + $0x1b8] sm:$0xff]  ;;  %v11070_v8 = vcombine.low %v1641_v58, %v1657_v59  ;;  %v11072_v9 = vcombine.low %v1642_v60, %v1658_v62  ;;  %v11359_v58 = vcombine.high %v1929_v52, %v1945_v53  ;;  %v1897_v60 = vld [vmem:[#allocation9 + $0xa30] sm:$0xff] }
 0x25a   : > { %v11041_v11 = vcombine.high %v1610_v6, %v1626_v7  ;;  %v1913_v62 = vld [vmem:[#allocation9 + $0xab0] sm:$0xff] }
 0x25c   : > { %4843 = vmatpush2.bf16.msra.mxu0 %v11290_v15  ;;  %4884 = vmatpush2.bf16.msra.mxu1 %v11292_v12  ;;  %v1578_v15 = vld [vmem:[#allocation9 + $0x38] sm:$0xff] }
 0x25d   : > { %4844 = vmatprep.subr.bf16.mxu0 %v11259_v16  ;;  %4885 = vmatprep.subr.bf16.mxu1 %v11261_v17  ;;  %v1594_v12 = vld [vmem:[#allocation9 + $0xb8] sm:$0xff]  ;;  %v11038_v16 = vcombine.low %v1609_v4, %v1625_v5  ;;  %v11040_v17 = vcombine.low %v1610_v6, %v1626_v7  ;;  %v11327_v4 = vcombine.high %v1897_v60, %v1913_v62  ;;  %v1865_v6 = vld [vmem:[#allocation9 + $0x930] sm:$0xff] }
 0x25e   : > { %v11009_v19 = vcombine.high %v1578_v15, %v1594_v12  ;;  %v1881_v7 = vld [vmem:[#allocation9 + $0x9b0] sm:$0xff] }
 0x260   : > { %4845 = vmatpush2.bf16.msra.mxu0 %v11258_v22  ;;  %4886 = vmatpush2.bf16.msra.mxu1 %v11260_v23  ;;  %v2058_v22 = vld [vmem:[#allocation9 + $0xf38] sm:$0xff] }
 0x261   : > { %4896 = vmatprep.subr.bf16.mxu0 %v11231_v24  ;;  %4937 = vmatprep.subr.bf16.mxu1 %v11233_v25  ;;  %v2074_v23 = vld [vmem:[#allocation9 + $0xfb8] sm:$0xff]  ;;  %v11006_v24 = vcombine.low %v1577_v13, %v1593_v14  ;;  %v11008_v25 = vcombine.low %v1578_v15, %v1594_v12  ;;  %v11295_v13 = vcombine.high %v1865_v6, %v1881_v7  ;;  %v1833_v15 = vld [vmem:[#allocation9 + $0x830] sm:$0xff] }
 0x262   : > { %v11489_v27 = vcombine.high %v2058_v22, %v2074_v23  ;;  %v1849_v12 = vld [vmem:[#allocation9 + $0x8b0] sm:$0xff] }
 0x263   : > { %4847 = vmatmul.mubr.bf16.vlgmr.msra.gmra.mxu0 %v13551_v31  ;;  %4888 = vmatmul.mubr.bf16.vlgmr.msra.gmra.mxu1 %v13551_v31 }
 0x264   : > { %4897 = vmatpush1.bf16.msra.mxu0 %v11230_v61  ;;  %4938 = vmatpush1.bf16.msra.mxu1 %v11232_v30  ;;  %v2026_v61 = vld [vmem:[#allocation9 + $0xe38] sm:$0xff] }
 0x265   : > { %4898 = vmatprep.subr.bf16.mxu0 %v11199_v32  ;;  %4939 = vmatprep.subr.bf16.mxu1 %v11201_v33  ;;  %v2042_v30 = vld [vmem:[#allocation9 + $0xeb8] sm:$0xff]  ;;  %v11486_v32 = vcombine.low %v2057_v20, %v2073_v21  ;;  %v11488_v33 = vcombine.low %v2058_v22, %v2074_v23  ;;  %v11263_v20 = vcombine.high %v1833_v15, %v1849_v12  ;;  %v1803_v22 = vld [vmem:[#allocation9 + $0x740] sm:$0xff] }
 0x266   : > { %4928 = vmatprep.mubr.bf16.mxu0 %v13545_v1  ;;  %4969 = vmatprep.mubr.bf16.mxu1 %v13545_v1  ;;  %v11457_v35 = vcombine.high %v2026_v61, %v2042_v30  ;;  %v1819_v23 = vld [vmem:[#allocation9 + $0x7c0] sm:$0xff] }
 0x268   : > { %4899 = vmatpush1.bf16.msra.mxu0 %v11198_v38  ;;  %4940 = vmatpush1.bf16.msra.mxu1 %v11200_v39  ;;  %v1994_v38 = vld [vmem:[#allocation9 + $0xd38] sm:$0xff] }
 0x269   : > { %4900 = vmatprep.subr.bf16.mxu0 %v11167_v40  ;;  %4941 = vmatprep.subr.bf16.mxu1 %v11169_v41  ;;  %v2010_v39 = vld [vmem:[#allocation9 + $0xdb8] sm:$0xff]  ;;  %v11454_v40 = vcombine.low %v2025_v28, %v2041_v29  ;;  %v11456_v41 = vcombine.low %v2026_v61, %v2042_v30  ;;  %v11235_v28 = vcombine.high %v1803_v22, %v1819_v23  ;;  %v1771_v61 = vld [vmem:[#allocation9 + $0x640] sm:$0xff] }
 0x26a   : > { %v11425_v43 = vcombine.high %v1994_v38, %v2010_v39  ;;  %v1787_v30 = vld [vmem:[#allocation9 + $0x6c0] sm:$0xff] }
 0x26c   : > { %4901 = vmatpush1.bf16.msra.mxu0 %v11166_v46  ;;  %4942 = vmatpush1.bf16.msra.mxu1 %v11168_v47  ;;  %v1962_v46 = vld [vmem:[#allocation9 + $0xc38] sm:$0xff] }
 0x26d   : > { %4902 = vmatprep.subr.bf16.mxu0 %v11135_v48  ;;  %4943 = vmatprep.subr.bf16.mxu1 %v11137_v49  ;;  %v1978_v47 = vld [vmem:[#allocation9 + $0xcb8] sm:$0xff]  ;;  %v11422_v48 = vcombine.low %v1993_v36, %v2009_v37  ;;  %v11424_v49 = vcombine.low %v1994_v38, %v2010_v39  ;;  %v11203_v36 = vcombine.high %v1771_v61, %v1787_v30  ;;  %v1739_v38 = vld [vmem:[#allocation9 + $0x540] sm:$0xff] }
 0x26e   : > { %v11393_v51 = vcombine.high %v1962_v46, %v1978_v47  ;;  %v1755_v39 = vld [vmem:[#allocation9 + $0x5c0] sm:$0xff] }
 0x270   : > { %4903 = vmatpush1.bf16.msra.mxu0 %v11134_v54  ;;  %4944 = vmatpush1.bf16.msra.mxu1 %v11136_v55  ;;  %v1930_v54 = vld [vmem:[#allocation9 + $0xb38] sm:$0xff] }
 0x271   : > { %4904 = vmatprep.subr.bf16.mxu0 %v11103_v56  ;;  %4945 = vmatprep.subr.bf16.mxu1 %v11105_v57  ;;  %v1946_v55 = vld [vmem:[#allocation9 + $0xbb8] sm:$0xff]  ;;  %v11390_v56 = vcombine.low %v1961_v44, %v1977_v45  ;;  %v11392_v57 = vcombine.low %v1962_v46, %v1978_v47  ;;  %v11202_v44 = vcombine.low %v1771_v61, %v1787_v30 }
 0x272   : > { %v11361_v59 = vcombine.high %v1930_v54, %v1946_v55  ;;  %v11171_v47 = vcombine.high %v1739_v38, %v1755_v39 }
 0x274   : > { %4905 = vmatpush1.bf16.msra.mxu0 %v11102_v63  ;;  %4946 = vmatpush1.bf16.msra.mxu1 %v11104_v0  ;;  %v1898_v63 = vld [vmem:[#allocation9 + $0xa38] sm:$0xff] }
 0x275   : > { %4906 = vmatprep.subr.bf16.mxu0 %v11071_v2  ;;  %4947 = vmatprep.subr.bf16.mxu1 %v11073_v3  ;;  %v1914_v0 = vld [vmem:[#allocation9 + $0xab8] sm:$0xff]  ;;  %v11358_v2 = vcombine.low %v1929_v52, %v1945_v53  ;;  %v11360_v3 = vcombine.low %v1930_v54, %v1946_v55  ;;  %v1708_v53 = vld [vmem:[#allocation9 + $0x448] sm:$0xff] }
 0x276   : > { %v11329_v5 = vcombine.high %v1898_v63, %v1914_v0  ;;  %v1724_v54 = vld [vmem:[#allocation9 + $0x4c8] sm:$0xff] }
 0x278   : > { %4907 = vmatpush1.bf16.msra.mxu0 %v11070_v8  ;;  %4948 = vmatpush1.bf16.msra.mxu1 %v11072_v9  ;;  %v1866_v8 = vld [vmem:[#allocation9 + $0x938] sm:$0xff] }
 0x279   : > { %4908 = vmatprep.subr.bf16.mxu0 %v11039_v10  ;;  %4949 = vmatprep.subr.bf16.mxu1 %v11041_v11  ;;  %v1882_v9 = vld [vmem:[#allocation9 + $0x9b8] sm:$0xff]  ;;  %v11326_v10 = vcombine.low %v1897_v60, %v1913_v62  ;;  %v11328_v11 = vcombine.low %v1898_v63, %v1914_v0  ;;  %v11141_v62 = vcombine.high %v1708_v53, %v1724_v54  ;;  %v1675_v63 = vld [vmem:[#allocation9 + $0x340] sm:$0xff] }
 0x27a   : > { %v11297_v14 = vcombine.high %v1866_v8, %v1882_v9  ;;  %v1691_v0 = vld [vmem:[#allocation9 + $0x3c0] sm:$0xff] }
 0x27c   : > { %4909 = vmatpush1.bf16.msra.mxu0 %v11038_v16  ;;  %4950 = vmatpush1.bf16.msra.mxu1 %v11040_v17  ;;  %v1834_v16 = vld [vmem:[#allocation9 + $0x838] sm:$0xff] }
 0x27d   : > { %4910 = vmatprep.subr.bf16.mxu0 %v11007_v18  ;;  %4951 = vmatprep.subr.bf16.mxu1 %v11009_v19  ;;  %v1850_v17 = vld [vmem:[#allocation9 + $0x8b8] sm:$0xff]  ;;  %v11294_v18 = vcombine.low %v1865_v6, %v1881_v7  ;;  %v11296_v19 = vcombine.low %v1866_v8, %v1882_v9  ;;  %v11107_v6 = vcombine.high %v1675_v63, %v1691_v0  ;;  %v1643_v8 = vld [vmem:[#allocation9 + $0x240] sm:$0xff] }
 0x27e   : > { %v11265_v21 = vcombine.high %v1834_v16, %v1850_v17  ;;  %v1659_v9 = vld [vmem:[#allocation9 + $0x2c0] sm:$0xff] }
 0x280   : > { %4911 = vmatpush1.bf16.msra.mxu0 %v11006_v24  ;;  %4952 = vmatpush1.bf16.msra.mxu1 %v11008_v25  ;;  %v1804_v24 = vld [vmem:[#allocation9 + $0x748] sm:$0xff] }
 0x281   : > { %4912 = vmatprep.subr.bf16.mxu0 %v11487_v26  ;;  %4953 = vmatprep.subr.bf16.mxu1 %v11489_v27  ;;  %v1820_v25 = vld [vmem:[#allocation9 + $0x7c8] sm:$0xff]  ;;  %v11262_v26 = vcombine.low %v1833_v15, %v1849_v12  ;;  %v11264_v27 = vcombine.low %v1834_v16, %v1850_v17  ;;  %v11075_v15 = vcombine.high %v1643_v8, %v1659_v9  ;;  %v1611_v16 = vld [vmem:[#allocation9 + $0x140] sm:$0xff] }
 0x282   : > { %v11237_v29 = vcombine.high %v1804_v24, %v1820_v25  ;;  %v1627_v17 = vld [vmem:[#allocation9 + $0x1c0] sm:$0xff] }
 0x284   : > { %4913 = vmatpush2.bf16.msra.mxu0 %v11486_v32  ;;  %4954 = vmatpush2.bf16.msra.mxu1 %v11488_v33  ;;  %v1772_v32 = vld [vmem:[#allocation9 + $0x648] sm:$0xff] }
 0x285   : > { %4914 = vmatprep.subr.bf16.mxu0 %v11455_v34  ;;  %4955 = vmatprep.subr.bf16.mxu1 %v11457_v35  ;;  %v1788_v33 = vld [vmem:[#allocation9 + $0x6c8] sm:$0xff]  ;;  %v11234_v34 = vcombine.low %v1803_v22, %v1819_v23  ;;  %v11236_v35 = vcombine.low %v1804_v24, %v1820_v25  ;;  %v11043_v22 = vcombine.high %v1611_v16, %v1627_v17  ;;  %v1579_v24 = vld [vmem:[#allocation9 + $0x40] sm:$0xff] }
 0x286   : > { %v11205_v37 = vcombine.high %v1772_v32, %v1788_v33  ;;  %v11204_v46 = vcombine.low %v1772_v32, %v1788_v33  ;;  %v1595_v25 = vld [vmem:[#allocation9 + $0xc0] sm:$0xff] }
 0x287   : > { %v11011_v61 = vcombine.high %v1579_v24, %v1595_v25  ;;  %v2059_v32 = vld [vmem:[#allocation9 + $0xf40] sm:$0xff] }
 0x288   : > { %4915 = vmatpush2.bf16.msra.mxu0 %v11454_v40  ;;  %4956 = vmatpush2.bf16.msra.mxu1 %v11456_v41  ;;  %v1740_v41 = vld [vmem:[#allocation9 + $0x548] sm:$0xff]  ;;  %v2075_v33 = vld [vmem:[#allocation9 + $0xfc0] sm:$0xff] }
 0x289   : > { %4916 = vmatprep.subr.bf16.mxu0 %v11423_v42  ;;  %4957 = vmatprep.subr.bf16.mxu1 %v11425_v43  ;;  %v1756_v42 = vld [vmem:[#allocation9 + $0x5c8] sm:$0xff] }
 0x28c   : > { %4917 = vmatpush2.bf16.msra.mxu0 %v11422_v48  ;;  %4958 = vmatpush2.bf16.msra.mxu1 %v11424_v49  ;;  %v11173_v49 = vcombine.high %v1740_v41, %v1756_v42 }
 0x28d   : > { %4918 = vmatprep.subr.bf16.mxu0 %v11391_v50  ;;  %4959 = vmatprep.subr.bf16.mxu1 %v11393_v51  ;;  %v1707_v50 = vld [vmem:[#allocation9 + $0x440] sm:$0xff] }
 0x28e   : > { %v1723_v51 = vld [vmem:[#allocation9 + $0x4c0] sm:$0xff] }
 0x290   : > { %4919 = vmatpush2.bf16.msra.mxu0 %v11390_v56  ;;  %4960 = vmatpush2.bf16.msra.mxu1 %v11392_v57  ;;  %v11170_v56 = vcombine.low %v1739_v38, %v1755_v39  ;;  %v11491_v38 = vcombine.high %v2059_v32, %v2075_v33 }
 0x291   : > { %4920 = vmatprep.subr.bf16.mxu0 %v11359_v58  ;;  %4961 = vmatprep.subr.bf16.mxu1 %v11361_v59  ;;  %v11172_v58 = vcombine.low %v1740_v41, %v1756_v42  ;;  %v11139_v59 = vcombine.high %v1707_v50, %v1723_v51  ;;  %v2043_v41 = vld [vmem:[#allocation9 + $0xec0] sm:$0xff]  ;;  %v2028_v42 = vld [vmem:[#allocation9 + $0xe48] sm:$0xff] }
 0x294   : > { %4921 = vmatpush2.bf16.msra.mxu0 %v11358_v2  ;;  %4962 = vmatpush2.bf16.msra.mxu1 %v11360_v3  ;;  %v1676_v2 = vld [vmem:[#allocation9 + $0x348] sm:$0xff] }
 0x295   : > { %4922 = vmatprep.subr.bf16.mxu0 %v11327_v4  ;;  %4963 = vmatprep.subr.bf16.mxu1 %v11329_v5  ;;  %v1692_v3 = vld [vmem:[#allocation9 + $0x3c8] sm:$0xff]  ;;  %v11138_v4 = vcombine.low %v1707_v50, %v1723_v51  ;;  %v11140_v5 = vcombine.low %v1708_v53, %v1724_v54 }
 0x296   : > { %v11109_v7 = vcombine.high %v1676_v2, %v1692_v3  ;;  %v1996_v50 = vld [vmem:[#allocation9 + $0xd48] sm:$0xff] }
 0x297   : > { %v2012_v51 = vld [vmem:[#allocation9 + $0xdc8] sm:$0xff] }
 0x298   : > { %4923 = vmatpush2.bf16.msra.mxu0 %v11326_v10  ;;  %4964 = vmatpush2.bf16.msra.mxu1 %v11328_v11  ;;  %v1644_v10 = vld [vmem:[#allocation9 + $0x248] sm:$0xff] }
 0x299   : > { %4924 = vmatprep.subr.bf16.mxu0 %v11295_v13  ;;  %4965 = vmatprep.subr.bf16.mxu1 %v11297_v14  ;;  %v1660_v11 = vld [vmem:[#allocation9 + $0x2c8] sm:$0xff]  ;;  %v11106_v13 = vcombine.low %v1675_v63, %v1691_v0  ;;  %v11108_v14 = vcombine.low %v1676_v2, %v1692_v3  ;;  %v1931_v2 = vld [vmem:[#allocation9 + $0xb40] sm:$0xff] }
 0x29a   : > { %v11077_v12 = vcombine.high %v1644_v10, %v1660_v11  ;;  %v1947_v3 = vld [vmem:[#allocation9 + $0xbc0] sm:$0xff] }
 0x29c   : > { %4925 = vmatpush2.bf16.msra.mxu0 %v11294_v18  ;;  %4966 = vmatpush2.bf16.msra.mxu1 %v11296_v19  ;;  %v1612_v18 = vld [vmem:[#allocation9 + $0x148] sm:$0xff] }
 0x29d   : > { %4926 = vmatprep.subr.bf16.mxu0 %v11263_v20  ;;  %4967 = vmatprep.subr.bf16.mxu1 %v11265_v21  ;;  %v1628_v19 = vld [vmem:[#allocation9 + $0x1c8] sm:$0xff]  ;;  %v11074_v20 = vcombine.low %v1643_v8, %v1659_v9  ;;  %v11076_v21 = vcombine.low %v1644_v10, %v1660_v11  ;;  %v11363_v8 = vcombine.high %v1931_v2, %v1947_v3  ;;  %v1899_v10 = vld [vmem:[#allocation9 + $0xa40] sm:$0xff] }
 0x29e   : > { %v11045_v23 = vcombine.high %v1612_v18, %v1628_v19  ;;  %v1915_v11 = vld [vmem:[#allocation9 + $0xac0] sm:$0xff] }
 0x2a0   : > { %4927 = vmatpush2.bf16.msra.mxu0 %v11262_v26  ;;  %4968 = vmatpush2.bf16.msra.mxu1 %v11264_v27  ;;  %v1580_v26 = vld [vmem:[#allocation9 + $0x48] sm:$0xff] }
 0x2a1   : > { %4978 = vmatprep.subr.bf16.mxu0 %v11235_v28  ;;  %5019 = vmatprep.subr.bf16.mxu1 %v11237_v29  ;;  %v1596_v27 = vld [vmem:[#allocation9 + $0xc8] sm:$0xff]  ;;  %v11042_v28 = vcombine.low %v1611_v16, %v1627_v17  ;;  %v11044_v29 = vcombine.low %v1612_v18, %v1628_v19  ;;  %v11331_v16 = vcombine.high %v1899_v10, %v1915_v11  ;;  %v1867_v18 = vld [vmem:[#allocation9 + $0x940] sm:$0xff] }
 0x2a2   : > { %v11013_v30 = vcombine.high %v1580_v26, %v1596_v27  ;;  %v1883_v19 = vld [vmem:[#allocation9 + $0x9c0] sm:$0xff] }
 0x2a3   : > { %v4684_v40 = vpop.f32.mrf.mxu0  ;;  %4929 = vmatmul.mubr.bf16.vlgmr.msra.gmra.mxu0 %v13551_v31  ;;  %v4725_v43 = vpop.f32.mrf.mxu1  ;;  %4970 = vmatmul.mubr.bf16.vlgmr.msra.gmra.mxu1 %v13551_v31 }
 0x2a4   : > { %5306 = vst [vmem:[#allocation3 + $0xb0] sm:$0xff] %v4684_v40  ;;  %4979 = vmatpush1.bf16.msra.mxu0 %v11234_v34  ;;  %5308 = vst [vmem:[#allocation3 + $0xd8] sm:$0xff] %v4725_v43  ;;  %5020 = vmatpush1.bf16.msra.mxu1 %v11236_v35  ;;  %v2060_v34 = vld [vmem:[#allocation9 + $0xf48] sm:$0xff]  ;;  %v2027_v40 = vld [vmem:[#allocation9 + $0xe40] sm:$0xff] }
 0x2a5   : > { %v4686_v45 = vpop.f32.mrf.mxu0  ;;  %4980 = vmatprep.subr.bf16.mxu0 %v11203_v36  ;;  %v4727_v48 = vpop.f32.mrf.mxu1  ;;  %5021 = vmatprep.subr.bf16.mxu1 %v11205_v37  ;;  %v2076_v35 = vld [vmem:[#allocation9 + $0xfc8] sm:$0xff]  ;;  %v11010_v36 = vcombine.low %v1579_v24, %v1595_v25  ;;  %v11012_v37 = vcombine.low %v1580_v26, %v1596_v27  ;;  %v11299_v24 = vcombine.high %v1867_v18, %v1883_v19  ;;  %v1835_v26 = vld [vmem:[#allocation9 + $0x840] sm:$0xff] }
 0x2a6   : > { %5307 = vst [vmem:[#allocation3] sm:$0xff] %v4686_v45  ;;  %5010 = vmatprep.mubr.bf16.mxu0 %v13545_v1  ;;  %5309 = vst [vmem:[#allocation3 + $0x18] sm:$0xff] %v4727_v48  ;;  %5051 = vmatprep.mubr.bf16.mxu1 %v13545_v1  ;;  %v11493_v39 = vcombine.high %v2060_v34, %v2076_v35  ;;  %v2044_v43 = vld [vmem:[#allocation9 + $0xec8] sm:$0xff]  ;;  %v11492_v45 = vcombine.low %v2060_v34, %v2076_v35  ;;  %v1995_v48 = vld [vmem:[#allocation9 + $0xd40] sm:$0xff] }
 0x2a7   : > { %v4688_v52 = vpop.f32.mrf.mxu0  ;;  %v4729_v55 = vpop.f32.mrf.mxu1  ;;  %v11460_v53 = vcombine.low %v2028_v42, %v2044_v43  ;;  %v1851_v27 = vld [vmem:[#allocation9 + $0x8c0] sm:$0xff]  ;;  %v1805_v34 = vld [vmem:[#allocation9 + $0x750] sm:$0xff] }
 0x2a8   : > { %4981 = vmatpush1.bf16.msra.mxu0 %v11202_v44  ;;  %5022 = vmatpush1.bf16.msra.mxu1 %v11204_v46  ;;  %v11490_v44 = vcombine.low %v2059_v32, %v2075_v33  ;;  %v11459_v46 = vcombine.high %v2027_v40, %v2043_v41  ;;  %v11458_v52 = vcombine.low %v2027_v40, %v2043_v41  ;;  %v1821_v35 = vld [vmem:[#allocation9 + $0x7d0] sm:$0xff] }
 0x2a9   : > { %v4689_v57 = vpop.f32.mrf.mxu0  ;;  %4982 = vmatprep.subr.bf16.mxu0 %v11171_v47  ;;  %v4730_v60 = vpop.f32.mrf.mxu1  ;;  %5023 = vmatprep.subr.bf16.mxu1 %v11173_v49  ;;  %v11461_v47 = vcombine.high %v2028_v42, %v2044_v43  ;;  %v2011_v49 = vld [vmem:[#allocation9 + $0xdc0] sm:$0xff]  ;;  %v11429_v55 = vcombine.high %v1996_v50, %v2012_v51  ;;  %v11267_v32 = vcombine.high %v1835_v26, %v1851_v27  ;;  %v1773_v42 = vld [vmem:[#allocation9 + $0x650] sm:$0xff] }
 0x2aa   : > { %v11427_v54 = vcombine.high %v1995_v48, %v2011_v49  ;;  %v1979_v57 = vld [vmem:[#allocation9 + $0xcc0] sm:$0xff]  ;;  %v11426_v60 = vcombine.low %v1995_v48, %v2011_v49  ;;  %v11239_v40 = vcombine.high %v1805_v34, %v1821_v35  ;;  %v1789_v43 = vld [vmem:[#allocation9 + $0x6d0] sm:$0xff] }
 0x2ab   : > { %v11207_v48 = vcombine.high %v1773_v42, %v1789_v43 }
 0x2ac   : > { %4983 = vmatpush1.bf16.msra.mxu0 %v11170_v56  ;;  %5024 = vmatpush1.bf16.msra.mxu1 %v11172_v58  ;;  %v1963_v56 = vld [vmem:[#allocation9 + $0xc40] sm:$0xff]  ;;  %v1964_v58 = vld [vmem:[#allocation9 + $0xc48] sm:$0xff] }
 0x2ad   : > { %4984 = vmatprep.subr.bf16.mxu0 %v11139_v59  ;;  %5025 = vmatprep.subr.bf16.mxu1 %v11141_v62  ;;  %v1980_v59 = vld [vmem:[#allocation9 + $0xcc8] sm:$0xff]  ;;  %v11428_v62 = vcombine.low %v1996_v50, %v2012_v51  ;;  %v11395_v63 = vcombine.high %v1963_v56, %v1979_v57  ;;  %v1741_v50 = vld [vmem:[#allocation9 + $0x550] sm:$0xff] }
 0x2ae   : > { %v11397_v0 = vcombine.high %v1964_v58, %v1980_v59  ;;  %v1757_v51 = vld [vmem:[#allocation9 + $0x5d0] sm:$0xff] }
 0x2b0   : > { %4985 = vmatpush1.bf16.msra.mxu0 %v11138_v4  ;;  %5026 = vmatpush1.bf16.msra.mxu1 %v11140_v5  ;;  %v1932_v4 = vld [vmem:[#allocation9 + $0xb48] sm:$0xff] }
 0x2b1   : > { %4986 = vmatprep.subr.bf16.mxu0 %v11107_v6  ;;  %5027 = vmatprep.subr.bf16.mxu1 %v11109_v7  ;;  %v1948_v5 = vld [vmem:[#allocation9 + $0xbc8] sm:$0xff]  ;;  %v11394_v6 = vcombine.low %v1963_v56, %v1979_v57  ;;  %v11396_v7 = vcombine.low %v1964_v58, %v1980_v59  ;;  %v11206_v56 = vcombine.low %v1773_v42, %v1789_v43 }
 0x2b2   : > { %v11365_v9 = vcombine.high %v1932_v4, %v1948_v5  ;;  %v11175_v59 = vcombine.high %v1741_v50, %v1757_v51 }
 0x2b4   : > { %4987 = vmatpush1.bf16.msra.mxu0 %v11106_v13  ;;  %5028 = vmatpush1.bf16.msra.mxu1 %v11108_v14  ;;  %v1900_v13 = vld [vmem:[#allocation9 + $0xa48] sm:$0xff] }
 0x2b5   : > { %4988 = vmatprep.subr.bf16.mxu0 %v11075_v15  ;;  %5029 = vmatprep.subr.bf16.mxu1 %v11077_v12  ;;  %v1916_v14 = vld [vmem:[#allocation9 + $0xac8] sm:$0xff]  ;;  %v11362_v15 = vcombine.low %v1931_v2, %v1947_v3  ;;  %v11364_v12 = vcombine.low %v1932_v4, %v1948_v5  ;;  %v1710_v3 = vld [vmem:[#allocation9 + $0x458] sm:$0xff] }
 0x2b6   : > { %v11333_v17 = vcombine.high %v1900_v13, %v1916_v14  ;;  %v1726_v4 = vld [vmem:[#allocation9 + $0x4d8] sm:$0xff] }
 0x2b8   : > { %4989 = vmatpush1.bf16.msra.mxu0 %v11074_v20  ;;  %5030 = vmatpush1.bf16.msra.mxu1 %v11076_v21  ;;  %v1868_v20 = vld [vmem:[#allocation9 + $0x948] sm:$0xff] }
 0x2b9   : > { %4990 = vmatprep.subr.bf16.mxu0 %v11043_v22  ;;  %5031 = vmatprep.subr.bf16.mxu1 %v11045_v23  ;;  %v1884_v21 = vld [vmem:[#allocation9 + $0x9c8] sm:$0xff]  ;;  %v11330_v22 = vcombine.low %v1899_v10, %v1915_v11  ;;  %v11332_v23 = vcombine.low %v1900_v13, %v1916_v14  ;;  %v11145_v11 = vcombine.high %v1710_v3, %v1726_v4  ;;  %v1677_v13 = vld [vmem:[#allocation9 + $0x350] sm:$0xff] }
 0x2ba   : > { %v11301_v25 = vcombine.high %v1868_v20, %v1884_v21  ;;  %v1693_v14 = vld [vmem:[#allocation9 + $0x3d0] sm:$0xff] }
 0x2bc   : > { %4991 = vmatpush1.bf16.msra.mxu0 %v11042_v28  ;;  %5032 = vmatpush1.bf16.msra.mxu1 %v11044_v29  ;;  %v1836_v28 = vld [vmem:[#allocation9 + $0x848] sm:$0xff] }
 0x2bd   : > { %4992 = vmatprep.subr.bf16.mxu0 %v11011_v61  ;;  %5033 = vmatprep.subr.bf16.mxu1 %v11013_v30  ;;  %v1852_v29 = vld [vmem:[#allocation9 + $0x8c8] sm:$0xff]  ;;  %v11298_v61 = vcombine.low %v1867_v18, %v1883_v19  ;;  %v11300_v30 = vcombine.low %v1868_v20, %v1884_v21  ;;  %v11111_v18 = vcombine.high %v1677_v13, %v1693_v14  ;;  %v1645_v20 = vld [vmem:[#allocation9 + $0x250] sm:$0xff] }
 0x2be   : > { %v11269_v33 = vcombine.high %v1836_v28, %v1852_v29  ;;  %v1661_v21 = vld [vmem:[#allocation9 + $0x2d0] sm:$0xff] }
 0x2c0   : > { %4993 = vmatpush1.bf16.msra.mxu0 %v11010_v36  ;;  %5034 = vmatpush1.bf16.msra.mxu1 %v11012_v37  ;;  %v1806_v36 = vld [vmem:[#allocation9 + $0x758] sm:$0xff] }
 0x2c1   : > { %4994 = vmatprep.subr.bf16.mxu0 %v11491_v38  ;;  %5035 = vmatprep.subr.bf16.mxu1 %v11493_v39  ;;  %v1822_v37 = vld [vmem:[#allocation9 + $0x7d8] sm:$0xff]  ;;  %v11266_v38 = vcombine.low %v1835_v26, %v1851_v27  ;;  %v11268_v39 = vcombine.low %v1836_v28, %v1852_v29  ;;  %v11079_v26 = vcombine.high %v1645_v20, %v1661_v21  ;;  %v1613_v28 = vld [vmem:[#allocation9 + $0x150] sm:$0xff] }
 0x2c2   : > { %v11241_v41 = vcombine.high %v1806_v36, %v1822_v37  ;;  %v1629_v29 = vld [vmem:[#allocation9 + $0x1d0] sm:$0xff] }
 0x2c4   : > { %4995 = vmatpush2.bf16.msra.mxu0 %v11490_v44  ;;  %5036 = vmatpush2.bf16.msra.mxu1 %v11492_v45  ;;  %v1774_v44 = vld [vmem:[#allocation9 + $0x658] sm:$0xff] }
 0x2c5   : > { %4996 = vmatprep.subr.bf16.mxu0 %v11459_v46  ;;  %5037 = vmatprep.subr.bf16.mxu1 %v11461_v47  ;;  %v1790_v45 = vld [vmem:[#allocation9 + $0x6d8] sm:$0xff]  ;;  %v11238_v46 = vcombine.low %v1805_v34, %v1821_v35  ;;  %v11240_v47 = vcombine.low %v1806_v36, %v1822_v37  ;;  %v11047_v34 = vcombine.high %v1613_v28, %v1629_v29  ;;  %v1581_v36 = vld [vmem:[#allocation9 + $0x50] sm:$0xff] }
 0x2c6   : > { %v11209_v49 = vcombine.high %v1774_v44, %v1790_v45  ;;  %v11208_v58 = vcombine.low %v1774_v44, %v1790_v45  ;;  %v1597_v37 = vld [vmem:[#allocation9 + $0xd0] sm:$0xff] }
 0x2c7   : > { %v11015_v42 = vcombine.high %v1581_v36, %v1597_v37  ;;  %v2061_v44 = vld [vmem:[#allocation9 + $0xf50] sm:$0xff] }
 0x2c8   : > { %4997 = vmatpush2.bf16.msra.mxu0 %v11458_v52  ;;  %5038 = vmatpush2.bf16.msra.mxu1 %v11460_v53  ;;  %v1742_v53 = vld [vmem:[#allocation9 + $0x558] sm:$0xff]  ;;  %v2077_v45 = vld [vmem:[#allocation9 + $0xfd0] sm:$0xff] }
 0x2c9   : > { %4998 = vmatprep.subr.bf16.mxu0 %v11427_v54  ;;  %5039 = vmatprep.subr.bf16.mxu1 %v11429_v55  ;;  %v1758_v54 = vld [vmem:[#allocation9 + $0x5d8] sm:$0xff] }
 0x2cc   : > { %4999 = vmatpush2.bf16.msra.mxu0 %v11426_v60  ;;  %5040 = vmatpush2.bf16.msra.mxu1 %v11428_v62  ;;  %v11177_v62 = vcombine.high %v1742_v53, %v1758_v54 }
 0x2cd   : > { %5000 = vmatprep.subr.bf16.mxu0 %v11395_v63  ;;  %5041 = vmatprep.subr.bf16.mxu1 %v11397_v0  ;;  %v1709_v63 = vld [vmem:[#allocation9 + $0x450] sm:$0xff] }
 0x2ce   : > { %v1725_v0 = vld [vmem:[#allocation9 + $0x4d0] sm:$0xff] }
 0x2d0   : > { %5001 = vmatpush2.bf16.msra.mxu0 %v11394_v6  ;;  %5042 = vmatpush2.bf16.msra.mxu1 %v11396_v7  ;;  %v11174_v6 = vcombine.low %v1741_v50, %v1757_v51  ;;  %v11495_v50 = vcombine.high %v2061_v44, %v2077_v45 }
 0x2d1   : > { %5002 = vmatprep.subr.bf16.mxu0 %v11363_v8  ;;  %5043 = vmatprep.subr.bf16.mxu1 %v11365_v9  ;;  %v11176_v8 = vcombine.low %v1742_v53, %v1758_v54  ;;  %v11143_v9 = vcombine.high %v1709_v63, %v1725_v0  ;;  %v2045_v53 = vld [vmem:[#allocation9 + $0xed0] sm:$0xff]  ;;  %v2030_v54 = vld [vmem:[#allocation9 + $0xe58] sm:$0xff] }
 0x2d4   : > { %5003 = vmatpush2.bf16.msra.mxu0 %v11362_v15  ;;  %5044 = vmatpush2.bf16.msra.mxu1 %v11364_v12  ;;  %v1678_v15 = vld [vmem:[#allocation9 + $0x358] sm:$0xff] }
 0x2d5   : > { %5004 = vmatprep.subr.bf16.mxu0 %v11331_v16  ;;  %5045 = vmatprep.subr.bf16.mxu1 %v11333_v17  ;;  %v1694_v12 = vld [vmem:[#allocation9 + $0x3d8] sm:$0xff]  ;;  %v11142_v16 = vcombine.low %v1709_v63, %v1725_v0  ;;  %v11144_v17 = vcombine.low %v1710_v3, %v1726_v4 }
 0x2d6   : > { %v11113_v19 = vcombine.high %v1678_v15, %v1694_v12  ;;  %v1998_v63 = vld [vmem:[#allocation9 + $0xd58] sm:$0xff] }
 0x2d7   : > { %v2014_v0 = vld [vmem:[#allocation9 + $0xdd8] sm:$0xff] }
 0x2d8   : > { %5005 = vmatpush2.bf16.msra.mxu0 %v11330_v22  ;;  %5046 = vmatpush2.bf16.msra.mxu1 %v11332_v23  ;;  %v1646_v22 = vld [vmem:[#allocation9 + $0x258] sm:$0xff] }
 0x2d9   : > { %5006 = vmatprep.subr.bf16.mxu0 %v11299_v24  ;;  %5047 = vmatprep.subr.bf16.mxu1 %v11301_v25  ;;  %v1662_v23 = vld [vmem:[#allocation9 + $0x2d8] sm:$0xff]  ;;  %v11110_v24 = vcombine.low %v1677_v13, %v1693_v14  ;;  %v11112_v25 = vcombine.low %v1678_v15, %v1694_v12  ;;  %v1933_v15 = vld [vmem:[#allocation9 + $0xb50] sm:$0xff] }
 0x2da   : > { %v11081_v27 = vcombine.high %v1646_v22, %v1662_v23  ;;  %v1949_v12 = vld [vmem:[#allocation9 + $0xbd0] sm:$0xff] }
 0x2dc   : > { %5007 = vmatpush2.bf16.msra.mxu0 %v11298_v61  ;;  %5048 = vmatpush2.bf16.msra.mxu1 %v11300_v30  ;;  %v1614_v61 = vld [vmem:[#allocation9 + $0x158] sm:$0xff] }
 0x2dd   : > { %5008 = vmatprep.subr.bf16.mxu0 %v11267_v32  ;;  %5049 = vmatprep.subr.bf16.mxu1 %v11269_v33  ;;  %v1630_v30 = vld [vmem:[#allocation9 + $0x1d8] sm:$0xff]  ;;  %v11078_v32 = vcombine.low %v1645_v20, %v1661_v21  ;;  %v11080_v33 = vcombine.low %v1646_v22, %v1662_v23  ;;  %v11367_v20 = vcombine.high %v1933_v15, %v1949_v12  ;;  %v1901_v22 = vld [vmem:[#allocation9 + $0xa50] sm:$0xff] }
 0x2de   : > { %v11049_v35 = vcombine.high %v1614_v61, %v1630_v30  ;;  %v1917_v23 = vld [vmem:[#allocation9 + $0xad0] sm:$0xff] }
 0x2e0   : > { %5009 = vmatpush2.bf16.msra.mxu0 %v11266_v38  ;;  %5050 = vmatpush2.bf16.msra.mxu1 %v11268_v39  ;;  %v1582_v38 = vld [vmem:[#allocation9 + $0x58] sm:$0xff] }
 0x2e1   : > { %5060 = vmatprep.subr.bf16.mxu0 %v11239_v40  ;;  %5101 = vmatprep.subr.bf16.mxu1 %v11241_v41  ;;  %v1598_v39 = vld [vmem:[#allocation9 + $0xd8] sm:$0xff]  ;;  %v11046_v40 = vcombine.low %v1613_v28, %v1629_v29  ;;  %v11048_v41 = vcombine.low %v1614_v61, %v1630_v30  ;;  %v11335_v28 = vcombine.high %v1901_v22, %v1917_v23  ;;  %v1869_v61 = vld [vmem:[#allocation9 + $0x950] sm:$0xff] }
 0x2e2   : > { %v11017_v43 = vcombine.high %v1582_v38, %v1598_v39  ;;  %v1885_v30 = vld [vmem:[#allocation9 + $0x9d0] sm:$0xff] }
 0x2e3   : > { %v4766_v52 = vpop.f32.mrf.mxu0  ;;  %5011 = vmatmul.mubr.bf16.vlgmr.msra.gmra.mxu0 %v13551_v31  ;;  %v4807_v55 = vpop.f32.mrf.mxu1  ;;  %5052 = vmatmul.mubr.bf16.vlgmr.msra.gmra.mxu1 %v13551_v31 }
 0x2e4   : > { %5310 = vst [vmem:[#allocation3 + $0x50] sm:$0xff] %v4766_v52  ;;  %5061 = vmatpush1.bf16.msra.mxu0 %v11238_v46  ;;  %5312 = vst [vmem:[#allocation3 + $0x30] sm:$0xff] %v4807_v55  ;;  %5102 = vmatpush1.bf16.msra.mxu1 %v11240_v47  ;;  %v2062_v46 = vld [vmem:[#allocation9 + $0xf58] sm:$0xff]  ;;  %v2029_v52 = vld [vmem:[#allocation9 + $0xe50] sm:$0xff] }
 0x2e5   : > { %v4768_v57 = vpop.f32.mrf.mxu0  ;;  %5062 = vmatprep.subr.bf16.mxu0 %v11207_v48  ;;  %v4809_v60 = vpop.f32.mrf.mxu1  ;;  %5103 = vmatprep.subr.bf16.mxu1 %v11209_v49  ;;  %v2078_v47 = vld [vmem:[#allocation9 + $0xfd8] sm:$0xff]  ;;  %v11014_v48 = vcombine.low %v1581_v36, %v1597_v37  ;;  %v11016_v49 = vcombine.low %v1582_v38, %v1598_v39  ;;  %v11303_v36 = vcombine.high %v1869_v61, %v1885_v30  ;;  %v1837_v38 = vld [vmem:[#allocation9 + $0x850] sm:$0xff] }
 0x2e6   : > { %5311 = vst [vmem:[#allocation3 + $0x68] sm:$0xff] %v4768_v57  ;;  %5092 = vmatprep.mubr.bf16.mxu0 %v13545_v1  ;;  %5313 = vst [vmem:[#allocation3 + $0x48] sm:$0xff] %v4809_v60  ;;  %5133 = vmatprep.mubr.bf16.mxu1 %v13545_v1  ;;  %v11497_v51 = vcombine.high %v2062_v46, %v2078_v47  ;;  %v2046_v55 = vld [vmem:[#allocation9 + $0xed8] sm:$0xff]  ;;  %v11496_v57 = vcombine.low %v2062_v46, %v2078_v47  ;;  %v1997_v60 = vld [vmem:[#allocation9 + $0xd50] sm:$0xff] }
 0x2e7   : > { %v4770_v2 = vpop.f32.mrf.mxu0  ;;  %v4811_v5 = vpop.f32.mrf.mxu1  ;;  %v11464_v3 = vcombine.low %v2030_v54, %v2046_v55  ;;  %v1853_v39 = vld [vmem:[#allocation9 + $0x8d0] sm:$0xff]  ;;  %v1807_v46 = vld [vmem:[#allocation9 + $0x760] sm:$0xff] }
 0x2e8   : > { %5063 = vmatpush1.bf16.msra.mxu0 %v11206_v56  ;;  %5104 = vmatpush1.bf16.msra.mxu1 %v11208_v58  ;;  %v11494_v56 = vcombine.low %v2061_v44, %v2077_v45  ;;  %v11463_v58 = vcombine.high %v2029_v52, %v2045_v53  ;;  %v11462_v2 = vcombine.low %v2029_v52, %v2045_v53  ;;  %v1823_v47 = vld [vmem:[#allocation9 + $0x7e0] sm:$0xff] }
 0x2e9   : > { %v4771_v7 = vpop.f32.mrf.mxu0  ;;  %5064 = vmatprep.subr.bf16.mxu0 %v11175_v59  ;;  %v4812_v10 = vpop.f32.mrf.mxu1  ;;  %5105 = vmatprep.subr.bf16.mxu1 %v11177_v62  ;;  %v11465_v59 = vcombine.high %v2030_v54, %v2046_v55  ;;  %v2013_v62 = vld [vmem:[#allocation9 + $0xdd0] sm:$0xff]  ;;  %v11433_v5 = vcombine.high %v1998_v63, %v2014_v0  ;;  %v11271_v44 = vcombine.high %v1837_v38, %v1853_v39  ;;  %v1775_v54 = vld [vmem:[#allocation9 + $0x660] sm:$0xff] }
 0x2ea   : > { %v11431_v4 = vcombine.high %v1997_v60, %v2013_v62  ;;  %v1981_v7 = vld [vmem:[#allocation9 + $0xcd0] sm:$0xff]  ;;  %v11430_v10 = vcombine.low %v1997_v60, %v2013_v62  ;;  %v11243_v52 = vcombine.high %v1807_v46, %v1823_v47  ;;  %v1791_v55 = vld [vmem:[#allocation9 + $0x6e0] sm:$0xff] }
 0x2eb   : > { %v11211_v60 = vcombine.high %v1775_v54, %v1791_v55 }
 0x2ec   : > { %5065 = vmatpush1.bf16.msra.mxu0 %v11174_v6  ;;  %5106 = vmatpush1.bf16.msra.mxu1 %v11176_v8  ;;  %v1965_v6 = vld [vmem:[#allocation9 + $0xc50] sm:$0xff]  ;;  %v1966_v8 = vld [vmem:[#allocation9 + $0xc58] sm:$0xff] }
 0x2ed   : > { %5066 = vmatprep.subr.bf16.mxu0 %v11143_v9  ;;  %5107 = vmatprep.subr.bf16.mxu1 %v11145_v11  ;;  %v1982_v9 = vld [vmem:[#allocation9 + $0xcd8] sm:$0xff]  ;;  %v11432_v11 = vcombine.low %v1998_v63, %v2014_v0  ;;  %v11399_v13 = vcombine.high %v1965_v6, %v1981_v7  ;;  %v1743_v63 = vld [vmem:[#allocation9 + $0x560] sm:$0xff] }
 0x2ee   : > { %v11401_v14 = vcombine.high %v1966_v8, %v1982_v9  ;;  %v1759_v0 = vld [vmem:[#allocation9 + $0x5e0] sm:$0xff] }
 0x2f0   : > { %5067 = vmatpush1.bf16.msra.mxu0 %v11142_v16  ;;  %5108 = vmatpush1.bf16.msra.mxu1 %v11144_v17  ;;  %v1934_v16 = vld [vmem:[#allocation9 + $0xb58] sm:$0xff] }
 0x2f1   : > { %5068 = vmatprep.subr.bf16.mxu0 %v11111_v18  ;;  %5109 = vmatprep.subr.bf16.mxu1 %v11113_v19  ;;  %v1950_v17 = vld [vmem:[#allocation9 + $0xbd8] sm:$0xff]  ;;  %v11398_v18 = vcombine.low %v1965_v6, %v1981_v7  ;;  %v11400_v19 = vcombine.low %v1966_v8, %v1982_v9  ;;  %v11210_v6 = vcombine.low %v1775_v54, %v1791_v55 }
 0x2f2   : > { %v11369_v21 = vcombine.high %v1934_v16, %v1950_v17  ;;  %v11179_v9 = vcombine.high %v1743_v63, %v1759_v0 }
 0x2f4   : > { %5069 = vmatpush1.bf16.msra.mxu0 %v11110_v24  ;;  %5110 = vmatpush1.bf16.msra.mxu1 %v11112_v25  ;;  %v1902_v24 = vld [vmem:[#allocation9 + $0xa58] sm:$0xff] }
 0x2f5   : > { %5070 = vmatprep.subr.bf16.mxu0 %v11079_v26  ;;  %5111 = vmatprep.subr.bf16.mxu1 %v11081_v27  ;;  %v1918_v25 = vld [vmem:[#allocation9 + $0xad8] sm:$0xff]  ;;  %v11366_v26 = vcombine.low %v1933_v15, %v1949_v12  ;;  %v11368_v27 = vcombine.low %v1934_v16, %v1950_v17  ;;  %v1712_v12 = vld [vmem:[#allocation9 + $0x468] sm:$0xff] }
 0x2f6   : > { %v11337_v29 = vcombine.high %v1902_v24, %v1918_v25  ;;  %v1728_v16 = vld [vmem:[#allocation9 + $0x4e8] sm:$0xff] }
 0x2f8   : > { %5071 = vmatpush1.bf16.msra.mxu0 %v11078_v32  ;;  %5112 = vmatpush1.bf16.msra.mxu1 %v11080_v33  ;;  %v1870_v32 = vld [vmem:[#allocation9 + $0x958] sm:$0xff] }
 0x2f9   : > { %5072 = vmatprep.subr.bf16.mxu0 %v11047_v34  ;;  %5113 = vmatprep.subr.bf16.mxu1 %v11049_v35  ;;  %v1886_v33 = vld [vmem:[#allocation9 + $0x9d8] sm:$0xff]  ;;  %v11334_v34 = vcombine.low %v1901_v22, %v1917_v23  ;;  %v11336_v35 = vcombine.low %v1902_v24, %v1918_v25  ;;  %v11149_v23 = vcombine.high %v1712_v12, %v1728_v16  ;;  %v1679_v24 = vld [vmem:[#allocation9 + $0x360] sm:$0xff] }
 0x2fa   : > { %v11305_v37 = vcombine.high %v1870_v32, %v1886_v33  ;;  %v1695_v25 = vld [vmem:[#allocation9 + $0x3e0] sm:$0xff] }
 0x2fc   : > { %5073 = vmatpush1.bf16.msra.mxu0 %v11046_v40  ;;  %5114 = vmatpush1.bf16.msra.mxu1 %v11048_v41  ;;  %v1838_v40 = vld [vmem:[#allocation9 + $0x858] sm:$0xff] }
 0x2fd   : > { %5074 = vmatprep.subr.bf16.mxu0 %v11015_v42  ;;  %5115 = vmatprep.subr.bf16.mxu1 %v11017_v43  ;;  %v1854_v41 = vld [vmem:[#allocation9 + $0x8d8] sm:$0xff]  ;;  %v11302_v42 = vcombine.low %v1869_v61, %v1885_v30  ;;  %v11304_v43 = vcombine.low %v1870_v32, %v1886_v33  ;;  %v11115_v61 = vcombine.high %v1679_v24, %v1695_v25  ;;  %v1647_v32 = vld [vmem:[#allocation9 + $0x260] sm:$0xff] }
 0x2fe   : > { %v11273_v45 = vcombine.high %v1838_v40, %v1854_v41  ;;  %v1663_v33 = vld [vmem:[#allocation9 + $0x2e0] sm:$0xff] }
 0x300   : > { %5075 = vmatpush1.bf16.msra.mxu0 %v11014_v48  ;;  %5116 = vmatpush1.bf16.msra.mxu1 %v11016_v49  ;;  %v1808_v48 = vld [vmem:[#allocation9 + $0x768] sm:$0xff] }
 0x301   : > { %5076 = vmatprep.subr.bf16.mxu0 %v11495_v50  ;;  %5117 = vmatprep.subr.bf16.mxu1 %v11497_v51  ;;  %v1824_v49 = vld [vmem:[#allocation9 + $0x7e8] sm:$0xff]  ;;  %v11270_v50 = vcombine.low %v1837_v38, %v1853_v39  ;;  %v11272_v51 = vcombine.low %v1838_v40, %v1854_v41  ;;  %v11083_v38 = vcombine.high %v1647_v32, %v1663_v33  ;;  %v1615_v40 = vld [vmem:[#allocation9 + $0x160] sm:$0xff] }
 0x302   : > { %v11245_v53 = vcombine.high %v1808_v48, %v1824_v49  ;;  %v1631_v41 = vld [vmem:[#allocation9 + $0x1e0] sm:$0xff] }
 0x304   : > { %5077 = vmatpush2.bf16.msra.mxu0 %v11494_v56  ;;  %5118 = vmatpush2.bf16.msra.mxu1 %v11496_v57  ;;  %v1776_v56 = vld [vmem:[#allocation9 + $0x668] sm:$0xff] }
 0x305   : > { %5078 = vmatprep.subr.bf16.mxu0 %v11463_v58  ;;  %5119 = vmatprep.subr.bf16.mxu1 %v11465_v59  ;;  %v1792_v57 = vld [vmem:[#allocation9 + $0x6e8] sm:$0xff]  ;;  %v11242_v58 = vcombine.low %v1807_v46, %v1823_v47  ;;  %v11244_v59 = vcombine.low %v1808_v48, %v1824_v49  ;;  %v11051_v46 = vcombine.high %v1615_v40, %v1631_v41  ;;  %v1583_v48 = vld [vmem:[#allocation9 + $0x60] sm:$0xff] }
 0x306   : > { %v11213_v62 = vcombine.high %v1776_v56, %v1792_v57  ;;  %v11212_v8 = vcombine.low %v1776_v56, %v1792_v57  ;;  %v1599_v49 = vld [vmem:[#allocation9 + $0xe0] sm:$0xff] }
 0x307   : > { %v11019_v54 = vcombine.high %v1583_v48, %v1599_v49  ;;  %v2063_v56 = vld [vmem:[#allocation9 + $0xf60] sm:$0xff] }
 0x308   : > { %5079 = vmatpush2.bf16.msra.mxu0 %v11462_v2  ;;  %5120 = vmatpush2.bf16.msra.mxu1 %v11464_v3  ;;  %v1744_v3 = vld [vmem:[#allocation9 + $0x568] sm:$0xff]  ;;  %v2079_v57 = vld [vmem:[#allocation9 + $0xfe0] sm:$0xff] }
 0x309   : > { %5080 = vmatprep.subr.bf16.mxu0 %v11431_v4  ;;  %5121 = vmatprep.subr.bf16.mxu1 %v11433_v5  ;;  %v1760_v4 = vld [vmem:[#allocation9 + $0x5e8] sm:$0xff] }
 0x30c   : > { %5081 = vmatpush2.bf16.msra.mxu0 %v11430_v10  ;;  %5122 = vmatpush2.bf16.msra.mxu1 %v11432_v11  ;;  %v11181_v11 = vcombine.high %v1744_v3, %v1760_v4 }
 0x30d   : > { %5082 = vmatprep.subr.bf16.mxu0 %v11399_v13  ;;  %5123 = vmatprep.subr.bf16.mxu1 %v11401_v14  ;;  %v1711_v13 = vld [vmem:[#allocation9 + $0x460] sm:$0xff] }
 0x30e   : > { %v1727_v14 = vld [vmem:[#allocation9 + $0x4e0] sm:$0xff] }
 0x310   : > { %5083 = vmatpush2.bf16.msra.mxu0 %v11398_v18  ;;  %5124 = vmatpush2.bf16.msra.mxu1 %v11400_v19  ;;  %v11178_v18 = vcombine.low %v1743_v63, %v1759_v0  ;;  %v11499_v63 = vcombine.high %v2063_v56, %v2079_v57 }
 0x311   : > { %5084 = vmatprep.subr.bf16.mxu0 %v11367_v20  ;;  %5125 = vmatprep.subr.bf16.mxu1 %v11369_v21  ;;  %v11180_v20 = vcombine.low %v1744_v3, %v1760_v4  ;;  %v11147_v21 = vcombine.high %v1711_v13, %v1727_v14  ;;  %v2047_v3 = vld [vmem:[#allocation9 + $0xee0] sm:$0xff]  ;;  %v2032_v4 = vld [vmem:[#allocation9 + $0xe68] sm:$0xff] }
 0x314   : > { %5085 = vmatpush2.bf16.msra.mxu0 %v11366_v26  ;;  %5126 = vmatpush2.bf16.msra.mxu1 %v11368_v27  ;;  %v1680_v26 = vld [vmem:[#allocation9 + $0x368] sm:$0xff] }
 0x315   : > { %5086 = vmatprep.subr.bf16.mxu0 %v11335_v28  ;;  %5127 = vmatprep.subr.bf16.mxu1 %v11337_v29  ;;  %v1696_v27 = vld [vmem:[#allocation9 + $0x3e8] sm:$0xff]  ;;  %v11146_v28 = vcombine.low %v1711_v13, %v1727_v14  ;;  %v11148_v29 = vcombine.low %v1712_v12, %v1728_v16 }
 0x316   : > { %v11117_v30 = vcombine.high %v1680_v26, %v1696_v27  ;;  %v2000_v13 = vld [vmem:[#allocation9 + $0xd68] sm:$0xff] }
 0x317   : > { %v2016_v14 = vld [vmem:[#allocation9 + $0xde8] sm:$0xff] }
 0x318   : > { %5087 = vmatpush2.bf16.msra.mxu0 %v11334_v34  ;;  %5128 = vmatpush2.bf16.msra.mxu1 %v11336_v35  ;;  %v1648_v34 = vld [vmem:[#allocation9 + $0x268] sm:$0xff] }
 0x319   : > { %5088 = vmatprep.subr.bf16.mxu0 %v11303_v36  ;;  %5129 = vmatprep.subr.bf16.mxu1 %v11305_v37  ;;  %v1664_v35 = vld [vmem:[#allocation9 + $0x2e8] sm:$0xff]  ;;  %v11114_v36 = vcombine.low %v1679_v24, %v1695_v25  ;;  %v11116_v37 = vcombine.low %v1680_v26, %v1696_v27  ;;  %v1935_v26 = vld [vmem:[#allocation9 + $0xb60] sm:$0xff] }
 0x31a   : > { %v11085_v39 = vcombine.high %v1648_v34, %v1664_v35  ;;  %v1951_v27 = vld [vmem:[#allocation9 + $0xbe0] sm:$0xff] }
 0x31c   : > { %5089 = vmatpush2.bf16.msra.mxu0 %v11302_v42  ;;  %5130 = vmatpush2.bf16.msra.mxu1 %v11304_v43  ;;  %v1616_v42 = vld [vmem:[#allocation9 + $0x168] sm:$0xff] }
 0x31d   : > { %5090 = vmatprep.subr.bf16.mxu0 %v11271_v44  ;;  %5131 = vmatprep.subr.bf16.mxu1 %v11273_v45  ;;  %v1632_v43 = vld [vmem:[#allocation9 + $0x1e8] sm:$0xff]  ;;  %v11082_v44 = vcombine.low %v1647_v32, %v1663_v33  ;;  %v11084_v45 = vcombine.low %v1648_v34, %v1664_v35  ;;  %v11371_v32 = vcombine.high %v1935_v26, %v1951_v27  ;;  %v1903_v34 = vld [vmem:[#allocation9 + $0xa60] sm:$0xff] }
 0x31e   : > { %v11053_v47 = vcombine.high %v1616_v42, %v1632_v43  ;;  %v1919_v35 = vld [vmem:[#allocation9 + $0xae0] sm:$0xff] }
 0x320   : > { %5091 = vmatpush2.bf16.msra.mxu0 %v11270_v50  ;;  %5132 = vmatpush2.bf16.msra.mxu1 %v11272_v51  ;;  %v1584_v50 = vld [vmem:[#allocation9 + $0x68] sm:$0xff] }
 0x321   : > { %5142 = vmatprep.subr.bf16.mxu0 %v11243_v52  ;;  %5183 = vmatprep.subr.bf16.mxu1 %v11245_v53  ;;  %v1600_v51 = vld [vmem:[#allocation9 + $0xe8] sm:$0xff]  ;;  %v11050_v52 = vcombine.low %v1615_v40, %v1631_v41  ;;  %v11052_v53 = vcombine.low %v1616_v42, %v1632_v43  ;;  %v11339_v40 = vcombine.high %v1903_v34, %v1919_v35  ;;  %v1871_v42 = vld [vmem:[#allocation9 + $0x960] sm:$0xff] }
 0x322   : > { %v11021_v55 = vcombine.high %v1584_v50, %v1600_v51  ;;  %v1887_v43 = vld [vmem:[#allocation9 + $0x9e0] sm:$0xff] }
 0x323   : > { %v4848_v2 = vpop.f32.mrf.mxu0  ;;  %5093 = vmatmul.mubr.bf16.vlgmr.msra.gmra.mxu0 %v13551_v31  ;;  %v4889_v5 = vpop.f32.mrf.mxu1  ;;  %5134 = vmatmul.mubr.bf16.vlgmr.msra.gmra.mxu1 %v13551_v31 }
 0x324   : > { %5314 = vst [vmem:[#allocation3 + $0x80] sm:$0xff] %v4848_v2  ;;  %5143 = vmatpush1.bf16.msra.mxu0 %v11242_v58  ;;  %5316 = vst [vmem:[#allocation3 + $0xe8] sm:$0xff] %v4889_v5  ;;  %5184 = vmatpush1.bf16.msra.mxu1 %v11244_v59  ;;  %v2064_v58 = vld [vmem:[#allocation9 + $0xf68] sm:$0xff]  ;;  %v2031_v2 = vld [vmem:[#allocation9 + $0xe60] sm:$0xff] }
 0x325   : > { %v4850_v7 = vpop.f32.mrf.mxu0  ;;  %5144 = vmatprep.subr.bf16.mxu0 %v11211_v60  ;;  %v4891_v10 = vpop.f32.mrf.mxu1  ;;  %5185 = vmatprep.subr.bf16.mxu1 %v11213_v62  ;;  %v2080_v59 = vld [vmem:[#allocation9 + $0xfe8] sm:$0xff]  ;;  %v11018_v60 = vcombine.low %v1583_v48, %v1599_v49  ;;  %v11020_v62 = vcombine.low %v1584_v50, %v1600_v51  ;;  %v11307_v48 = vcombine.high %v1871_v42, %v1887_v43  ;;  %v1839_v50 = vld [vmem:[#allocation9 + $0x860] sm:$0xff] }
 0x326   : > { %5315 = vst [vmem:[#allocation3 + $0x88] sm:$0xff] %v4850_v7  ;;  %5174 = vmatprep.mubr.bf16.mxu0 %v13545_v1  ;;  %5317 = vst [vmem:[#allocation3 + $0xb8] sm:$0xff] %v4891_v10  ;;  %5215 = vmatprep.mubr.bf16.mxu1 %v13545_v1  ;;  %v11501_v0 = vcombine.high %v2064_v58, %v2080_v59  ;;  %v2048_v5 = vld [vmem:[#allocation9 + $0xee8] sm:$0xff]  ;;  %v11500_v7 = vcombine.low %v2064_v58, %v2080_v59  ;;  %v1999_v10 = vld [vmem:[#allocation9 + $0xd60] sm:$0xff] }
 0x327   : > { %v4852_v15 = vpop.f32.mrf.mxu0  ;;  %v4893_v17 = vpop.f32.mrf.mxu1  ;;  %v11468_v12 = vcombine.low %v2032_v4, %v2048_v5  ;;  %v1855_v51 = vld [vmem:[#allocation9 + $0x8e0] sm:$0xff]  ;;  %v1809_v58 = vld [vmem:[#allocation9 + $0x770] sm:$0xff] }
 0x328   : > { %5145 = vmatpush1.bf16.msra.mxu0 %v11210_v6  ;;  %5186 = vmatpush1.bf16.msra.mxu1 %v11212_v8  ;;  %v11498_v6 = vcombine.low %v2063_v56, %v2079_v57  ;;  %v11467_v8 = vcombine.high %v2031_v2, %v2047_v3  ;;  %v11466_v15 = vcombine.low %v2031_v2, %v2047_v3  ;;  %v1825_v59 = vld [vmem:[#allocation9 + $0x7f0] sm:$0xff] }
 0x329   : > { %v4853_v19 = vpop.f32.mrf.mxu0  ;;  %5146 = vmatprep.subr.bf16.mxu0 %v11179_v9  ;;  %v4894_v22 = vpop.f32.mrf.mxu1  ;;  %5187 = vmatprep.subr.bf16.mxu1 %v11181_v11  ;;  %v11469_v9 = vcombine.high %v2032_v4, %v2048_v5  ;;  %v2015_v11 = vld [vmem:[#allocation9 + $0xde0] sm:$0xff]  ;;  %v11437_v17 = vcombine.high %v2000_v13, %v2016_v14  ;;  %v11275_v56 = vcombine.high %v1839_v50, %v1855_v51  ;;  %v1777_v4 = vld [vmem:[#allocation9 + $0x670] sm:$0xff] }
 0x32a   : > { %v11435_v16 = vcombine.high %v1999_v10, %v2015_v11  ;;  %v1983_v19 = vld [vmem:[#allocation9 + $0xce0] sm:$0xff]  ;;  %v11434_v22 = vcombine.low %v1999_v10, %v2015_v11  ;;  %v11247_v2 = vcombine.high %v1809_v58, %v1825_v59  ;;  %v1793_v5 = vld [vmem:[#allocation9 + $0x6f0] sm:$0xff] }
 0x32b   : > { %v11215_v10 = vcombine.high %v1777_v4, %v1793_v5 }
 0x32c   : > { %5147 = vmatpush1.bf16.msra.mxu0 %v11178_v18  ;;  %5188 = vmatpush1.bf16.msra.mxu1 %v11180_v20  ;;  %v1967_v18 = vld [vmem:[#allocation9 + $0xc60] sm:$0xff]  ;;  %v1968_v20 = vld [vmem:[#allocation9 + $0xc68] sm:$0xff] }
 0x32d   : > { %5148 = vmatprep.subr.bf16.mxu0 %v11147_v21  ;;  %5189 = vmatprep.subr.bf16.mxu1 %v11149_v23  ;;  %v1984_v21 = vld [vmem:[#allocation9 + $0xce8] sm:$0xff]  ;;  %v11436_v23 = vcombine.low %v2000_v13, %v2016_v14  ;;  %v11403_v24 = vcombine.high %v1967_v18, %v1983_v19  ;;  %v1745_v13 = vld [vmem:[#allocation9 + $0x570] sm:$0xff] }
 0x32e   : > { %v11405_v25 = vcombine.high %v1968_v20, %v1984_v21  ;;  %v1761_v14 = vld [vmem:[#allocation9 + $0x5f0] sm:$0xff] }
 0x330   : > { %5149 = vmatpush1.bf16.msra.mxu0 %v11146_v28  ;;  %5190 = vmatpush1.bf16.msra.mxu1 %v11148_v29  ;;  %v1936_v28 = vld [vmem:[#allocation9 + $0xb68] sm:$0xff] }
 0x331   : > { %5150 = vmatprep.subr.bf16.mxu0 %v11115_v61  ;;  %5191 = vmatprep.subr.bf16.mxu1 %v11117_v30  ;;  %v1952_v29 = vld [vmem:[#allocation9 + $0xbe8] sm:$0xff]  ;;  %v11402_v61 = vcombine.low %v1967_v18, %v1983_v19  ;;  %v11404_v30 = vcombine.low %v1968_v20, %v1984_v21  ;;  %v11214_v18 = vcombine.low %v1777_v4, %v1793_v5  ;;  %v2065_v5 = vld [vmem:[#allocation9 + $0xf70] sm:$0xff] }
 0x332   : > { %v11373_v33 = vcombine.high %v1936_v28, %v1952_v29  ;;  %v11183_v21 = vcombine.high %v1745_v13, %v1761_v14 }
 0x334   : > { %5151 = vmatpush1.bf16.msra.mxu0 %v11114_v36  ;;  %5192 = vmatpush1.bf16.msra.mxu1 %v11116_v37  ;;  %v1904_v36 = vld [vmem:[#allocation9 + $0xa68] sm:$0xff] }
 0x335   : > { %5152 = vmatprep.subr.bf16.mxu0 %v11083_v38  ;;  %5193 = vmatprep.subr.bf16.mxu1 %v11085_v39  ;;  %v1920_v37 = vld [vmem:[#allocation9 + $0xae8] sm:$0xff]  ;;  %v11370_v38 = vcombine.low %v1935_v26, %v1951_v27  ;;  %v11372_v39 = vcombine.low %v1936_v28, %v1952_v29  ;;  %v1714_v27 = vld [vmem:[#allocation9 + $0x478] sm:$0xff] }
 0x336   : > { %v11341_v41 = vcombine.high %v1904_v36, %v1920_v37  ;;  %v1730_v28 = vld [vmem:[#allocation9 + $0x4f8] sm:$0xff] }
 0x338   : > { %5153 = vmatpush1.bf16.msra.mxu0 %v11082_v44  ;;  %5194 = vmatpush1.bf16.msra.mxu1 %v11084_v45  ;;  %v1872_v44 = vld [vmem:[#allocation9 + $0x968] sm:$0xff] }
 0x339   : > { %5154 = vmatprep.subr.bf16.mxu0 %v11051_v46  ;;  %5195 = vmatprep.subr.bf16.mxu1 %v11053_v47  ;;  %v1888_v45 = vld [vmem:[#allocation9 + $0x9e8] sm:$0xff]  ;;  %v11338_v46 = vcombine.low %v1903_v34, %v1919_v35  ;;  %v11340_v47 = vcombine.low %v1904_v36, %v1920_v37  ;;  %v11153_v35 = vcombine.high %v1714_v27, %v1730_v28  ;;  %v1681_v36 = vld [vmem:[#allocation9 + $0x370] sm:$0xff] }
 0x33a   : > { %v11309_v49 = vcombine.high %v1872_v44, %v1888_v45  ;;  %v1697_v37 = vld [vmem:[#allocation9 + $0x3f0] sm:$0xff] }
 0x33c   : > { %5155 = vmatpush1.bf16.msra.mxu0 %v11050_v52  ;;  %5196 = vmatpush1.bf16.msra.mxu1 %v11052_v53  ;;  %v1840_v52 = vld [vmem:[#allocation9 + $0x868] sm:$0xff] }
 0x33d   : > { %5156 = vmatprep.subr.bf16.mxu0 %v11019_v54  ;;  %5197 = vmatprep.subr.bf16.mxu1 %v11021_v55  ;;  %v1856_v53 = vld [vmem:[#allocation9 + $0x8e8] sm:$0xff]  ;;  %v11306_v54 = vcombine.low %v1871_v42, %v1887_v43  ;;  %v11308_v55 = vcombine.low %v1872_v44, %v1888_v45  ;;  %v1649_v43 = vld [vmem:[#allocation9 + $0x270] sm:$0xff]  ;;  %v1650_v45 = vld [vmem:[#allocation9 + $0x278] sm:$0xff] }
 0x33e   : > { %v11277_v57 = vcombine.high %v1840_v52, %v1856_v53  ;;  %v1665_v44 = vld [vmem:[#allocation9 + $0x2f0] sm:$0xff] }
 0x340   : > { %5157 = vmatpush1.bf16.msra.mxu0 %v11018_v60  ;;  %5198 = vmatpush1.bf16.msra.mxu1 %v11020_v62  ;;  %v1810_v60 = vld [vmem:[#allocation9 + $0x778] sm:$0xff] }
 0x341   : > { %5158 = vmatprep.subr.bf16.mxu0 %v11499_v63  ;;  %5199 = vmatprep.subr.bf16.mxu1 %v11501_v0  ;;  %v1826_v62 = vld [vmem:[#allocation9 + $0x7f8] sm:$0xff]  ;;  %v11274_v63 = vcombine.low %v1839_v50, %v1855_v51  ;;  %v11276_v0 = vcombine.low %v1840_v52, %v1856_v53  ;;  %v1617_v51 = vld [vmem:[#allocation9 + $0x170] sm:$0xff] }
 0x342   : > { %v11249_v3 = vcombine.high %v1810_v60, %v1826_v62  ;;  %v1633_v52 = vld [vmem:[#allocation9 + $0x1f0] sm:$0xff]  ;;  %v1618_v53 = vld [vmem:[#allocation9 + $0x178] sm:$0xff] }
 0x344   : > { %5159 = vmatpush2.bf16.msra.mxu0 %v11498_v6  ;;  %5200 = vmatpush2.bf16.msra.mxu1 %v11500_v7  ;;  %v1778_v6 = vld [vmem:[#allocation9 + $0x678] sm:$0xff] }
 0x345   : > { %5160 = vmatprep.subr.bf16.mxu0 %v11467_v8  ;;  %5201 = vmatprep.subr.bf16.mxu1 %v11469_v9  ;;  %v1794_v7 = vld [vmem:[#allocation9 + $0x6f8] sm:$0xff]  ;;  %v11246_v8 = vcombine.low %v1809_v58, %v1825_v59  ;;  %v11248_v9 = vcombine.low %v1810_v60, %v1826_v62  ;;  %v1585_v59 = vld [vmem:[#allocation9 + $0x70] sm:$0xff] }
 0x346   : > { %v11217_v11 = vcombine.high %v1778_v6, %v1794_v7  ;;  %v11216_v20 = vcombine.low %v1778_v6, %v1794_v7  ;;  %v1601_v60 = vld [vmem:[#allocation9 + $0xf0] sm:$0xff]  ;;  %v1586_v62 = vld [vmem:[#allocation9 + $0x78] sm:$0xff] }
 0x347   : > { %v2081_v6 = vld [vmem:[#allocation9 + $0xff0] sm:$0xff]  ;;  %v2066_v7 = vld [vmem:[#allocation9 + $0xf78] sm:$0xff] }
 0x348   : > { %5161 = vmatpush2.bf16.msra.mxu0 %v11466_v15  ;;  %5202 = vmatpush2.bf16.msra.mxu1 %v11468_v12  ;;  %v1746_v12 = vld [vmem:[#allocation9 + $0x578] sm:$0xff] }
 0x349   : > { %5162 = vmatprep.subr.bf16.mxu0 %v11435_v16  ;;  %5203 = vmatprep.subr.bf16.mxu1 %v11437_v17  ;;  %v1762_v16 = vld [vmem:[#allocation9 + $0x5f8] sm:$0xff] }
 0x34c   : > { %5163 = vmatpush2.bf16.msra.mxu0 %v11434_v22  ;;  %5204 = vmatpush2.bf16.msra.mxu1 %v11436_v23  ;;  %v11185_v23 = vcombine.high %v1746_v12, %v1762_v16 }
 0x34d   : > { %5164 = vmatprep.subr.bf16.mxu0 %v11403_v24  ;;  %5205 = vmatprep.subr.bf16.mxu1 %v11405_v25  ;;  %v1713_v24 = vld [vmem:[#allocation9 + $0x470] sm:$0xff] }
 0x34e   : > { %v1729_v25 = vld [vmem:[#allocation9 + $0x4f0] sm:$0xff] }
 0x350   : > { %5165 = vmatpush2.bf16.msra.mxu0 %v11402_v61  ;;  %5206 = vmatpush2.bf16.msra.mxu1 %v11404_v30  ;;  %v11182_v61 = vcombine.low %v1745_v13, %v1761_v14  ;;  %v2033_v14 = vld [vmem:[#allocation9 + $0xe70] sm:$0xff] }
 0x351   : > { %5166 = vmatprep.subr.bf16.mxu0 %v11371_v32  ;;  %5207 = vmatprep.subr.bf16.mxu1 %v11373_v33  ;;  %v11184_v32 = vcombine.low %v1746_v12, %v1762_v16  ;;  %v11151_v33 = vcombine.high %v1713_v24, %v1729_v25  ;;  %v2034_v12 = vld [vmem:[#allocation9 + $0xe78] sm:$0xff] }
 0x352   : > { %v2050_v16 = vld [vmem:[#allocation9 + $0xef8] sm:$0xff] }
 0x354   : > { %5167 = vmatpush2.bf16.msra.mxu0 %v11370_v38  ;;  %5208 = vmatpush2.bf16.msra.mxu1 %v11372_v39  ;;  %v1682_v38 = vld [vmem:[#allocation9 + $0x378] sm:$0xff] }
 0x355   : > { %5168 = vmatprep.subr.bf16.mxu0 %v11339_v40  ;;  %5209 = vmatprep.subr.bf16.mxu1 %v11341_v41  ;;  %v1698_v39 = vld [vmem:[#allocation9 + $0x3f8] sm:$0xff]  ;;  %v11150_v40 = vcombine.low %v1713_v24, %v1729_v25  ;;  %v11119_v41 = vcombine.high %v1681_v36, %v1697_v37 }
 0x356   : > { %v11121_v42 = vcombine.high %v1682_v38, %v1698_v39  ;;  %v2018_v24 = vld [vmem:[#allocation9 + $0xdf8] sm:$0xff] }
 0x358   : > { %5169 = vmatpush2.bf16.msra.mxu0 %v11338_v46  ;;  %5210 = vmatpush2.bf16.msra.mxu1 %v11340_v47  ;;  %v1666_v46 = vld [vmem:[#allocation9 + $0x2f8] sm:$0xff]  ;;  %v11118_v47 = vcombine.low %v1681_v36, %v1697_v37  ;;  %v1937_v37 = vld [vmem:[#allocation9 + $0xb70] sm:$0xff] }
 0x359   : > { %5170 = vmatprep.subr.bf16.mxu0 %v11307_v48  ;;  %5211 = vmatprep.subr.bf16.mxu1 %v11309_v49  ;;  %v11120_v48 = vcombine.low %v1682_v38, %v1698_v39  ;;  %v11087_v49 = vcombine.high %v1649_v43, %v1665_v44  ;;  %v11089_v50 = vcombine.high %v1650_v45, %v1666_v46  ;;  %v1953_v38 = vld [vmem:[#allocation9 + $0xbf0] sm:$0xff]  ;;  %v1938_v39 = vld [vmem:[#allocation9 + $0xb78] sm:$0xff] }
 0x35c   : > { %5171 = vmatpush2.bf16.msra.mxu0 %v11306_v54  ;;  %5212 = vmatpush2.bf16.msra.mxu1 %v11308_v55  ;;  %v1634_v54 = vld [vmem:[#allocation9 + $0x1f8] sm:$0xff]  ;;  %v11086_v55 = vcombine.low %v1649_v43, %v1665_v44  ;;  %v1905_v44 = vld [vmem:[#allocation9 + $0xa70] sm:$0xff] }
 0x35d   : > { %5172 = vmatprep.subr.bf16.mxu0 %v11275_v56  ;;  %5213 = vmatprep.subr.bf16.mxu1 %v11277_v57  ;;  %v11088_v56 = vcombine.low %v1650_v45, %v1666_v46  ;;  %v11055_v57 = vcombine.high %v1617_v51, %v1633_v52  ;;  %v11057_v58 = vcombine.high %v1618_v53, %v1634_v54  ;;  %v1921_v45 = vld [vmem:[#allocation9 + $0xaf0] sm:$0xff]  ;;  %v1906_v46 = vld [vmem:[#allocation9 + $0xa78] sm:$0xff] }
 0x360   : > { %5173 = vmatpush2.bf16.msra.mxu0 %v11274_v63  ;;  %5214 = vmatpush2.bf16.msra.mxu1 %v11276_v0  ;;  %v1602_v63 = vld [vmem:[#allocation9 + $0xf8] sm:$0xff]  ;;  %v11054_v0 = vcombine.low %v1617_v51, %v1633_v52  ;;  %v1873_v52 = vld [vmem:[#allocation9 + $0x970] sm:$0xff] }
 0x361   : > { %5224 = vmatprep.subr.bf16.mxu0 %v11247_v2  ;;  %5265 = vmatprep.subr.bf16.mxu1 %v11249_v3  ;;  %v11056_v2 = vcombine.low %v1618_v53, %v1634_v54  ;;  %v11023_v3 = vcombine.high %v1585_v59, %v1601_v60  ;;  %v11025_v4 = vcombine.high %v1586_v62, %v1602_v63  ;;  %v1889_v53 = vld [vmem:[#allocation9 + $0x9f0] sm:$0xff]  ;;  %v1874_v54 = vld [vmem:[#allocation9 + $0x978] sm:$0xff] }
 0x363   : > { %v4930_v15 = vpop.f32.mrf.mxu0  ;;  %5175 = vmatmul.mubr.bf16.vlgmr.msra.gmra.mxu0 %v13551_v31  ;;  %v4971_v17 = vpop.f32.mrf.mxu1  ;;  %5216 = vmatmul.mubr.bf16.vlgmr.msra.gmra.mxu1 %v13551_v31 }
 0x364   : > { %5318 = vst [vmem:[#allocation3 + $0x60] sm:$0xff] %v4930_v15  ;;  %5225 = vmatpush1.bf16.msra.mxu0 %v11246_v8  ;;  %5320 = vst [vmem:[#allocation3 + $0x8] sm:$0xff] %v4971_v17  ;;  %5266 = vmatpush1.bf16.msra.mxu1 %v11248_v9  ;;  %v2082_v8 = vld [vmem:[#allocation9 + $0xff8] sm:$0xff]  ;;  %v11022_v9 = vcombine.low %v1585_v59, %v1601_v60  ;;  %v2049_v15 = vld [vmem:[#allocation9 + $0xef0] sm:$0xff]  ;;  %v11502_v17 = vcombine.low %v2065_v5, %v2081_v6 }
 0x365   : > { %v4932_v19 = vpop.f32.mrf.mxu0  ;;  %5226 = vmatprep.subr.bf16.mxu0 %v11215_v10  ;;  %v4973_v22 = vpop.f32.mrf.mxu1  ;;  %5267 = vmatprep.subr.bf16.mxu1 %v11217_v11  ;;  %v11024_v10 = vcombine.low %v1586_v62, %v1602_v63  ;;  %v11503_v11 = vcombine.high %v2065_v5, %v2081_v6  ;;  %v11505_v13 = vcombine.high %v2066_v7, %v2082_v8  ;;  %v1841_v60 = vld [vmem:[#allocation9 + $0x870] sm:$0xff]  ;;  %v1842_v63 = vld [vmem:[#allocation9 + $0x878] sm:$0xff] }
 0x366   : > { %5319 = vst [vmem:[#allocation3 + $0xf0] sm:$0xff] %v4932_v19  ;;  %5256 = vmatprep.mubr.bf16.mxu0 %v13545_v1  ;;  %5321 = vst [vmem:[#allocation3 + $0x78] sm:$0xff] %v4973_v22  ;;  %5297 = vmatprep.mubr.bf16.mxu1 %v13545_v1  ;;  %v11152_v1 = vcombine.low %v1714_v27, %v1730_v28  ;;  %v11471_v19 = vcombine.high %v2033_v14, %v2049_v15  ;;  %v2017_v22 = vld [vmem:[#allocation9 + $0xdf0] sm:$0xff] }
 0x367   : > { %v4934_v26 = vpop.f32.mrf.mxu0  ;;  %v4975_v29 = vpop.f32.mrf.mxu1  ;;  %v11470_v25 = vcombine.low %v2033_v14, %v2049_v15  ;;  %v1857_v62 = vld [vmem:[#allocation9 + $0x8f0] sm:$0xff] }
 0x368   : > { %5227 = vmatpush1.bf16.msra.mxu0 %v11214_v18  ;;  %5268 = vmatpush1.bf16.msra.mxu1 %v11216_v20  ;;  %v11504_v18 = vcombine.low %v2066_v7, %v2082_v8  ;;  %v11473_v20 = vcombine.high %v2034_v12, %v2050_v16  ;;  %v11472_v26 = vcombine.low %v2034_v12, %v2050_v16  ;;  %v1969_v29 = vld [vmem:[#allocation9 + $0xc70] sm:$0xff] }
 0x369   : > { %v4935_v30 = vpop.f32.mrf.mxu0  ;;  %5228 = vmatprep.subr.bf16.mxu0 %v11183_v21  ;;  %v4976_v34 = vpop.f32.mrf.mxu1  ;;  %5269 = vmatprep.subr.bf16.mxu1 %v11185_v23  ;;  %v2001_v21 = vld [vmem:[#allocation9 + $0xd70] sm:$0xff]  ;;  %v2002_v23 = vld [vmem:[#allocation9 + $0xd78] sm:$0xff]  ;;  %v11278_v6 = vcombine.low %v1841_v60, %v1857_v62 }
 0x36a   : > { %v11439_v27 = vcombine.high %v2001_v21, %v2017_v22  ;;  %v11441_v28 = vcombine.high %v2002_v23, %v2018_v24  ;;  %v1970_v30 = vld [vmem:[#allocation9 + $0xc78] sm:$0xff]  ;;  %v11440_v34 = vcombine.low %v2002_v23, %v2018_v24 }
 0x36c   : > { %5229 = vmatpush1.bf16.msra.mxu0 %v11182_v61  ;;  %5270 = vmatpush1.bf16.msra.mxu1 %v11184_v32  ;;  %v1985_v61 = vld [vmem:[#allocation9 + $0xcf0] sm:$0xff]  ;;  %v1986_v32 = vld [vmem:[#allocation9 + $0xcf8] sm:$0xff] }
 0x36d   : > { %5230 = vmatprep.subr.bf16.mxu0 %v11151_v33  ;;  %5271 = vmatprep.subr.bf16.mxu1 %v11153_v35  ;;  %v11438_v33 = vcombine.low %v2001_v21, %v2017_v22  ;;  %v11407_v35 = vcombine.high %v1969_v29, %v1985_v61  ;;  %v11409_v36 = vcombine.high %v1970_v30, %v1986_v32 }
 0x370   : > { %5231 = vmatpush1.bf16.msra.mxu0 %v11150_v40  ;;  %5272 = vmatpush1.bf16.msra.mxu1 %v11152_v1  ;;  %v1954_v40 = vld [vmem:[#allocation9 + $0xbf8] sm:$0xff]  ;;  %v11406_v1 = vcombine.low %v1969_v29, %v1985_v61 }
 0x371   : > { %5232 = vmatprep.subr.bf16.mxu0 %v11119_v41  ;;  %5273 = vmatprep.subr.bf16.mxu1 %v11121_v42  ;;  %v11408_v41 = vcombine.low %v1970_v30, %v1986_v32  ;;  %v11375_v42 = vcombine.high %v1937_v37, %v1953_v38  ;;  %v11377_v43 = vcombine.high %v1938_v39, %v1954_v40 }
 0x374   : > { %5233 = vmatpush1.bf16.msra.mxu0 %v11118_v47  ;;  %5274 = vmatpush1.bf16.msra.mxu1 %v11120_v48  ;;  %v1922_v47 = vld [vmem:[#allocation9 + $0xaf8] sm:$0xff]  ;;  %v11374_v48 = vcombine.low %v1937_v37, %v1953_v38 }
 0x375   : > { %5234 = vmatprep.subr.bf16.mxu0 %v11087_v49  ;;  %5275 = vmatprep.subr.bf16.mxu1 %v11089_v50  ;;  %v11376_v49 = vcombine.low %v1938_v39, %v1954_v40  ;;  %v11343_v50 = vcombine.high %v1905_v44, %v1921_v45  ;;  %v11345_v51 = vcombine.high %v1906_v46, %v1922_v47 }
 0x378   : > { %5235 = vmatpush1.bf16.msra.mxu0 %v11086_v55  ;;  %5276 = vmatpush1.bf16.msra.mxu1 %v11088_v56  ;;  %v1890_v55 = vld [vmem:[#allocation9 + $0x9f8] sm:$0xff]  ;;  %v11342_v56 = vcombine.low %v1905_v44, %v1921_v45 }
 0x379   : > { %5236 = vmatprep.subr.bf16.mxu0 %v11055_v57  ;;  %5277 = vmatprep.subr.bf16.mxu1 %v11057_v58  ;;  %v11344_v57 = vcombine.low %v1906_v46, %v1922_v47  ;;  %v11311_v58 = vcombine.high %v1873_v52, %v1889_v53  ;;  %v11313_v59 = vcombine.high %v1874_v54, %v1890_v55 }
 0x37c   : > { %5237 = vmatpush1.bf16.msra.mxu0 %v11054_v0  ;;  %5278 = vmatpush1.bf16.msra.mxu1 %v11056_v2  ;;  %v1858_v0 = vld [vmem:[#allocation9 + $0x8f8] sm:$0xff]  ;;  %v11310_v2 = vcombine.low %v1873_v52, %v1889_v53 }
 0x37d   : > { %5238 = vmatprep.subr.bf16.mxu0 %v11023_v3  ;;  %5279 = vmatprep.subr.bf16.mxu1 %v11025_v4  ;;  %v11312_v3 = vcombine.low %v1874_v54, %v1890_v55  ;;  %v11279_v4 = vcombine.high %v1841_v60, %v1857_v62  ;;  %v11281_v5 = vcombine.high %v1842_v63, %v1858_v0 }
 0x37e   : > { %v11280_v7 = vcombine.low %v1842_v63, %v1858_v0 }
 0x380   : > { %5239 = vmatpush1.bf16.msra.mxu0 %v11022_v9  ;;  %5280 = vmatpush1.bf16.msra.mxu1 %v11024_v10 }
 0x381   : > { %5240 = vmatprep.subr.bf16.mxu0 %v11503_v11  ;;  %5281 = vmatprep.subr.bf16.mxu1 %v11505_v13 }
 0x384   : > { %5241 = vmatpush2.bf16.msra.mxu0 %v11502_v17  ;;  %5282 = vmatpush2.bf16.msra.mxu1 %v11504_v18 }
 0x385   : > { %5242 = vmatprep.subr.bf16.mxu0 %v11471_v19  ;;  %5283 = vmatprep.subr.bf16.mxu1 %v11473_v20 }
 0x388   : > { %5243 = vmatpush2.bf16.msra.mxu0 %v11470_v25  ;;  %5284 = vmatpush2.bf16.msra.mxu1 %v11472_v26 }
 0x389   : > { %5244 = vmatprep.subr.bf16.mxu0 %v11439_v27  ;;  %5285 = vmatprep.subr.bf16.mxu1 %v11441_v28 }
 0x38c   : > { %5245 = vmatpush2.bf16.msra.mxu0 %v11438_v33  ;;  %5286 = vmatpush2.bf16.msra.mxu1 %v11440_v34 }
 0x38d   : > { %5246 = vmatprep.subr.bf16.mxu0 %v11407_v35  ;;  %5287 = vmatprep.subr.bf16.mxu1 %v11409_v36 }
 0x390   : > { %5247 = vmatpush2.bf16.msra.mxu0 %v11406_v1  ;;  %5288 = vmatpush2.bf16.msra.mxu1 %v11408_v41 }
 0x391   : > { %5248 = vmatprep.subr.bf16.mxu0 %v11375_v42  ;;  %5289 = vmatprep.subr.bf16.mxu1 %v11377_v43 }
 0x394   : > { %5249 = vmatpush2.bf16.msra.mxu0 %v11374_v48  ;;  %5290 = vmatpush2.bf16.msra.mxu1 %v11376_v49 }
 0x395   : > { %5250 = vmatprep.subr.bf16.mxu0 %v11343_v50  ;;  %5291 = vmatprep.subr.bf16.mxu1 %v11345_v51 }
 0x398   : > { %5251 = vmatpush2.bf16.msra.mxu0 %v11342_v56  ;;  %5292 = vmatpush2.bf16.msra.mxu1 %v11344_v57 }
 0x399   : > { %5252 = vmatprep.subr.bf16.mxu0 %v11311_v58  ;;  %5293 = vmatprep.subr.bf16.mxu1 %v11313_v59 }
 0x39c   : > { %5253 = vmatpush2.bf16.msra.mxu0 %v11310_v2  ;;  %5294 = vmatpush2.bf16.msra.mxu1 %v11312_v3 }
 0x39d   : > { %5254 = vmatprep.subr.bf16.mxu0 %v11279_v4  ;;  %5295 = vmatprep.subr.bf16.mxu1 %v11281_v5 }
 0x3a0   : > { %5255 = vmatpush2.bf16.msra.mxu0 %v11278_v6  ;;  %5296 = vmatpush2.bf16.msra.mxu1 %v11280_v7 }
 0x3a3   : > { %v5012_v8 = vpop.f32.mrf.mxu0  ;;  %5257 = vmatmul.mubr.bf16.vlgmr.msra.gmra.mxu0 %v13551_v31  ;;  %v5053_v9 = vpop.f32.mrf.mxu1  ;;  %5298 = vmatmul.mubr.bf16.vlgmr.msra.gmra.mxu1 %v13551_v31 }
 0x3a4   : > { %5322 = vst [vmem:[#allocation3 + $0x38] sm:$0xff] %v5012_v8  ;;  %5324 = vst [vmem:[#allocation3 + $0x40] sm:$0xff] %v5053_v9 }
 0x3a5   : > { %v5014_v10 = vpop.f32.mrf.mxu0  ;;  %v5055_v11 = vpop.f32.mrf.mxu1 }
 0x3a6   : > { %5323 = vst [vmem:[#allocation3 + $0x58] sm:$0xff] %v5014_v10  ;;  %5325 = vst [vmem:[#allocation3 + $0xc8] sm:$0xff] %v5055_v11 }
 0x3a7   : > { %v5016_v13 = vpop.f32.mrf.mxu0  ;;  %v5057_v14 = vpop.f32.mrf.mxu1 }
 0x3a9   : > { %v5017_v15 = vpop.f32.mrf.mxu0  ;;  %v5058_v12 = vpop.f32.mrf.mxu1 }
 0x3e3   : > { %v5094_v16 = vpop.f32.mrf.mxu0  ;;  %v5135_v17 = vpop.f32.mrf.mxu1 }
 0x3e4   : > { %5326 = vst [vmem:[#allocation3 + $0xe0] sm:$0xff] %v5094_v16  ;;  %5328 = vst [vmem:[#allocation3 + $0x70] sm:$0xff] %v5135_v17 }
 0x3e5   : > { %v5096_v18 = vpop.f32.mrf.mxu0  ;;  %v5137_v19 = vpop.f32.mrf.mxu1 }
 0x3e6   : > { %5327 = vst [vmem:[#allocation3 + $0x90] sm:$0xff] %v5096_v18  ;;  %5329 = vst [vmem:[#allocation3 + $0xc0] sm:$0xff] %v5137_v19 }
 0x3e7   : > { %v5098_v20 = vpop.f32.mrf.mxu0  ;;  %v5139_v21 = vpop.f32.mrf.mxu1 }
 0x3e9   : > { %v5099_v31 = vpop.f32.mrf.mxu0  ;;  %v5140_v22 = vpop.f32.mrf.mxu1 }
 0x423   : > { %v5176_v23 = vpop.f32.mrf.mxu0  ;;  %v5217_v24 = vpop.f32.mrf.mxu1 }
 0x424   : > { %5330 = vst [vmem:[#allocation3 + $0xa8] sm:$0xff] %v5176_v23  ;;  %5332 = vst [vmem:[#allocation3 + $0x10] sm:$0xff] %v5217_v24 }
 0x425   : > { %v5178_v25 = vpop.f32.mrf.mxu0  ;;  %v5219_v26 = vpop.f32.mrf.mxu1 }
 0x426   : > { %5331 = vst [vmem:[#allocation3 + $0xd0] sm:$0xff] %v5178_v25  ;;  %5333 = vst [vmem:[#allocation3 + $0x28] sm:$0xff] %v5219_v26 }
 0x427   : > { %v5180_v27 = vpop.f32.mrf.mxu0  ;;  %v5221_v28 = vpop.f32.mrf.mxu1 }
 0x429   : > { %v5181_v29 = vpop.f32.mrf.mxu0  ;;  %v5222_v61 = vpop.f32.mrf.mxu1 }
 0x463   : > { %v5258_v30 = vpop.f32.mrf.mxu0  ;;  %v5299_v32 = vpop.f32.mrf.mxu1 }
 0x464   : > { %5334 = vst [vmem:[#allocation3 + $0xa0] sm:$0xff] %v5258_v30  ;;  %5336 = vst [vmem:[#allocation3 + $0x20] sm:$0xff] %v5299_v32 }
 0x465   : > { %v5260_v33 = vpop.f32.mrf.mxu0  ;;  %v5301_v34 = vpop.f32.mrf.mxu1 }
 0x466   : > { %5335 = vst [vmem:[#allocation3 + $0xf8] sm:$0xff] %v5260_v33  ;;  %5337 = vst [vmem:[#allocation3 + $0x98] sm:$0xff] %v5301_v34 }
 0x467   : > { %v5262_v35 = vpop.f32.mrf.mxu0  ;;  %v5303_v36 = vpop.f32.mrf.mxu1 }
 0x469   : > { %v5263_v37 = vpop.f32.mrf.mxu0  ;;  %v5304_v38 = vpop.f32.mrf.mxu1 }
 0x46a PF: > { %v12138_v39 = vld [vmem:[%s13474_s8 + $0x74] ss:$8 sps:$4 sm:$0xff]   ;;  %v12142_v1 = vld [vmem:[%s13474_s8 + $0x70] ss:$8 sps:$4 sm:$0xff]   ;;  %v12144_v42 = vld [vmem:[%s13474_s8 + $0x64] ss:$8 sps:$4 sm:$0xff]  }
 0x46b   : > { %v12140_v40 = vld [vmem:[%s13474_s8 + $0x174] ss:$8 sps:$4 sm:$0xff]   ;;  %10053 = vmatprep.subr.bf16.mxu0 %v12138_v39  ;;  %v12143_v41 = vld [vmem:[%s13474_s8 + $0x170] ss:$8 sps:$4 sm:$0xff]   ;;  %v12146_v43 = vld [vmem:[%s13474_s8 + $0x164] ss:$8 sps:$4 sm:$0xff]  }
 0x46c   : > { %10094 = vmatprep.subr.bf16.mxu1 %v12140_v40  ;;  %10054 = vmatpush1.bf16.msra.mxu0 %v12142_v1  ;;  %v12148_v44 = vld [vmem:[%s13474_s8 + $0x60] ss:$8 sps:$4 sm:$0xff]   ;;  %v12150_v46 = vld [vmem:[%s13474_s8 + $0x54] ss:$8 sps:$4 sm:$0xff]   ;;  %v12154_v48 = vld [vmem:[%s13474_s8 + $0x50] ss:$8 sps:$4 sm:$0xff]  }
 0x46d   : > { %10095 = vmatpush1.bf16.msra.mxu1 %v12143_v41  ;;  %10055 = vmatprep.subr.bf16.mxu0 %v12144_v42  ;;  %v12149_v45 = vld [vmem:[%s13474_s8 + $0x160] ss:$8 sps:$4 sm:$0xff]   ;;  %v12152_v47 = vld [vmem:[%s13474_s8 + $0x154] ss:$8 sps:$4 sm:$0xff]   ;;  %v12155_v49 = vld [vmem:[%s13474_s8 + $0x150] ss:$8 sps:$4 sm:$0xff]  }
 0x46e   : > { %10096 = vmatprep.subr.bf16.mxu1 %v12146_v43  ;;  %v12156_v50 = vld [vmem:[%s13474_s8 + $0x44] ss:$8 sps:$4 sm:$0xff]   ;;  %v12160_v52 = vld [vmem:[%s13474_s8 + $0x40] ss:$8 sps:$4 sm:$0xff]   ;;  %v12162_v54 = vld [vmem:[%s13474_s8 + $0x34] ss:$8 sps:$4 sm:$0xff]  }
 0x46f   : > { %v12158_v51 = vld [vmem:[%s13474_s8 + $0x144] ss:$8 sps:$4 sm:$0xff]   ;;  %v12161_v53 = vld [vmem:[%s13474_s8 + $0x140] ss:$8 sps:$4 sm:$0xff]   ;;  %v12164_v55 = vld [vmem:[%s13474_s8 + $0x134] ss:$8 sps:$4 sm:$0xff]  }
 0x470   : > { %10056 = vmatpush1.bf16.msra.mxu0 %v12148_v44  ;;  %v12166_v56 = vld [vmem:[%s13474_s8 + $0x30] ss:$8 sps:$4 sm:$0xff]   ;;  %v12168_v58 = vld [vmem:[%s13474_s8 + $0x24] ss:$8 sps:$4 sm:$0xff]   ;;  %v12172_v60 = vld [vmem:[%s13474_s8 + $0x20] ss:$8 sps:$4 sm:$0xff]  }
 0x471   : > { %10097 = vmatpush1.bf16.msra.mxu1 %v12149_v45  ;;  %10057 = vmatprep.subr.bf16.mxu0 %v12150_v46  ;;  %v12167_v57 = vld [vmem:[%s13474_s8 + $0x130] ss:$8 sps:$4 sm:$0xff]   ;;  %v12170_v59 = vld [vmem:[%s13474_s8 + $0x124] ss:$8 sps:$4 sm:$0xff]   ;;  %v12173_v62 = vld [vmem:[%s13474_s8 + $0x120] ss:$8 sps:$4 sm:$0xff]  }
 0x472   : > { %10098 = vmatprep.subr.bf16.mxu1 %v12152_v47  ;;  %v12174_v63 = vld [vmem:[%s13474_s8 + $0x14] ss:$8 sps:$4 sm:$0xff]   ;;  %v12178_v2 = vld [vmem:[%s13474_s8 + $0x10] ss:$8 sps:$4 sm:$0xff]   ;;  %v12180_v4 = vld [vmem:[%s13474_s8 + $0x4] ss:$8 sps:$4 sm:$0xff]  }
 0x473   : > { %v12176_v0 = vld [vmem:[%s13474_s8 + $0x114] ss:$8 sps:$4 sm:$0xff]   ;;  %v12179_v3 = vld [vmem:[%s13474_s8 + $0x110] ss:$8 sps:$4 sm:$0xff]   ;;  %v12182_v5 = vld [vmem:[%s13474_s8 + $0x104] ss:$8 sps:$4 sm:$0xff]  }
 0x474   : > { %10058 = vmatpush1.bf16.msra.mxu0 %v12154_v48  ;;  %v12184_v6 = vld [vmem:[%s13474_s8] ss:$8 sps:$4 sm:$0xff]   ;;  %v12186_v8 = vld [vmem:[%s13474_s8 + $0xf4] ss:$8 sps:$4 sm:$0xff]   ;;  %v12190_v10 = vld [vmem:[%s13474_s8 + $0xf0] ss:$8 sps:$4 sm:$0xff]  }
 0x475   : > { %10099 = vmatpush1.bf16.msra.mxu1 %v12155_v49  ;;  %10059 = vmatprep.subr.bf16.mxu0 %v12156_v50  ;;  %v12185_v7 = vld [vmem:[%s13474_s8 + $0x100] ss:$8 sps:$4 sm:$0xff]   ;;  %v12188_v9 = vld [vmem:[%s13474_s8 + $0x1f4] ss:$8 sps:$4 sm:$0xff]   ;;  %v12191_v11 = vld [vmem:[%s13474_s8 + $0x1f0] ss:$8 sps:$4 sm:$0xff]  }
 0x476   : > { %10100 = vmatprep.subr.bf16.mxu1 %v12158_v51  ;;  %v12192_v13 = vld [vmem:[%s13474_s8 + $0xe4] ss:$8 sps:$4 sm:$0xff]   ;;  %v12196_v15 = vld [vmem:[%s13474_s8 + $0xe0] ss:$8 sps:$4 sm:$0xff]   ;;  %v12198_v16 = vld [vmem:[%s13474_s8 + $0xd4] ss:$8 sps:$4 sm:$0xff]  }
 0x477   : > { %v12194_v14 = vld [vmem:[%s13474_s8 + $0x1e4] ss:$8 sps:$4 sm:$0xff]   ;;  %v12197_v12 = vld [vmem:[%s13474_s8 + $0x1e0] ss:$8 sps:$4 sm:$0xff]   ;;  %v12200_v17 = vld [vmem:[%s13474_s8 + $0x1d4] ss:$8 sps:$4 sm:$0xff]  }
 0x478   : > { %10060 = vmatpush1.bf16.msra.mxu0 %v12160_v52  ;;  %v12202_v18 = vld [vmem:[%s13474_s8 + $0xd0] ss:$8 sps:$4 sm:$0xff]   ;;  %v12204_v20 = vld [vmem:[%s13474_s8 + $0xc4] ss:$8 sps:$4 sm:$0xff]   ;;  %v12208_v31 = vld [vmem:[%s13474_s8 + $0xc0] ss:$8 sps:$4 sm:$0xff]  }
 0x479   : > { %10101 = vmatpush1.bf16.msra.mxu1 %v12161_v53  ;;  %10061 = vmatprep.subr.bf16.mxu0 %v12162_v54  ;;  %v12203_v19 = vld [vmem:[%s13474_s8 + $0x1d0] ss:$8 sps:$4 sm:$0xff]   ;;  %v12206_v21 = vld [vmem:[%s13474_s8 + $0x1c4] ss:$8 sps:$4 sm:$0xff]   ;;  %v12209_v22 = vld [vmem:[%s13474_s8 + $0x1c0] ss:$8 sps:$4 sm:$0xff]  }
 0x47a   : > { %10102 = vmatprep.subr.bf16.mxu1 %v12164_v55  ;;  %v13631_v23 = vld [vmem:[#allocation3 + $0xb0] sm:$0xff]  ;;  %v12210_v24 = vld [vmem:[%s13474_s8 + $0xb4] ss:$8 sps:$4 sm:$0xff]   ;;  %v13647_v30 = vld [vmem:[#allocation3 + $0x68] sm:$0xff]  ;;  %s13257_s24 = smov [#allocation15]   ;;  %p12076_p11 = scmp.eq.s32.totalorder %s13394_s29, 1 }
 0x47b   : > { %v13634_v25 = vld [vmem:[#allocation3] sm:$0xff]  ;;  %v13636_v26 = vld [vmem:[#allocation3 + $0xd8] sm:$0xff]  ;;  %v5370_v28 = vrot.slane %v13631_v23, 4  ;;  %v13643_v29 = vmul.f32 %v13631_v23, %v13631_v23  ;;  %v13645_v61 = vld [vmem:[#allocation3 + $0x50] sm:$0xff]  ;;  %v5400_v1 = vrot.slane %v13647_v30, 4  ;;  %s10720_s27 = sshll.u32 %s13257_s24, 4  ;;  %s10721_s27 = int_to_ptr.vmem [resolvable:$true] %s10720_s27 }
 0x47c   : > { %10062 = vmatpush1.bf16.msra.mxu0 %v12166_v56  ;;  %v13638_v27 = vld [vmem:[#allocation3 + $0x18] sm:$0xff]  ;;  %v13649_v32 = vld [vmem:[#allocation3 + $0x30] sm:$0xff]  ;;  %v5376_v33 = vrot.slane %v13634_v25, 4  ;;  %v5382_v34 = vrot.slane %v13636_v26, 4  ;;  %v13656_v36 = vmul.f32 %v13634_v25, %v13634_v25  ;;  %v13659_v38 = vld [vmem:[#allocation3 + $0x48] sm:$0xff]  ;;  %v5394_v40 = vrot.slane %v13645_v61, 4  ;;  %p13160_p12 = scmp.lt.s32.totalorder %s10721_s27, %s10721_s27 }
 0x47d   : > { %10103 = vmatpush1.bf16.msra.mxu1 %v12167_v57  ;;  %10063 = vmatprep.subr.bf16.mxu0 %v12168_v58  ;;  %v5388_v35 = vrot.slane %v13638_v27, 4  ;;  %v12212_v37 = vld [vmem:[%s13474_s8 + $0x1b4] ss:$8 sps:$4 sm:$0xff]   ;;  %v5371_v39 = vadd.f32 %v5370_v28, %v13631_v23  ;;  %v5406_v41 = vrot.slane %v13649_v32, 4  ;;  %v12214_v42 = vld [vmem:[%s13474_s8 + $0xb0] ss:$8 sps:$4 sm:$0xff]   ;;  %v5401_v50 = vadd.f32 %v5400_v1, %v13647_v30 }
 0x47e   : > { %10104 = vmatprep.subr.bf16.mxu1 %v12170_v59  ;;  %v5377_v43 = vadd.f32 %v5376_v33, %v13634_v25  ;;  %v5383_v44 = vadd.f32 %v5382_v34, %v13636_v26  ;;  %v5412_v46 = vrot.slane %v13659_v38, 4  ;;  %v12215_v47 = vld [vmem:[%s13474_s8 + $0x1b0] ss:$8 sps:$4 sm:$0xff]   ;;  %v5395_v49 = vadd.f32 %v5394_v40, %v13645_v61  ;;  %v12216_v52 = vld [vmem:[%s13474_s8 + $0xa4] ss:$8 sps:$4 sm:$0xff]   ;;  %s13153_s11 = scalar_lea.vmem %s10721_s27, 256 }
 0x47f   : > { %v5389_v45 = vadd.f32 %v5388_v35, %v13638_v27  ;;  %v5372_v48 = vrot.slane %v5371_v39, 2  ;;  %v5407_v51 = vadd.f32 %v5406_v41, %v13649_v32  ;;  %v12218_v57 = vld [vmem:[%s13474_s8 + $0x1a4] ss:$8 sps:$4 sm:$0xff]   ;;  %v12227_v28 = vld [vmem:[%s13474_s8 + $0x190] ss:$8 sps:$4 sm:$0xff]   ;;  %p13154_p4 = scmp.ne.s32.totalorder %s10721_s27, %s13153_s11  ;;  %p13161_p2 = scmp.lt.s32.totalorder %s13153_s11, %s13153_s11 }
 0x480   : > { %10064 = vmatpush1.bf16.msra.mxu0 %v12172_v60  ;;  %v5378_v53 = vrot.slane %v5377_v43, 2  ;;  %v5384_v54 = vrot.slane %v5383_v44, 2  ;;  %v5413_v56 = vadd.f32 %v5412_v46, %v13659_v38  ;;  %v5396_v59 = vrot.slane %v5395_v49, 2 }
 0x481   : > { %10105 = vmatpush1.bf16.msra.mxu1 %v12173_v62  ;;  %10065 = vmatprep.subr.bf16.mxu0 %v12174_v63  ;;  %v5390_v55 = vrot.slane %v5389_v45, 2  ;;  %v5373_v58 = vadd.f32 %v5372_v48, %v5371_v39  ;;  %v5402_v60 = vrot.slane %v5401_v50, 2  ;;  %v5408_v62 = vrot.slane %v5407_v51, 2  ;;  %v12220_v63 = vld [vmem:[%s13474_s8 + $0xa0] ss:$8 sps:$4 sm:$0xff]   ;;  %p13155_p0 = pnand %p13154_p4, %p12076_p11  ;;  %p13162_p6 = por %p13161_p2, %p13160_p12 }
 0x482   : > { %10106 = vmatprep.subr.bf16.mxu1 %v12176_v0  ;;  %v5379_v0 = vadd.f32 %v5378_v53, %v5377_v43  ;;  %v12228_v39 = vld [vmem:[%s13474_s8 + $0x84] ss:$8 sps:$4 sm:$0xff]   ;;  %v12233_v53 = vld [vmem:[%s13474_s8 + $0x180] ss:$8 sps:$4 sm:$0xff]  }
 0x483   : > { %v12230_v43 = vld [vmem:[%s13474_s8 + $0x184] ss:$8 sps:$4 sm:$0xff]   ;;  %p13156_p7 = pneg %p13155_p0 }
 0x484   : > { %10066 = vmatpush1.bf16.msra.mxu0 %v12178_v2  ;;  %v5385_v2 = vadd.f32 %v5384_v54, %v5383_v44  ;;  %v5601_v54 = vmul.f32 %v13649_v32, %v13649_v32 }
 0x485   : > { %10107 = vmatpush1.bf16.msra.mxu1 %v12179_v3  ;;  %10067 = vmatprep.subr.bf16.mxu0 %v12180_v4  ;;  %v5391_v3 = vadd.f32 %v5390_v55, %v5389_v45  ;;  %v5414_v4 = vrot.slane %v5413_v56, 2  ;;  %v5602_v55 = vmul.f32 %v13659_v38, %v13659_v38  ;;  %p13163_p3 = pnand %p13162_p6, %p13156_p7 }
 0x486   : > { %10108 = vmatprep.subr.bf16.mxu1 %v12182_v5  ;;  %v12221_v5 = vld [vmem:[%s13474_s8 + $0x1a0] ss:$8 sps:$4 sm:$0xff]  }
 0x488   : > { %10068 = vmatpush1.bf16.msra.mxu0 %v12184_v6  ;;  %v12222_v6 = vld [vmem:[%s13474_s8 + $0x94] ss:$8 sps:$4 sm:$0xff]  }
 0x489   : > { %10109 = vmatpush1.bf16.msra.mxu1 %v12185_v7  ;;  %10069 = vmatprep.subr.bf16.mxu0 %v12186_v8  ;;  %v5374_v7 = vrot.slane %v5373_v58, 1  ;;  %v5397_v8 = vadd.f32 %v5396_v59, %v5395_v49  ;;  %v5598_v49 = vmul.f32 %v13638_v27, %v13638_v27 }
 0x48a   : > { %10110 = vmatprep.subr.bf16.mxu1 %v12188_v9  ;;  %v5403_v9 = vadd.f32 %v5402_v60, %v5401_v50  ;;  %v5599_v50 = vmul.f32 %v13645_v61, %v13645_v61 }
 0x48b   : > { %v5645_v59 = vrot.slane %v5598_v49, 4 }
 0x48c   : > { %10070 = vmatpush2.bf16.msra.mxu0 %v12190_v10  ;;  %v5409_v10 = vadd.f32 %v5408_v62, %v5407_v51  ;;  %v5600_v51 = vmul.f32 %v13647_v30, %v13647_v30  ;;  %v5651_v60 = vrot.slane %v5599_v50, 4 }
 0x48d   : > { %10111 = vmatpush2.bf16.msra.mxu1 %v12191_v11  ;;  %10071 = vmatprep.subr.bf16.mxu0 %v12192_v13  ;;  %v5380_v11 = vrot.slane %v5379_v0, 1  ;;  %v5386_v13 = vrot.slane %v5385_v2, 1 }
 0x48e   : > { %10112 = vmatprep.subr.bf16.mxu1 %v12194_v14  ;;  %v5392_v14 = vrot.slane %v5391_v3, 1  ;;  %v5657_v62 = vrot.slane %v5600_v51, 4 }
 0x490   : > { %10072 = vmatpush2.bf16.msra.mxu0 %v12196_v15  ;;  %v5415_v15 = vadd.f32 %v5414_v4, %v5413_v56  ;;  %v5627_v56 = vrot.slane %v13643_v29, 4  ;;  %v12236_v4 = vld [vmem:[%s13474_s8 + $0x274] ss:$8 sps:$4 sm:$0xff]  }
 0x491   : > { %10113 = vmatpush2.bf16.msra.mxu1 %v12197_v12  ;;  %10073 = vmatprep.subr.bf16.mxu0 %v12198_v16  ;;  %v12224_v12 = vld [vmem:[%s13474_s8 + $0x194] ss:$8 sps:$4 sm:$0xff]   ;;  %v5375_v16 = vadd.f32 %v5374_v7, %v5373_v58  ;;  %v5646_v7 = vadd.f32 %v5645_v59, %v5598_v49 }
 0x492   : > { %10114 = vmatprep.subr.bf16.mxu1 %v12200_v17  ;;  %v5398_v17 = vrot.slane %v5397_v8, 1 }
 0x494   : > { %10074 = vmatpush2.bf16.msra.mxu0 %v12202_v18  ;;  %v5404_v18 = vrot.slane %v5403_v9, 1  ;;  %v5399_v33 = vadd.f32 %v5398_v17, %v5397_v8  ;;  %v5652_v8 = vadd.f32 %v5651_v60, %v5599_v50 }
 0x495   : > { %10115 = vmatpush2.bf16.msra.mxu1 %v12203_v19  ;;  %10075 = vmatprep.subr.bf16.mxu0 %v12204_v20  ;;  %v5410_v19 = vrot.slane %v5409_v10, 1  ;;  %v5381_v20 = vadd.f32 %v5380_v11, %v5379_v0 }
 0x496   : > { %10116 = vmatprep.subr.bf16.mxu1 %v12206_v21  ;;  %v5387_v21 = vadd.f32 %v5386_v13, %v5385_v2  ;;  %v5405_v34 = vadd.f32 %v5404_v18, %v5403_v9  ;;  %v13693_v44 = vmul.f32 0.125, %v5399_v33  ;;  %v5663_v2 = vrot.slane %v5601_v54, 4 }
 0x497   : > { %v5411_v35 = vadd.f32 %v5410_v19, %v5409_v10  ;;  %v13686_v1 = vmul.f32 0.125, %v5381_v20  ;;  %v5658_v9 = vadd.f32 %v5657_v62, %v5600_v51 }
 0x498   : > { %10076 = vmatpush2.bf16.msra.mxu0 %v12208_v31  ;;  %v5393_v31 = vadd.f32 %v5392_v14, %v5391_v3  ;;  %v13688_v41 = vmul.f32 0.125, %v5387_v21  ;;  %v13695_v45 = vmul.f32 0.125, %v5405_v34  ;;  %v5669_v3 = vrot.slane %v5602_v55, 4 }
 0x499   : > { %10117 = vmatpush2.bf16.msra.mxu1 %v12209_v22  ;;  %10077 = vmatprep.subr.bf16.mxu0 %v12210_v24  ;;  %v5416_v22 = vrot.slane %v5415_v15, 1  ;;  %v12226_v24 = vld [vmem:[%s13474_s8 + $0x90] ss:$8 sps:$4 sm:$0xff]   ;;  %v13697_v46 = vmul.f32 0.125, %v5411_v35  ;;  %v5664_v13 = vadd.f32 %v5663_v2, %v5601_v54 }
 0x49a   : > { %10118 = vmatprep.subr.bf16.mxu1 %v12212_v37  ;;  %v13683_v37 = vmul.f32 0.125, %v5375_v16  ;;  %v5670_v14 = vadd.f32 %v5669_v3, %v5602_v55  ;;  %v5653_v16 = vrot.slane %v5652_v8, 2 }
 0x49b   : > { %v5417_v40 = vadd.f32 %v5416_v22, %v5415_v15  ;;  %v5665_v18 = vrot.slane %v5664_v13, 2 }
 0x49c   : > { %10078 = vmatpush2.bf16.msra.mxu0 %v12214_v42  ;;  %v13690_v42 = vmul.f32 0.125, %v5393_v31  ;;  %v5671_v19 = vrot.slane %v5670_v14, 2  ;;  %v5654_v31 = vadd.f32 %v5653_v16, %v5652_v8  ;;  %v5855_v8 = vmul.f32 %v13693_v44, %v13693_v44 }
 0x49d   : > { %10119 = vmatpush2.bf16.msra.mxu1 %v12215_v47  ;;  %10079 = vmatprep.subr.bf16.mxu0 %v12216_v52  ;;  %v5597_v47 = vmul.f32 %v13636_v26, %v13636_v26  ;;  %v13701_v48 = vmul.f32 0.125, %v5417_v40  ;;  %v12232_v52 = vld [vmem:[%s13474_s8 + $0x80] ss:$8 sps:$4 sm:$0xff]   ;;  %v5666_v33 = vadd.f32 %v5665_v18, %v5664_v13 }
 0x49e   : > { %10120 = vmatprep.subr.bf16.mxu1 %v12218_v57  ;;  %v5633_v57 = vrot.slane %v13656_v36, 4  ;;  %v5672_v34 = vadd.f32 %v5671_v19, %v5670_v14  ;;  %v5655_v40 = vrot.slane %v5654_v31, 1 }
 0x49f   : > { %v5639_v58 = vrot.slane %v5597_v47, 4  ;;  %v5667_v50 = vrot.slane %v5666_v33, 1 }
 0x4a0   : > { %10080 = vmatpush2.bf16.msra.mxu0 %v12220_v63  ;;  %v5628_v63 = vadd.f32 %v5627_v56, %v13643_v29  ;;  %v5634_v0 = vadd.f32 %v5633_v57, %v13656_v36  ;;  %v5659_v29 = vrot.slane %v5658_v9, 2  ;;  %v5673_v51 = vrot.slane %v5672_v34, 1 }
 0x4a1   : > { %10121 = vmatpush2.bf16.msra.mxu1 %v12221_v5  ;;  %10081 = vmatprep.subr.bf16.mxu0 %v12222_v6  ;;  %v12239_v5 = vld [vmem:[%s13474_s8 + $0x374] ss:$8 sps:$4 sm:$0xff]   ;;  %v5640_v6 = vadd.f32 %v5639_v58, %v5597_v47  ;;  %v5656_v54 = vadd.f32 %v5655_v40, %v5654_v31  ;;  %v5668_v56 = vadd.f32 %v5667_v50, %v5666_v33  ;;  %v13256_v50 = vmov 1966171168  }
 0x4a2   : > { %10122 = vmatprep.subr.bf16.mxu1 %v12224_v12  ;;  %v5629_v10 = vrot.slane %v5628_v63, 2  ;;  %v5635_v11 = vrot.slane %v5634_v0, 2  ;;  %v5647_v12 = vrot.slane %v5646_v7, 2  ;;  %v5660_v22 = vadd.f32 %v5659_v29, %v5658_v9 }
 0x4a3   : > { %v5641_v15 = vrot.slane %v5640_v6, 2  ;;  %v5674_v57 = vadd.f32 %v5673_v51, %v5672_v34  ;;  %v5825_v2 = vmul.f32 0.125, %v5668_v56  ;;  %v5856_v9 = vmul.f32 %v13695_v45, %v13695_v45 }
 0x4a4   : > { %10082 = vmatpush2.bf16.msra.mxu0 %v12226_v24  ;;  %v5630_v17 = vadd.f32 %v5629_v10, %v5628_v63  ;;  %v5636_v36 = vadd.f32 %v5635_v11, %v5634_v0  ;;  %v5648_v21 = vadd.f32 %v5647_v12, %v5646_v7  ;;  %v5823_v63 = vmul.f32 0.125, %v5656_v54 }
 0x4a5   : > { %10123 = vmatpush2.bf16.msra.mxu1 %v12227_v28  ;;  %10083 = vmatprep.subr.bf16.mxu0 %v12228_v39  ;;  %v5642_v20 = vadd.f32 %v5641_v15, %v5640_v6  ;;  %v5826_v3 = vmul.f32 0.125, %v5674_v57  ;;  %v5853_v6 = vmul.f32 %v13688_v41, %v13688_v41  ;;  %v5854_v7 = vmul.f32 %v13690_v42, %v13690_v42 }
 0x4a6   : > { %10124 = vmatprep.subr.bf16.mxu1 %v12230_v43  ;;  %v5631_v24 = vrot.slane %v5630_v17, 1  ;;  %v5637_v28 = vrot.slane %v5636_v36, 1  ;;  %v5649_v39 = vrot.slane %v5648_v21, 1  ;;  %v5661_v43 = vrot.slane %v5660_v22, 1 }
 0x4a7   : > { %v5643_v35 = vrot.slane %v5642_v20, 1  ;;  %v5857_v10 = vmul.f32 %v13697_v46, %v13697_v46  ;;  %v5858_v11 = vmul.f32 %v13701_v48, %v13701_v48  ;;  %v5887_v16 = vsub.f32 %v5823_v63, %v5855_v8 }
 0x4a8   : > { %10084 = vmatpush2.bf16.msra.mxu0 %v12232_v52  ;;  %v5632_v47 = vadd.f32 %v5631_v24, %v5630_v17  ;;  %v5638_v49 = vadd.f32 %v5637_v28, %v5636_v36  ;;  %v5662_v55 = vadd.f32 %v5661_v43, %v5660_v22  ;;  %v6052_v51 = vunpack.c.l.s4 %v13256_v50 }
 0x4a9   : > { %10125 = vmatpush2.bf16.msra.mxu1 %v12233_v53  ;;  %10135 = vmatprep.subr.bf16.mxu0 %v12236_v4  ;;  %v5644_v52 = vadd.f32 %v5643_v35, %v5642_v20  ;;  %v5650_v53 = vadd.f32 %v5649_v39, %v5648_v21  ;;  %v5851_v4 = vmul.f32 %v13683_v37, %v13683_v37  ;;  %v5919_v31 = vmax.f32 %v5887_v16, 0.0 }
 0x4aa   : > { %10176 = vmatprep.subr.bf16.mxu1 %v12239_v5  ;;  %v5819_v58 = vmul.f32 0.125, %v5632_v47  ;;  %v5820_v59 = vmul.f32 0.125, %v5638_v49  ;;  %v5824_v0 = vmul.f32 0.125, %v5662_v55  ;;  %v5852_v5 = vmul.f32 %v13686_v1, %v13686_v1 }
 0x4ab   : > { %v5821_v60 = vmul.f32 0.125, %v5644_v52  ;;  %v5822_v62 = vmul.f32 0.125, %v5650_v53  ;;  %v5889_v17 = vsub.f32 %v5825_v2, %v5857_v10  ;;  %v5890_v36 = vsub.f32 %v5826_v3, %v5858_v11 }
 0x4ac   : > { %v5883_v13 = vsub.f32 %v5819_v58, %v5851_v4  ;;  %v5884_v14 = vsub.f32 %v5820_v59, %v5852_v5  ;;  %v5888_v29 = vsub.f32 %v5824_v0, %v5856_v9  ;;  %v5955_v40 = vadd.f32 1e-05, %v5919_v31 }
 0x4ad   : > { %v5885_v15 = vsub.f32 %v5821_v60, %v5853_v6  ;;  %v5886_v12 = vsub.f32 %v5822_v62, %v5854_v7  ;;  %v5921_v24 = vmax.f32 %v5889_v17, 0.0  ;;  %v5922_v34 = vmax.f32 %v5890_v36, 0.0 }
 0x4ae   : > { %v5915_v18 = vmax.f32 %v5883_v13, 0.0  ;;  %v5916_v19 = vmax.f32 %v5884_v14, 0.0  ;;  %v5920_v22 = vmax.f32 %v5888_v29, 0.0  ;;  %v6054_v52 = vlaneseq }
 0x4af   : > { %v5917_v20 = vmax.f32 %v5885_v15, 0.0  ;;  %v5918_v21 = vmax.f32 %v5886_v12, 0.0  ;;  %v5957_v47 = vadd.f32 1e-05, %v5921_v24  ;;  %v5958_v49 = vadd.f32 1e-05, %v5922_v34 }
 0x4b0   : > { %v5951_v28 = vadd.f32 1e-05, %v5915_v18  ;;  %v5952_v33 = vadd.f32 1e-05, %v5916_v19  ;;  %v5956_v43 = vadd.f32 1e-05, %v5920_v22  ;;  %v6053_v53 = vunpack.c.0.s8 %v6052_v51 }
 0x4b1   : > { %v5953_v35 = vadd.f32 1e-05, %v5917_v20  ;;  %v5954_v39 = vadd.f32 1e-05, %v5918_v21  ;;  %v6055_v54 = vshrl.u32 %v6054_v52, 7  ;;  %v5947_v15 = vld [vmem:[%s13480_s17] sm:$0xff] }
 0x4b2   : > { %12906 = vrsqrt.f32 %v5951_v28 }
 0x4b3   : > { %12908 = vrsqrt.f32 %v5952_v33  ;;  %v13737_v56 = vsub.s32 %v6053_v53, %v6055_v54  ;;  %v13746_v12 = vsub.s32 0, %v6055_v54  ;;  %v13748_v29 = vsub.s32 1, %v6055_v54 }
 0x4b4   : > { %12910 = vrsqrt.f32 %v5953_v35  ;;  %v13750_v17 = vsub.s32 2, %v6055_v54  ;;  %v13752_v36 = vsub.s32 3, %v6055_v54  ;;  %v13754_v18 = vsub.s32 4, %v6055_v54 }
 0x4b5   : > { %12912 = vrsqrt.f32 %v5954_v39  ;;  %v13756_v19 = vsub.s32 5, %v6055_v54  ;;  %v13758_v20 = vsub.s32 6, %v6055_v54  ;;  %v13760_v21 = vsub.s32 7, %v6055_v54 }
 0x4b6   : > { %12914 = vrsqrt.f32 %v5955_v40 }
 0x4b7   : > { %12916 = vrsqrt.f32 %v5956_v43 }
 0x4b8   : > { %12918 = vrsqrt.f32 %v5957_v47 }
 0x4b9   : > { %12920 = vrsqrt.f32 %v5958_v49 }
 0x4bf   : > { %v12907_v55 = vpop.eup %12906 }
 0x4c0   : > { %v12909_v57 = vpop.eup %12908 }
 0x4c1   : > { %v12911_v58 = vpop.eup %12910  ;;  %v6047_v59 = vcombine.low %v12907_v55, %v12909_v57 }
 0x4c2   : > { %v12913_v60 = vpop.eup %12912 }
 0x4c3   : > { %v12915_v62 = vpop.eup %12914  ;;  %v6048_v63 = vcombine.low %v12911_v58, %v12913_v60  ;;  %v6057_v0 = vrot.slane %v6047_v59, %v13737_v56 }
 0x4c4   : > { %v12917_v2 = vpop.eup %12916 }
 0x4c5   : > { %v12919_v3 = vpop.eup %12918  ;;  %v6049_v4 = vcombine.low %v12915_v62, %v12917_v2  ;;  %v6064_v5 = vrot.slane %v6048_v63, %v13737_v56  ;;  %v6251_v62 = vld [vmem:[%s13482_s9] sm:$0xff] }
 0x4c6   : > { %v12921_v6 = vpop.eup %12920 }
 0x4c7   : > { %v6050_v7 = vcombine.low %v12919_v3, %v12921_v6  ;;  %v6071_v8 = vrot.slane %v6049_v4, %v13737_v56  ;;  %v6079_v9 = vcombine.low %v6057_v0, %v6064_v5 }
 0x4c9   : > { %v6078_v10 = vrot.slane %v6050_v7, %v13737_v56  ;;  %v6087_v13 = vrot.slane %v6079_v9, %v13737_v56 }
 0x4cb   : > { %v6080_v11 = vcombine.low %v6071_v8, %v6078_v10 }
 0x4cd   : > { %v6094_v14 = vrot.slane %v6080_v11, %v13737_v56 }
 0x4cf   : > { %v6095_v16 = vcombine.low %v6087_v13, %v6094_v14 }
 0x4d1   : > { %v6247_v31 = vmul.f32 %v6095_v16, %v5947_v15 }
 0x4d3   : > { %v6262_v22 = vrot.slane %v6247_v31, %v13746_v12  ;;  %v6266_v24 = vrot.slane %v6247_v31, %v13748_v29  ;;  %v6270_v28 = vrot.slane %v6247_v31, %v13750_v17  ;;  %v6274_v33 = vrot.slane %v6247_v31, %v13752_v36 }
 0x4d4   : > { %v6278_v34 = vrot.slane %v6247_v31, %v13754_v18  ;;  %v6282_v35 = vrot.slane %v6247_v31, %v13756_v19  ;;  %v6286_v39 = vrot.slane %v6247_v31, %v13758_v20  ;;  %v6290_v40 = vrot.slane %v6247_v31, %v13760_v21 }
 0x4d5   : > { %v6419_v43 = vmul.f32 %v6262_v22, %v13683_v37  ;;  %v6420_v47 = vmul.f32 %v6266_v24, %v13686_v1  ;;  %v6421_v49 = vmul.f32 %v6270_v28, %v13688_v41  ;;  %v6422_v50 = vmul.f32 %v6274_v33, %v13690_v42 }
 0x4d6   : > { %v6423_v51 = vmul.f32 %v6278_v34, %v13693_v44  ;;  %v6424_v52 = vmul.f32 %v6282_v35, %v13695_v45  ;;  %v6425_v53 = vmul.f32 %v6286_v39, %v13697_v46  ;;  %v6426_v54 = vmul.f32 %v6290_v40, %v13701_v48 }
 0x4d7   : > { %v6483_v55 = vcombine.low %v6419_v43, %v6420_v47  ;;  %v6484_v57 = vcombine.low %v6421_v49, %v6422_v50  ;;  %v6688_v63 = vmul.f32 %v6266_v24, %v13634_v25  ;;  %v6690_v2 = vmul.f32 %v6274_v33, %v13638_v27 }
 0x4d8   : > { %v6485_v58 = vcombine.low %v6423_v51, %v6424_v52  ;;  %v6486_v59 = vcombine.low %v6425_v53, %v6426_v54  ;;  %v6687_v3 = vmul.f32 %v6262_v22, %v13631_v23  ;;  %v6689_v4 = vmul.f32 %v6270_v28, %v13636_v26  ;;  %v12242_v51 = vld [vmem:[%s13474_s8 + $0x264] ss:$8 sps:$4 sm:$0xff]   ;;  %v12240_v53 = vld [vmem:[%s13474_s8 + $0x260] ss:$8 sps:$4 sm:$0xff]  }
 0x4d9   : > { %v6493_v37 = vrot.slane %v6483_v55, %v13737_v56  ;;  %v6500_v1 = vrot.slane %v6484_v57, %v13737_v56  ;;  %v6692_v5 = vmul.f32 %v6282_v35, %v13647_v30  ;;  %v6694_v6 = vmul.f32 %v6290_v40, %v13659_v38  ;;  %v12237_v35 = vld [vmem:[%s13474_s8 + $0x370] ss:$8 sps:$4 sm:$0xff]   ;;  %v12245_v52 = vld [vmem:[%s13474_s8 + $0x364] ss:$8 sps:$4 sm:$0xff]   ;;  %v12243_v54 = vld [vmem:[%s13474_s8 + $0x360] ss:$8 sps:$4 sm:$0xff]  }
 0x4da   : > { %v6507_v41 = vrot.slane %v6485_v58, %v13737_v56  ;;  %v6514_v42 = vrot.slane %v6486_v59, %v13737_v56  ;;  %v6691_v7 = vmul.f32 %v6278_v34, %v13645_v61  ;;  %v6693_v8 = vmul.f32 %v6286_v39, %v13649_v32  ;;  %v12234_v34 = vld [vmem:[%s13474_s8 + $0x270] ss:$8 sps:$4 sm:$0xff]   ;;  %v12248_v58 = vld [vmem:[%s13474_s8 + $0x254] ss:$8 sps:$4 sm:$0xff]  }
 0x4db   : > { %v6515_v44 = vcombine.low %v6493_v37, %v6500_v1  ;;  %v12251_v59 = vld [vmem:[%s13474_s8 + $0x354] ss:$8 sps:$4 sm:$0xff]   ;;  %v13813_v1 = vld [vmem:[#allocation3 + $0x88] sm:$0xff] }
 0x4dc   : > { %v6516_v60 = vcombine.low %v6507_v41, %v6514_v42  ;;  %v5346_v37 = vld [vmem:[#allocation3 + $0x80] sm:$0xff]  ;;  %v13815_v41 = vld [vmem:[#allocation3 + $0xe8] sm:$0xff]  ;;  %v13817_v42 = vld [vmem:[#allocation3 + $0xb8] sm:$0xff] }
 0x4dd   : > { %v6523_v45 = vrot.slane %v6515_v44, %v13737_v56  ;;  %v13819_v44 = vld [vmem:[#allocation3 + $0x60] sm:$0xff] }
 0x4de   : > { %v6530_v46 = vrot.slane %v6516_v60, %v13737_v56  ;;  %v13821_v60 = vld [vmem:[#allocation3 + $0xf0] sm:$0xff] }
 0x4e0   : > { %v6531_v48 = vcombine.low %v6523_v45, %v6530_v46  ;;  %v5418_v45 = vrot.slane %v5346_v37, 4  ;;  %v5424_v46 = vrot.slane %v13813_v1, 4 }
 0x4e2   : > { %v6683_v0 = vsub.f32 %v6251_v62, %v6531_v48  ;;  %v5430_v62 = vrot.slane %v13815_v41, 4  ;;  %v13825_v48 = vld [vmem:[#allocation3 + $0x8] sm:$0xff] }
 0x4e4   : > { %v6730_v9 = vrot.slane %v6683_v0, %v13748_v29  ;;  %v6738_v10 = vrot.slane %v6683_v0, %v13752_v36  ;;  %v6726_v25 = vrot.slane %v6683_v0, %v13746_v12  ;;  %v6734_v27 = vrot.slane %v6683_v0, %v13750_v17 }
 0x4e5   : > { %v6746_v23 = vrot.slane %v6683_v0, %v13756_v19  ;;  %v6754_v26 = vrot.slane %v6683_v0, %v13760_v21  ;;  %v6742_v30 = vrot.slane %v6683_v0, %v13754_v18  ;;  %v6750_v61 = vrot.slane %v6683_v0, %v13758_v20 }
 0x4e6   : > { %v6884_v38 = vadd.f32 %v6730_v9, %v6688_v63  ;;  %v6886_v32 = vadd.f32 %v6738_v10, %v6690_v2  ;;  %v6883_v11 = vadd.f32 %v6726_v25, %v6687_v3  ;;  %v6885_v13 = vadd.f32 %v6734_v27, %v6689_v4  ;;  %v13827_v63 = vld [vmem:[#allocation3 + $0x78] sm:$0xff]  ;;  %v12254_v25 = vld [vmem:[%s13474_s8 + $0x244] ss:$8 sps:$4 sm:$0xff]  }
 0x4e7   : > { %v6888_v14 = vadd.f32 %v6746_v23, %v6692_v5  ;;  %v6890_v15 = vadd.f32 %v6754_v26, %v6694_v6  ;;  %v13801_v16 = vadd.f32 %v6742_v30, %v6691_v7  ;;  %v13803_v31 = vadd.f32 %v6750_v61, %v6693_v8  ;;  %v12246_v5 = vld [vmem:[%s13474_s8 + $0x250] ss:$8 sps:$4 sm:$0xff]   ;;  %v12257_v61 = vld [vmem:[%s13474_s8 + $0x344] ss:$8 sps:$4 sm:$0xff]  }
 0x4e8   : > { %v6916_v22 = vmax.f32 %v6884_v38, 0.0  ;;  %v6918_v24 = vmax.f32 %v6886_v32, 0.0  ;;  %v6915_v28 = vmax.f32 %v6883_v11, 0.0  ;;  %v6917_v33 = vmax.f32 %v6885_v13, 0.0  ;;  %v12249_v10 = vld [vmem:[%s13474_s8 + $0x350] ss:$8 sps:$4 sm:$0xff]  }
 0x4e9   : > { %v6920_v39 = vmax.f32 %v6888_v14, 0.0  ;;  %v6922_v40 = vmax.f32 %v6890_v15, 0.0  ;;  %v5436_v0 = vrot.slane %v13817_v42, 4  ;;  %v5442_v2 = vrot.slane %v13819_v44, 4 }
 0x4ea   : > { %v6948_v43 = vpack.c.bf16 %v6916_v22, %v6916_v22  ;;  %v6950_v47 = vpack.c.bf16 %v6918_v24, %v6918_v24  ;;  %v6947_v49 = vpack.c.bf16 %v6915_v28, %v6915_v28  ;;  %v6949_v50 = vpack.c.bf16 %v6917_v33, %v6917_v33  ;;  %v12252_v28 = vld [vmem:[%s13474_s8 + $0x240] ss:$8 sps:$4 sm:$0xff]  }
 0x4eb   : > { %v6952_v55 = vpack.c.bf16 %v6920_v39, %v6920_v39  ;;  %v6954_v57 = vpack.c.bf16 %v6922_v40, %v6922_v40  ;;  %v5448_v3 = vrot.slane %v13821_v60, 4  ;;  %v13832_v4 = vmul.f32 %v5346_v37, %v5346_v37  ;;  %v12255_v33 = vld [vmem:[%s13474_s8 + $0x340] ss:$8 sps:$4 sm:$0xff]  }
 0x4ec   : > { %10085 = vmatprep.mubr.bf16.mxu0 %v6948_v43  ;;  %10126 = vmatprep.mubr.bf16.mxu1 %v6950_v47  ;;  %v5419_v6 = vadd.f32 %v5418_v45, %v5346_v37  ;;  %v5425_v7 = vadd.f32 %v5424_v46, %v13813_v1  ;;  %v5431_v8 = vadd.f32 %v5430_v62, %v13815_v41  ;;  %v5454_v9 = vrot.slane %v13825_v48, 4  ;;  %v12260_v43 = vld [vmem:[%s13474_s8 + $0x234] ss:$8 sps:$4 sm:$0xff]   ;;  %v12258_v46 = vld [vmem:[%s13474_s8 + $0x230] ss:$8 sps:$4 sm:$0xff]  }
 0x4ed   : > { %10086 = vmatmul.mubr.bf16.vlgmr.msra.gmra.mxu0 %v6947_v49  ;;  %10127 = vmatmul.mubr.bf16.vlgmr.msra.gmra.mxu1 %v6949_v50  ;;  %v5437_v27 = vadd.f32 %v5436_v0, %v13817_v42  ;;  %v5443_v23 = vadd.f32 %v5442_v2, %v13819_v44  ;;  %v5449_v26 = vadd.f32 %v5448_v3, %v13821_v60  ;;  %v5460_v30 = vrot.slane %v13827_v63, 4 }
 0x4ee   : > { %10136 = vmatpush1.bf16.msra.mxu0 %v12234_v34  ;;  %10177 = vmatpush1.bf16.msra.mxu1 %v12237_v35  ;;  %v5420_v38 = vrot.slane %v5419_v6, 2  ;;  %v5426_v32 = vrot.slane %v5425_v7, 2  ;;  %v5432_v11 = vrot.slane %v5431_v8, 2  ;;  %v5455_v13 = vadd.f32 %v5454_v9, %v13825_v48 }
 0x4ef   : > { %10137 = vmatprep.subr.bf16.mxu0 %v12242_v51  ;;  %10178 = vmatprep.subr.bf16.mxu1 %v12245_v52  ;;  %v5438_v14 = vrot.slane %v5437_v27, 2  ;;  %v5444_v15 = vrot.slane %v5443_v23, 2  ;;  %v5450_v22 = vrot.slane %v5449_v26, 2  ;;  %v5461_v24 = vadd.f32 %v5460_v30, %v13827_v63  ;;  %v12263_v52 = vld [vmem:[%s13474_s8 + $0x334] ss:$8 sps:$4 sm:$0xff]  }
 0x4f0   : > { %10167 = vmatprep.mubr.bf16.mxu0 %v6952_v55  ;;  %10208 = vmatprep.mubr.bf16.mxu1 %v6954_v57  ;;  %v5421_v34 = vadd.f32 %v5420_v38, %v5419_v6  ;;  %v5427_v35 = vadd.f32 %v5426_v32, %v5425_v7  ;;  %v5433_v39 = vadd.f32 %v5432_v11, %v5431_v8  ;;  %v5456_v40 = vrot.slane %v5455_v13, 2  ;;  %v12266_v6 = vld [vmem:[%s13474_s8 + $0x224] ss:$8 sps:$4 sm:$0xff]  }
 0x4f1   : > { %v5439_v47 = vadd.f32 %v5438_v14, %v5437_v27  ;;  %v5445_v49 = vadd.f32 %v5444_v15, %v5443_v23  ;;  %v5451_v50 = vadd.f32 %v5450_v22, %v5449_v26  ;;  %v5462_v51 = vrot.slane %v5461_v24, 2  ;;  %v12267_v14 = vld [vmem:[%s13474_s8 + $0x320] ss:$8 sps:$4 sm:$0xff]  }
 0x4f2   : > { %10138 = vmatpush1.bf16.msra.mxu0 %v12240_v53  ;;  %10179 = vmatpush1.bf16.msra.mxu1 %v12243_v54  ;;  %v5422_v53 = vrot.slane %v5421_v34, 1  ;;  %v5428_v54 = vrot.slane %v5427_v35, 1  ;;  %v5434_v55 = vrot.slane %v5433_v39, 1  ;;  %v5457_v57 = vadd.f32 %v5456_v40, %v5455_v13  ;;  %v12264_v13 = vld [vmem:[%s13474_s8 + $0x220] ss:$8 sps:$4 sm:$0xff]  }
 0x4f3   : > { %10139 = vmatprep.subr.bf16.mxu0 %v12248_v58  ;;  %10180 = vmatprep.subr.bf16.mxu1 %v12251_v59  ;;  %v5440_v58 = vrot.slane %v5439_v47, 1  ;;  %v5446_v59 = vrot.slane %v5445_v49, 1  ;;  %v5452_v37 = vrot.slane %v5451_v50, 1  ;;  %v5463_v45 = vadd.f32 %v5462_v51, %v5461_v24  ;;  %v12270_v51 = vld [vmem:[%s13474_s8 + $0x210] ss:$8 sps:$4 sm:$0xff]  }
 0x4f4   : > { %v5423_v62 = vadd.f32 %v5422_v53, %v5421_v34  ;;  %v5429_v0 = vadd.f32 %v5428_v54, %v5427_v35  ;;  %v5435_v2 = vadd.f32 %v5434_v55, %v5433_v39  ;;  %v5458_v3 = vrot.slane %v5457_v57, 1  ;;  %v12278_v55 = vld [vmem:[%s13474_s8 + $0x204] ss:$8 sps:$4 sm:$0xff]  }
 0x4f5   : > { %v5441_v7 = vadd.f32 %v5440_v58, %v5439_v47  ;;  %v5447_v8 = vadd.f32 %v5446_v59, %v5445_v49  ;;  %v5453_v9 = vadd.f32 %v5452_v37, %v5451_v50  ;;  %v5604_v30 = vmul.f32 %v13813_v1, %v13813_v1 }
 0x4f6   : > { %10140 = vmatpush1.bf16.msra.mxu0 %v12246_v5  ;;  %10181 = vmatpush1.bf16.msra.mxu1 %v12249_v10  ;;  %v12261_v5 = vld [vmem:[%s13474_s8 + $0x330] ss:$8 sps:$4 sm:$0xff]   ;;  %v5464_v10 = vrot.slane %v5463_v45, 1  ;;  %v5459_v27 = vadd.f32 %v5458_v3, %v5457_v57  ;;  %v13855_v23 = vmul.f32 0.125, %v5423_v62  ;;  %v13857_v26 = vmul.f32 0.125, %v5429_v0 }
 0x4f7   : > { %10141 = vmatprep.subr.bf16.mxu0 %v12254_v25  ;;  %10182 = vmatprep.subr.bf16.mxu1 %v12257_v61  ;;  %v12269_v25 = vld [vmem:[%s13474_s8 + $0x324] ss:$8 sps:$4 sm:$0xff]   ;;  %v13861_v38 = vmul.f32 0.125, %v5435_v2  ;;  %v13863_v32 = vmul.f32 0.125, %v5441_v7  ;;  %v13865_v11 = vmul.f32 0.125, %v5447_v8  ;;  %v13869_v15 = vmul.f32 0.125, %v5453_v9 }
 0x4f8   : > { %v5465_v61 = vadd.f32 %v5464_v10, %v5463_v45  ;;  %v5605_v22 = vmul.f32 %v13815_v41, %v13815_v41  ;;  %v5606_v24 = vmul.f32 %v13817_v42, %v13817_v42  ;;  %v5607_v1 = vmul.f32 %v13819_v44, %v13819_v44  ;;  %v12275_v42 = vld [vmem:[%s13474_s8 + $0x314] ss:$8 sps:$4 sm:$0xff]   ;;  %v12281_v57 = vld [vmem:[%s13474_s8 + $0x304] ss:$8 sps:$4 sm:$0xff]   ;;  %v12276_v7 = vld [vmem:[%s13474_s8 + $0x200] ss:$8 sps:$4 sm:$0xff]  }
 0x4f9   : > { %v5608_v34 = vmul.f32 %v13821_v60, %v13821_v60  ;;  %v5609_v35 = vmul.f32 %v13825_v48, %v13825_v48  ;;  %v5610_v41 = vmul.f32 %v13827_v63, %v13827_v63  ;;  %v5675_v44 = vrot.slane %v13832_v4, 4  ;;  %v12279_v8 = vld [vmem:[%s13474_s8 + $0x300] ss:$8 sps:$4 sm:$0xff]  }
 0x4fa   : > { %10142 = vmatpush1.bf16.msra.mxu0 %v12252_v28  ;;  %10183 = vmatpush1.bf16.msra.mxu1 %v12255_v33  ;;  %v12272_v28 = vld [vmem:[%s13474_s8 + $0x214] ss:$8 sps:$4 sm:$0xff]   ;;  %v13878_v33 = vmul.f32 0.125, %v5459_v27  ;;  %v5681_v39 = vrot.slane %v5604_v30, 4  ;;  %v5687_v40 = vrot.slane %v5605_v22, 4  ;;  %v5699_v47 = vrot.slane %v5607_v1, 4 }
 0x4fb   : > { %10143 = vmatprep.subr.bf16.mxu0 %v12260_v43  ;;  %10184 = vmatprep.subr.bf16.mxu1 %v12263_v52  ;;  %v5693_v43 = vrot.slane %v5606_v24, 4  ;;  %v5705_v49 = vrot.slane %v5608_v34, 4  ;;  %v5711_v50 = vrot.slane %v5609_v35, 4  ;;  %v5717_v60 = vrot.slane %v5610_v41, 4  ;;  %v12273_v52 = vld [vmem:[%s13474_s8 + $0x310] ss:$8 sps:$4 sm:$0xff]  }
 0x4fc   : > { %v5676_v48 = vadd.f32 %v5675_v44, %v13832_v4  ;;  %v5682_v53 = vadd.f32 %v5681_v39, %v5604_v30  ;;  %v5688_v63 = vadd.f32 %v5687_v40, %v5605_v22  ;;  %v13893_v58 = vmul.f32 0.125, %v5465_v61  ;;  %v12284_v30 = vld [vmem:[%s13474_s8 + $0x2f4] ss:$8 sps:$4 sm:$0xff]   ;;  %v12282_v40 = vld [vmem:[%s13474_s8 + $0x2f0] ss:$8 sps:$4 sm:$0xff]  }
 0x4fd   : > { %v5694_v54 = vadd.f32 %v5693_v43, %v5606_v24  ;;  %v5700_v59 = vadd.f32 %v5699_v47, %v5607_v1  ;;  %v5706_v37 = vadd.f32 %v5705_v49, %v5608_v34  ;;  %v5712_v45 = vadd.f32 %v5711_v50, %v5609_v35  ;;  %v12287_v24 = vld [vmem:[%s13474_s8 + $0x3f4] ss:$8 sps:$4 sm:$0xff]   ;;  %v12285_v43 = vld [vmem:[%s13474_s8 + $0x3f0] ss:$8 sps:$4 sm:$0xff]  }
 0x4fe   : > { %10144 = vmatpush1.bf16.msra.mxu0 %v12258_v46  ;;  %10185 = vmatpush1.bf16.msra.mxu1 %v12261_v5  ;;  %v5677_v46 = vrot.slane %v5676_v48, 2  ;;  %v5683_v62 = vrot.slane %v5682_v53, 2  ;;  %v5689_v4 = vrot.slane %v5688_v63, 2 }
 0x4ff   : > { %10145 = vmatprep.subr.bf16.mxu0 %v12266_v6  ;;  %10186 = vmatprep.subr.bf16.mxu1 %v12269_v25  ;;  %v5695_v0 = vrot.slane %v5694_v54, 2  ;;  %v5701_v2 = vrot.slane %v5700_v59, 2  ;;  %v5707_v3 = vrot.slane %v5706_v37, 2  ;;  %v5713_v5 = vrot.slane %v5712_v45, 2 }
 0x500   : > { %v5718_v6 = vadd.f32 %v5717_v60, %v5610_v41  ;;  %v5678_v9 = vadd.f32 %v5677_v46, %v5676_v48  ;;  %v5684_v10 = vadd.f32 %v5683_v62, %v5682_v53  ;;  %v5690_v25 = vadd.f32 %v5689_v4, %v5688_v63 }
 0x501   : > { %v5696_v27 = vadd.f32 %v5695_v0, %v5694_v54  ;;  %v5702_v61 = vadd.f32 %v5701_v2, %v5700_v59  ;;  %v12293_v54 = vld [vmem:[%s13474_s8 + $0x3e4] ss:$8 sps:$4 sm:$0xff]   ;;  %v5859_v0 = vmul.f32 %v13855_v23, %v13855_v23  ;;  %v5860_v2 = vmul.f32 %v13857_v26, %v13857_v26 }
 0x502   : > { %10146 = vmatpush1.bf16.msra.mxu0 %v12264_v13  ;;  %10187 = vmatpush1.bf16.msra.mxu1 %v12267_v14  ;;  %v5708_v13 = vadd.f32 %v5707_v3, %v5706_v37  ;;  %v5714_v14 = vadd.f32 %v5713_v5, %v5712_v45  ;;  %v5719_v22 = vrot.slane %v5718_v6, 2  ;;  %v5679_v1 = vrot.slane %v5678_v9, 1 }
 0x503   : > { %10147 = vmatprep.subr.bf16.mxu0 %v12272_v28  ;;  %10188 = vmatprep.subr.bf16.mxu1 %v12275_v42  ;;  %v5685_v28 = vrot.slane %v5684_v10, 1  ;;  %v5691_v34 = vrot.slane %v5690_v25, 1  ;;  %v5697_v35 = vrot.slane %v5696_v27, 1  ;;  %v5703_v41 = vrot.slane %v5702_v61, 1 }
 0x504   : > { %v5709_v42 = vrot.slane %v5708_v13, 1  ;;  %v5715_v44 = vrot.slane %v5714_v14, 1  ;;  %v5720_v39 = vadd.f32 %v5719_v22, %v5718_v6  ;;  %v5680_v47 = vadd.f32 %v5679_v1, %v5678_v9  ;;  %v12288_v6 = vld [vmem:[%s13474_s8 + $0x2e0] ss:$8 sps:$4 sm:$0xff]   ;;  %v12294_v22 = vld [vmem:[%s13474_s8 + $0x2d0] ss:$8 sps:$4 sm:$0xff]  }
 0x505   : > { %v5686_v49 = vadd.f32 %v5685_v28, %v5684_v10  ;;  %v5692_v50 = vadd.f32 %v5691_v34, %v5690_v25  ;;  %v5698_v60 = vadd.f32 %v5697_v35, %v5696_v27  ;;  %v5861_v3 = vmul.f32 %v13861_v38, %v13861_v38  ;;  %v12296_v27 = vld [vmem:[%s13474_s8 + $0x2d4] ss:$8 sps:$4 sm:$0xff]  }
 0x506   : > { %10148 = vmatpush1.bf16.msra.mxu0 %v12270_v51  ;;  %10189 = vmatpush1.bf16.msra.mxu1 %v12273_v52  ;;  %v12290_v51 = vld [vmem:[%s13474_s8 + $0x2e4] ss:$8 sps:$4 sm:$0xff]   ;;  %v5704_v52 = vadd.f32 %v5703_v41, %v5702_v61  ;;  %v5710_v48 = vadd.f32 %v5709_v42, %v5708_v13  ;;  %v5716_v53 = vadd.f32 %v5715_v44, %v5714_v14  ;;  %v5721_v63 = vrot.slane %v5720_v39, 1 }
 0x507   : > { %10149 = vmatprep.subr.bf16.mxu0 %v12278_v55  ;;  %10190 = vmatprep.subr.bf16.mxu1 %v12281_v57  ;;  %v5827_v55 = vmul.f32 0.125, %v5680_v47  ;;  %v5828_v57 = vmul.f32 0.125, %v5686_v49  ;;  %v5829_v59 = vmul.f32 0.125, %v5692_v50  ;;  %v5830_v37 = vmul.f32 0.125, %v5698_v60  ;;  %v12302_v41 = vld [vmem:[%s13474_s8 + $0x2c4] ss:$8 sps:$4 sm:$0xff]  }
 0x508   : > { %v5722_v45 = vadd.f32 %v5721_v63, %v5720_v39  ;;  %v5831_v46 = vmul.f32 0.125, %v5704_v52  ;;  %v5832_v62 = vmul.f32 0.125, %v5710_v48  ;;  %v5833_v4 = vmul.f32 0.125, %v5716_v53 }
 0x509   : > { %v5862_v5 = vmul.f32 %v13863_v32, %v13863_v32  ;;  %v5863_v9 = vmul.f32 %v13865_v11, %v13865_v11  ;;  %v5864_v10 = vmul.f32 %v13869_v15, %v13869_v15  ;;  %v5865_v25 = vmul.f32 %v13878_v33, %v13878_v33 }
 0x50a   : > { %10150 = vmatpush1.bf16.msra.mxu0 %v12276_v7  ;;  %10191 = vmatpush1.bf16.msra.mxu1 %v12279_v8  ;;  %v12291_v7 = vld [vmem:[%s13474_s8 + $0x3e0] ss:$8 sps:$4 sm:$0xff]   ;;  %v5834_v8 = vmul.f32 0.125, %v5722_v45  ;;  %v5866_v61 = vmul.f32 %v13893_v58, %v13893_v58  ;;  %v5891_v13 = vsub.f32 %v5827_v55, %v5859_v0  ;;  %v5892_v14 = vsub.f32 %v5828_v57, %v5860_v2  ;;  %v12306_v0 = vld [vmem:[%s13474_s8 + $0x2b0] ss:$8 sps:$4 sm:$0xff]  }
 0x50b   : > { %10151 = vmatprep.subr.bf16.mxu0 %v12284_v30  ;;  %10192 = vmatprep.subr.bf16.mxu1 %v12287_v24  ;;  %v12299_v30 = vld [vmem:[%s13474_s8 + $0x3d4] ss:$8 sps:$4 sm:$0xff]   ;;  %v12297_v24 = vld [vmem:[%s13474_s8 + $0x3d0] ss:$8 sps:$4 sm:$0xff]   ;;  %v5893_v1 = vsub.f32 %v5829_v59, %v5861_v3  ;;  %v5894_v28 = vsub.f32 %v5830_v37, %v5862_v5  ;;  %v5895_v34 = vsub.f32 %v5831_v46, %v5863_v9  ;;  %v12300_v55 = vld [vmem:[%s13474_s8 + $0x2c0] ss:$8 sps:$4 sm:$0xff]  }
 0x50c   : > { %v5896_v35 = vsub.f32 %v5832_v62, %v5864_v10  ;;  %v5897_v42 = vsub.f32 %v5833_v4, %v5865_v25  ;;  %v5898_v44 = vsub.f32 %v5834_v8, %v5866_v61  ;;  %v5923_v39 = vmax.f32 %v5891_v13, 0.0  ;;  %v12303_v57 = vld [vmem:[%s13474_s8 + $0x3c0] ss:$8 sps:$4 sm:$0xff]   ;;  %v12308_v37 = vld [vmem:[%s13474_s8 + $0x2b4] ss:$8 sps:$4 sm:$0xff]  }
 0x50d   : > { %v5925_v47 = vmax.f32 %v5893_v1, 0.0  ;;  %v5926_v49 = vmax.f32 %v5894_v28, 0.0  ;;  %v5927_v50 = vmax.f32 %v5895_v34, 0.0  ;;  %v12311_v46 = vld [vmem:[%s13474_s8 + $0x3b4] ss:$8 sps:$4 sm:$0xff]   ;;  %v6919_v1 = vmax.f32 %v13801_v16, 0.0 }
 0x50e   : > { %10152 = vmatpush2.bf16.msra.mxu0 %v12282_v40  ;;  %10193 = vmatpush2.bf16.msra.mxu1 %v12285_v43  ;;  %v5924_v40 = vmax.f32 %v5892_v14, 0.0  ;;  %v12305_v43 = vld [vmem:[%s13474_s8 + $0x3c4] ss:$8 sps:$4 sm:$0xff]   ;;  %v5928_v60 = vmax.f32 %v5896_v35, 0.0  ;;  %v5959_v52 = vadd.f32 1e-05, %v5923_v39 }
 0x50f   : > { %10153 = vmatprep.subr.bf16.mxu0 %v12290_v51  ;;  %10194 = vmatprep.subr.bf16.mxu1 %v12293_v54  ;;  %v5929_v51 = vmax.f32 %v5897_v42, 0.0  ;;  %v5930_v53 = vmax.f32 %v5898_v44, 0.0  ;;  %v5961_v63 = vadd.f32 1e-05, %v5925_v47  ;;  %v5962_v54 = vadd.f32 1e-05, %v5926_v49 }
 0x510   : > { %v5960_v48 = vadd.f32 1e-05, %v5924_v40  ;;  %v5963_v59 = vadd.f32 1e-05, %v5927_v50  ;;  %12922 = vrsqrt.f32 %v5959_v52  ;;  %v5964_v45 = vadd.f32 1e-05, %v5928_v60 }
 0x511   : > { %v5965_v62 = vadd.f32 1e-05, %v5929_v51  ;;  %v5966_v4 = vadd.f32 1e-05, %v5930_v53  ;;  %v12309_v2 = vld [vmem:[%s13474_s8 + $0x3b0] ss:$8 sps:$4 sm:$0xff]   ;;  %v6951_v51 = vpack.c.bf16 %v6919_v1, %v6919_v1 }
 0x512   : > { %10154 = vmatpush2.bf16.msra.mxu0 %v12288_v6  ;;  %10195 = vmatpush2.bf16.msra.mxu1 %v12291_v7  ;;  %12924 = vrsqrt.f32 %v5960_v48  ;;  %v12314_v3 = vld [vmem:[%s13474_s8 + $0x2a4] ss:$8 sps:$4 sm:$0xff]   ;;  %v12312_v6 = vld [vmem:[%s13474_s8 + $0x2a0] ss:$8 sps:$4 sm:$0xff]   ;;  %v12320_v8 = vld [vmem:[%s13474_s8 + $0x294] ss:$8 sps:$4 sm:$0xff]  }
 0x513   : > { %10155 = vmatprep.subr.bf16.mxu0 %v12296_v27  ;;  %10196 = vmatprep.subr.bf16.mxu1 %v12299_v30  ;;  %12926 = vrsqrt.f32 %v5961_v63  ;;  %v12317_v5 = vld [vmem:[%s13474_s8 + $0x3a4] ss:$8 sps:$4 sm:$0xff]   ;;  %v12315_v7 = vld [vmem:[%s13474_s8 + $0x3a0] ss:$8 sps:$4 sm:$0xff]   ;;  %v12323_v9 = vld [vmem:[%s13474_s8 + $0x394] ss:$8 sps:$4 sm:$0xff]  }
 0x514   : > { %12928 = vrsqrt.f32 %v5962_v54  ;;  %v12318_v25 = vld [vmem:[%s13474_s8 + $0x290] ss:$8 sps:$4 sm:$0xff]   ;;  %v12326_v61 = vld [vmem:[%s13474_s8 + $0x284] ss:$8 sps:$4 sm:$0xff]   ;;  %v6921_v28 = vmax.f32 %v13803_v31, 0.0 }
 0x515   : > { %12930 = vrsqrt.f32 %v5963_v59  ;;  %v12321_v27 = vld [vmem:[%s13474_s8 + $0x390] ss:$8 sps:$4 sm:$0xff]   ;;  %v12329_v13 = vld [vmem:[%s13474_s8 + $0x384] ss:$8 sps:$4 sm:$0xff]   ;;  %v12324_v35 = vld [vmem:[%s13474_s8 + $0x280] ss:$8 sps:$4 sm:$0xff]  }
 0x516   : > { %10156 = vmatpush2.bf16.msra.mxu0 %v12294_v22  ;;  %10197 = vmatpush2.bf16.msra.mxu1 %v12297_v24  ;;  %12932 = vrsqrt.f32 %v5964_v45  ;;  %v12332_v40 = vld [vmem:[%s13474_s8 + $0x474] ss:$8 sps:$4 sm:$0xff]   ;;  %v12330_v16 = vld [vmem:[%s13474_s8 + $0x470] ss:$8 sps:$4 sm:$0xff]   ;;  %v6953_v52 = vpack.c.bf16 %v6921_v28, %v6921_v28  ;;  %v12338_v54 = vld [vmem:[%s13474_s8 + $0x464] ss:$8 sps:$4 sm:$0xff]  }
 0x517   : > { %10157 = vmatprep.subr.bf16.mxu0 %v12302_v41  ;;  %10198 = vmatprep.subr.bf16.mxu1 %v12305_v43  ;;  %12934 = vrsqrt.f32 %v5965_v62  ;;  %v12327_v41 = vld [vmem:[%s13474_s8 + $0x380] ss:$8 sps:$4 sm:$0xff]   ;;  %v12335_v43 = vld [vmem:[%s13474_s8 + $0x574] ss:$8 sps:$4 sm:$0xff]   ;;  %v12333_v49 = vld [vmem:[%s13474_s8 + $0x570] ss:$8 sps:$4 sm:$0xff]  }
 0x518   : > { %12936 = vrsqrt.f32 %v5966_v4  ;;  %v12339_v59 = vld [vmem:[%s13474_s8 + $0x560] ss:$8 sps:$4 sm:$0xff]   ;;  %v12344_v62 = vld [vmem:[%s13474_s8 + $0x454] ss:$8 sps:$4 sm:$0xff]  }
 0x519   : > { %v12347_v4 = vld [vmem:[%s13474_s8 + $0x554] ss:$8 sps:$4 sm:$0xff]  }
 0x51a   : > { %10158 = vmatpush2.bf16.msra.mxu0 %v12300_v55  ;;  %10199 = vmatpush2.bf16.msra.mxu1 %v12303_v57  ;;  %v12341_v55 = vld [vmem:[%s13474_s8 + $0x564] ss:$8 sps:$4 sm:$0xff]   ;;  %v12336_v57 = vld [vmem:[%s13474_s8 + $0x460] ss:$8 sps:$4 sm:$0xff]  }
 0x51b   : > { %10159 = vmatprep.subr.bf16.mxu0 %v12308_v37  ;;  %10200 = vmatprep.subr.bf16.mxu1 %v12311_v46 }
 0x51d   : > { %v12923_v10 = vpop.eup %12922 }
 0x51e   : > { %10160 = vmatpush2.bf16.msra.mxu0 %v12306_v0  ;;  %10201 = vmatpush2.bf16.msra.mxu1 %v12309_v2  ;;  %v12342_v0 = vld [vmem:[%s13474_s8 + $0x450] ss:$8 sps:$4 sm:$0xff]  }
 0x51f   : > { %10161 = vmatprep.subr.bf16.mxu0 %v12314_v3  ;;  %10202 = vmatprep.subr.bf16.mxu1 %v12317_v5  ;;  %v12925_v30 = vpop.eup %12924  ;;  %v12345_v2 = vld [vmem:[%s13474_s8 + $0x550] ss:$8 sps:$4 sm:$0xff]   ;;  %v5948_v3 = vld [vmem:[%s13480_s17 + $0x8] sm:$0xff] }
 0x520   : > { %v12927_v14 = vpop.eup %12926  ;;  %v6096_v22 = vcombine.low %v12923_v10, %v12925_v30  ;;  %v12348_v10 = vld [vmem:[%s13474_s8 + $0x440] ss:$8 sps:$4 sm:$0xff]  }
 0x521   : > { %v12929_v24 = vpop.eup %12928 }
 0x522   : > { %10162 = vmatpush2.bf16.msra.mxu0 %v12312_v6  ;;  %10203 = vmatpush2.bf16.msra.mxu1 %v12315_v7  ;;  %v12931_v34 = vpop.eup %12930  ;;  %v6097_v42 = vcombine.low %v12927_v14, %v12929_v24  ;;  %v6106_v44 = vrot.slane %v6096_v22, %v13737_v56  ;;  %v12350_v7 = vld [vmem:[%s13474_s8 + $0x444] ss:$8 sps:$4 sm:$0xff]   ;;  %v12359_v14 = vld [vmem:[%s13474_s8 + $0x534] ss:$8 sps:$4 sm:$0xff]  }
 0x523   : > { %10163 = vmatprep.subr.bf16.mxu0 %v12320_v8  ;;  %10204 = vmatprep.subr.bf16.mxu1 %v12323_v9  ;;  %v12933_v39 = vpop.eup %12932  ;;  %v12353_v8 = vld [vmem:[%s13474_s8 + $0x544] ss:$8 sps:$4 sm:$0xff]  }
 0x524   : > { %v12935_v47 = vpop.eup %12934  ;;  %v6098_v31 = vcombine.low %v12931_v34, %v12933_v39  ;;  %v6113_v50 = vrot.slane %v6097_v42, %v13737_v56 }
 0x525   : > { %v12937_v60 = vpop.eup %12936 }
 0x526   : > { %10164 = vmatpush2.bf16.msra.mxu0 %v12318_v25  ;;  %10205 = vmatpush2.bf16.msra.mxu1 %v12321_v27  ;;  %v6099_v48 = vcombine.low %v12935_v47, %v12937_v60  ;;  %v6120_v53 = vrot.slane %v6098_v31, %v13737_v56  ;;  %v6128_v63 = vcombine.low %v6106_v44, %v6113_v50  ;;  %v12351_v25 = vld [vmem:[%s13474_s8 + $0x540] ss:$8 sps:$4 sm:$0xff]   ;;  %v12357_v47 = vld [vmem:[%s13474_s8 + $0x530] ss:$8 sps:$4 sm:$0xff]  }
 0x527   : > { %10165 = vmatprep.subr.bf16.mxu0 %v12326_v61  ;;  %10206 = vmatprep.subr.bf16.mxu1 %v12329_v13  ;;  %v12356_v13 = vld [vmem:[%s13474_s8 + $0x434] ss:$8 sps:$4 sm:$0xff]   ;;  %v12363_v60 = vld [vmem:[%s13474_s8 + $0x520] ss:$8 sps:$4 sm:$0xff]  }
 0x528   : > { %v6127_v37 = vrot.slane %v6099_v48, %v13737_v56  ;;  %v6136_v46 = vrot.slane %v6128_v63, %v13737_v56  ;;  %v12371_v48 = vld [vmem:[%s13474_s8 + $0x514] ss:$8 sps:$4 sm:$0xff]   ;;  %v12366_v63 = vld [vmem:[%s13474_s8 + $0x410] ss:$8 sps:$4 sm:$0xff]  }
 0x52a   : > { %10166 = vmatpush2.bf16.msra.mxu0 %v12324_v35  ;;  %10207 = vmatpush2.bf16.msra.mxu1 %v12327_v41  ;;  %v6129_v45 = vcombine.low %v6120_v53, %v6127_v37 }
 0x52b   : > { %10217 = vmatprep.subr.bf16.mxu0 %v12332_v40  ;;  %10258 = vmatprep.subr.bf16.mxu1 %v12335_v43  ;;  %v12354_v43 = vld [vmem:[%s13474_s8 + $0x430] ss:$8 sps:$4 sm:$0xff]  }
 0x52c   : > { %v6143_v5 = vrot.slane %v6129_v45, %v13737_v56  ;;  %v12970_v45 = vld [vmem:[#allocation3 + $0x88] sm:$0xff] }
 0x52d   : > { %10168 = vmatmul.mubr.bf16.vlgmr.msra.gmra.mxu0 %v6951_v51  ;;  %10209 = vmatmul.mubr.bf16.vlgmr.msra.gmra.mxu1 %v6953_v52  ;;  %v12368_v52 = vld [vmem:[%s13474_s8 + $0x414] ss:$8 sps:$4 sm:$0xff]  }
 0x52e   : > { %10218 = vmatpush1.bf16.msra.mxu0 %v12330_v16  ;;  %10259 = vmatpush1.bf16.msra.mxu1 %v12333_v49  ;;  %v6144_v6 = vcombine.low %v6136_v46, %v6143_v5 }
 0x52f   : > { %10219 = vmatprep.subr.bf16.mxu0 %v12338_v54  ;;  %10260 = vmatprep.subr.bf16.mxu1 %v12341_v55 }
 0x530   : > { %v6248_v9 = vmul.f32 %v6144_v6, %v5948_v3  ;;  %v12972_v3 = vld [vmem:[#allocation3 + $0x80] sm:$0xff]  ;;  %v12973_v6 = vld [vmem:[#allocation3 + $0xe8] sm:$0xff] }
 0x532   : > { %10220 = vmatpush1.bf16.msra.mxu0 %v12336_v57  ;;  %10261 = vmatpush1.bf16.msra.mxu1 %v12339_v59  ;;  %v6294_v27 = vrot.slane %v6248_v9, %v13746_v12  ;;  %v6298_v30 = vrot.slane %v6248_v9, %v13748_v29  ;;  %v6302_v61 = vrot.slane %v6248_v9, %v13750_v17  ;;  %v12369_v57 = vld [vmem:[%s13474_s8 + $0x510] ss:$8 sps:$4 sm:$0xff]   ;;  %v12374_v59 = vld [vmem:[%s13474_s8 + $0x404] ss:$8 sps:$4 sm:$0xff]  }
 0x533   : > { %10221 = vmatprep.subr.bf16.mxu0 %v12344_v62  ;;  %10262 = vmatprep.subr.bf16.mxu1 %v12347_v4  ;;  %v6306_v22 = vrot.slane %v6248_v9, %v13752_v36  ;;  %v13977_v24 = vrot.slane %v6248_v9, %v13754_v18  ;;  %v6314_v1 = vrot.slane %v6248_v9, %v13756_v19  ;;  %v12377_v62 = vld [vmem:[%s13474_s8 + $0x504] ss:$8 sps:$4 sm:$0xff]  }
 0x534   : > { %v13981_v28 = vrot.slane %v6248_v9, %v13758_v20  ;;  %v6322_v34 = vrot.slane %v6248_v9, %v13760_v21  ;;  %v6427_v35 = vmul.f32 %v6294_v27, %v13855_v23  ;;  %v6428_v41 = vmul.f32 %v6298_v30, %v13857_v26  ;;  %v6252_v4 = vld [vmem:[%s13482_s9 + $0x8] sm:$0xff] }
 0x535   : > { %v6429_v42 = vmul.f32 %v6302_v61, %v13861_v38  ;;  %v6430_v44 = vmul.f32 %v6306_v22, %v13863_v32  ;;  %v6431_v39 = vmul.f32 %v13977_v24, %v13865_v11  ;;  %v6432_v40 = vmul.f32 %v6314_v1, %v13869_v15  ;;  %v12362_v38 = vld [vmem:[%s13474_s8 + $0x424] ss:$8 sps:$4 sm:$0xff]  }
 0x536   : > { %10222 = vmatpush1.bf16.msra.mxu0 %v12342_v0  ;;  %10263 = vmatpush1.bf16.msra.mxu1 %v12345_v2  ;;  %v6433_v23 = vmul.f32 %v13981_v28, %v13878_v33  ;;  %v6434_v26 = vmul.f32 %v6322_v34, %v13893_v58  ;;  %v6532_v16 = vcombine.low %v6427_v35, %v6428_v41  ;;  %v12365_v32 = vld [vmem:[%s13474_s8 + $0x524] ss:$8 sps:$4 sm:$0xff]   ;;  %v12360_v58 = vld [vmem:[%s13474_s8 + $0x420] ss:$8 sps:$4 sm:$0xff]   ;;  %v12971_v0 = vld [vmem:[#allocation3 + $0xb8] sm:$0xff] }
 0x537   : > { %10223 = vmatprep.subr.bf16.mxu0 %v12350_v7  ;;  %10264 = vmatprep.subr.bf16.mxu1 %v12353_v8  ;;  %v6533_v11 = vcombine.low %v6429_v42, %v6430_v44  ;;  %v6534_v15 = vcombine.low %v6431_v39, %v6432_v40  ;;  %v6696_v46 = vmul.f32 %v12970_v45, %v6298_v30  ;;  %v14013_v8 = vld [vmem:[#allocation3 + $0x38] sm:$0xff]  ;;  %v14017_v35 = vld [vmem:[#allocation3 + $0x40] sm:$0xff]  ;;  %v14019_v41 = vld [vmem:[#allocation3 + $0xc8] sm:$0xff] }
 0x538   : > { %v6535_v49 = vcombine.low %v6433_v23, %v6434_v26  ;;  %v6542_v31 = vrot.slane %v6532_v16, %v13737_v56  ;;  %v6698_v2 = vmul.f32 %v12971_v0, %v6306_v22  ;;  %v6695_v5 = vmul.f32 %v12972_v3, %v6294_v27  ;;  %v14015_v30 = vld [vmem:[#allocation3 + $0x58] sm:$0xff]  ;;  %v12976_v27 = vld [vmem:[#allocation3 + $0x60] sm:$0xff] }
 0x539   : > { %v6549_v50 = vrot.slane %v6533_v11, %v13737_v56  ;;  %v6556_v33 = vrot.slane %v6534_v15, %v13737_v56  ;;  %v6697_v7 = vmul.f32 %v12973_v6, %v6302_v61  ;;  %v5466_v22 = vrot.slane %v14013_v8, 4  ;;  %v14023_v42 = vld [vmem:[#allocation3 + $0xe0] sm:$0xff] }
 0x53a   : > { %10224 = vmatpush1.bf16.msra.mxu0 %v12348_v10  ;;  %10265 = vmatpush1.bf16.msra.mxu1 %v12351_v25  ;;  %v6563_v51 = vrot.slane %v6535_v49, %v13737_v56  ;;  %v12974_v10 = vld [vmem:[#allocation3 + $0xf0] sm:$0xff]  ;;  %v6699_v61 = vmul.f32 %v12976_v27, %v13977_v24  ;;  %v5478_v44 = vrot.slane %v14017_v35, 4  ;;  %v12372_v39 = vld [vmem:[%s13474_s8 + $0x400] ss:$8 sps:$4 sm:$0xff]   ;;  %v12380_v26 = vld [vmem:[%s13474_s8 + $0x4f4] ss:$8 sps:$4 sm:$0xff]  }
 0x53b   : > { %10225 = vmatprep.subr.bf16.mxu0 %v12356_v13  ;;  %10266 = vmatprep.subr.bf16.mxu1 %v12359_v14  ;;  %v6564_v53 = vcombine.low %v6542_v31, %v6549_v50  ;;  %v6700_v25 = vmul.f32 %v12974_v10, %v6314_v1  ;;  %v12975_v13 = vld [vmem:[#allocation3 + $0x78] sm:$0xff]  ;;  %v5472_v1 = vrot.slane %v14015_v30, 4  ;;  %v12375_v40 = vld [vmem:[%s13474_s8 + $0x500] ss:$8 sps:$4 sm:$0xff]   ;;  %v5467_v24 = vadd.f32 %v5466_v22, %v14013_v8 }
 0x53c   : > { %v6565_v54 = vcombine.low %v6556_v33, %v6563_v51  ;;  %v6702_v14 = vmul.f32 %v12975_v13, %v6322_v34  ;;  %v5484_v34 = vrot.slane %v14019_v41, 4  ;;  %v12383_v16 = vld [vmem:[%s13474_s8 + $0x5f4] ss:$8 sps:$4 sm:$0xff]   ;;  %v5490_v15 = vrot.slane %v14023_v42, 4  ;;  %v12378_v49 = vld [vmem:[%s13474_s8 + $0x4f0] ss:$8 sps:$4 sm:$0xff]  }
 0x53d   : > { %v6572_v55 = vrot.slane %v6564_v53, %v13737_v56 }
 0x53e   : > { %10226 = vmatpush1.bf16.msra.mxu0 %v12354_v43  ;;  %10267 = vmatpush1.bf16.msra.mxu1 %v12357_v47  ;;  %v6579_v37 = vrot.slane %v6565_v54, %v13737_v56  ;;  %v12977_v47 = vld [vmem:[#allocation3 + $0x8] sm:$0xff]  ;;  %v14039_v11 = vadd.f32 %v5484_v34, %v14019_v41 }
 0x53f   : > { %10227 = vmatprep.subr.bf16.mxu0 %v12362_v38  ;;  %10268 = vmatprep.subr.bf16.mxu1 %v12365_v32  ;;  %v6701_v23 = vmul.f32 %v12977_v47, %v13981_v28  ;;  %v5473_v38 = vadd.f32 %v5472_v1, %v14015_v30  ;;  %v14036_v32 = vadd.f32 %v5478_v44, %v14017_v35  ;;  %v12395_v44 = vld [vmem:[%s13474_s8 + $0x5d4] ss:$8 sps:$4 sm:$0xff]  }
 0x540   : > { %v6580_v9 = vcombine.low %v6572_v55, %v6579_v37  ;;  %v14052_v55 = vld [vmem:[#allocation3 + $0x90] sm:$0xff]  ;;  %v14065_v1 = vmul.f32 %v14013_v8, %v14013_v8 }
 0x541   : > { %v12389_v37 = vld [vmem:[%s13474_s8 + $0x5e4] ss:$8 sps:$4 sm:$0xff]   ;;  %v5474_v0 = vrot.slane %v5473_v38, 2  ;;  %v5496_v13 = vrot.slane %v14052_v55, 4 }
 0x542   : > { %10228 = vmatpush1.bf16.msra.mxu0 %v12360_v58  ;;  %10269 = vmatpush1.bf16.msra.mxu1 %v12363_v60  ;;  %v6684_v43 = vsub.f32 %v6252_v4, %v6580_v9 }
 0x543   : > { %10229 = vmatprep.subr.bf16.mxu0 %v12368_v52  ;;  %10270 = vmatprep.subr.bf16.mxu1 %v12371_v48  ;;  %v12381_v48 = vld [vmem:[%s13474_s8 + $0x5f0] ss:$8 sps:$4 sm:$0xff]  }
 0x544   : > { %v6762_v28 = vrot.slane %v6684_v43, %v13748_v29  ;;  %v6770_v31 = vrot.slane %v6684_v43, %v13752_v36  ;;  %v6758_v50 = vrot.slane %v6684_v43, %v13746_v12  ;;  %v6766_v33 = vrot.slane %v6684_v43, %v13750_v17 }
 0x545   : > { %v6778_v58 = vrot.slane %v6684_v43, %v13756_v19  ;;  %v6786_v60 = vrot.slane %v6684_v43, %v13760_v21  ;;  %v6774_v51 = vrot.slane %v6684_v43, %v13754_v18  ;;  %v6782_v52 = vrot.slane %v6684_v43, %v13758_v20  ;;  %v12390_v43 = vld [vmem:[%s13474_s8 + $0x4d0] ss:$8 sps:$4 sm:$0xff]  }
 0x546   : > { %10230 = vmatpush1.bf16.msra.mxu0 %v12366_v63  ;;  %10271 = vmatpush1.bf16.msra.mxu1 %v12369_v57  ;;  %v6892_v53 = vadd.f32 %v6762_v28, %v6696_v46  ;;  %v6894_v63 = vadd.f32 %v6770_v31, %v6698_v2  ;;  %v6891_v54 = vadd.f32 %v6758_v50, %v6695_v5  ;;  %v5468_v57 = vrot.slane %v5467_v24, 2  ;;  %v12393_v31 = vld [vmem:[%s13474_s8 + $0x5d0] ss:$8 sps:$4 sm:$0xff]  }
 0x547   : > { %10231 = vmatprep.subr.bf16.mxu0 %v12374_v59  ;;  %10272 = vmatprep.subr.bf16.mxu1 %v12377_v62  ;;  %v12386_v59 = vld [vmem:[%s13474_s8 + $0x4e4] ss:$8 sps:$4 sm:$0xff]   ;;  %v6893_v45 = vadd.f32 %v6766_v33, %v6697_v7  ;;  %v6896_v62 = vadd.f32 %v6778_v58, %v6700_v25  ;;  %v6898_v4 = vadd.f32 %v6786_v60, %v6702_v14  ;;  %v12384_v7 = vld [vmem:[%s13474_s8 + $0x4e0] ss:$8 sps:$4 sm:$0xff]  }
 0x548   : > { %v6924_v3 = vmax.f32 %v6892_v53, 0.0  ;;  %v6926_v6 = vmax.f32 %v6894_v63, 0.0  ;;  %v6923_v9 = vmax.f32 %v6891_v54, 0.0  ;;  %v14056_v46 = vadd.f32 %v6774_v51, %v6699_v61  ;;  %v12387_v25 = vld [vmem:[%s13474_s8 + $0x5e0] ss:$8 sps:$4 sm:$0xff]  }
 0x549   : > { %v6925_v2 = vmax.f32 %v6893_v45, 0.0  ;;  %v6928_v5 = vmax.f32 %v6896_v62, 0.0  ;;  %v14058_v10 = vadd.f32 %v6782_v52, %v6701_v23  ;;  %v6930_v27 = vmax.f32 %v6898_v4, 0.0  ;;  %v12392_v61 = vld [vmem:[%s13474_s8 + $0x4d4] ss:$8 sps:$4 sm:$0xff]  }
 0x54a   : > { %10232 = vmatpush1.bf16.msra.mxu0 %v12372_v39  ;;  %10273 = vmatpush1.bf16.msra.mxu1 %v12375_v40  ;;  %v6956_v14 = vpack.c.bf16 %v6924_v3, %v6924_v3  ;;  %v6958_v22 = vpack.c.bf16 %v6926_v6, %v6926_v6  ;;  %v14069_v34 = vpack.c.bf16 %v6923_v9, %v6923_v9  ;;  %v12398_v60 = vld [vmem:[%s13474_s8 + $0x4c4] ss:$8 sps:$4 sm:$0xff]   ;;  %v12399_v4 = vld [vmem:[%s13474_s8 + $0x5c0] ss:$8 sps:$4 sm:$0xff]   ;;  %v12404_v9 = vld [vmem:[%s13474_s8 + $0x4b4] ss:$8 sps:$4 sm:$0xff]  }
 0x54b   : > { %10233 = vmatprep.subr.bf16.mxu0 %v12380_v26  ;;  %10274 = vmatprep.subr.bf16.mxu1 %v12383_v16  ;;  %v14073_v39 = vmul.f32 %v14015_v30, %v14015_v30  ;;  %v14077_v40 = vmul.f32 %v14017_v35, %v14017_v35  ;;  %v14080_v8 = vpack.c.bf16 %v6925_v2, %v6925_v2  ;;  %v5480_v26 = vrot.slane %v14036_v32, 2  ;;  %v5360_v30 = vld [vmem:[#allocation3 + $0x70] sm:$0xff]  ;;  %v12407_v2 = vld [vmem:[%s13474_s8 + $0x5b4] ss:$8 sps:$4 sm:$0xff]  }
 0x54c   : > { %10249 = vmatprep.mubr.bf16.mxu0 %v6956_v14  ;;  %10290 = vmatprep.mubr.bf16.mxu1 %v6958_v22  ;;  %v5469_v47 = vadd.f32 %v5468_v57, %v5467_v24  ;;  %v5475_v23 = vadd.f32 %v5474_v0, %v5473_v38  ;;  %v14083_v16 = vpack.c.bf16 %v6928_v5, %v6928_v5  ;;  %v14091_v24 = vld [vmem:[#allocation3 + $0xc0] sm:$0xff]  ;;  %v12401_v51 = vld [vmem:[%s13474_s8 + $0x5c4] ss:$8 sps:$4 sm:$0xff]   ;;  %v12402_v14 = vld [vmem:[%s13474_s8 + $0x4b0] ss:$8 sps:$4 sm:$0xff]  }
 0x54d   : > { %v5491_v28 = vadd.f32 %v5490_v15, %v14023_v42  ;;  %v5497_v35 = vadd.f32 %v5496_v13, %v14052_v55  ;;  %v14089_v50 = vpack.c.bf16 %v6930_v27, %v6930_v27  ;;  %v5481_v58 = vadd.f32 %v5480_v26, %v14036_v32  ;;  %v12405_v26 = vld [vmem:[%s13474_s8 + $0x5b0] ss:$8 sps:$4 sm:$0xff]  }
 0x54e   : > { %10234 = vmatpush2.bf16.msra.mxu0 %v12378_v49  ;;  %10275 = vmatpush2.bf16.msra.mxu1 %v12381_v48  ;;  %v5486_v49 = vrot.slane %v14039_v11, 2  ;;  %v5470_v38 = vrot.slane %v5469_v47, 1  ;;  %v5476_v33 = vrot.slane %v5475_v23, 1  ;;  %v14099_v53 = vmul.f32 %v14019_v41, %v14019_v41 }
 0x54f   : > { %10235 = vmatprep.subr.bf16.mxu0 %v12386_v59  ;;  %10276 = vmatprep.subr.bf16.mxu1 %v12389_v37  ;;  %v5492_v52 = vrot.slane %v5491_v28, 2  ;;  %v5498_v48 = vrot.slane %v5497_v35, 2  ;;  %v5482_v57 = vrot.slane %v5481_v58, 1  ;;  %v5502_v59 = vrot.slane %v5360_v30, 4 }
 0x550   : > { %v5487_v15 = vadd.f32 %v5486_v49, %v14039_v11  ;;  %v5471_v63 = vadd.f32 %v5470_v38, %v5469_v47  ;;  %v5477_v54 = vadd.f32 %v5476_v33, %v5475_v23  ;;  %v5508_v62 = vrot.slane %v14091_v24, 4  ;;  %v12396_v11 = vld [vmem:[%s13474_s8 + $0x4c0] ss:$8 sps:$4 sm:$0xff]   ;;  %v12410_v38 = vld [vmem:[%s13474_s8 + $0x4a4] ss:$8 sps:$4 sm:$0xff]  }
 0x551   : > { %v5493_v37 = vadd.f32 %v5492_v52, %v5491_v28  ;;  %v5499_v45 = vadd.f32 %v5498_v48, %v5497_v35  ;;  %v5483_v0 = vadd.f32 %v5482_v57, %v5481_v58  ;;  %v5503_v3 = vadd.f32 %v5502_v59, %v5360_v30  ;;  %v12413_v33 = vld [vmem:[%s13474_s8 + $0x5a4] ss:$8 sps:$4 sm:$0xff]  }
 0x552   : > { %10236 = vmatpush2.bf16.msra.mxu0 %v12384_v7  ;;  %10277 = vmatpush2.bf16.msra.mxu1 %v12387_v25  ;;  %v5488_v32 = vrot.slane %v5487_v15, 1  ;;  %v14104_v41 = vmul.f32 0.125, %v5471_v63  ;;  %v5615_v6 = vmul.f32 %v14023_v42, %v14023_v42  ;;  %v5509_v25 = vadd.f32 %v5508_v62, %v14091_v24 }
 0x553   : > { %10237 = vmatprep.subr.bf16.mxu0 %v12392_v61  ;;  %10278 = vmatprep.subr.bf16.mxu1 %v12395_v44  ;;  %v5494_v13 = vrot.slane %v5493_v37, 1  ;;  %v5500_v7 = vrot.slane %v5499_v45, 1  ;;  %v5504_v22 = vrot.slane %v5503_v3, 2  ;;  %v14112_v27 = vmul.f32 0.125, %v5477_v54 }
 0x554   : > { %v5489_v5 = vadd.f32 %v5488_v32, %v5487_v15  ;;  %v14114_v61 = vmul.f32 0.125, %v5483_v0  ;;  %v5616_v42 = vmul.f32 %v14052_v55, %v14052_v55  ;;  %v5510_v47 = vrot.slane %v5509_v25, 2  ;;  %v12408_v32 = vld [vmem:[%s13474_s8 + $0x4a0] ss:$8 sps:$4 sm:$0xff]  }
 0x555   : > { %v5495_v44 = vadd.f32 %v5494_v13, %v5493_v37  ;;  %v5617_v23 = vmul.f32 %v5360_v30, %v5360_v30  ;;  %v5505_v49 = vadd.f32 %v5504_v22, %v5503_v3  ;;  %v5723_v35 = vrot.slane %v14065_v1, 4  ;;  %v12411_v37 = vld [vmem:[%s13474_s8 + $0x5a0] ss:$8 sps:$4 sm:$0xff]  }
 0x556   : > { %10238 = vmatpush2.bf16.msra.mxu0 %v12390_v43  ;;  %10279 = vmatpush2.bf16.msra.mxu1 %v12393_v31  ;;  %v5501_v43 = vadd.f32 %v5500_v7, %v5499_v45  ;;  %v14119_v28 = vmul.f32 0.125, %v5489_v5  ;;  %v5729_v31 = vrot.slane %v14073_v39, 4  ;;  %v5511_v55 = vadd.f32 %v5510_v47, %v5509_v25 }
 0x557   : > { %10239 = vmatprep.subr.bf16.mxu0 %v12398_v60  ;;  %10280 = vmatprep.subr.bf16.mxu1 %v12401_v51  ;;  %v14125_v58 = vmul.f32 0.125, %v5495_v44  ;;  %v5618_v60 = vmul.f32 %v14091_v24, %v14091_v24  ;;  %v5506_v51 = vrot.slane %v5505_v49, 1  ;;  %v5724_v15 = vadd.f32 %v5723_v35, %v14065_v1  ;;  %v12422_v35 = vld [vmem:[%s13474_s8 + $0x484] ss:$8 sps:$4 sm:$0xff]  }
 0x558   : > { %v14127_v30 = vmul.f32 0.125, %v5501_v43  ;;  %v5730_v52 = vadd.f32 %v5729_v31, %v14073_v39  ;;  %v5735_v48 = vrot.slane %v14077_v40, 4  ;;  %v5512_v63 = vrot.slane %v5511_v55, 1  ;;  %v12416_v39 = vld [vmem:[%s13474_s8 + $0x494] ss:$8 sps:$4 sm:$0xff]  }
 0x559   : > { %v5741_v54 = vrot.slane %v14099_v53, 4  ;;  %v5747_v57 = vrot.slane %v5615_v6, 4  ;;  %v5753_v59 = vrot.slane %v5616_v42, 4  ;;  %v5507_v45 = vadd.f32 %v5506_v51, %v5505_v49  ;;  %v12425_v31 = vld [vmem:[%s13474_s8 + $0x584] ss:$8 sps:$4 sm:$0xff]  }
 0x55a   : > { %10240 = vmatpush2.bf16.msra.mxu0 %v12396_v11  ;;  %10281 = vmatpush2.bf16.msra.mxu1 %v12399_v4  ;;  %v5725_v62 = vrot.slane %v5724_v15, 2  ;;  %v5731_v11 = vrot.slane %v5730_v52, 2  ;;  %v5736_v1 = vadd.f32 %v5735_v48, %v14077_v40  ;;  %v12419_v4 = vld [vmem:[%s13474_s8 + $0x594] ss:$8 sps:$4 sm:$0xff]   ;;  %v5513_v5 = vadd.f32 %v5512_v63, %v5511_v55 }
 0x55b   : > { %10241 = vmatprep.subr.bf16.mxu0 %v12404_v9  ;;  %10282 = vmatprep.subr.bf16.mxu1 %v12407_v2  ;;  %v5742_v0 = vadd.f32 %v5741_v54, %v14099_v53  ;;  %v5748_v3 = vadd.f32 %v5747_v57, %v5615_v6  ;;  %v5759_v9 = vrot.slane %v5617_v23, 4  ;;  %v14143_v2 = vmul.f32 %v14104_v41, %v14104_v41  ;;  %v12414_v53 = vld [vmem:[%s13474_s8 + $0x490] ss:$8 sps:$4 sm:$0xff]  }
 0x55c   : > { %v5726_v13 = vadd.f32 %v5725_v62, %v5724_v15  ;;  %v5732_v7 = vadd.f32 %v5731_v11, %v5730_v52  ;;  %v5737_v25 = vrot.slane %v5736_v1, 2  ;;  %v14145_v40 = vmul.f32 0.125, %v5507_v45  ;;  %v12417_v6 = vld [vmem:[%s13474_s8 + $0x590] ss:$8 sps:$4 sm:$0xff]  }
 0x55d   : > { %v5749_v22 = vrot.slane %v5748_v3, 2  ;;  %v5754_v44 = vadd.f32 %v5753_v59, %v5616_v42  ;;  %v5760_v49 = vadd.f32 %v5759_v9, %v5617_v23  ;;  %v5765_v51 = vrot.slane %v5618_v60, 4  ;;  %v12420_v59 = vld [vmem:[%s13474_s8 + $0x480] ss:$8 sps:$4 sm:$0xff]  }
 0x55e   : > { %10242 = vmatpush2.bf16.msra.mxu0 %v12402_v14  ;;  %10283 = vmatpush2.bf16.msra.mxu1 %v12405_v26  ;;  %v5743_v14 = vrot.slane %v5742_v0, 2  ;;  %v5727_v43 = vrot.slane %v5726_v13, 1  ;;  %v5733_v47 = vrot.slane %v5732_v7, 1  ;;  %v5738_v26 = vadd.f32 %v5737_v25, %v5736_v1  ;;  %v12428_v1 = vld [vmem:[%s13474_s8 + $0x674] ss:$8 sps:$4 sm:$0xff]  }
 0x55f   : > { %10243 = vmatprep.subr.bf16.mxu0 %v12410_v38  ;;  %10284 = vmatprep.subr.bf16.mxu1 %v12413_v33  ;;  %v5750_v33 = vadd.f32 %v5749_v22, %v5748_v3  ;;  %v5755_v55 = vrot.slane %v5754_v44, 2  ;;  %v5761_v48 = vrot.slane %v5760_v49, 2  ;;  %v5766_v23 = vadd.f32 %v5765_v51, %v5618_v60  ;;  %v12426_v60 = vld [vmem:[%s13474_s8 + $0x670] ss:$8 sps:$4 sm:$0xff]  }
 0x560   : > { %v5744_v38 = vadd.f32 %v5743_v14, %v5742_v0  ;;  %v5728_v15 = vadd.f32 %v5727_v43, %v5726_v13  ;;  %v5734_v42 = vadd.f32 %v5733_v47, %v5732_v7  ;;  %v5739_v52 = vrot.slane %v5738_v26, 1  ;;  %v12429_v13 = vld [vmem:[%s13474_s8 + $0x770] ss:$8 sps:$4 sm:$0xff]  }
 0x561   : > { %v5751_v54 = vrot.slane %v5750_v33, 1  ;;  %v5756_v57 = vadd.f32 %v5755_v55, %v5754_v44  ;;  %v5762_v62 = vadd.f32 %v5761_v48, %v5760_v49  ;;  %v5767_v9 = vrot.slane %v5766_v23, 2 }
 0x562   : > { %10244 = vmatpush2.bf16.msra.mxu0 %v12408_v32  ;;  %10285 = vmatpush2.bf16.msra.mxu1 %v12411_v37  ;;  %v5745_v63 = vrot.slane %v5744_v38, 1  ;;  %v12423_v32 = vld [vmem:[%s13474_s8 + $0x580] ss:$8 sps:$4 sm:$0xff]   ;;  %v14153_v37 = vmul.f32 0.125, %v5513_v5  ;;  %v5740_v45 = vadd.f32 %v5739_v52, %v5738_v26  ;;  %v5835_v11 = vmul.f32 0.125, %v5728_v15 }
 0x563   : > { %10245 = vmatprep.subr.bf16.mxu0 %v12416_v39  ;;  %10286 = vmatprep.subr.bf16.mxu1 %v12419_v4  ;;  %v12431_v39 = vld [vmem:[%s13474_s8 + $0x774] ss:$8 sps:$4 sm:$0xff]   ;;  %v5752_v0 = vadd.f32 %v5751_v54, %v5750_v33  ;;  %v5757_v3 = vrot.slane %v5756_v57, 1  ;;  %v5763_v7 = vrot.slane %v5762_v62, 1  ;;  %v5836_v25 = vmul.f32 0.125, %v5734_v42 }
 0x564   : > { %v5746_v4 = vadd.f32 %v5745_v63, %v5744_v38  ;;  %v5837_v14 = vmul.f32 0.125, %v5740_v45  ;;  %v5868_v5 = vmul.f32 %v14112_v27, %v14112_v27  ;;  %v5768_v44 = vadd.f32 %v5767_v9, %v5766_v23  ;;  %v12432_v15 = vld [vmem:[%s13474_s8 + $0x660] ss:$8 sps:$4 sm:$0xff]  }
 0x565   : > { %v5758_v22 = vadd.f32 %v5757_v3, %v5756_v57  ;;  %v5764_v43 = vadd.f32 %v5763_v7, %v5762_v62  ;;  %v5839_v47 = vmul.f32 0.125, %v5752_v0  ;;  %v5870_v26 = vmul.f32 %v14119_v28, %v14119_v28  ;;  %v12435_v42 = vld [vmem:[%s13474_s8 + $0x760] ss:$8 sps:$4 sm:$0xff]   ;;  %v12440_v57 = vld [vmem:[%s13474_s8 + $0x654] ss:$8 sps:$4 sm:$0xff]  }
 0x566   : > { %10246 = vmatpush2.bf16.msra.mxu0 %v12414_v53  ;;  %10287 = vmatpush2.bf16.msra.mxu1 %v12417_v6  ;;  %v5838_v53 = vmul.f32 0.125, %v5746_v4  ;;  %v5869_v6 = vmul.f32 %v14114_v61, %v14114_v61  ;;  %v5871_v49 = vmul.f32 %v14125_v58, %v14125_v58  ;;  %v5769_v38 = vrot.slane %v5768_v44, 1  ;;  %v12438_v0 = vld [vmem:[%s13474_s8 + $0x650] ss:$8 sps:$4 sm:$0xff]  }
 0x567   : > { %10247 = vmatprep.subr.bf16.mxu0 %v12422_v35  ;;  %10288 = vmatprep.subr.bf16.mxu1 %v12425_v31  ;;  %v12434_v35 = vld [vmem:[%s13474_s8 + $0x664] ss:$8 sps:$4 sm:$0xff]   ;;  %v5840_v33 = vmul.f32 0.125, %v5758_v22  ;;  %v5872_v55 = vmul.f32 %v14127_v30, %v14127_v30  ;;  %v5873_v51 = vmul.f32 %v14145_v40, %v14145_v40  ;;  %v5841_v52 = vmul.f32 0.125, %v5764_v43  ;;  %v12441_v22 = vld [vmem:[%s13474_s8 + $0x750] ss:$8 sps:$4 sm:$0xff]  }
 0x568   : > { %v12437_v31 = vld [vmem:[%s13474_s8 + $0x764] ss:$8 sps:$4 sm:$0xff]   ;;  %v5874_v48 = vmul.f32 %v14153_v37, %v14153_v37  ;;  %v5899_v63 = vsub.f32 %v5835_v11, %v14143_v2  ;;  %v5900_v54 = vsub.f32 %v5836_v25, %v5868_v5  ;;  %v5770_v23 = vadd.f32 %v5769_v38, %v5768_v44  ;;  %v12443_v2 = vld [vmem:[%s13474_s8 + $0x754] ss:$8 sps:$4 sm:$0xff]   ;;  %v12450_v38 = vld [vmem:[%s13474_s8 + $0x630] ss:$8 sps:$4 sm:$0xff]  }
 0x569   : > { %v5903_v45 = vsub.f32 %v5839_v47, %v5871_v49  ;;  %v5904_v62 = vsub.f32 %v5840_v33, %v5872_v55  ;;  %v12446_v44 = vld [vmem:[%s13474_s8 + $0x644] ss:$8 sps:$4 sm:$0xff]   ;;  %v12447_v49 = vld [vmem:[%s13474_s8 + $0x740] ss:$8 sps:$4 sm:$0xff]   ;;  %v12453_v33 = vld [vmem:[%s13474_s8 + $0x730] ss:$8 sps:$4 sm:$0xff]  }
 0x56a   : > { %10248 = vmatpush2.bf16.msra.mxu0 %v12420_v59  ;;  %10289 = vmatpush2.bf16.msra.mxu1 %v12423_v32  ;;  %v5901_v59 = vsub.f32 %v5837_v14, %v5869_v6  ;;  %v5902_v32 = vsub.f32 %v5838_v53, %v5870_v26  ;;  %v5842_v11 = vmul.f32 0.125, %v5770_v23  ;;  %v5932_v4 = vmax.f32 %v5900_v54, 0.0  ;;  %v12444_v26 = vld [vmem:[%s13474_s8 + $0x640] ss:$8 sps:$4 sm:$0xff]   ;;  %v12458_v55 = vld [vmem:[%s13474_s8 + $0x624] ss:$8 sps:$4 sm:$0xff]  }
 0x56b   : > { %10299 = vmatprep.subr.bf16.mxu0 %v12428_v1  ;;  %10340 = vmatprep.subr.bf16.mxu1 %v12431_v39  ;;  %v5905_v1 = vsub.f32 %v5841_v52, %v5873_v51  ;;  %v5931_v39 = vmax.f32 %v5899_v63, 0.0  ;;  %v5935_v3 = vmax.f32 %v5903_v45, 0.0  ;;  %v5936_v9 = vmax.f32 %v5904_v62, 0.0  ;;  %v12461_v51 = vld [vmem:[%s13474_s8 + $0x724] ss:$8 sps:$4 sm:$0xff]  }
 0x56c   : > { %v5906_v7 = vsub.f32 %v5842_v11, %v5874_v48  ;;  %v5968_v25 = vadd.f32 1e-05, %v5932_v4  ;;  %v12464_v48 = vld [vmem:[%s13474_s8 + $0x614] ss:$8 sps:$4 sm:$0xff]   ;;  %v12465_v45 = vld [vmem:[%s13474_s8 + $0x710] ss:$8 sps:$4 sm:$0xff]  }
 0x56d   : > { %10250 = vmatmul.mubr.bf16.vlgmr.msra.gmra.mxu0 %v14069_v34  ;;  %10291 = vmatmul.mubr.bf16.vlgmr.msra.gmra.mxu1 %v14080_v8  ;;  %v5933_v34 = vmax.f32 %v5901_v59, 0.0  ;;  %v5934_v8 = vmax.f32 %v5902_v32, 0.0  ;;  %v5971_v53 = vadd.f32 1e-05, %v5935_v3  ;;  %v5972_v6 = vadd.f32 1e-05, %v5936_v9 }
 0x56e   : > { %10300 = vmatpush1.bf16.msra.mxu0 %v12426_v60  ;;  %10341 = vmatpush1.bf16.msra.mxu1 %v12429_v13  ;;  %v5937_v60 = vmax.f32 %v5905_v1, 0.0  ;;  %v5967_v13 = vadd.f32 1e-05, %v5931_v39  ;;  %v12467_v63 = vld [vmem:[%s13474_s8 + $0x714] ss:$8 sps:$4 sm:$0xff]  }
 0x56f   : > { %10301 = vmatprep.subr.bf16.mxu0 %v12434_v35  ;;  %10342 = vmatprep.subr.bf16.mxu1 %v12437_v31  ;;  %v5969_v14 = vadd.f32 1e-05, %v5933_v34  ;;  %v5970_v5 = vadd.f32 1e-05, %v5934_v8  ;;  %v12452_v35 = vld [vmem:[%s13474_s8 + $0x634] ss:$8 sps:$4 sm:$0xff]  }
 0x570   : > { %10331 = vmatprep.mubr.bf16.mxu0 %v14083_v16  ;;  %10372 = vmatprep.mubr.bf16.mxu1 %v14089_v50  ;;  %12938 = vrsqrt.f32 %v5967_v13  ;;  %v12449_v16 = vld [vmem:[%s13474_s8 + $0x744] ss:$8 sps:$4 sm:$0xff]   ;;  %v5938_v50 = vmax.f32 %v5906_v7, 0.0  ;;  %v5973_v43 = vadd.f32 1e-05, %v5937_v60 }
 0x571   : > { %12940 = vrsqrt.f32 %v5968_v25  ;;  %v12455_v31 = vld [vmem:[%s13474_s8 + $0x734] ss:$8 sps:$4 sm:$0xff]   ;;  %v12462_v32 = vld [vmem:[%s13474_s8 + $0x610] ss:$8 sps:$4 sm:$0xff]   ;;  %v12470_v1 = vld [vmem:[%s13474_s8 + $0x604] ss:$8 sps:$4 sm:$0xff]  }
 0x572   : > { %10302 = vmatpush1.bf16.msra.mxu0 %v12432_v15  ;;  %10343 = vmatpush1.bf16.msra.mxu1 %v12435_v42  ;;  %12942 = vrsqrt.f32 %v5969_v14  ;;  %v5974_v47 = vadd.f32 1e-05, %v5938_v50  ;;  %v12456_v15 = vld [vmem:[%s13474_s8 + $0x620] ss:$8 sps:$4 sm:$0xff]   ;;  %v12473_v39 = vld [vmem:[%s13474_s8 + $0x704] ss:$8 sps:$4 sm:$0xff]  }
 0x573   : > { %10303 = vmatprep.subr.bf16.mxu0 %v12440_v57  ;;  %10344 = vmatprep.subr.bf16.mxu1 %v12443_v2  ;;  %12944 = vrsqrt.f32 %v5970_v5  ;;  %v12459_v42 = vld [vmem:[%s13474_s8 + $0x720] ss:$8 sps:$4 sm:$0xff]   ;;  %v12476_v13 = vld [vmem:[%s13474_s8 + $0x6f4] ss:$8 sps:$4 sm:$0xff]   ;;  %v12485_v50 = vld [vmem:[%s13474_s8 + $0x7e4] ss:$8 sps:$4 sm:$0xff]  }
 0x574   : > { %12946 = vrsqrt.f32 %v5971_v53  ;;  %v12468_v9 = vld [vmem:[%s13474_s8 + $0x600] ss:$8 sps:$4 sm:$0xff]   ;;  %v12479_v7 = vld [vmem:[%s13474_s8 + $0x7f4] ss:$8 sps:$4 sm:$0xff]   ;;  %v12477_v53 = vld [vmem:[%s13474_s8 + $0x7f0] ss:$8 sps:$4 sm:$0xff]  }
 0x575   : > { %12948 = vrsqrt.f32 %v5972_v6  ;;  %v12471_v60 = vld [vmem:[%s13474_s8 + $0x700] ss:$8 sps:$4 sm:$0xff]  }
 0x576   : > { %10304 = vmatpush1.bf16.msra.mxu0 %v12438_v0  ;;  %10345 = vmatpush1.bf16.msra.mxu1 %v12441_v22  ;;  %12950 = vrsqrt.f32 %v5973_v43 }
 0x577   : > { %10305 = vmatprep.subr.bf16.mxu0 %v12446_v44  ;;  %10346 = vmatprep.subr.bf16.mxu1 %v12449_v16  ;;  %12952 = vrsqrt.f32 %v5974_v47  ;;  %v12474_v44 = vld [vmem:[%s13474_s8 + $0x6f0] ss:$8 sps:$4 sm:$0xff]   ;;  %v12482_v16 = vld [vmem:[%s13474_s8 + $0x6e4] ss:$8 sps:$4 sm:$0xff]   ;;  %v12480_v47 = vld [vmem:[%s13474_s8 + $0x6e0] ss:$8 sps:$4 sm:$0xff]  }
 0x57a   : > { %10306 = vmatpush1.bf16.msra.mxu0 %v12444_v26  ;;  %10347 = vmatpush1.bf16.msra.mxu1 %v12447_v49  ;;  %v12483_v49 = vld [vmem:[%s13474_s8 + $0x7e0] ss:$8 sps:$4 sm:$0xff]  }
 0x57b   : > { %10307 = vmatprep.subr.bf16.mxu0 %v12452_v35  ;;  %10348 = vmatprep.subr.bf16.mxu1 %v12455_v31  ;;  %v5949_v35 = vld [vmem:[%s13480_s17 + $0x10] sm:$0xff] }
 0x57c   : > { %v12488_v31 = vld [vmem:[%s13474_s8 + $0x6d4] ss:$8 sps:$4 sm:$0xff]  }
 0x57d   : > { %v12939_v52 = vpop.eup %12938 }
 0x57e   : > { %10308 = vmatpush1.bf16.msra.mxu0 %v12450_v38  ;;  %10349 = vmatpush1.bf16.msra.mxu1 %v12453_v33  ;;  %v12941_v54 = vpop.eup %12940  ;;  %v12491_v38 = vld [vmem:[%s13474_s8 + $0x7d4] ss:$8 sps:$4 sm:$0xff]  }
 0x57f   : > { %10309 = vmatprep.subr.bf16.mxu0 %v12458_v55  ;;  %10350 = vmatprep.subr.bf16.mxu1 %v12461_v51  ;;  %v12943_v57 = vpop.eup %12942  ;;  %v6145_v23 = vcombine.low %v12939_v52, %v12941_v54  ;;  %v12486_v51 = vld [vmem:[%s13474_s8 + $0x6d0] ss:$8 sps:$4 sm:$0xff]   ;;  %v12497_v52 = vld [vmem:[%s13474_s8 + $0x7c4] ss:$8 sps:$4 sm:$0xff]  }
 0x580   : > { %v12945_v59 = vpop.eup %12944 }
 0x581   : > { %v12947_v62 = vpop.eup %12946  ;;  %v6146_v2 = vcombine.low %v12943_v57, %v12945_v59  ;;  %v6155_v11 = vrot.slane %v6145_v23, %v13737_v56 }
 0x582   : > { %10310 = vmatpush1.bf16.msra.mxu0 %v12456_v15  ;;  %10351 = vmatpush1.bf16.msra.mxu1 %v12459_v42  ;;  %v12949_v4 = vpop.eup %12948  ;;  %v12489_v15 = vld [vmem:[%s13474_s8 + $0x7d0] ss:$8 sps:$4 sm:$0xff]   ;;  %v12494_v42 = vld [vmem:[%s13474_s8 + $0x6c4] ss:$8 sps:$4 sm:$0xff]  }
 0x583   : > { %10311 = vmatprep.subr.bf16.mxu0 %v12464_v48  ;;  %10352 = vmatprep.subr.bf16.mxu1 %v12467_v63  ;;  %v12951_v34 = vpop.eup %12950  ;;  %v6147_v8 = vcombine.low %v12947_v62, %v12949_v4  ;;  %v6162_v0 = vrot.slane %v6146_v2, %v13737_v56  ;;  %v12492_v2 = vld [vmem:[%s13474_s8 + $0x6c0] ss:$8 sps:$4 sm:$0xff]  }
 0x584   : > { %v12953_v3 = vpop.eup %12952 }
 0x585   : > { %v6148_v25 = vcombine.low %v12951_v34, %v12953_v3  ;;  %v6169_v14 = vrot.slane %v6147_v8, %v13737_v56  ;;  %v6177_v5 = vcombine.low %v6155_v11, %v6162_v0  ;;  %v12495_v11 = vld [vmem:[%s13474_s8 + $0x7c0] ss:$8 sps:$4 sm:$0xff]   ;;  %v12503_v8 = vld [vmem:[%s13474_s8 + $0x7b4] ss:$8 sps:$4 sm:$0xff]  }
 0x586   : > { %10312 = vmatpush1.bf16.msra.mxu0 %v12462_v32  ;;  %10353 = vmatpush1.bf16.msra.mxu1 %v12465_v45 }
 0x587   : > { %10313 = vmatprep.subr.bf16.mxu0 %v12470_v1  ;;  %10354 = vmatprep.subr.bf16.mxu1 %v12473_v39  ;;  %v6176_v22 = vrot.slane %v6148_v25, %v13737_v56  ;;  %v6185_v43 = vrot.slane %v6177_v5, %v13737_v56  ;;  %v12509_v25 = vld [vmem:[%s13474_s8 + $0x7a4] ss:$8 sps:$4 sm:$0xff]   ;;  %v12504_v5 = vld [vmem:[%s13474_s8 + $0x6a0] ss:$8 sps:$4 sm:$0xff]  }
 0x589   : > { %v6178_v6 = vcombine.low %v6169_v14, %v6176_v22 }
 0x58a   : > { %10314 = vmatpush1.bf16.msra.mxu0 %v12468_v9  ;;  %10355 = vmatpush1.bf16.msra.mxu1 %v12471_v60 }
 0x58b   : > { %10315 = vmatprep.subr.bf16.mxu0 %v12476_v13  ;;  %10356 = vmatprep.subr.bf16.mxu1 %v12479_v7  ;;  %v6192_v26 = vrot.slane %v6178_v6, %v13737_v56  ;;  %v12501_v13 = vld [vmem:[%s13474_s8 + $0x7b0] ss:$8 sps:$4 sm:$0xff]   ;;  %v12515_v6 = vld [vmem:[%s13474_s8 + $0x794] ss:$8 sps:$4 sm:$0xff]  }
 0x58d   : > { %v6193_v33 = vcombine.low %v6185_v43, %v6192_v26  ;;  %v6253_v43 = vld [vmem:[%s13482_s9 + $0x10] sm:$0xff] }
 0x58e   : > { %10316 = vmatpush2.bf16.msra.mxu0 %v12474_v44  ;;  %10357 = vmatpush2.bf16.msra.mxu1 %v12477_v53  ;;  %v12507_v53 = vld [vmem:[%s13474_s8 + $0x7a0] ss:$8 sps:$4 sm:$0xff]  }
 0x58f   : > { %10317 = vmatprep.subr.bf16.mxu0 %v12482_v16  ;;  %10358 = vmatprep.subr.bf16.mxu1 %v12485_v50  ;;  %v6249_v55 = vmul.f32 %v6193_v33, %v5949_v35  ;;  %v12512_v16 = vld [vmem:[%s13474_s8 + $0x694] ss:$8 sps:$4 sm:$0xff]   ;;  %v12513_v35 = vld [vmem:[%s13474_s8 + $0x790] ss:$8 sps:$4 sm:$0xff]   ;;  %v6927_v33 = vmax.f32 %v14056_v46, 0.0  ;;  %v6929_v46 = vmax.f32 %v14058_v10, 0.0 }
 0x591   : > { %v14228_v48 = vrot.slane %v6249_v55, %v13746_v12  ;;  %v14231_v63 = vrot.slane %v6249_v55, %v13748_v29  ;;  %v14234_v54 = vrot.slane %v6249_v55, %v13750_v17  ;;  %v14237_v57 = vrot.slane %v6249_v55, %v13752_v36 }
 0x592   : > { %10318 = vmatpush2.bf16.msra.mxu0 %v12480_v47  ;;  %10359 = vmatpush2.bf16.msra.mxu1 %v12483_v49  ;;  %v14240_v23 = vrot.slane %v6249_v55, %v13754_v18  ;;  %v14243_v59 = vrot.slane %v6249_v55, %v13756_v19  ;;  %v14246_v32 = vrot.slane %v6249_v55, %v13758_v20  ;;  %v12510_v49 = vld [vmem:[%s13474_s8 + $0x690] ss:$8 sps:$4 sm:$0xff]  }
 0x593   : > { %10319 = vmatprep.subr.bf16.mxu0 %v12488_v31  ;;  %10360 = vmatprep.subr.bf16.mxu1 %v12491_v38  ;;  %v14249_v45 = vrot.slane %v6249_v55, %v13760_v21  ;;  %v6435_v62 = vmul.f32 %v14228_v48, %v14104_v41  ;;  %v6436_v1 = vmul.f32 %v14231_v63, %v14112_v27  ;;  %v12500_v27 = vld [vmem:[%s13474_s8 + $0x6b4] ss:$8 sps:$4 sm:$0xff]   ;;  %v12518_v31 = vld [vmem:[%s13474_s8 + $0x684] ss:$8 sps:$4 sm:$0xff]  }
 0x594   : > { %v6437_v39 = vmul.f32 %v14234_v54, %v14114_v61  ;;  %v6438_v4 = vmul.f32 %v14237_v57, %v14119_v28  ;;  %v6439_v34 = vmul.f32 %v14240_v23, %v14125_v58  ;;  %v6440_v41 = vmul.f32 %v14243_v59, %v14127_v30  ;;  %v12498_v30 = vld [vmem:[%s13474_s8 + $0x6b0] ss:$8 sps:$4 sm:$0xff]   ;;  %v12521_v38 = vld [vmem:[%s13474_s8 + $0x784] ss:$8 sps:$4 sm:$0xff]  }
 0x595   : > { %v6441_v61 = vmul.f32 %v14246_v32, %v14145_v40  ;;  %v6442_v28 = vmul.f32 %v14249_v45, %v14153_v37  ;;  %v6581_v0 = vcombine.low %v6435_v62, %v6436_v1  ;;  %v12506_v37 = vld [vmem:[%s13474_s8 + $0x6a4] ss:$8 sps:$4 sm:$0xff]  }
 0x596   : > { %10320 = vmatpush2.bf16.msra.mxu0 %v12486_v51  ;;  %10361 = vmatpush2.bf16.msra.mxu1 %v12489_v15  ;;  %v6582_v3 = vcombine.low %v6437_v39, %v6438_v4  ;;  %v6583_v58 = vcombine.low %v6439_v34, %v6440_v41  ;;  %v12978_v51 = vld [vmem:[#allocation3 + $0x58] sm:$0xff]  ;;  %v12980_v62 = vld [vmem:[#allocation3 + $0x90] sm:$0xff]  ;;  %v6710_v39 = vmul.f32 %v14249_v45, %v14091_v24  ;;  %v12981_v45 = vld [vmem:[#allocation3 + $0xe0] sm:$0xff] }
 0x597   : > { %10321 = vmatprep.subr.bf16.mxu0 %v12494_v42  ;;  %10362 = vmatprep.subr.bf16.mxu1 %v12497_v52  ;;  %v6584_v9 = vcombine.low %v6441_v61, %v6442_v28  ;;  %v6591_v60 = vrot.slane %v6581_v0, %v13737_v56  ;;  %v6704_v15 = vmul.f32 %v12978_v51, %v14231_v63  ;;  %v12979_v42 = vld [vmem:[#allocation3 + $0xc8] sm:$0xff]  ;;  %v14316_v0 = vld [vmem:[#allocation3 + $0x10] sm:$0xff] }
 0x598   : > { %v6598_v7 = vrot.slane %v6582_v3, %v13737_v56  ;;  %v6605_v40 = vrot.slane %v6583_v58, %v13737_v56  ;;  %v6706_v52 = vmul.f32 %v12979_v42, %v14237_v57  ;;  %v6708_v1 = vmul.f32 %v12980_v62, %v14243_v59  ;;  %v14305_v63 = vld [vmem:[#allocation3 + $0xa8] sm:$0xff]  ;;  %v12524_v57 = vld [vmem:[%s13474_s8 + $0x874] ss:$8 sps:$4 sm:$0xff]   ;;  %v12522_v58 = vld [vmem:[%s13474_s8 + $0x870] ss:$8 sps:$4 sm:$0xff]  }
 0x599   : > { %v6612_v14 = vrot.slane %v6584_v9, %v13737_v56  ;;  %v12527_v59 = vld [vmem:[%s13474_s8 + $0x974] ss:$8 sps:$4 sm:$0xff]   ;;  %v6707_v41 = vmul.f32 %v12981_v45, %v14240_v23  ;;  %v14318_v3 = vld [vmem:[#allocation3 + $0x28] sm:$0xff]  ;;  %v12525_v9 = vld [vmem:[%s13474_s8 + $0x970] ss:$8 sps:$4 sm:$0xff]  }
 0x59a   : > { %10322 = vmatpush2.bf16.msra.mxu0 %v12492_v2  ;;  %10363 = vmatpush2.bf16.msra.mxu1 %v12495_v11  ;;  %v6613_v22 = vcombine.low %v6591_v60, %v6598_v7  ;;  %v12516_v2 = vld [vmem:[%s13474_s8 + $0x680] ss:$8 sps:$4 sm:$0xff]   ;;  %v5514_v7 = vrot.slane %v14305_v63, 4  ;;  %v12537_v45 = vld [vmem:[%s13474_s8 + $0x950] ss:$8 sps:$4 sm:$0xff]  }
 0x59b   : > { %10323 = vmatprep.subr.bf16.mxu0 %v12500_v27  ;;  %10364 = vmatprep.subr.bf16.mxu1 %v12503_v8  ;;  %v6614_v44 = vcombine.low %v6605_v40, %v6612_v14  ;;  %v12519_v11 = vld [vmem:[%s13474_s8 + $0x780] ss:$8 sps:$4 sm:$0xff]   ;;  %v14314_v27 = vld [vmem:[#allocation3 + $0xd0] sm:$0xff]  ;;  %v6959_v8 = vpack.c.bf16 %v6927_v33, %v6927_v33  ;;  %v6961_v40 = vpack.c.bf16 %v6929_v46, %v6929_v46  ;;  %v12536_v33 = vld [vmem:[%s13474_s8 + $0x854] ss:$8 sps:$4 sm:$0xff]  }
 0x59c   : > { %v6621_v50 = vrot.slane %v6613_v22, %v13737_v56 }
 0x59d   : > { %v6628_v47 = vrot.slane %v6614_v44, %v13737_v56  ;;  %v5526_v44 = vrot.slane %v14316_v0, 4 }
 0x59e   : > { %10324 = vmatpush2.bf16.msra.mxu0 %v12498_v30  ;;  %10365 = vmatpush2.bf16.msra.mxu1 %v12501_v13  ;;  %v14328_v13 = vld [vmem:[#allocation3 + $0xa0] sm:$0xff] }
 0x59f   : > { %10325 = vmatprep.subr.bf16.mxu0 %v12506_v37  ;;  %10366 = vmatprep.subr.bf16.mxu1 %v12509_v25  ;;  %v6629_v26 = vcombine.low %v6621_v50, %v6628_v47  ;;  %v12530_v37 = vld [vmem:[%s13474_s8 + $0x864] ss:$8 sps:$4 sm:$0xff]   ;;  %v12528_v47 = vld [vmem:[%s13474_s8 + $0x860] ss:$8 sps:$4 sm:$0xff]   ;;  %v5538_v42 = vrot.slane %v14328_v13, 4  ;;  %v5527_v62 = vadd.f32 %v5526_v44, %v14316_v0 }
 0x5a1   : > { %v14291_v55 = vsub.f32 %v6253_v43, %v6629_v26  ;;  %v5532_v43 = vrot.slane %v14318_v3, 4  ;;  %v12531_v26 = vld [vmem:[%s13474_s8 + $0x960] ss:$8 sps:$4 sm:$0xff]  }
 0x5a2   : > { %10326 = vmatpush2.bf16.msra.mxu0 %v12504_v5  ;;  %10367 = vmatpush2.bf16.msra.mxu1 %v12507_v53  ;;  %v5520_v5 = vrot.slane %v14314_v27, 4  ;;  %v12533_v53 = vld [vmem:[%s13474_s8 + $0x964] ss:$8 sps:$4 sm:$0xff]  }
 0x5a3   : > { %10327 = vmatprep.subr.bf16.mxu0 %v12512_v16  ;;  %10368 = vmatprep.subr.bf16.mxu1 %v12515_v6  ;;  %v6794_v4 = vrot.slane %v14291_v55, %v13748_v29  ;;  %v6802_v34 = vrot.slane %v14291_v55, %v13752_v36  ;;  %v6810_v24 = vrot.slane %v14291_v55, %v13756_v19  ;;  %v12982_v16 = vld [vmem:[#allocation3 + $0x70] sm:$0xff]  ;;  %v14338_v6 = vld [vmem:[#allocation3 + $0xf8] sm:$0xff] }
 0x5a4   : > { %v6818_v10 = vrot.slane %v14291_v55, %v13760_v21  ;;  %v6806_v23 = vrot.slane %v14291_v55, %v13754_v18  ;;  %v6709_v50 = vmul.f32 %v12982_v16, %v14246_v32  ;;  %v6814_v51 = vrot.slane %v14291_v55, %v13758_v20  ;;  %v12542_v16 = vld [vmem:[%s13474_s8 + $0x844] ss:$8 sps:$4 sm:$0xff]  }
 0x5a5   : > { %v6900_v61 = vadd.f32 %v6794_v4, %v6704_v15  ;;  %v6902_v28 = vadd.f32 %v6802_v34, %v6706_v52  ;;  %v14322_v60 = vadd.f32 %v6810_v24, %v6708_v1  ;;  %v5515_v15 = vadd.f32 %v5514_v7, %v14305_v63  ;;  %v14356_v4 = vld [vmem:[#allocation3 + $0x20] sm:$0xff] }
 0x5a6   : > { %10328 = vmatpush2.bf16.msra.mxu0 %v12510_v49  ;;  %10369 = vmatpush2.bf16.msra.mxu1 %v12513_v35  ;;  %v14324_v30 = vadd.f32 %v6818_v10, %v6710_v39  ;;  %v14333_v22 = vadd.f32 %v6806_v23, %v6707_v41  ;;  %v5521_v32 = vadd.f32 %v5520_v5, %v14314_v27  ;;  %v5544_v1 = vrot.slane %v14338_v6, 4  ;;  %v12534_v10 = vld [vmem:[%s13474_s8 + $0x850] ss:$8 sps:$4 sm:$0xff]  }
 0x5a7   : > { %10329 = vmatprep.subr.bf16.mxu0 %v12518_v31  ;;  %10370 = vmatprep.subr.bf16.mxu1 %v12521_v38  ;;  %v6932_v25 = vmax.f32 %v6900_v61, 0.0  ;;  %v6934_v14 = vmax.f32 %v6902_v28, 0.0  ;;  %v14354_v46 = vadd.f32 %v6814_v51, %v6709_v50  ;;  %v5516_v34 = vrot.slane %v5515_v15, 2  ;;  %v14363_v41 = vld [vmem:[#allocation3 + $0x98] sm:$0xff]  ;;  %v12545_v50 = vld [vmem:[%s13474_s8 + $0x944] ss:$8 sps:$4 sm:$0xff]  }
 0x5a8   : > { %v5539_v61 = vadd.f32 %v5538_v42, %v14328_v13  ;;  %v5545_v28 = vadd.f32 %v5544_v1, %v14338_v6  ;;  %v5550_v5 = vrot.slane %v14356_v4, 4  ;;  %v12540_v42 = vld [vmem:[%s13474_s8 + $0x840] ss:$8 sps:$4 sm:$0xff]  }
 0x5a9   : > { %v6964_v49 = vpack.c.bf16 %v6932_v25, %v6932_v25  ;;  %v6966_v35 = vpack.c.bf16 %v6934_v14, %v6934_v14  ;;  %v5517_v23 = vadd.f32 %v5516_v34, %v5515_v15 }
 0x5aa   : > { %10330 = vmatpush2.bf16.msra.mxu0 %v12516_v2  ;;  %10371 = vmatpush2.bf16.msra.mxu1 %v12519_v11  ;;  %v12539_v11 = vld [vmem:[%s13474_s8 + $0x954] ss:$8 sps:$4 sm:$0xff]   ;;  %v5540_v25 = vrot.slane %v5539_v61, 2  ;;  %v5546_v14 = vrot.slane %v5545_v28, 2  ;;  %v5551_v15 = vadd.f32 %v5550_v5, %v14356_v4  ;;  %v5622_v5 = vmul.f32 %v14318_v3, %v14318_v3 }
 0x5ab   : > { %10381 = vmatprep.subr.bf16.mxu0 %v12524_v57  ;;  %10422 = vmatprep.subr.bf16.mxu1 %v12527_v59  ;;  %v5522_v57 = vrot.slane %v5521_v32, 2  ;;  %v5533_v59 = vadd.f32 %v5532_v43, %v14318_v3  ;;  %v5626_v3 = vmul.f32 %v14363_v41, %v14363_v41 }
 0x5ad   : > { %10332 = vmatmul.mubr.bf16.vlgmr.msra.gmra.mxu0 %v6959_v8  ;;  %10373 = vmatmul.mubr.bf16.vlgmr.msra.gmra.mxu1 %v6961_v40  ;;  %v10087_v31 = vpop.f32.mrf.mxu0  ;;  %v10128_v38 = vpop.f32.mrf.mxu1  ;;  %v5528_v8 = vrot.slane %v5527_v62, 2  ;;  %v5523_v7 = vadd.f32 %v5522_v57, %v5521_v32  ;;  %v5534_v40 = vrot.slane %v5533_v59, 2  ;;  %v5556_v32 = vrot.slane %v14363_v41, 4 }
 0x5ae   : > { %v14349_v52 = vadd.f32 %v10128_v38, %v10087_v31  ;;  %10382 = vmatpush1.bf16.msra.mxu0 %v12522_v58  ;;  %10423 = vmatpush1.bf16.msra.mxu1 %v12525_v9  ;;  %v5541_v38 = vadd.f32 %v5540_v25, %v5539_v61 }
 0x5af   : > { %v10089_v39 = vpop.f32.mrf.mxu0  ;;  %v10130_v2 = vpop.f32.mrf.mxu1  ;;  %10383 = vmatprep.subr.bf16.mxu0 %v12530_v37  ;;  %10424 = vmatprep.subr.bf16.mxu1 %v12533_v53  ;;  %v5529_v37 = vadd.f32 %v5528_v8, %v5527_v62  ;;  %v5535_v43 = vadd.f32 %v5534_v40, %v5533_v59  ;;  %v12543_v62 = vld [vmem:[%s13474_s8 + $0x940] ss:$8 sps:$4 sm:$0xff]   ;;  %v5552_v59 = vrot.slane %v5551_v15, 2  ;;  %v5557_v8 = vadd.f32 %v5556_v32, %v14363_v41  ;;  %v12546_v40 = vld [vmem:[%s13474_s8 + $0x830] ss:$8 sps:$4 sm:$0xff]  }
 0x5b0   : > { %v14359_v24 = vadd.f32 %v10130_v2, %v10089_v39  ;;  %10413 = vmatprep.mubr.bf16.mxu0 %v6964_v49  ;;  %10454 = vmatprep.mubr.bf16.mxu1 %v6966_v35  ;;  %v5619_v49 = vmul.f32 %v14305_v63, %v14305_v63  ;;  %v5524_v35 = vrot.slane %v5523_v7, 1  ;;  %v12548_v2 = vld [vmem:[%s13474_s8 + $0x834] ss:$8 sps:$4 sm:$0xff]   ;;  %v12552_v32 = vld [vmem:[%s13474_s8 + $0x820] ss:$8 sps:$4 sm:$0xff]  }
 0x5b1   : > { %v10091_v58 = vpop.f32.mrf.mxu0  ;;  %v10132_v9 = vpop.f32.mrf.mxu1  ;;  %v5530_v31 = vrot.slane %v5529_v37, 1  ;;  %v5536_v51 = vrot.slane %v5535_v43, 1 }
 0x5b2   : > { %10384 = vmatpush1.bf16.msra.mxu0 %v12528_v47  ;;  %10425 = vmatpush1.bf16.msra.mxu1 %v12531_v26  ;;  %v5620_v47 = vmul.f32 %v14314_v27, %v14314_v27  ;;  %v5518_v26 = vrot.slane %v5517_v23, 1  ;;  %v5525_v1 = vadd.f32 %v5524_v35, %v5523_v7  ;;  %v5542_v27 = vrot.slane %v5541_v38, 1 }
 0x5b3   : > { %v10092_v44 = vpop.f32.mrf.mxu0  ;;  %v10133_v53 = vpop.f32.mrf.mxu1  ;;  %10385 = vmatprep.subr.bf16.mxu0 %v12536_v33  ;;  %10426 = vmatprep.subr.bf16.mxu1 %v12539_v11  ;;  %v5547_v33 = vadd.f32 %v5546_v14, %v5545_v28  ;;  %v5531_v39 = vadd.f32 %v5530_v31, %v5529_v37  ;;  %v12551_v11 = vld [vmem:[%s13474_s8 + $0x934] ss:$8 sps:$4 sm:$0xff]   ;;  %v5537_v34 = vadd.f32 %v5536_v51, %v5535_v43  ;;  %v12549_v37 = vld [vmem:[%s13474_s8 + $0x930] ss:$8 sps:$4 sm:$0xff]  }
 0x5b4   : > { %v5519_v63 = vadd.f32 %v5518_v26, %v5517_v23  ;;  %v5543_v61 = vadd.f32 %v5542_v27, %v5541_v38  ;;  %v5553_v9 = vadd.f32 %v5552_v59, %v5551_v15  ;;  %v5558_v23 = vrot.slane %v5557_v8, 2  ;;  %v12554_v53 = vld [vmem:[%s13474_s8 + $0x824] ss:$8 sps:$4 sm:$0xff]   ;;  %v12563_v27 = vld [vmem:[%s13474_s8 + $0x914] ss:$8 sps:$4 sm:$0xff]  }
 0x5b5   : > { %v5548_v57 = vrot.slane %v5547_v33, 1  ;;  %v14385_v28 = vmul.f32 0.125, %v5531_v39  ;;  %v14387_v7 = vmul.f32 0.125, %v5537_v34  ;;  %v5621_v14 = vmul.f32 %v14316_v0, %v14316_v0  ;;  %v12560_v39 = vld [vmem:[%s13474_s8 + $0x814] ss:$8 sps:$4 sm:$0xff]  }
 0x5b6   : > { %10386 = vmatpush1.bf16.msra.mxu0 %v12534_v10  ;;  %10427 = vmatpush1.bf16.msra.mxu1 %v12537_v45  ;;  %v14381_v10 = vmul.f32 0.125, %v5519_v63  ;;  %v14383_v45 = vmul.f32 0.125, %v5525_v1  ;;  %v14391_v25 = vmul.f32 0.125, %v5543_v61  ;;  %v5623_v44 = vmul.f32 %v14328_v13, %v14328_v13 }
 0x5b7   : > { %10387 = vmatprep.subr.bf16.mxu0 %v12542_v16  ;;  %10428 = vmatprep.subr.bf16.mxu1 %v12545_v50  ;;  %v5549_v58 = vadd.f32 %v5548_v57, %v5547_v33  ;;  %v12557_v16 = vld [vmem:[%s13474_s8 + $0x924] ss:$8 sps:$4 sm:$0xff]   ;;  %v5554_v50 = vrot.slane %v5553_v9, 1  ;;  %v5559_v43 = vadd.f32 %v5558_v23, %v5557_v8  ;;  %v5624_v35 = vmul.f32 %v14338_v6, %v14338_v6 }
 0x5b8   : > { %v5625_v0 = vmul.f32 %v14356_v4, %v14356_v4  ;;  %v5771_v13 = vrot.slane %v5619_v49, 4  ;;  %v5777_v31 = vrot.slane %v5620_v47, 4  ;;  %v5783_v33 = vrot.slane %v5621_v14, 4 }
 0x5b9   : > { %v14401_v26 = vmul.f32 0.125, %v5549_v58  ;;  %v5555_v38 = vadd.f32 %v5554_v50, %v5553_v9  ;;  %v5560_v51 = vrot.slane %v5559_v43, 1  ;;  %v5789_v15 = vrot.slane %v5622_v5, 4 }
 0x5ba   : > { %10388 = vmatpush1.bf16.msra.mxu0 %v12540_v42  ;;  %10429 = vmatpush1.bf16.msra.mxu1 %v12543_v62  ;;  %v12555_v42 = vld [vmem:[%s13474_s8 + $0x920] ss:$8 sps:$4 sm:$0xff]   ;;  %v5772_v62 = vadd.f32 %v5771_v13, %v5619_v49  ;;  %v5778_v6 = vadd.f32 %v5777_v31, %v5620_v47  ;;  %v5795_v63 = vrot.slane %v5623_v44, 4  ;;  %v5801_v1 = vrot.slane %v5624_v35, 4 }
 0x5bb   : > { %10389 = vmatprep.subr.bf16.mxu0 %v12548_v2  ;;  %10430 = vmatprep.subr.bf16.mxu1 %v12551_v11  ;;  %v5561_v2 = vadd.f32 %v5560_v51, %v5559_v43  ;;  %v14413_v11 = vmul.f32 0.125, %v5555_v38  ;;  %v5784_v34 = vadd.f32 %v5783_v33, %v5621_v14  ;;  %v5790_v57 = vadd.f32 %v5789_v15, %v5622_v5  ;;  %v12566_v5 = vld [vmem:[%s13474_s8 + $0x804] ss:$8 sps:$4 sm:$0xff]  }
 0x5bc   : > { %v5773_v59 = vrot.slane %v5772_v62, 2  ;;  %v5779_v8 = vrot.slane %v5778_v6, 2  ;;  %v5796_v61 = vadd.f32 %v5795_v63, %v5623_v44  ;;  %v5802_v58 = vadd.f32 %v5801_v1, %v5624_v35  ;;  %v12569_v44 = vld [vmem:[%s13474_s8 + $0x904] ss:$8 sps:$4 sm:$0xff]   ;;  %v12564_v63 = vld [vmem:[%s13474_s8 + $0x800] ss:$8 sps:$4 sm:$0xff]  }
 0x5bd   : > { %v14415_v49 = vmul.f32 0.125, %v5561_v2  ;;  %v5785_v47 = vrot.slane %v5784_v34, 2  ;;  %v5791_v9 = vrot.slane %v5790_v57, 2  ;;  %v5807_v23 = vrot.slane %v5625_v0, 4  ;;  %v12567_v1 = vld [vmem:[%s13474_s8 + $0x900] ss:$8 sps:$4 sm:$0xff]  }
 0x5be   : > { %10390 = vmatpush1.bf16.msra.mxu0 %v12546_v40  ;;  %10431 = vmatpush1.bf16.msra.mxu1 %v12549_v37  ;;  %v12558_v40 = vld [vmem:[%s13474_s8 + $0x810] ss:$8 sps:$4 sm:$0xff]   ;;  %v5797_v50 = vrot.slane %v5796_v61, 2  ;;  %v5803_v14 = vrot.slane %v5802_v58, 2  ;;  %v5813_v31 = vrot.slane %v5626_v3, 4 }
 0x5bf   : > { %10391 = vmatprep.subr.bf16.mxu0 %v12554_v53  ;;  %10432 = vmatprep.subr.bf16.mxu1 %v12557_v16  ;;  %v12561_v37 = vld [vmem:[%s13474_s8 + $0x910] ss:$8 sps:$4 sm:$0xff]   ;;  %v5774_v53 = vadd.f32 %v5773_v59, %v5772_v62  ;;  %v5780_v16 = vadd.f32 %v5779_v8, %v5778_v6  ;;  %v5786_v43 = vadd.f32 %v5785_v47, %v5784_v34 }
 0x5c0   : > { %v5792_v35 = vadd.f32 %v5791_v9, %v5790_v57  ;;  %v5808_v13 = vadd.f32 %v5807_v23, %v5625_v0  ;;  %v5798_v33 = vadd.f32 %v5797_v50, %v5796_v61  ;;  %v5804_v15 = vadd.f32 %v5803_v14, %v5802_v58  ;;  %v12572_v0 = vld [vmem:[%s13474_s8 + $0x8f4] ss:$8 sps:$4 sm:$0xff]   ;;  %v12570_v50 = vld [vmem:[%s13474_s8 + $0x8f0] ss:$8 sps:$4 sm:$0xff]  }
 0x5c1   : > { %v5775_v38 = vrot.slane %v5774_v53, 1  ;;  %v5781_v51 = vrot.slane %v5780_v16, 1  ;;  %v5814_v6 = vadd.f32 %v5813_v31, %v5626_v3  ;;  %v12575_v57 = vld [vmem:[%s13474_s8 + $0x9f4] ss:$8 sps:$4 sm:$0xff]   ;;  %v12573_v14 = vld [vmem:[%s13474_s8 + $0x9f0] ss:$8 sps:$4 sm:$0xff]  }
 0x5c2   : > { %10392 = vmatpush1.bf16.msra.mxu0 %v12552_v32  ;;  %10433 = vmatpush1.bf16.msra.mxu1 %v12555_v42  ;;  %v5787_v32 = vrot.slane %v5786_v43, 1  ;;  %v5793_v42 = vrot.slane %v5792_v35, 1  ;;  %v5809_v62 = vrot.slane %v5808_v13, 2  ;;  %v5799_v2 = vrot.slane %v5798_v33, 1  ;;  %v12581_v31 = vld [vmem:[%s13474_s8 + $0x9e4] ss:$8 sps:$4 sm:$0xff]  }
 0x5c3   : > { %10393 = vmatprep.subr.bf16.mxu0 %v12560_v39  ;;  %10434 = vmatprep.subr.bf16.mxu1 %v12563_v27  ;;  %v5776_v39 = vadd.f32 %v5775_v38, %v5774_v53  ;;  %v5782_v27 = vadd.f32 %v5781_v51, %v5780_v16  ;;  %v5805_v34 = vrot.slane %v5804_v15, 1  ;;  %v5815_v58 = vrot.slane %v5814_v6, 2 }
 0x5c4   : > { %v5788_v59 = vadd.f32 %v5787_v32, %v5786_v43  ;;  %v5794_v8 = vadd.f32 %v5793_v42, %v5792_v35  ;;  %v5810_v61 = vadd.f32 %v5809_v62, %v5808_v13  ;;  %v5800_v47 = vadd.f32 %v5799_v2, %v5798_v33  ;;  %v12578_v13 = vld [vmem:[%s13474_s8 + $0x8e4] ss:$8 sps:$4 sm:$0xff]   ;;  %v12576_v2 = vld [vmem:[%s13474_s8 + $0x8e0] ss:$8 sps:$4 sm:$0xff]  }
 0x5c5   : > { %v5806_v3 = vadd.f32 %v5805_v34, %v5804_v15  ;;  %v5843_v9 = vmul.f32 0.125, %v5776_v39  ;;  %v5844_v23 = vmul.f32 0.125, %v5782_v27  ;;  %v5875_v43 = vmul.f32 %v14381_v10, %v14381_v10  ;;  %v12579_v34 = vld [vmem:[%s13474_s8 + $0x9e0] ss:$8 sps:$4 sm:$0xff]  }
 0x5c6   : > { %10394 = vmatpush1.bf16.msra.mxu0 %v12558_v40  ;;  %10435 = vmatpush1.bf16.msra.mxu1 %v12561_v37  ;;  %v5811_v40 = vrot.slane %v5810_v61, 1  ;;  %v5816_v37 = vadd.f32 %v5815_v58, %v5814_v6  ;;  %v5845_v53 = vmul.f32 0.125, %v5788_v59  ;;  %v5846_v16 = vmul.f32 0.125, %v5794_v8  ;;  %v12584_v8 = vld [vmem:[%s13474_s8 + $0x8d4] ss:$8 sps:$4 sm:$0xff]  }
 0x5c7   : > { %10395 = vmatprep.subr.bf16.mxu0 %v12566_v5  ;;  %10436 = vmatprep.subr.bf16.mxu1 %v12569_v44  ;;  %v5847_v5 = vmul.f32 0.125, %v5800_v47  ;;  %v5848_v44 = vmul.f32 0.125, %v5806_v3  ;;  %v5876_v35 = vmul.f32 %v14383_v45, %v14383_v45  ;;  %v5877_v33 = vmul.f32 %v14385_v28, %v14385_v28 }
 0x5c8   : > { %v5812_v38 = vadd.f32 %v5811_v40, %v5810_v61  ;;  %v5817_v51 = vrot.slane %v5816_v37, 1  ;;  %v5878_v15 = vmul.f32 %v14387_v7, %v14387_v7  ;;  %v5879_v32 = vmul.f32 %v14391_v25, %v14391_v25  ;;  %v12587_v61 = vld [vmem:[%s13474_s8 + $0x9d4] ss:$8 sps:$4 sm:$0xff]  }
 0x5c9   : > { %v5880_v42 = vmul.f32 %v14401_v26, %v14401_v26  ;;  %v5881_v62 = vmul.f32 %v14413_v11, %v14413_v11  ;;  %v5882_v6 = vmul.f32 %v14415_v49, %v14415_v49  ;;  %v5907_v39 = vsub.f32 %v5843_v9, %v5875_v43 }
 0x5ca   : > { %10396 = vmatpush1.bf16.msra.mxu0 %v12564_v63  ;;  %10437 = vmatpush1.bf16.msra.mxu1 %v12567_v1  ;;  %v5818_v63 = vadd.f32 %v5817_v51, %v5816_v37  ;;  %v5849_v1 = vmul.f32 0.125, %v5812_v38  ;;  %v5908_v27 = vsub.f32 %v5844_v23, %v5876_v35  ;;  %v5911_v59 = vsub.f32 %v5847_v5, %v5879_v32  ;;  %v12585_v5 = vld [vmem:[%s13474_s8 + $0x9d0] ss:$8 sps:$4 sm:$0xff]  }
 0x5cb   : > { %10397 = vmatprep.subr.bf16.mxu0 %v12572_v0  ;;  %10438 = vmatprep.subr.bf16.mxu1 %v12575_v57  ;;  %v5909_v0 = vsub.f32 %v5845_v53, %v5877_v33  ;;  %v5910_v57 = vsub.f32 %v5846_v16, %v5878_v15  ;;  %v5912_v47 = vsub.f32 %v5848_v44, %v5880_v42  ;;  %v5939_v40 = vmax.f32 %v5907_v39, 0.0  ;;  %v12590_v44 = vld [vmem:[%s13474_s8 + $0x8c4] ss:$8 sps:$4 sm:$0xff]   ;;  %v12588_v42 = vld [vmem:[%s13474_s8 + $0x8c0] ss:$8 sps:$4 sm:$0xff]  }
 0x5cc   : > { %v5850_v58 = vmul.f32 0.125, %v5818_v63  ;;  %v5913_v3 = vsub.f32 %v5849_v1, %v5881_v62  ;;  %v5940_v9 = vmax.f32 %v5908_v27, 0.0  ;;  %v12591_v62 = vld [vmem:[%s13474_s8 + $0x9c0] ss:$8 sps:$4 sm:$0xff]   ;;  %v12596_v63 = vld [vmem:[%s13474_s8 + $0x8b4] ss:$8 sps:$4 sm:$0xff]  }
 0x5cd   : > { %v5941_v23 = vmax.f32 %v5909_v0, 0.0  ;;  %v5942_v37 = vmax.f32 %v5910_v57, 0.0  ;;  %v5944_v53 = vmax.f32 %v5912_v47, 0.0  ;;  %v5975_v16 = vadd.f32 1e-05, %v5939_v40  ;;  %v12983_v57 = vld [vmem:[#allocation3 + $0x38] sm:$0xff] }
 0x5ce   : > { %10398 = vmatpush2.bf16.msra.mxu0 %v12570_v50  ;;  %10439 = vmatpush2.bf16.msra.mxu1 %v12573_v14  ;;  %v5943_v50 = vmax.f32 %v5911_v59, 0.0  ;;  %v12582_v14 = vld [vmem:[%s13474_s8 + $0x8d0] ss:$8 sps:$4 sm:$0xff]   ;;  %v5914_v43 = vsub.f32 %v5850_v58, %v5882_v6  ;;  %v5945_v35 = vmax.f32 %v5913_v3, 0.0  ;;  %v12599_v1 = vld [vmem:[%s13474_s8 + $0x9b4] ss:$8 sps:$4 sm:$0xff]   ;;  %v6703_v59 = vmul.f32 %v12983_v57, %v14228_v48 }
 0x5cf   : > { %10399 = vmatprep.subr.bf16.mxu0 %v12578_v13  ;;  %10440 = vmatprep.subr.bf16.mxu1 %v12581_v31  ;;  %v5976_v13 = vadd.f32 1e-05, %v5940_v9  ;;  %v12593_v31 = vld [vmem:[%s13474_s8 + $0x9c4] ss:$8 sps:$4 sm:$0xff]   ;;  %v5977_v51 = vadd.f32 1e-05, %v5941_v23  ;;  %12954 = vrsqrt.f32 %v5975_v16  ;;  %v6798_v47 = vrot.slane %v14291_v55, %v13750_v17 }
 0x5d0   : > { %v5946_v38 = vmax.f32 %v5914_v43, 0.0  ;;  %v5978_v33 = vadd.f32 1e-05, %v5942_v37  ;;  %v5979_v15 = vadd.f32 1e-05, %v5943_v50 }
 0x5d1   : > { %v5980_v32 = vadd.f32 1e-05, %v5944_v53  ;;  %12956 = vrsqrt.f32 %v5976_v13  ;;  %v5981_v6 = vadd.f32 1e-05, %v5945_v35  ;;  %v12594_v27 = vld [vmem:[%s13474_s8 + $0x8b0] ss:$8 sps:$4 sm:$0xff]  }
 0x5d2   : > { %10400 = vmatpush2.bf16.msra.mxu0 %v12576_v2  ;;  %10441 = vmatpush2.bf16.msra.mxu1 %v12579_v34  ;;  %12958 = vrsqrt.f32 %v5977_v51  ;;  %v5982_v39 = vadd.f32 1e-05, %v5946_v38  ;;  %v12597_v2 = vld [vmem:[%s13474_s8 + $0x9b0] ss:$8 sps:$4 sm:$0xff]   ;;  %v12602_v34 = vld [vmem:[%s13474_s8 + $0x8a4] ss:$8 sps:$4 sm:$0xff]  }
 0x5d3   : > { %10401 = vmatprep.subr.bf16.mxu0 %v12584_v8  ;;  %10442 = vmatprep.subr.bf16.mxu1 %v12587_v61  ;;  %12960 = vrsqrt.f32 %v5978_v33  ;;  %v12605_v0 = vld [vmem:[%s13474_s8 + $0x9a4] ss:$8 sps:$4 sm:$0xff]   ;;  %v6790_v8 = vrot.slane %v14291_v55, %v13746_v12  ;;  %v12984_v61 = vld [vmem:[#allocation3 + $0x40] sm:$0xff]  ;;  %v12609_v55 = vld [vmem:[%s13474_s8 + $0x990] ss:$8 sps:$4 sm:$0xff]  }
 0x5d4   : > { %12962 = vrsqrt.f32 %v5979_v15  ;;  %v6705_v58 = vmul.f32 %v12984_v61, %v14234_v54  ;;  %v12600_v3 = vld [vmem:[%s13474_s8 + $0x8a0] ss:$8 sps:$4 sm:$0xff]   ;;  %v12608_v48 = vld [vmem:[%s13474_s8 + $0x894] ss:$8 sps:$4 sm:$0xff]   ;;  %v12606_v54 = vld [vmem:[%s13474_s8 + $0x890] ss:$8 sps:$4 sm:$0xff]  }
 0x5d5   : > { %12964 = vrsqrt.f32 %v5980_v32  ;;  %v12603_v40 = vld [vmem:[%s13474_s8 + $0x9a0] ss:$8 sps:$4 sm:$0xff]   ;;  %v12611_v9 = vld [vmem:[%s13474_s8 + $0x994] ss:$8 sps:$4 sm:$0xff]   ;;  %v6899_v23 = vadd.f32 %v6790_v8, %v6703_v59  ;;  %v12614_v53 = vld [vmem:[%s13474_s8 + $0x884] ss:$8 sps:$4 sm:$0xff]  }
 0x5d6   : > { %10402 = vmatpush2.bf16.msra.mxu0 %v12582_v14  ;;  %10443 = vmatpush2.bf16.msra.mxu1 %v12585_v5  ;;  %12966 = vrsqrt.f32 %v5981_v6  ;;  %v6901_v37 = vadd.f32 %v6798_v47, %v6705_v58  ;;  %v12617_v16 = vld [vmem:[%s13474_s8 + $0x984] ss:$8 sps:$4 sm:$0xff]   ;;  %v12612_v33 = vld [vmem:[%s13474_s8 + $0x880] ss:$8 sps:$4 sm:$0xff]   ;;  %v12618_v8 = vld [vmem:[%s13474_s8 + $0xa70] ss:$8 sps:$4 sm:$0xff]  }
 0x5d7   : > { %10403 = vmatprep.subr.bf16.mxu0 %v12590_v44  ;;  %10444 = vmatprep.subr.bf16.mxu1 %v12593_v31  ;;  %12968 = vrsqrt.f32 %v5982_v39  ;;  %v6931_v35 = vmax.f32 %v6899_v23, 0.0  ;;  %v12615_v15 = vld [vmem:[%s13474_s8 + $0x980] ss:$8 sps:$4 sm:$0xff]   ;;  %v12621_v61 = vld [vmem:[%s13474_s8 + $0xb70] ss:$8 sps:$4 sm:$0xff]  }
 0x5d8   : > { %v6933_v13 = vmax.f32 %v6901_v37, 0.0  ;;  %v12626_v58 = vld [vmem:[%s13474_s8 + $0xa64] ss:$8 sps:$4 sm:$0xff]  }
 0x5d9   : > { %v12629_v47 = vld [vmem:[%s13474_s8 + $0xb64] ss:$8 sps:$4 sm:$0xff]  }
 0x5da   : > { %10404 = vmatpush2.bf16.msra.mxu0 %v12588_v42  ;;  %10445 = vmatpush2.bf16.msra.mxu1 %v12591_v62  ;;  %v12620_v42 = vld [vmem:[%s13474_s8 + $0xa74] ss:$8 sps:$4 sm:$0xff]   ;;  %v6965_v39 = vpack.c.bf16 %v6933_v13, %v6933_v13 }
 0x5db   : > { %10405 = vmatprep.subr.bf16.mxu0 %v12596_v63  ;;  %10446 = vmatprep.subr.bf16.mxu1 %v12599_v1  ;;  %v12623_v62 = vld [vmem:[%s13474_s8 + $0xb74] ss:$8 sps:$4 sm:$0xff]   ;;  %v6963_v1 = vpack.c.bf16 %v6931_v35, %v6931_v35 }
 0x5dc   : > { %v12955_v50 = vpop.eup %12954 }
 0x5de   : > { %10406 = vmatpush2.bf16.msra.mxu0 %v12594_v27  ;;  %10447 = vmatpush2.bf16.msra.mxu1 %v12597_v2  ;;  %v12957_v14 = vpop.eup %12956  ;;  %v6936_v27 = vmax.f32 %v14322_v60, 0.0  ;;  %v6938_v2 = vmax.f32 %v14324_v30, 0.0 }
 0x5df   : > { %10407 = vmatprep.subr.bf16.mxu0 %v12602_v34  ;;  %10448 = vmatprep.subr.bf16.mxu1 %v12605_v0  ;;  %v12959_v43 = vpop.eup %12958  ;;  %v6194_v31 = vcombine.low %v12955_v50, %v12957_v14  ;;  %v12624_v50 = vld [vmem:[%s13474_s8 + $0xa60] ss:$8 sps:$4 sm:$0xff]  }
 0x5e0   : > { %v12961_v5 = vpop.eup %12960  ;;  %v6968_v30 = vpack.c.bf16 %v6936_v27, %v6936_v27  ;;  %v12627_v14 = vld [vmem:[%s13474_s8 + $0xb60] ss:$8 sps:$4 sm:$0xff]  }
 0x5e1   : > { %v12963_v44 = vpop.eup %12962  ;;  %v6195_v38 = vcombine.low %v12959_v43, %v12961_v5  ;;  %v6204_v0 = vrot.slane %v6194_v31, %v13737_v56  ;;  %v12632_v43 = vld [vmem:[%s13474_s8 + $0xa54] ss:$8 sps:$4 sm:$0xff]  }
 0x5e2   : > { %10408 = vmatpush2.bf16.msra.mxu0 %v12600_v3  ;;  %10449 = vmatpush2.bf16.msra.mxu1 %v12603_v40  ;;  %v12965_v51 = vpop.eup %12964  ;;  %v6970_v3 = vpack.c.bf16 %v6938_v2, %v6938_v2  ;;  %v12642_v2 = vld [vmem:[%s13474_s8 + $0xa30] ss:$8 sps:$4 sm:$0xff]  }
 0x5e3   : > { %10409 = vmatprep.subr.bf16.mxu0 %v12608_v48  ;;  %10450 = vmatprep.subr.bf16.mxu1 %v12611_v9  ;;  %v12967_v32 = vpop.eup %12966  ;;  %v6196_v6 = vcombine.low %v12963_v44, %v12965_v51  ;;  %v6211_v57 = vrot.slane %v6195_v38, %v13737_v56  ;;  %v12630_v38 = vld [vmem:[%s13474_s8 + $0xa50] ss:$8 sps:$4 sm:$0xff]  }
 0x5e4   : > { %v12969_v63 = vpop.eup %12968 }
 0x5e5   : > { %v6197_v34 = vcombine.low %v12967_v32, %v12969_v63  ;;  %v6218_v59 = vrot.slane %v6196_v6, %v13737_v56  ;;  %v6226_v9 = vcombine.low %v6204_v0, %v6211_v57  ;;  %v12641_v32 = vld [vmem:[%s13474_s8 + $0xb44] ss:$8 sps:$4 sm:$0xff]   ;;  %v12639_v6 = vld [vmem:[%s13474_s8 + $0xb40] ss:$8 sps:$4 sm:$0xff]   ;;  %v5950_v63 = vld [vmem:[%s13480_s17 + $0x18] sm:$0xff] }
 0x5e6   : > { %10410 = vmatpush2.bf16.msra.mxu0 %v12606_v54  ;;  %10451 = vmatpush2.bf16.msra.mxu1 %v12609_v55  ;;  %v12650_v0 = vld [vmem:[%s13474_s8 + $0xa24] ss:$8 sps:$4 sm:$0xff]  }
 0x5e7   : > { %10411 = vmatprep.subr.bf16.mxu0 %v12614_v53  ;;  %10452 = vmatprep.subr.bf16.mxu1 %v12617_v16  ;;  %v6225_v60 = vrot.slane %v6197_v34, %v13737_v56  ;;  %v12635_v53 = vld [vmem:[%s13474_s8 + $0xb54] ss:$8 sps:$4 sm:$0xff]   ;;  %v6234_v13 = vrot.slane %v6226_v9, %v13737_v56  ;;  %v12645_v34 = vld [vmem:[%s13474_s8 + $0xb30] ss:$8 sps:$4 sm:$0xff]   ;;  %v12653_v57 = vld [vmem:[%s13474_s8 + $0xb24] ss:$8 sps:$4 sm:$0xff]  }
 0x5e9   : > { %v6227_v23 = vcombine.low %v6218_v59, %v6225_v60 }
 0x5ea   : > { %10412 = vmatpush2.bf16.msra.mxu0 %v12612_v33  ;;  %10453 = vmatpush2.bf16.msra.mxu1 %v12615_v15  ;;  %v12638_v15 = vld [vmem:[%s13474_s8 + $0xa44] ss:$8 sps:$4 sm:$0xff]  }
 0x5eb   : > { %10463 = vmatprep.subr.bf16.mxu0 %v12620_v42  ;;  %10504 = vmatprep.subr.bf16.mxu1 %v12623_v62  ;;  %v6241_v44 = vrot.slane %v6227_v23, %v13737_v56  ;;  %v12636_v62 = vld [vmem:[%s13474_s8 + $0xa40] ss:$8 sps:$4 sm:$0xff]  }
 0x5ed   : > { %v10169_v40 = vpop.f32.mrf.mxu0  ;;  %v10210_v48 = vpop.f32.mrf.mxu1  ;;  %10414 = vmatmul.mubr.bf16.vlgmr.msra.gmra.mxu0 %v6963_v1  ;;  %10455 = vmatmul.mubr.bf16.vlgmr.msra.gmra.mxu1 %v6965_v39  ;;  %v6242_v42 = vcombine.low %v6234_v13, %v6241_v44  ;;  %v12644_v1 = vld [vmem:[%s13474_s8 + $0xa34] ss:$8 sps:$4 sm:$0xff]  }
 0x5ee   : > { %v10170_v37 = vadd.f32 %v10169_v40, %v14349_v52  ;;  %10464 = vmatpush1.bf16.msra.mxu0 %v12618_v8  ;;  %10505 = vmatpush1.bf16.msra.mxu1 %v12621_v61  ;;  %v12647_v39 = vld [vmem:[%s13474_s8 + $0xb34] ss:$8 sps:$4 sm:$0xff]   ;;  %v12648_v61 = vld [vmem:[%s13474_s8 + $0xa20] ss:$8 sps:$4 sm:$0xff]  }
 0x5ef   : > { %v10171_v54 = vpop.f32.mrf.mxu0  ;;  %v10212_v55 = vpop.f32.mrf.mxu1  ;;  %10465 = vmatprep.subr.bf16.mxu0 %v12626_v58  ;;  %10506 = vmatprep.subr.bf16.mxu1 %v12629_v47  ;;  %v6250_v27 = vmul.f32 %v6242_v42, %v5950_v63  ;;  %v12651_v58 = vld [vmem:[%s13474_s8 + $0xb20] ss:$8 sps:$4 sm:$0xff]   ;;  %v12659_v40 = vld [vmem:[%s13474_s8 + $0xb14] ss:$8 sps:$4 sm:$0xff]  }
 0x5f0   : > { %v14494_v16 = vadd.f32 %v10210_v48, %v10170_v37  ;;  %v10172_v5 = vadd.f32 %v10171_v54, %v14359_v24  ;;  %10495 = vmatprep.mubr.bf16.mxu0 %v6968_v30  ;;  %10536 = vmatprep.mubr.bf16.mxu1 %v6970_v3  ;;  %v12633_v24 = vld [vmem:[%s13474_s8 + $0xb50] ss:$8 sps:$4 sm:$0xff]   ;;  %v12656_v3 = vld [vmem:[%s13474_s8 + $0xa14] ss:$8 sps:$4 sm:$0xff]   ;;  %v12675_v63 = vld [vmem:[%s13474_s8 + $0xbe0] ss:$8 sps:$4 sm:$0xff]  }
 0x5f1   : > { %v10173_v52 = vpop.f32.mrf.mxu0  ;;  %v10214_v35 = vpop.f32.mrf.mxu1  ;;  %v14515_v59 = vrot.slane %v6250_v27, %v13746_v12  ;;  %v14518_v8 = vrot.slane %v6250_v27, %v13748_v29  ;;  %v14523_v47 = vrot.slane %v6250_v27, %v13750_v17  ;;  %v14526_v60 = vrot.slane %v6250_v27, %v13752_v36  ;;  %v12657_v54 = vld [vmem:[%s13474_s8 + $0xb10] ss:$8 sps:$4 sm:$0xff]   ;;  %v12668_v13 = vld [vmem:[%s13474_s8 + $0xaf4] ss:$8 sps:$4 sm:$0xff]  }
 0x5f2   : > { %v14499_v31 = vadd.f32 %v10212_v55, %v10172_v5  ;;  %10466 = vmatpush1.bf16.msra.mxu0 %v12624_v50  ;;  %10507 = vmatpush1.bf16.msra.mxu1 %v12627_v14  ;;  %v14529_v30 = vrot.slane %v6250_v27, %v13754_v18  ;;  %v14534_v48 = vrot.slane %v6250_v27, %v13756_v19  ;;  %v12654_v14 = vld [vmem:[%s13474_s8 + $0xa10] ss:$8 sps:$4 sm:$0xff]   ;;  %v12671_v44 = vld [vmem:[%s13474_s8 + $0xbf4] ss:$8 sps:$4 sm:$0xff]  }
 0x5f3   : > { %v10174_v51 = vpop.f32.mrf.mxu0  ;;  %v10215_v33 = vpop.f32.mrf.mxu1  ;;  %10467 = vmatprep.subr.bf16.mxu0 %v12632_v43  ;;  %10508 = vmatprep.subr.bf16.mxu1 %v12635_v53  ;;  %v14537_v9 = vrot.slane %v6250_v27, %v13758_v20  ;;  %v14540_v23 = vrot.slane %v6250_v27, %v13760_v21  ;;  %v6443_v37 = vmul.f32 %v14515_v59, %v14381_v10  ;;  %v12662_v10 = vld [vmem:[%s13474_s8 + $0xa04] ss:$8 sps:$4 sm:$0xff]  }
 0x5f4   : > { %v6444_v50 = vmul.f32 %v14518_v8, %v14383_v45  ;;  %v6445_v55 = vmul.f32 %v14523_v47, %v14385_v28  ;;  %v6446_v43 = vmul.f32 %v14526_v60, %v14387_v7  ;;  %v6447_v53 = vmul.f32 %v14529_v30, %v14391_v25  ;;  %v12665_v45 = vld [vmem:[%s13474_s8 + $0xb04] ss:$8 sps:$4 sm:$0xff]   ;;  %v12660_v7 = vld [vmem:[%s13474_s8 + $0xa00] ss:$8 sps:$4 sm:$0xff]  }
 0x5f5   : > { %v6448_v5 = vmul.f32 %v14534_v48, %v14401_v26  ;;  %v6449_v52 = vmul.f32 %v14537_v9, %v14413_v11  ;;  %v6450_v28 = vmul.f32 %v14540_v23, %v14415_v49  ;;  %v12663_v25 = vld [vmem:[%s13474_s8 + $0xb00] ss:$8 sps:$4 sm:$0xff]   ;;  %v12666_v49 = vld [vmem:[%s13474_s8 + $0xaf0] ss:$8 sps:$4 sm:$0xff]   ;;  %v12674_v33 = vld [vmem:[%s13474_s8 + $0xae4] ss:$8 sps:$4 sm:$0xff]  }
 0x5f6   : > { %10468 = vmatpush1.bf16.msra.mxu0 %v12630_v38  ;;  %10509 = vmatpush1.bf16.msra.mxu1 %v12633_v24  ;;  %v6630_v35 = vcombine.low %v6443_v37, %v6444_v50  ;;  %v6631_v26 = vcombine.low %v6445_v55, %v6446_v43  ;;  %v12669_v24 = vld [vmem:[%s13474_s8 + $0xbf0] ss:$8 sps:$4 sm:$0xff]   ;;  %v12687_v37 = vld [vmem:[%s13474_s8 + $0xbc0] ss:$8 sps:$4 sm:$0xff]   ;;  %v12692_v50 = vld [vmem:[%s13474_s8 + $0xab4] ss:$8 sps:$4 sm:$0xff]  }
 0x5f7   : > { %10469 = vmatprep.subr.bf16.mxu0 %v12638_v15  ;;  %10510 = vmatprep.subr.bf16.mxu1 %v12641_v32  ;;  %v6632_v38 = vcombine.low %v6447_v53, %v6448_v5  ;;  %v6633_v11 = vcombine.low %v6449_v52, %v6450_v28  ;;  %v12677_v15 = vld [vmem:[%s13474_s8 + $0xbe4] ss:$8 sps:$4 sm:$0xff]   ;;  %v6254_v55 = vld [vmem:[%s13482_s9 + $0x18] sm:$0xff]  ;;  %v12696_v5 = vld [vmem:[%s13474_s8 + $0xaa0] ss:$8 sps:$4 sm:$0xff]  }
 0x5f8   : > { %v6640_v51 = vrot.slane %v6630_v35, %v13737_v56  ;;  %v6647_v32 = vrot.slane %v6631_v26, %v13737_v56  ;;  %v12690_v43 = vld [vmem:[%s13474_s8 + $0xab0] ss:$8 sps:$4 sm:$0xff]   ;;  %v12698_v53 = vld [vmem:[%s13474_s8 + $0xaa4] ss:$8 sps:$4 sm:$0xff]   ;;  %v12699_v52 = vld [vmem:[%s13474_s8 + $0xba0] ss:$8 sps:$4 sm:$0xff]  }
 0x5f9   : > { %v6654_v42 = vrot.slane %v6632_v38, %v13737_v56  ;;  %v12985_v28 = vld [vmem:[#allocation3 + $0xd0] sm:$0xff]  ;;  %v12707_v35 = vld [vmem:[%s13474_s8 + $0xb94] ss:$8 sps:$4 sm:$0xff]  }
 0x5fa   : > { %10470 = vmatpush1.bf16.msra.mxu0 %v12636_v62  ;;  %10511 = vmatpush1.bf16.msra.mxu1 %v12639_v6  ;;  %v6661_v62 = vrot.slane %v6633_v11, %v13737_v56  ;;  %v12672_v6 = vld [vmem:[%s13474_s8 + $0xae0] ss:$8 sps:$4 sm:$0xff]   ;;  %v6662_v27 = vcombine.low %v6640_v51, %v6647_v32  ;;  %v12702_v11 = vld [vmem:[%s13474_s8 + $0xa90] ss:$8 sps:$4 sm:$0xff]   ;;  %v6935_v51 = vmax.f32 %v14333_v22, 0.0 }
 0x5fb   : > { %10471 = vmatprep.subr.bf16.mxu0 %v12644_v1  ;;  %10512 = vmatprep.subr.bf16.mxu1 %v12647_v39  ;;  %v12680_v1 = vld [vmem:[%s13474_s8 + $0xad4] ss:$8 sps:$4 sm:$0xff]  }
 0x5fc   : > { %v12683_v39 = vld [vmem:[%s13474_s8 + $0xbd4] ss:$8 sps:$4 sm:$0xff]  }
 0x5fe   : > { %10472 = vmatpush1.bf16.msra.mxu0 %v12642_v2  ;;  %10513 = vmatpush1.bf16.msra.mxu1 %v12645_v34  ;;  %v6663_v2 = vcombine.low %v6654_v42, %v6661_v62  ;;  %v12678_v34 = vld [vmem:[%s13474_s8 + $0xad0] ss:$8 sps:$4 sm:$0xff]   ;;  %v6718_v42 = vmul.f32 %v14540_v23, %v14363_v41  ;;  %v12988_v62 = vld [vmem:[#allocation3 + $0xa0] sm:$0xff] }
 0x5ff   : > { %10473 = vmatprep.subr.bf16.mxu0 %v12650_v0  ;;  %10514 = vmatprep.subr.bf16.mxu1 %v12653_v57  ;;  %v12681_v0 = vld [vmem:[%s13474_s8 + $0xbd0] ss:$8 sps:$4 sm:$0xff]   ;;  %v12686_v57 = vld [vmem:[%s13474_s8 + $0xac4] ss:$8 sps:$4 sm:$0xff]   ;;  %v12711_v41 = vld [vmem:[%s13474_s8 + $0xb80] ss:$8 sps:$4 sm:$0xff]  }
 0x602   : > { %10474 = vmatpush1.bf16.msra.mxu0 %v12648_v61  ;;  %10515 = vmatpush1.bf16.msra.mxu1 %v12651_v58  ;;  %v12689_v61 = vld [vmem:[%s13474_s8 + $0xbc4] ss:$8 sps:$4 sm:$0xff]   ;;  %v6670_v58 = vrot.slane %v6662_v27, %v13737_v56 }
 0x603   : > { %10475 = vmatprep.subr.bf16.mxu0 %v12656_v3  ;;  %10516 = vmatprep.subr.bf16.mxu1 %v12659_v40  ;;  %v6677_v3 = vrot.slane %v6663_v2, %v13737_v56  ;;  %v12684_v40 = vld [vmem:[%s13474_s8 + $0xac0] ss:$8 sps:$4 sm:$0xff]   ;;  %v12693_v56 = vld [vmem:[%s13474_s8 + $0xbb0] ss:$8 sps:$4 sm:$0xff]  }
 0x604   : > { %v12714_v2 = vld [vmem:[%s13474_s8 + $0xc70] ss:$8 sps:$4 sm:$0xff]  }
 0x606   : > { %10476 = vmatpush1.bf16.msra.mxu0 %v12654_v14  ;;  %10517 = vmatpush1.bf16.msra.mxu1 %v12657_v54  ;;  %v12695_v14 = vld [vmem:[%s13474_s8 + $0xbb4] ss:$8 sps:$4 sm:$0xff]   ;;  %v6678_v54 = vcombine.low %v6670_v58, %v6677_v3 }
 0x607   : > { %10477 = vmatprep.subr.bf16.mxu0 %v12662_v10  ;;  %10518 = vmatprep.subr.bf16.mxu1 %v12665_v45  ;;  %v12701_v10 = vld [vmem:[%s13474_s8 + $0xba4] ss:$8 sps:$4 sm:$0xff]  }
 0x608   : > { %v14593_v45 = vsub.f32 %v6254_v55, %v6678_v54 }
 0x60a   : > { %10478 = vmatpush1.bf16.msra.mxu0 %v12660_v7  ;;  %10519 = vmatpush1.bf16.msra.mxu1 %v12663_v25  ;;  %v6712_v7 = vmul.f32 %v12985_v28, %v14518_v8  ;;  %v12704_v25 = vld [vmem:[%s13474_s8 + $0xa94] ss:$8 sps:$4 sm:$0xff]   ;;  %v6834_v38 = vrot.slane %v14593_v45, %v13752_v36  ;;  %v12710_v8 = vld [vmem:[%s13474_s8 + $0xa84] ss:$8 sps:$4 sm:$0xff]   ;;  %v6842_v36 = vrot.slane %v14593_v45, %v13756_v19  ;;  %v12726_v28 = vld [vmem:[%s13474_s8 + $0xc50] ss:$8 sps:$4 sm:$0xff]  }
 0x60b   : > { %10479 = vmatprep.subr.bf16.mxu0 %v12668_v13  ;;  %10520 = vmatprep.subr.bf16.mxu1 %v12671_v44  ;;  %v6826_v13 = vrot.slane %v14593_v45, %v13748_v29  ;;  %v12986_v44 = vld [vmem:[#allocation3 + $0x28] sm:$0xff]  ;;  %v6850_v22 = vrot.slane %v14593_v45, %v13760_v21  ;;  %v6846_v19 = vrot.slane %v14593_v45, %v13758_v20 }
 0x60c   : > { %v6714_v26 = vmul.f32 %v12986_v44, %v14526_v60  ;;  %v12987_v60 = vld [vmem:[#allocation3 + $0xf8] sm:$0xff]  ;;  %v12732_v44 = vld [vmem:[%s13474_s8 + $0xc40] ss:$8 sps:$4 sm:$0xff]  }
 0x60d   : > { %v6908_v29 = vadd.f32 %v6826_v13, %v6712_v7  ;;  %v6716_v32 = vmul.f32 %v12987_v60, %v14534_v48  ;;  %v6717_v48 = vmul.f32 %v14537_v9, %v14356_v4  ;;  %v14629_v21 = vadd.f32 %v6850_v22, %v6718_v42  ;;  %v12729_v7 = vld [vmem:[%s13474_s8 + $0xd50] ss:$8 sps:$4 sm:$0xff]   ;;  %v12737_v13 = vld [vmem:[%s13474_s8 + $0xd44] ss:$8 sps:$4 sm:$0xff]   ;;  %v12755_v60 = vld [vmem:[%s13474_s8 + $0xd14] ss:$8 sps:$4 sm:$0xff]  }
 0x60e   : > { %10480 = vmatpush2.bf16.msra.mxu0 %v12666_v49  ;;  %10521 = vmatpush2.bf16.msra.mxu1 %v12669_v24  ;;  %v12705_v49 = vld [vmem:[%s13474_s8 + $0xb90] ss:$8 sps:$4 sm:$0xff]   ;;  %v12713_v24 = vld [vmem:[%s13474_s8 + $0xb84] ss:$8 sps:$4 sm:$0xff]  }
 0x60f   : > { %10481 = vmatprep.subr.bf16.mxu0 %v12674_v33  ;;  %10522 = vmatprep.subr.bf16.mxu1 %v12677_v15  ;;  %v6937_v33 = vmax.f32 %v14354_v46, 0.0  ;;  %v6910_v15 = vadd.f32 %v6834_v38, %v6714_v26  ;;  %v6715_v46 = vmul.f32 %v12988_v62, %v14529_v30  ;;  %v14627_v23 = vadd.f32 %v6842_v36, %v6716_v32  ;;  %v12719_v30 = vld [vmem:[%s13474_s8 + $0xd74] ss:$8 sps:$4 sm:$0xff]   ;;  %v12735_v26 = vld [vmem:[%s13474_s8 + $0xd40] ss:$8 sps:$4 sm:$0xff]  }
 0x610   : > { %v14635_v9 = vadd.f32 %v6846_v19, %v6717_v48  ;;  %v6940_v20 = vmax.f32 %v6908_v29, 0.0  ;;  %v12740_v38 = vld [vmem:[%s13474_s8 + $0xc34] ss:$8 sps:$4 sm:$0xff]   ;;  %v12747_v29 = vld [vmem:[%s13474_s8 + $0xd20] ss:$8 sps:$4 sm:$0xff]  }
 0x611   : > { %v6969_v27 = vpack.c.bf16 %v6937_v33, %v6937_v33  ;;  %v12744_v33 = vld [vmem:[%s13474_s8 + $0xc20] ss:$8 sps:$4 sm:$0xff]   ;;  %v12750_v32 = vld [vmem:[%s13474_s8 + $0xc10] ss:$8 sps:$4 sm:$0xff]   ;;  %v12758_v42 = vld [vmem:[%s13474_s8 + $0xc04] ss:$8 sps:$4 sm:$0xff]  }
 0x612   : > { %10482 = vmatpush2.bf16.msra.mxu0 %v12672_v6  ;;  %10523 = vmatpush2.bf16.msra.mxu1 %v12675_v63  ;;  %v6838_v6 = vrot.slane %v14593_v45, %v13754_v18  ;;  %v12708_v63 = vld [vmem:[%s13474_s8 + $0xa80] ss:$8 sps:$4 sm:$0xff]   ;;  %v12716_v18 = vld [vmem:[%s13474_s8 + $0xc74] ss:$8 sps:$4 sm:$0xff]   ;;  %v12753_v36 = vld [vmem:[%s13474_s8 + $0xd10] ss:$8 sps:$4 sm:$0xff]  }
 0x613   : > { %10483 = vmatprep.subr.bf16.mxu0 %v12680_v1  ;;  %10524 = vmatprep.subr.bf16.mxu1 %v12683_v39  ;;  %v6942_v1 = vmax.f32 %v6910_v15, 0.0  ;;  %v6967_v39 = vpack.c.bf16 %v6935_v51, %v6935_v51  ;;  %v12749_v51 = vld [vmem:[%s13474_s8 + $0xd24] ss:$8 sps:$4 sm:$0xff]   ;;  %v12752_v15 = vld [vmem:[%s13474_s8 + $0xc14] ss:$8 sps:$4 sm:$0xff]  }
 0x614   : > { %v14633_v4 = vadd.f32 %v6838_v6, %v6715_v46  ;;  %v12761_v22 = vld [vmem:[%s13474_s8 + $0xd04] ss:$8 sps:$4 sm:$0xff]   ;;  %v12756_v62 = vld [vmem:[%s13474_s8 + $0xc00] ss:$8 sps:$4 sm:$0xff]   ;;  %v12764_v6 = vld [vmem:[%s13474_s8 + $0xcf4] ss:$8 sps:$4 sm:$0xff]  }
 0x615   : > { %v6974_v58 = vpack.c.bf16 %v6942_v1, %v6942_v1  ;;  %v12759_v46 = vld [vmem:[%s13474_s8 + $0xd00] ss:$8 sps:$4 sm:$0xff]   ;;  %v12767_v48 = vld [vmem:[%s13474_s8 + $0xdf4] ss:$8 sps:$4 sm:$0xff]   ;;  %v12762_v19 = vld [vmem:[%s13474_s8 + $0xcf0] ss:$8 sps:$4 sm:$0xff]  }
 0x616   : > { %10484 = vmatpush2.bf16.msra.mxu0 %v12678_v34  ;;  %10525 = vmatpush2.bf16.msra.mxu1 %v12681_v0  ;;  %v12717_v34 = vld [vmem:[%s13474_s8 + $0xd70] ss:$8 sps:$4 sm:$0xff]   ;;  %v12722_v0 = vld [vmem:[%s13474_s8 + $0xc64] ss:$8 sps:$4 sm:$0xff]   ;;  %v12776_v1 = vld [vmem:[%s13474_s8 + $0xcd4] ss:$8 sps:$4 sm:$0xff]  }
 0x617   : > { %10485 = vmatprep.subr.bf16.mxu0 %v12686_v57  ;;  %10526 = vmatprep.subr.bf16.mxu1 %v12689_v61  ;;  %v12725_v57 = vld [vmem:[%s13474_s8 + $0xd64] ss:$8 sps:$4 sm:$0xff]   ;;  %v6972_v61 = vpack.c.bf16 %v6940_v20, %v6940_v20  ;;  %v12771_v20 = vld [vmem:[%s13474_s8 + $0xde0] ss:$8 sps:$4 sm:$0xff]  }
 0x61a   : > { %10486 = vmatpush2.bf16.msra.mxu0 %v12684_v40  ;;  %10527 = vmatpush2.bf16.msra.mxu1 %v12687_v37 }
 0x61b   : > { %10487 = vmatprep.subr.bf16.mxu0 %v12692_v50  ;;  %10528 = vmatprep.subr.bf16.mxu1 %v12695_v14  ;;  %v12720_v50 = vld [vmem:[%s13474_s8 + $0xc60] ss:$8 sps:$4 sm:$0xff]  }
 0x61c   : > { %v12723_v14 = vld [vmem:[%s13474_s8 + $0xd60] ss:$8 sps:$4 sm:$0xff]  }
 0x61e   : > { %10488 = vmatpush2.bf16.msra.mxu0 %v12690_v43  ;;  %10529 = vmatpush2.bf16.msra.mxu1 %v12693_v56  ;;  %v12728_v43 = vld [vmem:[%s13474_s8 + $0xc54] ss:$8 sps:$4 sm:$0xff]  }
 0x61f   : > { %10489 = vmatprep.subr.bf16.mxu0 %v12698_v53  ;;  %10530 = vmatprep.subr.bf16.mxu1 %v12701_v10  ;;  %v12731_v56 = vld [vmem:[%s13474_s8 + $0xd54] ss:$8 sps:$4 sm:$0xff]  }
 0x622   : > { %10490 = vmatpush2.bf16.msra.mxu0 %v12696_v5  ;;  %10531 = vmatpush2.bf16.msra.mxu1 %v12699_v52 }
 0x623   : > { %10491 = vmatprep.subr.bf16.mxu0 %v12704_v25  ;;  %10532 = vmatprep.subr.bf16.mxu1 %v12707_v35 }
 0x626   : > { %10492 = vmatpush2.bf16.msra.mxu0 %v12702_v11  ;;  %10533 = vmatpush2.bf16.msra.mxu1 %v12705_v49  ;;  %v12743_v11 = vld [vmem:[%s13474_s8 + $0xd34] ss:$8 sps:$4 sm:$0xff]   ;;  %v12738_v49 = vld [vmem:[%s13474_s8 + $0xc30] ss:$8 sps:$4 sm:$0xff]  }
 0x627   : > { %10493 = vmatprep.subr.bf16.mxu0 %v12710_v8  ;;  %10534 = vmatprep.subr.bf16.mxu1 %v12713_v24  ;;  %v12741_v8 = vld [vmem:[%s13474_s8 + $0xd30] ss:$8 sps:$4 sm:$0xff]   ;;  %v12746_v24 = vld [vmem:[%s13474_s8 + $0xc24] ss:$8 sps:$4 sm:$0xff]  }
 0x62a   : > { %10494 = vmatpush2.bf16.msra.mxu0 %v12708_v63  ;;  %10535 = vmatpush2.bf16.msra.mxu1 %v12711_v41  ;;  %v12765_v63 = vld [vmem:[%s13474_s8 + $0xdf0] ss:$8 sps:$4 sm:$0xff]   ;;  %v12770_v41 = vld [vmem:[%s13474_s8 + $0xce4] ss:$8 sps:$4 sm:$0xff]  }
 0x62b   : > { %10545 = vmatprep.subr.bf16.mxu0 %v12716_v18  ;;  %10586 = vmatprep.subr.bf16.mxu1 %v12719_v30  ;;  %v12773_v18 = vld [vmem:[%s13474_s8 + $0xde4] ss:$8 sps:$4 sm:$0xff]   ;;  %v12768_v30 = vld [vmem:[%s13474_s8 + $0xce0] ss:$8 sps:$4 sm:$0xff]  }
 0x62d   : > { %v10251_v3 = vpop.f32.mrf.mxu0  ;;  %v10292_v40 = vpop.f32.mrf.mxu1  ;;  %10496 = vmatmul.mubr.bf16.vlgmr.msra.gmra.mxu0 %v6967_v39  ;;  %10537 = vmatmul.mubr.bf16.vlgmr.msra.gmra.mxu1 %v6969_v27  ;;  %v12779_v39 = vld [vmem:[%s13474_s8 + $0xdd4] ss:$8 sps:$4 sm:$0xff]   ;;  %v12774_v27 = vld [vmem:[%s13474_s8 + $0xcd0] ss:$8 sps:$4 sm:$0xff]  }
 0x62e   : > { %v10252_v37 = vadd.f32 %v10251_v3, %v14494_v16  ;;  %10546 = vmatpush1.bf16.msra.mxu0 %v12714_v2  ;;  %10587 = vmatpush1.bf16.msra.mxu1 %v12717_v34  ;;  %v12777_v2 = vld [vmem:[%s13474_s8 + $0xdd0] ss:$8 sps:$4 sm:$0xff]   ;;  %v12782_v34 = vld [vmem:[%s13474_s8 + $0xcc4] ss:$8 sps:$4 sm:$0xff]   ;;  %v12791_v3 = vld [vmem:[%s13474_s8 + $0xdb4] ss:$8 sps:$4 sm:$0xff]  }
 0x62f   : > { %v10253_v54 = vpop.f32.mrf.mxu0  ;;  %v10294_v55 = vpop.f32.mrf.mxu1  ;;  %10547 = vmatprep.subr.bf16.mxu0 %v12722_v0  ;;  %10588 = vmatprep.subr.bf16.mxu1 %v12725_v57  ;;  %v12785_v0 = vld [vmem:[%s13474_s8 + $0xdc4] ss:$8 sps:$4 sm:$0xff]   ;;  %v12780_v57 = vld [vmem:[%s13474_s8 + $0xcc0] ss:$8 sps:$4 sm:$0xff]  }
 0x630   : > { %v14646_v53 = vadd.f32 %v10292_v40, %v10252_v37  ;;  %v10254_v10 = vadd.f32 %v10253_v54, %v14499_v31  ;;  %10577 = vmatprep.mubr.bf16.mxu0 %v6972_v61  ;;  %10618 = vmatprep.mubr.bf16.mxu1 %v6974_v58  ;;  %v12734_v31 = vld [vmem:[%s13474_s8 + $0xc44] ss:$8 sps:$4 sm:$0xff]   ;;  %v12783_v61 = vld [vmem:[%s13474_s8 + $0xdc0] ss:$8 sps:$4 sm:$0xff]   ;;  %v12788_v58 = vld [vmem:[%s13474_s8 + $0xcb4] ss:$8 sps:$4 sm:$0xff]  }
 0x631   : > { %v10255_v16 = vpop.f32.mrf.mxu0  ;;  %v10296_v5 = vpop.f32.mrf.mxu1  ;;  %v12786_v40 = vld [vmem:[%s13474_s8 + $0xcb0] ss:$8 sps:$4 sm:$0xff]   ;;  %v12989_v54 = vld [vmem:[#allocation3 + $0xa8] sm:$0xff] }
 0x632   : > { %v14649_v52 = vadd.f32 %v10294_v55, %v10254_v10  ;;  %10548 = vmatpush1.bf16.msra.mxu0 %v12720_v50  ;;  %10589 = vmatpush1.bf16.msra.mxu1 %v12723_v14  ;;  %v12789_v37 = vld [vmem:[%s13474_s8 + $0xdb0] ss:$8 sps:$4 sm:$0xff]   ;;  %v12794_v50 = vld [vmem:[%s13474_s8 + $0xca4] ss:$8 sps:$4 sm:$0xff]   ;;  %v6711_v55 = vmul.f32 %v12989_v54, %v14515_v59  ;;  %v6830_v16 = vrot.slane %v14593_v45, %v13750_v17  ;;  %v12792_v5 = vld [vmem:[%s13474_s8 + $0xca0] ss:$8 sps:$4 sm:$0xff]  }
 0x633   : > { %v10256_v25 = vpop.f32.mrf.mxu0  ;;  %v10297_v35 = vpop.f32.mrf.mxu1  ;;  %10549 = vmatprep.subr.bf16.mxu0 %v12728_v43  ;;  %10590 = vmatprep.subr.bf16.mxu1 %v12731_v56  ;;  %v12797_v14 = vld [vmem:[%s13474_s8 + $0xda4] ss:$8 sps:$4 sm:$0xff]   ;;  %v6822_v43 = vrot.slane %v14593_v45, %v13746_v12  ;;  %v12800_v59 = vld [vmem:[%s13474_s8 + $0xc94] ss:$8 sps:$4 sm:$0xff]   ;;  %v12801_v17 = vld [vmem:[%s13474_s8 + $0xd90] ss:$8 sps:$4 sm:$0xff]  }
 0x634   : > { %v12990_v56 = vld [vmem:[#allocation3 + $0x10] sm:$0xff]  ;;  %v12848_v54 = vld [vmem:[%s13474_s8 + $0xe14] ss:$8 sps:$4 sm:$0xff]  }
 0x635   : > { %v6713_v10 = vmul.f32 %v12990_v56, %v14523_v47  ;;  %v6907_v12 = vadd.f32 %v6822_v43, %v6711_v55  ;;  %v12798_v47 = vld [vmem:[%s13474_s8 + $0xc90] ss:$8 sps:$4 sm:$0xff]   ;;  %v12806_v45 = vld [vmem:[%s13474_s8 + $0xc84] ss:$8 sps:$4 sm:$0xff]   ;;  %v12851_v55 = vld [vmem:[%s13474_s8 + $0xf14] ss:$8 sps:$4 sm:$0xff]  }
 0x636   : > { %10550 = vmatpush1.bf16.msra.mxu0 %v12726_v28  ;;  %10591 = vmatpush1.bf16.msra.mxu1 %v12729_v7  ;;  %v12795_v28 = vld [vmem:[%s13474_s8 + $0xda0] ss:$8 sps:$4 sm:$0xff]   ;;  %v12803_v7 = vld [vmem:[%s13474_s8 + $0xd94] ss:$8 sps:$4 sm:$0xff]   ;;  %v12809_v35 = vld [vmem:[%s13474_s8 + $0xd84] ss:$8 sps:$4 sm:$0xff]  }
 0x637   : > { %10551 = vmatprep.subr.bf16.mxu0 %v12734_v31  ;;  %10592 = vmatprep.subr.bf16.mxu1 %v12737_v13  ;;  %v6909_v25 = vadd.f32 %v6830_v16, %v6713_v10  ;;  %v6939_v31 = vmax.f32 %v6907_v12, 0.0  ;;  %v12846_v43 = vld [vmem:[%s13474_s8 + $0xe10] ss:$8 sps:$4 sm:$0xff]   ;;  %v12854_v10 = vld [vmem:[%s13474_s8 + $0xe04] ss:$8 sps:$4 sm:$0xff]  }
 0x638   : > { %v12849_v56 = vld [vmem:[%s13474_s8 + $0xf10] ss:$8 sps:$4 sm:$0xff]   ;;  %v12857_v16 = vld [vmem:[%s13474_s8 + $0xf04] ss:$8 sps:$4 sm:$0xff]  }
 0x639   : > { %v6941_v13 = vmax.f32 %v6909_v25, 0.0  ;;  %v12858_v12 = vld [vmem:[%s13474_s8 + $0xef0] ss:$8 sps:$4 sm:$0xff]  }
 0x63a   : > { %10552 = vmatpush1.bf16.msra.mxu0 %v12732_v44  ;;  %10593 = vmatpush1.bf16.msra.mxu1 %v12735_v26  ;;  %v12804_v44 = vld [vmem:[%s13474_s8 + $0xc80] ss:$8 sps:$4 sm:$0xff]   ;;  %v12861_v25 = vld [vmem:[%s13474_s8 + $0xff0] ss:$8 sps:$4 sm:$0xff]  }
 0x63b   : > { %10553 = vmatprep.subr.bf16.mxu0 %v12740_v38  ;;  %10594 = vmatprep.subr.bf16.mxu1 %v12743_v11  ;;  %v12807_v26 = vld [vmem:[%s13474_s8 + $0xd80] ss:$8 sps:$4 sm:$0xff]   ;;  %v12812_v38 = vld [vmem:[%s13474_s8 + $0xe74] ss:$8 sps:$4 sm:$0xff]  }
 0x63c   : > { %v12815_v11 = vld [vmem:[%s13474_s8 + $0xf74] ss:$8 sps:$4 sm:$0xff]  }
 0x63e   : > { %10554 = vmatpush1.bf16.msra.mxu0 %v12738_v49  ;;  %10595 = vmatpush1.bf16.msra.mxu1 %v12741_v8  ;;  %v6944_v49 = vmax.f32 %v14627_v23, 0.0  ;;  %v6946_v8 = vmax.f32 %v14629_v21, 0.0 }
 0x63f   : > { %10555 = vmatprep.subr.bf16.mxu0 %v12746_v24  ;;  %10596 = vmatprep.subr.bf16.mxu1 %v12749_v51  ;;  %v6971_v24 = vpack.c.bf16 %v6939_v31, %v6939_v31  ;;  %v6973_v51 = vpack.c.bf16 %v6941_v13, %v6941_v13  ;;  %v12872_v31 = vld [vmem:[%s13474_s8 + $0xed4] ss:$8 sps:$4 sm:$0xff]  }
 0x640   : > { %v12875_v13 = vld [vmem:[%s13474_s8 + $0xfd4] ss:$8 sps:$4 sm:$0xff]  }
 0x642   : > { %10556 = vmatpush1.bf16.msra.mxu0 %v12744_v33  ;;  %10597 = vmatpush1.bf16.msra.mxu1 %v12747_v29  ;;  %v12810_v33 = vld [vmem:[%s13474_s8 + $0xe70] ss:$8 sps:$4 sm:$0xff]  }
 0x643   : > { %10557 = vmatprep.subr.bf16.mxu0 %v12752_v15  ;;  %10598 = vmatprep.subr.bf16.mxu1 %v12755_v60  ;;  %v12813_v29 = vld [vmem:[%s13474_s8 + $0xf70] ss:$8 sps:$4 sm:$0xff]   ;;  %v12818_v15 = vld [vmem:[%s13474_s8 + $0xe64] ss:$8 sps:$4 sm:$0xff]  }
 0x644   : > { %v12821_v60 = vld [vmem:[%s13474_s8 + $0xf64] ss:$8 sps:$4 sm:$0xff]  }
 0x646   : > { %10558 = vmatpush1.bf16.msra.mxu0 %v12750_v32  ;;  %10599 = vmatpush1.bf16.msra.mxu1 %v12753_v36  ;;  %v6976_v32 = vpack.c.bf16 %v6944_v49, %v6944_v49  ;;  %v6978_v36 = vpack.c.bf16 %v6946_v8, %v6946_v8  ;;  %v12876_v49 = vld [vmem:[%s13474_s8 + $0xec0] ss:$8 sps:$4 sm:$0xff]  }
 0x647   : > { %10559 = vmatprep.subr.bf16.mxu0 %v12758_v42  ;;  %10600 = vmatprep.subr.bf16.mxu1 %v12761_v22  ;;  %v12816_v22 = vld [vmem:[%s13474_s8 + $0xe60] ss:$8 sps:$4 sm:$0xff]  }
 0x648   : > { %v12879_v8 = vld [vmem:[%s13474_s8 + $0xfc0] ss:$8 sps:$4 sm:$0xff]  }
 0x64a   : > { %10560 = vmatpush1.bf16.msra.mxu0 %v12756_v62  ;;  %10601 = vmatpush1.bf16.msra.mxu1 %v12759_v46  ;;  %v12819_v62 = vld [vmem:[%s13474_s8 + $0xf60] ss:$8 sps:$4 sm:$0xff]  }
 0x64b   : > { %10561 = vmatprep.subr.bf16.mxu0 %v12764_v6  ;;  %10602 = vmatprep.subr.bf16.mxu1 %v12767_v48  ;;  %v12824_v48 = vld [vmem:[%s13474_s8 + $0xe54] ss:$8 sps:$4 sm:$0xff]  }
 0x64e   : > { %10562 = vmatpush2.bf16.msra.mxu0 %v12762_v19  ;;  %10603 = vmatpush2.bf16.msra.mxu1 %v12765_v63  ;;  %v12827_v19 = vld [vmem:[%s13474_s8 + $0xf54] ss:$8 sps:$4 sm:$0xff]  }
 0x64f   : > { %10563 = vmatprep.subr.bf16.mxu0 %v12770_v41  ;;  %10604 = vmatprep.subr.bf16.mxu1 %v12773_v18 }
 0x652   : > { %10564 = vmatpush2.bf16.msra.mxu0 %v12768_v30  ;;  %10605 = vmatpush2.bf16.msra.mxu1 %v12771_v20  ;;  %v12822_v20 = vld [vmem:[%s13474_s8 + $0xe50] ss:$8 sps:$4 sm:$0xff]  }
 0x653   : > { %10565 = vmatprep.subr.bf16.mxu0 %v12776_v1  ;;  %10606 = vmatprep.subr.bf16.mxu1 %v12779_v39  ;;  %v12825_v1 = vld [vmem:[%s13474_s8 + $0xf50] ss:$8 sps:$4 sm:$0xff]  }
 0x656   : > { %10566 = vmatpush2.bf16.msra.mxu0 %v12774_v27  ;;  %10607 = vmatpush2.bf16.msra.mxu1 %v12777_v2  ;;  %v12833_v2 = vld [vmem:[%s13474_s8 + $0xf44] ss:$8 sps:$4 sm:$0xff]  }
 0x657   : > { %10567 = vmatprep.subr.bf16.mxu0 %v12782_v34  ;;  %10608 = vmatprep.subr.bf16.mxu1 %v12785_v0  ;;  %v12828_v34 = vld [vmem:[%s13474_s8 + $0xe40] ss:$8 sps:$4 sm:$0xff]  }
 0x658   : > { %v12831_v0 = vld [vmem:[%s13474_s8 + $0xf40] ss:$8 sps:$4 sm:$0xff]  }
 0x65a   : > { %10568 = vmatpush2.bf16.msra.mxu0 %v12780_v57  ;;  %10609 = vmatpush2.bf16.msra.mxu1 %v12783_v61  ;;  %v12836_v57 = vld [vmem:[%s13474_s8 + $0xe34] ss:$8 sps:$4 sm:$0xff]  }
 0x65b   : > { %10569 = vmatprep.subr.bf16.mxu0 %v12788_v58  ;;  %10610 = vmatprep.subr.bf16.mxu1 %v12791_v3  ;;  %v12839_v61 = vld [vmem:[%s13474_s8 + $0xf34] ss:$8 sps:$4 sm:$0xff]   ;;  %v12834_v58 = vld [vmem:[%s13474_s8 + $0xe30] ss:$8 sps:$4 sm:$0xff]  }
 0x65c   : > { %v12837_v3 = vld [vmem:[%s13474_s8 + $0xf30] ss:$8 sps:$4 sm:$0xff]  }
 0x65e   : > { %10570 = vmatpush2.bf16.msra.mxu0 %v12786_v40  ;;  %10611 = vmatpush2.bf16.msra.mxu1 %v12789_v37  ;;  %v12842_v40 = vld [vmem:[%s13474_s8 + $0xe24] ss:$8 sps:$4 sm:$0xff]  }
 0x65f   : > { %10571 = vmatprep.subr.bf16.mxu0 %v12794_v50  ;;  %10612 = vmatprep.subr.bf16.mxu1 %v12797_v14  ;;  %v12845_v37 = vld [vmem:[%s13474_s8 + $0xf24] ss:$8 sps:$4 sm:$0xff]   ;;  %v12840_v50 = vld [vmem:[%s13474_s8 + $0xe20] ss:$8 sps:$4 sm:$0xff]  }
 0x660   : > { %v12843_v14 = vld [vmem:[%s13474_s8 + $0xf20] ss:$8 sps:$4 sm:$0xff]  }
 0x662   : > { %10572 = vmatpush2.bf16.msra.mxu0 %v12792_v5  ;;  %10613 = vmatpush2.bf16.msra.mxu1 %v12795_v28  ;;  %v12852_v5 = vld [vmem:[%s13474_s8 + $0xe00] ss:$8 sps:$4 sm:$0xff]  }
 0x663   : > { %10573 = vmatprep.subr.bf16.mxu0 %v12800_v59  ;;  %10614 = vmatprep.subr.bf16.mxu1 %v12803_v7  ;;  %v12855_v28 = vld [vmem:[%s13474_s8 + $0xf00] ss:$8 sps:$4 sm:$0xff]   ;;  %v12860_v59 = vld [vmem:[%s13474_s8 + $0xef4] ss:$8 sps:$4 sm:$0xff]  }
 0x664   : > { %v12863_v7 = vld [vmem:[%s13474_s8 + $0xff4] ss:$8 sps:$4 sm:$0xff]  }
 0x666   : > { %10574 = vmatpush2.bf16.msra.mxu0 %v12798_v47  ;;  %10615 = vmatpush2.bf16.msra.mxu1 %v12801_v17  ;;  %v12866_v47 = vld [vmem:[%s13474_s8 + $0xee4] ss:$8 sps:$4 sm:$0xff]  }
 0x667   : > { %10575 = vmatprep.subr.bf16.mxu0 %v12806_v45  ;;  %10616 = vmatprep.subr.bf16.mxu1 %v12809_v35  ;;  %v12869_v17 = vld [vmem:[%s13474_s8 + $0xfe4] ss:$8 sps:$4 sm:$0xff]   ;;  %v12864_v45 = vld [vmem:[%s13474_s8 + $0xee0] ss:$8 sps:$4 sm:$0xff]  }
 0x668   : > { %v12867_v35 = vld [vmem:[%s13474_s8 + $0xfe0] ss:$8 sps:$4 sm:$0xff]  }
 0x66a   : > { %10576 = vmatpush2.bf16.msra.mxu0 %v12804_v44  ;;  %10617 = vmatpush2.bf16.msra.mxu1 %v12807_v26  ;;  %v12870_v44 = vld [vmem:[%s13474_s8 + $0xed0] ss:$8 sps:$4 sm:$0xff]  }
 0x66b   : > { %10627 = vmatprep.subr.bf16.mxu0 %v12812_v38  ;;  %10668 = vmatprep.subr.bf16.mxu1 %v12815_v11  ;;  %v12873_v26 = vld [vmem:[%s13474_s8 + $0xfd0] ss:$8 sps:$4 sm:$0xff]   ;;  %v12878_v38 = vld [vmem:[%s13474_s8 + $0xec4] ss:$8 sps:$4 sm:$0xff]  }
 0x66c   : > { %v12881_v11 = vld [vmem:[%s13474_s8 + $0xfc4] ss:$8 sps:$4 sm:$0xff]  }
 0x66d   : > { %v10333_v42 = vpop.f32.mrf.mxu0  ;;  %v10374_v23 = vpop.f32.mrf.mxu1  ;;  %10578 = vmatmul.mubr.bf16.vlgmr.msra.gmra.mxu0 %v6971_v24  ;;  %10619 = vmatmul.mubr.bf16.vlgmr.msra.gmra.mxu1 %v6973_v51  ;;  %v12884_v24 = vld [vmem:[%s13474_s8 + $0xeb4] ss:$8 sps:$4 sm:$0xff]  }
 0x66e   : > { %v10334_v21 = vadd.f32 %v10333_v42, %v14646_v53  ;;  %10628 = vmatpush1.bf16.msra.mxu0 %v12810_v33  ;;  %10669 = vmatpush1.bf16.msra.mxu1 %v12813_v29  ;;  %v12887_v51 = vld [vmem:[%s13474_s8 + $0xfb4] ss:$8 sps:$4 sm:$0xff]   ;;  %v12882_v33 = vld [vmem:[%s13474_s8 + $0xeb0] ss:$8 sps:$4 sm:$0xff]  }
 0x66f   : > { %v10335_v46 = vpop.f32.mrf.mxu0  ;;  %v10376_v6 = vpop.f32.mrf.mxu1  ;;  %10629 = vmatprep.subr.bf16.mxu0 %v12818_v15  ;;  %10670 = vmatprep.subr.bf16.mxu1 %v12821_v60  ;;  %v12885_v29 = vld [vmem:[%s13474_s8 + $0xfb0] ss:$8 sps:$4 sm:$0xff]   ;;  %v12890_v15 = vld [vmem:[%s13474_s8 + $0xea4] ss:$8 sps:$4 sm:$0xff]   ;;  %v12896_v42 = vld [vmem:[%s13474_s8 + $0xe94] ss:$8 sps:$4 sm:$0xff]  }
 0x670   : > { %v14724_v63 = vadd.f32 %v10374_v23, %v10334_v21  ;;  %v10336_v41 = vadd.f32 %v10335_v46, %v14649_v52  ;;  %10659 = vmatprep.mubr.bf16.mxu0 %v6976_v32  ;;  %10700 = vmatprep.mubr.bf16.mxu1 %v6978_v36  ;;  %v12830_v52 = vld [vmem:[%s13474_s8 + $0xe44] ss:$8 sps:$4 sm:$0xff]   ;;  %v12888_v32 = vld [vmem:[%s13474_s8 + $0xea0] ss:$8 sps:$4 sm:$0xff]   ;;  %v12899_v23 = vld [vmem:[%s13474_s8 + $0xf94] ss:$8 sps:$4 sm:$0xff]  }
 0x671   : > { %v10337_v53 = vpop.f32.mrf.mxu0  ;;  %v10378_v18 = vpop.f32.mrf.mxu1  ;;  %v12893_v60 = vld [vmem:[%s13474_s8 + $0xfa4] ss:$8 sps:$4 sm:$0xff]   ;;  %v12891_v36 = vld [vmem:[%s13474_s8 + $0xfa0] ss:$8 sps:$4 sm:$0xff]   ;;  %v12894_v21 = vld [vmem:[%s13474_s8 + $0xe90] ss:$8 sps:$4 sm:$0xff]  }
 0x672   : > { %v14727_v30 = vadd.f32 %v10376_v6, %v10336_v41  ;;  %10630 = vmatpush1.bf16.msra.mxu0 %v12816_v22  ;;  %10671 = vmatpush1.bf16.msra.mxu1 %v12819_v62  ;;  %v12897_v22 = vld [vmem:[%s13474_s8 + $0xf90] ss:$8 sps:$4 sm:$0xff]   ;;  %v12902_v62 = vld [vmem:[%s13474_s8 + $0xe84] ss:$8 sps:$4 sm:$0xff]   ;;  %v6943_v6 = vmax.f32 %v14633_v4, 0.0 }
 0x673   : > { %v10338_v39 = vpop.f32.mrf.mxu0  ;;  %v10379_v27 = vpop.f32.mrf.mxu1  ;;  %10631 = vmatprep.subr.bf16.mxu0 %v12824_v48  ;;  %10672 = vmatprep.subr.bf16.mxu1 %v12827_v19  ;;  %v12905_v46 = vld [vmem:[%s13474_s8 + $0xf84] ss:$8 sps:$4 sm:$0xff]   ;;  %v6945_v48 = vmax.f32 %v14635_v9, 0.0  ;;  %v12900_v19 = vld [vmem:[%s13474_s8 + $0xe80] ss:$8 sps:$4 sm:$0xff]  }
 0x674   : > { %v12903_v41 = vld [vmem:[%s13474_s8 + $0xf80] ss:$8 sps:$4 sm:$0xff]   ;;  %v6975_v53 = vpack.c.bf16 %v6943_v6, %v6943_v6 }
 0x675   : > { %v6977_v18 = vpack.c.bf16 %v6945_v48, %v6945_v48 }
 0x676   : > { %10632 = vmatpush1.bf16.msra.mxu0 %v12822_v20  ;;  %10673 = vmatpush1.bf16.msra.mxu1 %v12825_v1 }
 0x677   : > { %10633 = vmatprep.subr.bf16.mxu0 %v12830_v52  ;;  %10674 = vmatprep.subr.bf16.mxu1 %v12833_v2 }
 0x67a   : > { %10634 = vmatpush1.bf16.msra.mxu0 %v12828_v34  ;;  %10675 = vmatpush1.bf16.msra.mxu1 %v12831_v0 }
 0x67b   : > { %10635 = vmatprep.subr.bf16.mxu0 %v12836_v57  ;;  %10676 = vmatprep.subr.bf16.mxu1 %v12839_v61 }
 0x67e   : > { %10636 = vmatpush1.bf16.msra.mxu0 %v12834_v58  ;;  %10677 = vmatpush1.bf16.msra.mxu1 %v12837_v3 }
 0x67f   : > { %10637 = vmatprep.subr.bf16.mxu0 %v12842_v40  ;;  %10678 = vmatprep.subr.bf16.mxu1 %v12845_v37 }
 0x682   : > { %10638 = vmatpush1.bf16.msra.mxu0 %v12840_v50  ;;  %10679 = vmatpush1.bf16.msra.mxu1 %v12843_v14 }
 0x683   : > { %10639 = vmatprep.subr.bf16.mxu0 %v12848_v54  ;;  %10680 = vmatprep.subr.bf16.mxu1 %v12851_v55 }
 0x686   : > { %10640 = vmatpush1.bf16.msra.mxu0 %v12846_v43  ;;  %10681 = vmatpush1.bf16.msra.mxu1 %v12849_v56 }
 0x687   : > { %10641 = vmatprep.subr.bf16.mxu0 %v12854_v10  ;;  %10682 = vmatprep.subr.bf16.mxu1 %v12857_v16 }
 0x68a   : > { %10642 = vmatpush1.bf16.msra.mxu0 %v12852_v5  ;;  %10683 = vmatpush1.bf16.msra.mxu1 %v12855_v28 }
 0x68b   : > { %10643 = vmatprep.subr.bf16.mxu0 %v12860_v59  ;;  %10684 = vmatprep.subr.bf16.mxu1 %v12863_v7 }
 0x68e   : > { %10644 = vmatpush2.bf16.msra.mxu0 %v12858_v12  ;;  %10685 = vmatpush2.bf16.msra.mxu1 %v12861_v25 }
 0x68f   : > { %10645 = vmatprep.subr.bf16.mxu0 %v12866_v47  ;;  %10686 = vmatprep.subr.bf16.mxu1 %v12869_v17 }
 0x692   : > { %10646 = vmatpush2.bf16.msra.mxu0 %v12864_v45  ;;  %10687 = vmatpush2.bf16.msra.mxu1 %v12867_v35 }
 0x693   : > { %10647 = vmatprep.subr.bf16.mxu0 %v12872_v31  ;;  %10688 = vmatprep.subr.bf16.mxu1 %v12875_v13 }
 0x696   : > { %10648 = vmatpush2.bf16.msra.mxu0 %v12870_v44  ;;  %10689 = vmatpush2.bf16.msra.mxu1 %v12873_v26  ;;  %v6979_v26 = vld [vmem:[#allocation15] sm:$0xff] }
 0x697   : > { %10649 = vmatprep.subr.bf16.mxu0 %v12878_v38  ;;  %10690 = vmatprep.subr.bf16.mxu1 %v12881_v11 }
 0x69a   : > { %10650 = vmatpush2.bf16.msra.mxu0 %v12876_v49  ;;  %10691 = vmatpush2.bf16.msra.mxu1 %v12879_v8 }
 0x69b   : > { %10651 = vmatprep.subr.bf16.mxu0 %v12884_v24  ;;  %10692 = vmatprep.subr.bf16.mxu1 %v12887_v51  ;;  %v6980_v24 = vld [vmem:[#allocation15 + $0x8] sm:$0xff] }
 0x69e   : > { %10652 = vmatpush2.bf16.msra.mxu0 %v12882_v33  ;;  %10693 = vmatpush2.bf16.msra.mxu1 %v12885_v29 }
 0x69f   : > { %10653 = vmatprep.subr.bf16.mxu0 %v12890_v15  ;;  %10694 = vmatprep.subr.bf16.mxu1 %v12893_v60 }
 0x6a2   : > { %10654 = vmatpush2.bf16.msra.mxu0 %v12888_v32  ;;  %10695 = vmatpush2.bf16.msra.mxu1 %v12891_v36 }
 0x6a3   : > { %10655 = vmatprep.subr.bf16.mxu0 %v12896_v42  ;;  %10696 = vmatprep.subr.bf16.mxu1 %v12899_v23 }
 0x6a6   : > { %10656 = vmatpush2.bf16.msra.mxu0 %v12894_v21  ;;  %10697 = vmatpush2.bf16.msra.mxu1 %v12897_v22 }
 0x6a7   : > { %10657 = vmatprep.subr.bf16.mxu0 %v12902_v62  ;;  %10698 = vmatprep.subr.bf16.mxu1 %v12905_v46 }
 0x6aa   : > { %10658 = vmatpush2.bf16.msra.mxu0 %v12900_v19  ;;  %10699 = vmatpush2.bf16.msra.mxu1 %v12903_v41 }
 0x6ad   : > { %v10415_v20 = vpop.f32.mrf.mxu0  ;;  %v10456_v1 = vpop.f32.mrf.mxu1  ;;  %10660 = vmatmul.mubr.bf16.vlgmr.msra.gmra.mxu0 %v6975_v53  ;;  %10701 = vmatmul.mubr.bf16.vlgmr.msra.gmra.mxu1 %v6977_v18 }
 0x6ae   : > { %v10416_v39 = vadd.f32 %v10415_v20, %v14724_v63 }
 0x6af   : > { %v10417_v27 = vpop.f32.mrf.mxu0  ;;  %v10458_v4 = vpop.f32.mrf.mxu1 }
 0x6b0   : > { %v10457_v52 = vadd.f32 %v10456_v1, %v10416_v39  ;;  %v10418_v9 = vadd.f32 %v10417_v27, %v14727_v30 }
 0x6b1   : > { %v10419_v2 = vpop.f32.mrf.mxu0  ;;  %v10460_v34 = vpop.f32.mrf.mxu1 }
 0x6b2   : > { %v10459_v0 = vadd.f32 %v10458_v4, %v10418_v9 }
 0x6b3   : > { %v10420_v57 = vpop.f32.mrf.mxu0  ;;  %v10461_v61 = vpop.f32.mrf.mxu1 }
 0x6ed   : > { %v10497_v58 = vpop.f32.mrf.mxu0  ;;  %v10538_v3 = vpop.f32.mrf.mxu1 }
 0x6ee   : > { %v10498_v40 = vadd.f32 %v10497_v58, %v10457_v52 }
 0x6ef   : > { %v10499_v37 = vpop.f32.mrf.mxu0  ;;  %v10540_v50 = vpop.f32.mrf.mxu1 }
 0x6f0   : > { %v10539_v14 = vadd.f32 %v10538_v3, %v10498_v40  ;;  %v10500_v54 = vadd.f32 %v10499_v37, %v10459_v0 }
 0x6f1   : > { %v10501_v55 = vpop.f32.mrf.mxu0  ;;  %v10542_v43 = vpop.f32.mrf.mxu1 }
 0x6f2   : > { %v10541_v63 = vadd.f32 %v10540_v50, %v10500_v54 }
 0x6f3   : > { %v10502_v56 = vpop.f32.mrf.mxu0  ;;  %v10543_v10 = vpop.f32.mrf.mxu1 }
 0x72d   : > { %v10579_v16 = vpop.f32.mrf.mxu0  ;;  %v10620_v5 = vpop.f32.mrf.mxu1 }
 0x72e   : > { %v10580_v47 = vadd.f32 %v10579_v16, %v10539_v14 }
 0x72f   : > { %v10581_v30 = vpop.f32.mrf.mxu0  ;;  %v10622_v28 = vpop.f32.mrf.mxu1 }
 0x730   : > { %v10582_v17 = vadd.f32 %v10581_v30, %v10541_v63  ;;  %v10621_v45 = vadd.f32 %v10620_v5, %v10580_v47 }
 0x731   : > { %v10583_v59 = vpop.f32.mrf.mxu0  ;;  %v10624_v7 = vpop.f32.mrf.mxu1 }
 0x732   : > { %v10623_v13 = vadd.f32 %v10622_v28, %v10582_v17 }
 0x733   : > { %v10584_v12 = vpop.f32.mrf.mxu0  ;;  %v10625_v25 = vpop.f32.mrf.mxu1 }
 0x76d   : > { %v10661_v35 = vpop.f32.mrf.mxu0  ;;  %v10702_v31 = vpop.f32.mrf.mxu1 }
 0x76e   : > { %v10662_v44 = vadd.f32 %v10661_v35, %v10621_v45 }
 0x76f   : > { %v10663_v38 = vpop.f32.mrf.mxu0  ;;  %v10704_v11 = vpop.f32.mrf.mxu1 }
 0x770   : > { %v10703_v49 = vadd.f32 %v10702_v31, %v10662_v44  ;;  %v10664_v8 = vadd.f32 %v10663_v38, %v10623_v13 }
 0x771   : > { %v10665_v51 = vpop.f32.mrf.mxu0  ;;  %v10706_v33 = vpop.f32.mrf.mxu1 }
 0x772   : > { %v10709_v29 = vadd.f32 %v10703_v49, %v6979_v26  ;;  %v10705_v15 = vadd.f32 %v10704_v11, %v10664_v8 }
 0x773   : > { %v10666_v60 = vpop.f32.mrf.mxu0  ;;  %v10707_v32 = vpop.f32.mrf.mxu1 }
 0x774   : > { %10711 = vst [vmem:[#allocation15] sm:$0xff] %v10709_v29  ;;  %v10710_v36 = vadd.f32 %v10705_v15, %v6980_v24 }
 0x776   : > { %10712 = vst [vmem:[#allocation15 + $0x8] sm:$0xff] %v10710_v36 }
 0x777   : > { %13166 = shalt.err (!%p13163_p3)
}
 0x778   : > { %12046 = dma.vmem_to_hbm [thread:$0]  (%p12076_p11), %s10721_s27, 256, %s14823_s6, [#allocation6]  }
 0x779   : > { %13218 = dma.done.wait (%p12076_p11), [#allocation6], 256  }
 0x77a   : > { %13220 = vsyncadd (%p12076_p11), [#allocation6], 4294967040 }
 0x77b PF: > { %s27_s26 = sadd.s32 1, %s13243_s26   ;;  %s14844_s21 = smov %s13227_s22 }
 0x77c   : > { %p24_p1 = scmp.ge.s32.totalorder %s27_s26, 4   ;;  %s14845_s22 = smov %s13231_s23 }
 0x77d   : > { %s14846_s23 = smov %s13377_s13  ;;  %s14847_s24 = smov %s13239_s25 }
 0x77e   : > { %s14848_s25 = smov %s14850_s14  ;;  %26 = sbr.rel (!%p24_p1) target bundleno = 14 (0xe), region = 150 }
 0x783   :  { %10733 = vsyncpa [#allocation5], 1 }
 0x784   :  { %10735 = vsyncpa [#allocation5 + $0x1], 1 }
 0x785   :  { %10736 = vsyncpa [#allocation8], 1 }
 0x786   :  { %10738 = vsyncpa [#allocation8 + $0x1], 1 }
 0x787   :  { %10739 = vsyncpa [#allocation11], 1 }
 0x788   :  { %10741 = vsyncpa [#allocation11 + $0x1], 1 }
 0x789   :  { %10742 = vsyncpa [#allocation14], 1 }
 0x78a   :  { %10744 = vsyncpa [#allocation14 + $0x1], 1 }
 0x78b   :  { %10745 = vsyncpa [#allocation6], 1 }
 0x78c   :  { %10747 = vsyncpa [#allocation6 + $0x1], 1 }

</bundles_post_ra>
